<compile_context>
chip_gen: v5e
topology: v5e:2x2
jax: 0.10.0
libtpu: 0.0.40
codegen_flags: <defaults>
</compile_context>

<pallas_src>
import jax
import jax.numpy as jnp
from jax import lax
from jax.experimental import pallas as pl
from jax.experimental.pallas import tpu as pltpu


# ---------------------------------------------------------------------------
# Kernel
# ---------------------------------------------------------------------------
def _compo_lv_kernel(xk_ref, xt_ref, g_ref, wt_ref, xo_ref, acc_ref):
    """Grid = (row_tiles, k_tiles); k (reduction) is the last / innermost axis.

    xk_ref : (1, TK)  contraction chunk of x        (block index (0, k))
    xt_ref : (1, TM)  output-row chunk of x         (block index (0, i))
    g_ref  : (1, TM)  growth-rate chunk             (block index (0, i))
    wt_ref : (TK, TM) pre-hardshrunk W^T slab       (block index (k, i))
    xo_ref : (1, TM)  un-normalized x'              (block index (0, i))
    acc_ref: (1, TM)  f32 partial matvec accumulator (VMEM scratch)
    """
    k = pl.program_id(1)

    @pl.when(k == 0)
    def _init():
        acc_ref[...] = jnp.zeros_like(acc_ref)

    # mv_partial[0, j] += sum_k x[0, k] * W^T[k, j]  -- canonical MXU matvec,
    # no in-kernel transpose, no in-kernel hardshrink (weights are pre-shrunk).
    acc_ref[...] += jnp.dot(
        xk_ref[...], wt_ref[...],
        preferred_element_type=jnp.float32,
        precision=lax.Precision.HIGHEST,
    )

    @pl.when(k == pl.num_programs(1) - 1)
    def _finalize():
        xt = xt_ref[...]
        xo_ref[...] = xt + xt * acc_ref[...] + xt * g_ref[...]


# ---------------------------------------------------------------------------
# Tiling policy
# ---------------------------------------------------------------------------
def _round_up(v, m):
    return ((v + m - 1) // m) * m


def _default_tile_budget():
    """Bytes allowed for one (TK, TM) f32 W^T slab (double-buffered by BlockSpec)."""
    budget = 8 * 1024 * 1024       # 2 x 8 MiB: safe on v7x (64 MiB VMEM, 32 MiB scoped default)
    try:
        info = pltpu.get_tpu_info()
        vmem = getattr(info, "vmem_capacity_bytes", None)
        if vmem is not None and int(vmem) >= 96 * 1024 * 1024:
            budget = 16 * 1024 * 1024   # v5e / v6e: 128 MiB VMEM -> fewer, longer DMA bursts
    except Exception:
        pass
    return budget


def _pick_tiles(n_pad, max_tile_bytes):
    """Pick (tm, tk) for (tk, tm) W^T slabs with tk*tm*4 <= max_tile_bytes.

    Prefers the full contraction dim (tk == n_pad, no reduction grid axis) with the
    widest lane tile tm among ALL multiples of 128 dividing n_pad, largest first.
    Falls back to tiling the contraction (K) axis only when even tm=128 over the
    full K would blow the budget (very large n).
    """
    divisors = [d for d in range(n_pad, 0, -128) if n_pad % d == 0]  # multiples of 128, desc
    for tm in divisors:                       # full-K, widest tm that fits
        if n_pad * tm * 4 <= max_tile_bytes:
            return tm, n_pad
    tm = 128                                  # must tile K too
    for tk in divisors:
        if tk * tm * 4 <= max_tile_bytes:
            return tm, tk
    return 128, 128


# ---------------------------------------------------------------------------
# One-time weight preprocessing (interaction is a static module parameter:
# hardshrink, cast, transpose and pad ONCE and cache the result).
# ---------------------------------------------------------------------------
def preprocess_interaction(interaction):
    """Returns the (n_pad, n_pad) pre-hardshrunk W^T, zero-padded to a multiple of 128."""
    n = interaction.shape[0]
    n_pad = _round_up(n, 128)
    w = interaction.astype(jnp.float32)
    w = jnp.where(jnp.abs(w) > 0.5, w, jnp.zeros_like(w))   # Hardshrink(0.5), exact f32
    wt = w.T                                                 # wt[k, j] = W[j, k]
    if n_pad != n:
        wt = jnp.pad(wt, ((0, n_pad - n), (0, n_pad - n)))   # zero rows/cols contribute 0
    return wt


# ---------------------------------------------------------------------------
# Forward wrapper
# ---------------------------------------------------------------------------
def compo_lv_forward(x, g, wt_prepped, *, max_tile_bytes=None):
    """x: (n,), g: (n,), wt_prepped: preprocess_interaction(interaction).

    Returns (x_new (n,), y (n,)) matching the PyTorch module's forward.
    """
    n = x.shape[0]
    n_pad = wt_prepped.shape[0]
    assert wt_prepped.shape == (n_pad, n_pad) and n_pad == _round_up(n, 128), (
        "wt_prepped must come from preprocess_interaction for this x size")

    if max_tile_bytes is None:
        max_tile_bytes = _default_tile_budget()

    x2 = x.reshape(1, n).astype(jnp.float32)
    g2 = g.reshape(1, n).astype(jnp.float32)
    if n_pad != n:                      # O(n) per-call padding; padded lanes stay 0
        pad = n_pad - n
        x2 = jnp.pad(x2, ((0, 0), (0, pad)))
        g2 = jnp.pad(g2, ((0, 0), (0, pad)))

    tm, tk = _pick_tiles(n_pad, max_tile_bytes)
    grid = (n_pad // tm, n_pad // tk)   # (parallel row tiles, arbitrary reduction tiles)

    slab_bytes = tk * tm * 4
    small_bytes = 2 * 4 * (tk + 3 * tm)            # xk, xt, g, out blocks (double-buffered)
    vmem_limit = 2 * slab_bytes + small_bytes + tm * 4 + (2 << 20)
    vmem_limit = int(min(max(vmem_limit, 16 << 20), 48 << 20))

    x_new = pl.pallas_call(
        _compo_lv_kernel,
        out_shape=jax.ShapeDtypeStruct((1, n_pad), jnp.float32),
        grid_spec=pltpu.PrefetchScalarGridSpec(
            num_scalar_prefetch=0,
            grid=grid,
            in_specs=[
                pl.BlockSpec((1, tk), lambda i, k: (0, k)),   # x chunk for the contraction
                pl.BlockSpec((1, tm), lambda i, k: (0, i)),   # x chunk for the elementwise update
                pl.BlockSpec((1, tm), lambda i, k: (0, i)),   # g chunk
                pl.BlockSpec((tk, tm), lambda i, k: (k, i)),  # W^T slab (streamed, double-buffered)
            ],
            out_specs=pl.BlockSpec((1, tm), lambda i, k: (0, i)),
            scratch_shapes=[pltpu.VMEM((1, tm), jnp.float32)],
        ),
        compiler_params=pltpu.CompilerParams(
            dimension_semantics=("parallel", "arbitrary"),
            vmem_limit_bytes=vmem_limit,
        ),
    )(x2, x2, g2, wt_prepped.astype(jnp.float32))

    x_new = x_new.reshape(n_pad)[:n]
    # Global normalization hoisted to the wrapper (O(n)); no eps guard, same as the
    # PyTorch reference (sum ~ 0 would give inf/NaN there too).
    y = x_new / jnp.sum(x_new)
    return x_new, y


# ---------------------------------------------------------------------------
# Pure-JAX reference (exact f32 elementwise matvec)
# ---------------------------------------------------------------------------
def compo_lv_reference(x, g, interaction):
    w = jnp.where(jnp.abs(interaction) > 0.5, interaction, 0.0)
    mv = jnp.sum(w * x[None, :], axis=1)
    x_new = x + x * mv + x * g
    return x_new, x_new / jnp.sum(x_new)


if __name__ == "__main__":
    key = jax.random.PRNGKey(0)

    # 640: multiple of 128 -> single full (640, 640) slab, grid (1, 1).
    # 100: not lane-aligned -> zero-padded to 128 on the fast tiled path.
    for n_vertices in (640, 100):
        k_g, k_w, k_x = jax.random.split(jax.random.fold_in(key, n_vertices), 3)

        # Deterministic "parameters" matching torch.rand init (uniform [0, 1)).
        g = jax.random.uniform(k_g, (n_vertices,), dtype=jnp.float32)
        interaction = jax.random.uniform(k_w, (n_vertices, n_vertices), dtype=jnp.float32)
        x = jax.random.uniform(k_x, (n_vertices,), dtype=jnp.float32)

        # One-time (cached) weight preprocessing -- interaction is a static parameter.
        wt_prepped = preprocess_interaction(interaction)
        wt_prepped = jax.block_until_ready(wt_prepped)

        x_out, y_out = compo_lv_forward(x, g, wt_prepped)
        jax.block_until_ready((x_out, y_out))

        x_ref, y_ref = compo_lv_reference(x, g, interaction)
        assert jnp.allclose(x_out, x_ref, rtol=1e-3, atol=1e-3), f"x mismatch (n={n_vertices})"
        assert jnp.allclose(y_out, y_ref, rtol=1e-3, atol=1e-3), f"y mismatch (n={n_vertices})"

    print("KERNEL_OK")
</pallas_src>

<mosaic_0001>
module attributes {stable_mosaic.version = 11 : i64} {
  func.func @_compo_lv_kernel(%arg0: i32, %arg1: i32, %arg2: memref<1x640xf32, #tpu.memory_space<vmem>>, %arg3: memref<1x640xf32, #tpu.memory_space<vmem>>, %arg4: memref<1x640xf32, #tpu.memory_space<vmem>>, %arg5: memref<640x640xf32, #tpu.memory_space<vmem>>, %arg6: memref<1x640xf32, #tpu.memory_space<vmem>>, %arg7: memref<1x640xf32, #tpu.memory_space<vmem>>) attributes {dimension_semantics = [#tpu.dimension_semantics<parallel>, #tpu.dimension_semantics<arbitrary>], iteration_bounds = array<i64: 1, 1>, scalar_prefetch = 0 : i64, scratch_operands = 1 : i64, tpu.core_type = #tpu.core_type<tc>, window_params = [{transform_indices = @transform_0, window_bounds = array<i64: 1, 640>}, {transform_indices = @transform_1, window_bounds = array<i64: 1, 640>}, {transform_indices = @transform_2, window_bounds = array<i64: 1, 640>}, {transform_indices = @transform_3, window_bounds = array<i64: 640, 640>}, {transform_indices = @transform_4, window_bounds = array<i64: 1, 640>}]} {
    %c0_i32 = arith.constant 0 : i32
    %0 = arith.cmpi eq, %arg1, %c0_i32 : i32
    %1 = arith.extui %0 : i1 to i32
    %c0_i32_0 = arith.constant 0 : i32
    %2 = arith.cmpi ne, %1, %c0_i32_0 : i32
    scf.if %2 {
      %cst_10 = arith.constant 0.000000e+00 : f32
      %12 = vector.broadcast %cst_10 : f32 to vector<1x640xf32>
      %c0_11 = arith.constant 0 : index
      %c0_12 = arith.constant 0 : index
      %13 = vector.load %arg7[%c0_11, %c0_12] : memref<1x640xf32, #tpu.memory_space<vmem>>, vector<1x640xf32>
      tpu.vector_store %arg7[%c0_11, %c0_12], %12 {strides = array<i32>} : memref<1x640xf32, #tpu.memory_space<vmem>>, vector<1x640xf32>,
    } else {
    }
    %c0 = arith.constant 0 : index
    %c0_1 = arith.constant 0 : index
    %3 = vector.load %arg7[%c0, %c0_1] : memref<1x640xf32, #tpu.memory_space<vmem>>, vector<1x640xf32>
    %c0_2 = arith.constant 0 : index
    %c0_3 = arith.constant 0 : index
    %4 = vector.load %arg2[%c0_2, %c0_3] : memref<1x640xf32, #tpu.memory_space<vmem>>, vector<1x640xf32>
    %c0_4 = arith.constant 0 : index
    %c0_5 = arith.constant 0 : index
    %5 = vector.load %arg5[%c0_4, %c0_5] : memref<640x640xf32, #tpu.memory_space<vmem>>, vector<640x640xf32>
    %cst = arith.constant dense<0.000000e+00> : vector<1x640xf32>
    %6 = tpu.matmul %4, %5, %cst {dimension_numbers = #tpu.dot_dimension_numbers<[1], [0], [0], [1], [0, 0, 1, 1], [], []>, precision = #tpu.contract_precision<fp32>} : vector<1x640xf32>, vector<640x640xf32>, vector<1x640xf32> -> vector<1x640xf32>
    %7 = arith.addf %3, %6 : vector<1x640xf32>
    %c0_6 = arith.constant 0 : index
    %c0_7 = arith.constant 0 : index
    %8 = vector.load %arg7[%c0_6, %c0_7] : memref<1x640xf32, #tpu.memory_space<vmem>>, vector<1x640xf32>
    tpu.vector_store %arg7[%c0_6, %c0_7], %7 {strides = array<i32>} : memref<1x640xf32, #tpu.memory_space<vmem>>, vector<1x640xf32>,
    %c0_i32_8 = arith.constant 0 : i32
    %9 = arith.cmpi eq, %arg1, %c0_i32_8 : i32
    %10 = arith.extui %9 : i1 to i32
    %c0_i32_9 = arith.constant 0 : i32
    %11 = arith.cmpi ne, %10, %c0_i32_9 : i32
    scf.if %11 {
      %c0_10 = arith.constant 0 : index
      %c0_11 = arith.constant 0 : index
      %12 = vector.load %arg3[%c0_10, %c0_11] : memref<1x640xf32, #tpu.memory_space<vmem>>, vector<1x640xf32>
      %c0_12 = arith.constant 0 : index
      %c0_13 = arith.constant 0 : index
      %13 = vector.load %arg7[%c0_12, %c0_13] : memref<1x640xf32, #tpu.memory_space<vmem>>, vector<1x640xf32>
      %14 = arith.mulf %12, %13 : vector<1x640xf32>
      %15 = arith.addf %12, %14 : vector<1x640xf32>
      %c0_14 = arith.constant 0 : index
      %c0_15 = arith.constant 0 : index
      %16 = vector.load %arg4[%c0_14, %c0_15] : memref<1x640xf32, #tpu.memory_space<vmem>>, vector<1x640xf32>
      %17 = arith.mulf %12, %16 : vector<1x640xf32>
      %18 = arith.addf %15, %17 : vector<1x640xf32>
      %c0_16 = arith.constant 0 : index
      %c0_17 = arith.constant 0 : index
      %19 = vector.load %arg6[%c0_16, %c0_17] : memref<1x640xf32, #tpu.memory_space<vmem>>, vector<1x640xf32>
      tpu.vector_store %arg6[%c0_16, %c0_17], %18 {strides = array<i32>} : memref<1x640xf32, #tpu.memory_space<vmem>>, vector<1x640xf32>,
    } else {
    }
    return
  }
  func.func @transform_0(%arg0: i32, %arg1: i32) -> (i32, i32) {
    %c0_i32 = arith.constant 0 : i32
    %c0_i32_0 = arith.constant 0 : i32
    return %c0_i32, %arg1 : i32, i32
  }
  func.func @transform_1(%arg0: i32, %arg1: i32) -> (i32, i32) {
    %c0_i32 = arith.constant 0 : i32
    %c0_i32_0 = arith.constant 0 : i32
    return %c0_i32, %arg0 : i32, i32
  }
  func.func @transform_2(%arg0: i32, %arg1: i32) -> (i32, i32) {
    %c0_i32 = arith.constant 0 : i32
    %c0_i32_0 = arith.constant 0 : i32
    return %c0_i32, %arg0 : i32, i32
  }
  func.func @transform_3(%arg0: i32, %arg1: i32) -> (i32, i32) {
    %c0_i32 = arith.constant 0 : i32
    return %arg1, %arg0 : i32, i32
  }
  func.func @transform_4(%arg0: i32, %arg1: i32) -> (i32, i32) {
    %c0_i32 = arith.constant 0 : i32
    %c0_i32_0 = arith.constant 0 : i32
    return %c0_i32, %arg0 : i32, i32
  }
}

</mosaic_0001>

<bundles_post_ra>
// kernel: tpu_custom_call.1
= control target key start
LH: loop header
LB: loop body
LE: loop exit
PB: predicated region body
PF: predicated region fallthrough
CT: control target
= control target key end

     0   :  { %9 = vsyncpa [#allocation4], 0  ;;  %s15632_s0 = inlined_call_operand.hbm [shape: f32[1,640], index: 0, kind: input, shape index: {}]   ;;  %s15633_s1 = inlined_call_operand.hbm [shape: f32[1,640], index: 1, kind: input, shape index: {}]   ;;  %s15634_s2 = inlined_call_operand.hbm [shape: f32[1,640], index: 2, kind: input, shape index: {}]   ;;  %s15635_s3 = inlined_call_operand.hbm [shape: f32[640,640], index: 3, kind: input, shape index: {}]   ;;  %s15636_s4 = inlined_call_operand.hbm [shape: f32[1,640], index: 4, kind: output, shape index: {}]  }
   0x1   :  { %10 = vsyncpa [#allocation7], 0 }
   0x2   :  { %11 = vsyncpa [#allocation10], 0  ;;  %s29_s17 = sshll.u32 %s15633_s1, 4  ;;  %s30_s17 = int_to_ptr.hbm [resolvable:$true] %s29_s17 }
   0x3   :  { %12 = vsyncpa [#allocation5], 0  ;;  %s9213_s18 = smov [#allocation6]   ;;  %s18_s22 = sshll.u32 %s15632_s0, 4  ;;  %s19_s22 = int_to_ptr.hbm [resolvable:$true] %s18_s22 }
   0x4   :  { %s31_s19 = sshll.u32 %s9213_s18, 4  ;;  %s9214_s23 = smov [#allocation3]   ;;  %s32_s19 = int_to_ptr.vmem [resolvable:$true] %s31_s19 }
   0x5   :  { %34 = dma.hbm_to_vmem [thread:$0]  %s30_s17, 80, %s32_s19, [#allocation7]  }
   0x6   :  { %s20_s24 = sshll.u32 %s9214_s23, 4  ;;  %s40_s27 = sshll.u32 %s15634_s2, 4  ;;  %s21_s24 = int_to_ptr.vmem [resolvable:$true] %s20_s24  ;;  %s41_s27 = int_to_ptr.hbm [resolvable:$true] %s40_s27 }
   0x7   :  { %23 = dma.hbm_to_vmem [thread:$0]  %s19_s22, 80, %s21_s24, [#allocation4]  }
   0x8   :  { %s50_s29 = sshll.u32 %s15635_s3, 4  ;;  %s9215_s30 = smov [#allocation8]   ;;  %s51_s29 = int_to_ptr.hbm [resolvable:$true] %s50_s29 }
   0x9   :  { %s42_s5 = sshll.u32 %s9215_s30, 4  ;;  %s9216_s0 = smov [#allocation9]   ;;  %s43_s5 = int_to_ptr.vmem [resolvable:$true] %s42_s5 }
   0xa   :  { %45 = dma.hbm_to_vmem [thread:$0]  %s41_s27, 80, %s43_s5, [#allocation7]  }
   0xb   :  { %s52_s6 = sshll.u32 %s9216_s0, 4  ;;  %s9217_s7 = smov 640   ;;  %s53_s6 = int_to_ptr.vmem [resolvable:$true] %s52_s6 }
   0xc   :  { %s9218_s8 = smov 40  }
   0xd   :  { %58 = dma.hbm_to_vmem [thread:$0]  %s51_s29, 51200, %s53_s6, [#allocation10], %s9217_s7, %s9217_s7, %s9218_s8  }
   0xe   :  { %9205 = dma.done.wait [#allocation4], 80  }
   0xf   :  { %9206 = vsyncadd [#allocation4], 4294967216 }
  0x10   :  { %9207 = dma.done.wait [#allocation7], 160  }
  0x11   :  { %9208 = vsyncadd [#allocation7], 4294967136 }
  0x12   :  { %9209 = dma.done.wait [#allocation10], 51200  }
  0x13   :  { %9210 = vsyncadd [#allocation10], 4294916096  ;;  %v161_v0 = vld [vmem:[#allocation9 + $0x258] sm:$0xff]  ;;  %v156_v1 = vld [vmem:[#allocation9 + $0x230] sm:$0xff]  ;;  %vm9031_vm0 = vcmask 1040384   ;;  %vm9033_vm1 = vcmask 1041408  }
  0x14   :  { %v151_v2 = vld [vmem:[#allocation9 + $0x208] sm:$0xff]  ;;  %v9258_v3 = vand.u32 4294901760, %v161_v0  ;;  %v9260_v4 = vand.u32 4294901760, %v156_v1  ;;  %v146_v6 = vld [vmem:[#allocation9 + $0x1e0] sm:$0xff]  ;;  %v141_v7 = vld [vmem:[#allocation9 + $0x1b8] sm:$0xff]  ;;  %vm9035_vm3 = vcmask 1043459  }
  0x15   :  { %v9262_v5 = vand.u32 4294901760, %v151_v2  ;;  %v136_v8 = vld [vmem:[#allocation9 + $0x190] sm:$0xff]  ;;  %v9264_v9 = vand.u32 4294901760, %v146_v6  ;;  %v9266_v10 = vand.u32 4294901760, %v141_v7  ;;  %v131_v12 = vld [vmem:[#allocation9 + $0x168] sm:$0xff]  ;;  %v126_v13 = vld [vmem:[#allocation9 + $0x140] sm:$0xff] }
  0x16   :  { %v9268_v11 = vand.u32 4294901760, %v136_v8  ;;  %498 = vmatpush.msra.mxu0 %v9258_v3  ;;  %v9272_v14 = vsub.f32 %v161_v0, %v9258_v3  ;;  %v9275_v15 = vsub.f32 %v156_v1, %v9260_v4  ;;  %694 = vmatpush.msra.mxu3 %v9258_v3  ;;  %v9281_v17 = vand.u32 4294901760, %v131_v12  ;;  %v121_v18 = vld [vmem:[#allocation9 + $0x118] sm:$0xff]  ;;  %v116_v26 = vld [vmem:[#allocation9 + $0xf0] sm:$0xff]  ;;  %v111_v34 = vld [vmem:[#allocation9 + $0xc8] sm:$0xff]  ;;  %s9220_s2 = smov [#allocation11]  }
  0x17   :  { %v9279_v16 = vsub.f32 %v151_v2, %v9262_v5  ;;  %v9284_v19 = vsub.f32 %v146_v6, %v9264_v9  ;;  %v9287_v20 = vsub.f32 %v141_v7, %v9266_v10  ;;  %v9289_v21 = vand.u32 4294901760, %v126_v13  ;;  %v106_v42 = vld [vmem:[#allocation9 + $0xa0] sm:$0xff]  ;;  %v101_v48 = vld [vmem:[#allocation9 + $0x78] sm:$0xff]  ;;  %v96_v54 = vld [vmem:[#allocation9 + $0x50] sm:$0xff]  ;;  %s9062_s3 = sshll.u32 %s9220_s2, 4  ;;  %s9064_s11 = sshll.u32 %s15636_s4, 4  ;;  %s9063_s3 = int_to_ptr.vmem [resolvable:$true] %s9062_s3  ;;  %s9065_s11 = int_to_ptr.hbm [resolvable:$true] %s9064_s11 }
  0x18   :  { %500 = vmatpush.msra.mxu0 %v9260_v4  ;;  %641 = vmatpush.msra.mxu2 %v9272_v14  ;;  %v540_v22 = vand.u32 4294901760, %v9272_v14  ;;  %v15651_v23 = vand.u32 4294901760, %v9275_v15  ;;  %v9297_v25 = vsub.f32 %v136_v8, %v9268_v11  ;;  %v9301_v28 = vand.u32 4294901760, %v121_v18  ;;  %v241_v59 = vld [vmem:[#allocation9 + $0x4d8] sm:$0xff]  ;;  %v91_v61 = vld [vmem:[#allocation9 + $0x28] sm:$0xff]  ;;  %v236_v2 = vld [vmem:[#allocation9 + $0x4b0] sm:$0xff] }
  0x19   :  { %v15650_v24 = vand.u32 4294901760, %v9279_v16  ;;  %696 = vmatpush.msra.mxu3 %v9260_v4  ;;  %v15649_v27 = vand.u32 4294901760, %v9284_v19  ;;  %v9304_v29 = vsub.f32 %v131_v12, %v9281_v17  ;;  %v15646_v33 = vand.u32 4294901760, %v9287_v20  ;;  %v86_v7 = vld [vmem:[#allocation9] sm:$0xff] }
  0x1a   :  { %502 = vmatpush.msra.mxu0 %v9262_v5  ;;  %644 = vmatpush.msra.mxu2 %v9275_v15  ;;  %v541_v30 = vsub.f32 %v9272_v14, %v540_v22  ;;  %v547_v31 = vsub.f32 %v9275_v15, %v15651_v23  ;;  %v9319_v35 = vand.u32 4294901760, %v116_v26  ;;  %v9322_v36 = vsub.f32 %v126_v13, %v9289_v21  ;;  %v196_v23 = vld [vmem:[#allocation9 + $0x370] sm:$0xff] }
  0x1b   :  { %v553_v32 = vsub.f32 %v9279_v16, %v15650_v24  ;;  %698 = vmatpush.msra.mxu3 %v9262_v5  ;;  %v559_v39 = vsub.f32 %v9284_v19, %v15649_v27  ;;  %v15645_v40 = vand.u32 4294901760, %v9297_v25  ;;  %v9331_v41 = vand.u32 4294901760, %v111_v34 }
  0x1c   :  { %504 = vmatpush.msra.mxu0 %v9264_v9  ;;  %v542_v37 = vand.u32 4294901760, %v541_v30  ;;  %647 = vmatpush.msra.mxu2 %v9279_v16  ;;  %v548_v38 = vand.u32 4294901760, %v547_v31  ;;  %v565_v44 = vsub.f32 %v9287_v20, %v15646_v33  ;;  %v15643_v45 = vand.u32 4294901760, %v9304_v29 }
  0x1d   :  { %700 = vmatpush.msra.mxu3 %v9264_v9  ;;  %v554_v43 = vand.u32 4294901760, %v553_v32  ;;  %v9339_v46 = vsub.f32 %v121_v18, %v9301_v28  ;;  %v15642_v47 = vand.u32 4294901760, %v9322_v36  ;;  %v560_v49 = vand.u32 4294901760, %v559_v39  ;;  %v231_v32 = vld [vmem:[#allocation9 + $0x488] sm:$0xff] }
  0x1e   :  { %506 = vmatpush.msra.mxu0 %v9266_v10  ;;  %543 = vmatpush.msra.mxu1 %v542_v37  ;;  %v571_v50 = vsub.f32 %v9297_v25, %v15645_v40  ;;  %v9348_v51 = vand.u32 4294901760, %v106_v42  ;;  %v9351_v52 = vsub.f32 %v116_v26, %v9319_v35  ;;  %v9356_v53 = vsub.f32 %v111_v34, %v9331_v41 }
  0x1f   :  { %650 = vmatpush.msra.mxu2 %v9284_v19  ;;  %702 = vmatpush.msra.mxu3 %v9266_v10  ;;  %v566_v55 = vand.u32 4294901760, %v565_v44  ;;  %v577_v56 = vsub.f32 %v9304_v29, %v15643_v45  ;;  %v9362_v57 = vand.u32 4294901760, %v101_v48  ;;  %v15641_v58 = vand.u32 4294901760, %v9339_v46 }
  0x20   :  { %508 = vmatpush.msra.mxu0 %v9268_v11  ;;  %549 = vmatpush.msra.mxu1 %v548_v38  ;;  %v583_v60 = vsub.f32 %v9322_v36, %v15642_v47  ;;  %v572_v62 = vand.u32 4294901760, %v571_v50  ;;  %v9371_v63 = vand.u32 4294901760, %v96_v54  ;;  %v15639_v0 = vand.u32 4294901760, %v9351_v52 }
  0x21   :  { %653 = vmatpush.msra.mxu2 %v9287_v20  ;;  %704 = vmatpush.msra.mxu3 %v9268_v11  ;;  %v9375_v1 = vsub.f32 %v106_v42, %v9348_v51  ;;  %v15637_v6 = vand.u32 4294901760, %v9356_v53  ;;  %v9380_v8 = vand.u32 4294901760, %v241_v59  ;;  %v578_v12 = vand.u32 4294901760, %v577_v56  ;;  %v226_v42 = vld [vmem:[#allocation9 + $0x460] sm:$0xff] }
  0x22   :  { %510 = vmatpush.msra.mxu0 %v9281_v17  ;;  %555 = vmatpush.msra.mxu1 %v554_v43  ;;  %v589_v13 = vsub.f32 %v9339_v46, %v15641_v58  ;;  %v9386_v18 = vand.u32 4294901760, %v91_v61  ;;  %v9389_v26 = vsub.f32 %v101_v48, %v9362_v57  ;;  %v584_v30 = vand.u32 4294901760, %v583_v60 }
  0x23   :  { %656 = vmatpush.msra.mxu2 %v9297_v25  ;;  %706 = vmatpush.msra.mxu3 %v9281_v17  ;;  %15900 = vst [vmem:[#allocation16_spill] sm:$0xff] %v9380_v8  ;;  %v9393_v31 = vand.u32 4294901760, %v236_v2  ;;  %v595_v34 = vsub.f32 %v9351_v52, %v15639_v0  ;;  %v9399_v37 = vand.u32 4294901760, %v86_v7  ;;  %v15638_v38 = vand.u32 4294901760, %v9375_v1 }
  0x24   :  { %512 = vmatpush.msra.mxu0 %v9289_v21  ;;  %561 = vmatpush.msra.mxu1 %v560_v49  ;;  %v9403_v39 = vsub.f32 %v96_v54, %v9371_v63  ;;  %v601_v43 = vsub.f32 %v9356_v53, %v15637_v6  ;;  %v9411_v44 = vsub.f32 %v241_v59, %v9380_v8  ;;  %v590_v48 = vand.u32 4294901760, %v589_v13  ;;  %v221_v59 = vld [vmem:[#allocation9 + $0x438] sm:$0xff]  ;;  %v216_v6 = vld [vmem:[#allocation9 + $0x410] sm:$0xff] }
  0x25   :  { %659 = vmatpush.msra.mxu2 %v9304_v29  ;;  %708 = vmatpush.msra.mxu3 %v9289_v21  ;;  %15901 = vst [vmem:[#allocation17_spill] sm:$0xff] %v9399_v37  ;;  %v15640_v49 = vand.u32 4294901760, %v9389_v26  ;;  %v9416_v50 = vsub.f32 %v91_v61, %v9386_v18  ;;  %v9418_v54 = vand.u32 4294901760, %v231_v32  ;;  %v9425_v56 = vand.u32 4294901760, %v226_v42 }
  0x26   :  { %514 = vmatpush.msra.mxu0 %v9301_v28  ;;  %567 = vmatpush.msra.mxu1 %v566_v55  ;;  %v9423_v55 = vsub.f32 %v236_v2, %v9393_v31  ;;  %v596_v60 = vand.u32 4294901760, %v595_v34  ;;  %v607_v61 = vsub.f32 %v9375_v1, %v15638_v38  ;;  %v602_v2 = vand.u32 4294901760, %v601_v43  ;;  %v211_v43 = vld [vmem:[#allocation9 + $0x3e8] sm:$0xff] }
  0x27   :  { %662 = vmatpush.msra.mxu2 %v9322_v36  ;;  %710 = vmatpush.msra.mxu3 %v9301_v28  ;;  %v15647_v13 = vand.u32 4294901760, %v9411_v44  ;;  %v15648_v34 = vand.u32 4294901760, %v9416_v50  ;;  %v9446_v38 = vand.u32 4294901760, %v221_v59  ;;  %v9459_v47 = vand.u32 4294901760, %v216_v6 }
  0x28   :  { %516 = vmatpush.msra.mxu0 %v9319_v35  ;;  %573 = vmatpush.msra.mxu1 %v572_v62  ;;  %v15644_v62 = vand.u32 4294901760, %v9403_v39  ;;  %v15652_v0 = vand.u32 4294901760, %v9423_v55  ;;  %v9466_v45 = vand.u32 4294901760, %v211_v43  ;;  %v15902_v14 = vand.u32 4294901760, %v9275_v15 }
  0x29   :  { %665 = vmatpush.msra.mxu2 %v9339_v46  ;;  %712 = vmatpush.msra.mxu3 %v9319_v35  ;;  %v9474_v33 = vsub.f32 %v221_v59, %v9446_v38  ;;  %v9487_v27 = vsub.f32 %v216_v6, %v9459_v47  ;;  %v15904_v15 = vand.u32 4294901760, %v9279_v16  ;;  %v15906_v16 = vand.u32 4294901760, %v9284_v19 }
  0x2a   :  { %518 = vmatpush.msra.mxu0 %v9331_v41  ;;  %579 = vmatpush.msra.mxu1 %v578_v12  ;;  %v9433_v12 = vsub.f32 %v86_v7, %v9399_v37  ;;  %v9444_v7 = vsub.f32 %v231_v32, %v9418_v54  ;;  %v619_v32 = vsub.f32 %v9403_v39, %v15644_v62  ;;  %vm9037_vm4 = vcmask 1042432  }
  0x2b   :  { %668 = vmatpush.msra.mxu2 %v9351_v52  ;;  %714 = vmatpush.msra.mxu3 %v9331_v41  ;;  %v625_v62 = vsub.f32 %v9416_v50, %v15648_v34 }
  0x2c   :  { %520 = vmatpush.msra.mxu0 %v9348_v51  ;;  %585 = vmatpush.msra.mxu1 %v584_v30  ;;  %v613_v30 = vsub.f32 %v9389_v26, %v15640_v49  ;;  %v608_v49 = vand.u32 4294901760, %v607_v61  ;;  %v15653_v58 = vand.u32 4294901760, %v9433_v12  ;;  %v15654_v40 = vand.u32 4294901760, %v9444_v7 }
  0x2d   :  { %671 = vmatpush.msra.mxu2 %v9356_v53  ;;  %716 = vmatpush.msra.mxu3 %v9348_v51  ;;  %v620_v34 = vand.u32 4294901760, %v619_v32 }
  0x2e   :  { %522 = vmatpush.msra.mxu0 %v9362_v57  ;;  %591 = vmatpush.msra.mxu1 %v590_v48  ;;  %v9452_v48 = vsub.f32 %v226_v42, %v9425_v56  ;;  %v882_v42 = vsub.f32 %v9411_v44, %v15647_v13  ;;  %v614_v61 = vand.u32 4294901760, %v613_v30  ;;  %v888_v13 = vsub.f32 %v9423_v55, %v15652_v0  ;;  %v201_v30 = vld [vmem:[#allocation9 + $0x398] sm:$0xff] }
  0x2f   :  { %674 = vmatpush.msra.mxu2 %v9375_v1  ;;  %718 = vmatpush.msra.mxu3 %v9362_v57  ;;  %v631_v59 = vsub.f32 %v9433_v12, %v15653_v58  ;;  %v894_v6 = vsub.f32 %v9444_v7, %v15654_v40  ;;  %v9502_v58 = vand.u32 4294901760, %v201_v30 }
  0x30   :  { %524 = vmatpush.msra.mxu0 %v9371_v63  ;;  %597 = vmatpush.msra.mxu1 %v596_v60  ;;  %v206_v60 = vld [vmem:[#allocation9 + $0x3c0] sm:$0xff]  ;;  %v883_v0 = vand.u32 4294901760, %v882_v42  ;;  %v9510_v42 = vand.u32 4294901760, %v196_v23 }
  0x31   :  { %677 = vmatpush.msra.mxu2 %v9389_v26  ;;  %720 = vmatpush.msra.mxu3 %v9371_v63  ;;  %v9489_v24 = vand.u32 4294901760, %v206_v60  ;;  %v632_v40 = vand.u32 4294901760, %v631_v59  ;;  %v15905_v59 = vand.u32 4294901760, %v9474_v33 }
  0x32   :  { %526 = vmatpush.msra.mxu0 %v9386_v18  ;;  %603 = vmatpush.msra.mxu1 %v602_v2  ;;  %v9495_v2 = vsub.f32 %v211_v43, %v9466_v45  ;;  %v15903_v43 = vand.u32 4294901760, %v9452_v48 }
  0x33   :  { %680 = vmatpush.msra.mxu2 %v9403_v39  ;;  %722 = vmatpush.msra.mxu3 %v9386_v18  ;;  %v906_v32 = vsub.f32 %v9474_v33, %v15905_v59 }
  0x34   :  { %528 = vmatpush.msra.mxu0 %v9399_v37  ;;  %609 = vmatpush.msra.mxu1 %v608_v49  ;;  %v626_v49 = vand.u32 4294901760, %v625_v62  ;;  %v900_v62 = vsub.f32 %v9452_v48, %v15903_v43  ;;  %v9520_v43 = vld [vmem:[#allocation3] sm:$0x1f] }
  0x35   :  { %683 = vmatpush.msra.mxu2 %v9416_v50  ;;  %724 = vmatpush.msra.mxu3 %v9399_v37  ;;  %v9515_v37 = vsub.f32 %v206_v60, %v9489_v24  ;;  %v9527_v60 = vsub.f32 %v201_v30, %v9502_v58  ;;  %v487_v19 = vperm.slane %v9520_v43, 0 }
  0x36   :  { %735 = vmatpush.msrb.mxu0 %v540_v22  ;;  %615 = vmatpush.msra.mxu1 %v614_v61  ;;  %v889_v22 = vand.u32 4294901760, %v888_v13  ;;  %v191_v61 = vld [vmem:[#allocation9 + $0x348] sm:$0xff] }
  0x37   :  { %686 = vmatpush.msra.mxu2 %v9433_v12  ;;  %884 = vmatpush.msrb.mxu3 %v883_v0  ;;  %v901_v0 = vand.u32 4294901760, %v900_v62  ;;  %v907_v62 = vand.u32 4294901760, %v906_v32  ;;  %v15911_v32 = vand.u32 4294901760, %v9515_v37 }
  0x38   :  { %739 = vmatpush.msrb.mxu0 %v15902_v14  ;;  %621 = vmatpush.msra.mxu1 %v620_v34  ;;  %v186_v14 = vld [vmem:[#allocation9 + $0x320] sm:$0xff]  ;;  %v895_v34 = vand.u32 4294901760, %v894_v6  ;;  %v15907_v6 = vand.u32 4294901760, %v9487_v27 }
  0x39   :  { %839 = vmatpush.msrb.mxu2 %v9380_v8  ;;  %v9529_v8 = vand.u32 4294901760, %v191_v61  ;;  %890 = vmatpush.msrb.mxu3 %v889_v22  ;;  %v9541_v13 = vand.u32 4294901760, %v186_v14  ;;  %v15908_v22 = vand.u32 4294901760, %v9287_v20  ;;  %v15910_v20 = vand.u32 4294901760, %v9297_v25 }
  0x3a   :  { %743 = vmatpush.msrb.mxu0 %v15904_v15  ;;  %627 = vmatpush.msra.mxu1 %v626_v49  ;;  %v9534_v15 = vsub.f32 %v196_v23, %v9510_v42  ;;  %v181_v49 = vld [vmem:[#allocation9 + $0x2f8] sm:$0xff]  ;;  %v912_v59 = vsub.f32 %v9487_v27, %v15907_v6  ;;  %v15909_v23 = vand.u32 4294901760, %v9495_v2  ;;  %v15913_v25 = vand.u32 4294901760, %v9304_v29 }
  0x3b   :  { %841 = vmatpush.msrb.mxu2 %v9393_v31  ;;  %896 = vmatpush.msrb.mxu3 %v895_v34  ;;  %v9553_v6 = vsub.f32 %v191_v61, %v9529_v8  ;;  %v9555_v30 = vand.u32 4294901760, %v181_v49  ;;  %v9566_v61 = vsub.f32 %v186_v14, %v9541_v13  ;;  %v15915_v29 = vand.u32 4294901760, %v9322_v36 }
  0x3c   :  { %747 = vmatpush.msrb.mxu0 %v15906_v16  ;;  %633 = vmatpush.msra.mxu1 %v632_v40  ;;  %v918_v40 = vsub.f32 %v9495_v2, %v15909_v23  ;;  %v913_v34 = vand.u32 4294901760, %v912_v59  ;;  %v924_v23 = vsub.f32 %v9515_v37, %v15911_v32  ;;  %v9568_v16 = vand.u32 4294901760, %v487_v19  ;;  %v166_v32 = vld [vmem:[#allocation9 + $0x280] sm:$0xff] }
  0x3d   :  { %843 = vmatpush.msrb.mxu2 %v9418_v54  ;;  %902 = vmatpush.msrb.mxu3 %v901_v0  ;;  %v15914_v0 = vand.u32 4294901760, %v9527_v60  ;;  %v15918_v36 = vand.u32 4294901760, %v9339_v46 }
  0x3e   :  { %751 = vmatpush.msrb.mxu0 %v15908_v22  ;;  %802 = vmatpush.msrb.mxu1 %v9258_v3  ;;  %v176_v22 = vld [vmem:[#allocation9 + $0x2d0] sm:$0xff]  ;;  %15912 = vst [vmem:[#allocation18_spill] sm:$0xff] %v9568_v16  ;;  %v9581_v3 = vsub.f32 %v181_v49, %v9555_v30 }
  0x3f   :  { %845 = vmatpush.msrb.mxu2 %v9425_v56  ;;  %908 = vmatpush.msrb.mxu3 %v907_v62  ;;  %v930_v59 = vsub.f32 %v9527_v60, %v15914_v0  ;;  %v9578_v14 = vand.u32 4294901760, %v176_v22  ;;  %v925_v62 = vand.u32 4294901760, %v924_v23  ;;  %v9592_v0 = vsub.f32 %v487_v19, %v9568_v16 }
  0x40   :  { %755 = vmatpush.msrb.mxu0 %v15910_v20  ;;  %804 = vmatpush.msrb.mxu1 %v9260_v4  ;;  %v919_v4 = vand.u32 4294901760, %v918_v40  ;;  %v171_v20 = vld [vmem:[#allocation9 + $0x2a8] sm:$0xff] }
  0x41   :  { %847 = vmatpush.msrb.mxu2 %v9446_v38  ;;  %914 = vmatpush.msrb.mxu3 %v913_v34  ;;  %15917 = vst [vmem:[#allocation19_spill] sm:$0xff] %v9592_v0  ;;  %v9594_v49 = vand.u32 4294901760, %v171_v20  ;;  %v15919_v34 = vand.u32 4294901760, %v9553_v6  ;;  %v9605_v19 = vsub.f32 %v176_v22, %v9578_v14 }
  0x42   :  { %759 = vmatpush.msrb.mxu0 %v15913_v25  ;;  %806 = vmatpush.msrb.mxu1 %v9262_v5  ;;  %v15916_v5 = vand.u32 4294901760, %v9534_v15  ;;  %v947_v25 = vand.u32 4294901760, %v9566_v61 }
  0x43   :  { %849 = vmatpush.msrb.mxu2 %v9459_v47  ;;  %920 = vmatpush.msrb.mxu3 %v919_v4  ;;  %v942_v23 = vsub.f32 %v9553_v6, %v15919_v34  ;;  %v9620_v22 = vsub.f32 %v171_v20, %v9594_v49  ;;  %v15923_v20 = vand.u32 4294901760, %v9375_v1 }
  0x44   :  { %763 = vmatpush.msrb.mxu0 %v15915_v29  ;;  %808 = vmatpush.msrb.mxu1 %v9264_v9  ;;  %v936_v40 = vsub.f32 %v9534_v15, %v15916_v5  ;;  %v931_v9 = vand.u32 4294901760, %v930_v59  ;;  %v953_v29 = vand.u32 4294901760, %v9581_v3  ;;  %v15920_v5 = vand.u32 4294901760, %v9351_v52 }
  0x45   :  { %851 = vmatpush.msrb.mxu2 %v9466_v45  ;;  %926 = vmatpush.msrb.mxu3 %v925_v62  ;;  %v948_v4 = vsub.f32 %v9566_v61, %v947_v25  ;;  %v9617_v59 = vand.u32 4294901760, %v9592_v0  ;;  %v488_v52 = vperm.slane %v9520_v43, 1  ;;  %v965_v34 = vand.u32 4294901760, %v9620_v22 }
  0x46   :  { %767 = vmatpush.msrb.mxu0 %v15918_v36  ;;  %810 = vmatpush.msrb.mxu1 %v9266_v10  ;;  %v937_v46 = vand.u32 4294901760, %v936_v40  ;;  %v9610_v10 = vand.u32 4294901760, %v166_v32  ;;  %v943_v40 = vand.u32 4294901760, %v942_v23  ;;  %v954_v62 = vsub.f32 %v9581_v3, %v953_v29 }
  0x47   :  { %853 = vmatpush.msrb.mxu2 %v9489_v24  ;;  %15921 = vst [vmem:[#allocation20_spill] sm:$0xff] %v9617_v59  ;;  %932 = vmatpush.msrb.mxu3 %v931_v9  ;;  %v959_v36 = vand.u32 4294901760, %v9605_v19  ;;  %v532_v9 = vsub.f32 %v9592_v0, %v9617_v59  ;;  %v9641_v23 = vand.u32 4294901760, %v488_v52 }
  0x48   :  { %771 = vmatpush.msrb.mxu0 %v15920_v5  ;;  %812 = vmatpush.msrb.mxu1 %v9268_v11  ;;  %v15922_v11 = vand.u32 4294901760, %v9356_v53  ;;  %v9635_v53 = vsub.f32 %v166_v32, %v9610_v10  ;;  %v15925_v5 = vand.u32 4294901760, %v9389_v26  ;;  %v15926_v32 = vand.u32 4294901760, %v9403_v39 }
  0x49   :  { %855 = vmatpush.msrb.mxu2 %v9502_v58  ;;  %938 = vmatpush.msrb.mxu3 %v937_v46  ;;  %15924 = vst [vmem:[#allocation21_spill] sm:$0xff] %v9641_v23  ;;  %v960_v1 = vsub.f32 %v9605_v19, %v959_v36  ;;  %v9655_v26 = vand.u32 4294901760, %v532_v9  ;;  %v15930_v39 = vand.u32 4294901760, %v9433_v12 }
  0x4a   :  { %775 = vmatpush.msrb.mxu0 %v15922_v11  ;;  %814 = vmatpush.msrb.mxu1 %v9281_v17  ;;  %v949_v17 = vand.u32 4294901760, %v948_v4  ;;  %v971_v46 = vand.u32 4294901760, %v9635_v53  ;;  %v9661_v4 = vsub.f32 %v488_v52, %v9641_v23  ;;  %v15929_v11 = vand.u32 4294901760, %v9416_v50 }
  0x4b   :  { %857 = vmatpush.msrb.mxu2 %v9510_v42  ;;  %944 = vmatpush.msrb.mxu3 %v943_v40  ;;  %15927 = vst [vmem:[#allocation22_spill] sm:$0xff] %v9655_v26 }
  0x4c   :  { %779 = vmatpush.msrb.mxu0 %v15923_v20  ;;  %816 = vmatpush.msrb.mxu1 %v9289_v21  ;;  %v955_v21 = vand.u32 4294901760, %v954_v62  ;;  %15928 = vst [vmem:[#allocation23_spill] sm:$0xff] %v9661_v4  ;;  %v972_v40 = vsub.f32 %v9635_v53, %v971_v46  ;;  %v15935_v62 = vld [vmem:[#allocation16_spill] sm:$0xff]  ;;  %v15936_v20 = vld [vmem:[#allocation17_spill] sm:$0xff] }
  0x4d   :  { %859 = vmatpush.msrb.mxu2 %v9529_v8  ;;  %950 = vmatpush.msrb.mxu3 %v949_v17 }
  0x4e   :  { %783 = vmatpush.msrb.mxu0 %v15925_v5  ;;  %818 = vmatpush.msrb.mxu1 %v9301_v28  ;;  %v966_v28 = vsub.f32 %v9620_v22, %v965_v34 }
  0x4f   :  { %861 = vmatpush.msrb.mxu2 %v9541_v13  ;;  %956 = vmatpush.msrb.mxu3 %v955_v21 }
  0x50   :  { %787 = vmatpush.msrb.mxu0 %v15926_v32  ;;  %820 = vmatpush.msrb.mxu1 %v9319_v35  ;;  %v961_v35 = vand.u32 4294901760, %v960_v1  ;;  %v967_v50 = vand.u32 4294901760, %v966_v28  ;;  %v276_v32 = vld [vmem:[#allocation9 + $0x5f0] sm:$0xff] }
  0x51   :  { %863 = vmatpush.msrb.mxu2 %v9555_v30  ;;  %534 = vmatmul.f32.vlgmr.msra.gmra.mxu0 %v9655_v26 }
  0x52   :  { %791 = vmatpush.msrb.mxu0 %v15929_v11  ;;  %822 = vmatpush.msrb.mxu1 %v9331_v41  ;;  %v9676_v41 = vand.u32 4294901760, %v9661_v4 }
  0x53   :  { %865 = vmatpush.msrb.mxu2 %v9578_v14  ;;  %962 = vmatpush.msrb.mxu3 %v961_v35 }
  0x54   :  { %795 = vmatpush.msrb.mxu0 %v15930_v39  ;;  %824 = vmatpush.msrb.mxu1 %v9348_v51  ;;  %15931 = vst [vmem:[#allocation24_spill] sm:$0xff] %v9676_v41  ;;  %v973_v51 = vand.u32 4294901760, %v972_v40  ;;  %v873_v12 = vsub.f32 %v9661_v4, %v9676_v41  ;;  %v271_v39 = vld [vmem:[#allocation9 + $0x5c8] sm:$0xff] }
  0x55   :  { %867 = vmatpush.msrb.mxu2 %v9594_v49  ;;  %968 = vmatpush.msrb.mxu3 %v967_v50 }
  0x56   :  { %982 = vmatpush.msra.mxu0 %v9411_v44  ;;  %826 = vmatpush.msrb.mxu1 %v9362_v57  ;;  %v15932_v57 = vand.u32 4294901760, %v9411_v44  ;;  %v9695_v52 = vand.u32 4294901760, %v873_v12  ;;  %v15938_v44 = vand.u32 4294901760, %v9452_v48 }
  0x57   :  { %689 = vmatmul.f32.vlgmr.msra.gmra.mxu2 %v9592_v0  ;;  %728 = vmatmul.f32.vlgmr.msra.gmra.mxu3 %v9617_v59  ;;  %v361_v0 = vld [vmem:[#allocation9 + $0x898] sm:$0xff] }
  0x58   :  { %985 = vmatpush.msra.mxu0 %v9423_v55  ;;  %828 = vmatpush.msrb.mxu1 %v9371_v63  ;;  %v15933_v63 = vand.u32 4294901760, %v9423_v55  ;;  %15934 = vst [vmem:[#allocation25_spill] sm:$0xff] %v9695_v52  ;;  %v15939_v55 = vand.u32 4294901760, %v9474_v33  ;;  %v10042_v26 = vand.u32 4294901760, %v361_v0 }
  0x59   :  { %869 = vmatpush.msrb.mxu2 %v9610_v10  ;;  %974 = vmatpush.msrb.mxu3 %v973_v51  ;;  %v9842_v51 = vand.u32 4294901760, %v276_v32 }
  0x5a   :  { %988 = vmatpush.msra.mxu0 %v9444_v7  ;;  %830 = vmatpush.msrb.mxu1 %v9386_v18  ;;  %v15937_v18 = vand.u32 4294901760, %v9444_v7  ;;  %v15945_v7 = vand.u32 4294901760, %v9553_v6 }
  0x5b   :  { %1076 = vmatpush.msra.mxu2 %v15932_v57  ;;  %635 = vmatmul.f32.vlgmr.msra.gmra.mxu1 %v9568_v16  ;;  %v266_v57 = vld [vmem:[#allocation9 + $0x5a0] sm:$0xff] }
  0x5c   :  { %991 = vmatpush.msra.mxu0 %v9452_v48  ;;  %1143 = vmatpush.msra.mxu3 %v15935_v62 }
  0x5d   :  { %1080 = vmatpush.msra.mxu2 %v15933_v63  ;;  %832 = vmatpush.msrb.mxu1 %v15936_v20  ;;  %v489_v63 = vperm.slane %v9520_v43, 2  ;;  %v9854_v20 = vand.u32 4294901760, %v271_v39 }
  0x5e   :  { %994 = vmatpush.msra.mxu0 %v9474_v33  ;;  %1145 = vmatpush.msra.mxu3 %v9393_v31  ;;  %v15941_v33 = vand.u32 4294901760, %v9495_v2 }
  0x5f   :  { %1035 = vmatpush.msra.mxu1 %v15935_v62  ;;  %1084 = vmatpush.msra.mxu2 %v15937_v18 }
  0x60   :  { %875 = vmatmul.f32.vlgmr.msrb.gmra.mxu2 %v9695_v52  ;;  %997 = vmatpush.msra.mxu0 %v9487_v27 }
  0x61   :  { %1037 = vmatpush.msra.mxu1 %v9393_v31  ;;  %1088 = vmatpush.msra.mxu2 %v15938_v44  ;;  %v15940_v31 = vand.u32 4294901760, %v9487_v27  ;;  %v321_v27 = vld [vmem:[#allocation9 + $0x758] sm:$0xff] }
  0x62   :  { %1147 = vmatpush.msra.mxu3 %v9418_v54  ;;  %797 = vmatmul.f32.vlgmr.msrb.gmra.mxu0 %v9568_v16 }
  0x63   :  { %976 = vmatmul.f32.vlgmr.msrb.gmra.mxu3 %v9641_v23  ;;  %1000 = vmatpush.msra.mxu0 %v9495_v2 }
  0x64   :  { %1039 = vmatpush.msra.mxu1 %v9418_v54  ;;  %1092 = vmatpush.msra.mxu2 %v15939_v55  ;;  %v15942_v54 = vand.u32 4294901760, %v9515_v37 }
  0x65   :  { %1149 = vmatpush.msra.mxu3 %v9425_v56  ;;  %834 = vmatmul.f32.vlgmr.msrb.gmra.mxu1 %v9568_v16  ;;  %v356_v16 = vld [vmem:[#allocation9 + $0x870] sm:$0xff] }
  0x66   :  { %1003 = vmatpush.msra.mxu0 %v9515_v37  ;;  %1041 = vmatpush.msra.mxu1 %v9425_v56  ;;  %v15944_v37 = vand.u32 4294901760, %v9534_v15  ;;  %v9743_v56 = vand.u32 4294901760, %v321_v27 }
  0x67   :  { %1096 = vmatpush.msra.mxu2 %v15940_v31  ;;  %1151 = vmatpush.msra.mxu3 %v9446_v38  ;;  %v261_v31 = vld [vmem:[#allocation9 + $0x578] sm:$0xff] }
  0x68   :  { %1006 = vmatpush.msra.mxu0 %v9527_v60  ;;  %1043 = vmatpush.msra.mxu1 %v9446_v38  ;;  %v15943_v38 = vand.u32 4294901760, %v9527_v60  ;;  %v301_v60 = vld [vmem:[#allocation9 + $0x6b8] sm:$0xff] }
  0x69   :  { %1100 = vmatpush.msra.mxu2 %v15941_v33  ;;  %1153 = vmatpush.msra.mxu3 %v9459_v47 }
  0x6a   :  { %1009 = vmatpush.msra.mxu0 %v9534_v15  ;;  %1045 = vmatpush.msra.mxu1 %v9459_v47  ;;  %v316_v47 = vld [vmem:[#allocation9 + $0x730] sm:$0xff] }
  0x6b   :  { %1104 = vmatpush.msra.mxu2 %v15942_v54  ;;  %1155 = vmatpush.msra.mxu3 %v9466_v45  ;;  %v9750_v48 = vand.u32 4294901760, %v316_v47  ;;  %v9866_v54 = vand.u32 4294901760, %v266_v57 }
  0x6c   :  { %1012 = vmatpush.msra.mxu0 %v9553_v6  ;;  %1047 = vmatpush.msra.mxu1 %v9466_v45  ;;  %v311_v45 = vld [vmem:[#allocation9 + $0x708] sm:$0xff]  ;;  %v296_v6 = vld [vmem:[#allocation9 + $0x690] sm:$0xff] }
  0x6d   :  { %1108 = vmatpush.msra.mxu2 %v15943_v38  ;;  %1157 = vmatpush.msra.mxu3 %v9489_v24  ;;  %v9757_v2 = vand.u32 4294901760, %v311_v45  ;;  %v9770_v15 = vsub.f32 %v316_v47, %v9750_v48  ;;  %v9870_v38 = vsub.f32 %v276_v32, %v9842_v51  ;;  %v251_v32 = vld [vmem:[#allocation9 + $0x528] sm:$0xff] }
  0x6e   :  { %1015 = vmatpush.msra.mxu0 %v9566_v61  ;;  %1049 = vmatpush.msra.mxu1 %v9489_v24  ;;  %v306_v24 = vld [vmem:[#allocation9 + $0x6e0] sm:$0xff]  ;;  %v9774_v61 = vand.u32 4294901760, %v301_v60 }
  0x6f   :  { %1112 = vmatpush.msra.mxu2 %v15944_v37  ;;  %1159 = vmatpush.msra.mxu3 %v9502_v58  ;;  %v256_v37 = vld [vmem:[#allocation9 + $0x550] sm:$0xff] }
  0x70   :  { %1018 = vmatpush.msra.mxu0 %v9581_v3  ;;  %1051 = vmatpush.msra.mxu1 %v9502_v58  ;;  %v9760_v58 = vsub.f32 %v321_v27, %v9743_v56  ;;  %v9781_v3 = vsub.f32 %v311_v45, %v9757_v2  ;;  %v9874_v45 = vand.u32 4294901760, %v489_v63 }
  0x71   :  { %1116 = vmatpush.msra.mxu2 %v15945_v7  ;;  %1161 = vmatpush.msra.mxu3 %v9510_v42 }
  0x72   :  { %1021 = vmatpush.msra.mxu0 %v9605_v19  ;;  %1053 = vmatpush.msra.mxu1 %v9510_v42  ;;  %v9767_v42 = vand.u32 4294901760, %v306_v24  ;;  %v15667_v9 = vand.u32 4294901760, %v9781_v3  ;;  %15946 = vst [vmem:[#allocation16_spill] sm:$0xff] %v9874_v45 }
  0x73   :  { %1120 = vmatpush.msra.mxu2 %v947_v25  ;;  %1163 = vmatpush.msra.mxu3 %v9529_v8  ;;  %v9785_v25 = vand.u32 4294901760, %v296_v6 }
  0x74   :  { %1024 = vmatpush.msra.mxu0 %v9620_v22  ;;  %1055 = vmatpush.msra.mxu1 %v9529_v8  ;;  %v15670_v8 = vand.u32 4294901760, %v9760_v58  ;;  %v9792_v19 = vsub.f32 %v306_v24, %v9767_v42  ;;  %v1235_v28 = vsub.f32 %v9781_v3, %v15667_v9  ;;  %v9880_v24 = vand.u32 4294901760, %v261_v31 }
  0x75   :  { %1124 = vmatpush.msra.mxu2 %v953_v29  ;;  %1165 = vmatpush.msra.mxu3 %v9541_v13  ;;  %v291_v29 = vld [vmem:[#allocation9 + $0x668] sm:$0xff] }
  0x76   :  { %1027 = vmatpush.msra.mxu0 %v9635_v53  ;;  %1057 = vmatpush.msra.mxu1 %v9541_v13  ;;  %v15668_v13 = vand.u32 4294901760, %v9770_v15  ;;  %v1223_v22 = vsub.f32 %v9760_v58, %v15670_v8  ;;  %v9805_v17 = vand.u32 4294901760, %v291_v29  ;;  %v15666_v21 = vand.u32 4294901760, %v9792_v19 }
  0x77   :  { %1128 = vmatpush.msra.mxu2 %v959_v36  ;;  %1167 = vmatpush.msra.mxu3 %v9555_v30  ;;  %v9797_v36 = vsub.f32 %v301_v60, %v9774_v61  ;;  %v1236_v62 = vand.u32 4294901760, %v1235_v28 }
  0x78   :  { %1030 = vmatmul.f32.vlgmr.msra.gmra.mxu0 %v9661_v4  ;;  %1059 = vmatpush.msra.mxu1 %v9555_v30  ;;  %v286_v30 = vld [vmem:[#allocation9 + $0x640] sm:$0xff]  ;;  %v1229_v53 = vsub.f32 %v9770_v15, %v15668_v13  ;;  %v9832_v35 = vsub.f32 %v291_v29, %v9805_v17  ;;  %v1241_v50 = vsub.f32 %v9792_v19, %v15666_v21  ;;  %v381_v13 = vld [vmem:[#allocation9 + $0x938] sm:$0xff] }
  0x79   :  { %1180 = vmatpush.msrb.mxu0 %v9743_v56  ;;  %1132 = vmatpush.msra.mxu2 %v965_v34  ;;  %v281_v34 = vld [vmem:[#allocation9 + $0x618] sm:$0xff]  ;;  %v9818_v5 = vand.u32 4294901760, %v286_v30  ;;  %v15664_v1 = vand.u32 4294901760, %v9797_v36  ;;  %v366_v4 = vld [vmem:[#allocation9 + $0x8c0] sm:$0xff] }
  0x7a   :  { %1169 = vmatpush.msra.mxu3 %v9578_v14  ;;  %1061 = vmatpush.msra.mxu1 %v9578_v14  ;;  %v9811_v14 = vsub.f32 %v296_v6, %v9785_v25  ;;  %v9829_v11 = vand.u32 4294901760, %v281_v34  ;;  %v1230_v40 = vand.u32 4294901760, %v1229_v53  ;;  %v15661_v18 = vand.u32 4294901760, %v9832_v35 }
  0x7b   :  { %1182 = vmatpush.msrb.mxu0 %v9750_v48  ;;  %1136 = vmatpush.msra.mxu2 %v971_v46  ;;  %v1224_v46 = vand.u32 4294901760, %v1223_v22  ;;  %v9845_v12 = vsub.f32 %v286_v30, %v9818_v5  ;;  %v1242_v33 = vand.u32 4294901760, %v1241_v50  ;;  %v9884_v6 = vsub.f32 %v271_v39, %v9854_v20 }
  0x7c   :  { %1171 = vmatpush.msra.mxu3 %v9594_v49  ;;  %1138 = vmatmul.f32.vlgmr.msra.gmra.mxu2 %v9641_v23  ;;  %v9858_v44 = vsub.f32 %v281_v34, %v9829_v11  ;;  %v1259_v7 = vsub.f32 %v9832_v35, %v15661_v18  ;;  %v9892_v22 = vand.u32 4294901760, %v256_v37  ;;  %v15658_v34 = vand.u32 4294901760, %v9870_v38  ;;  %v391_v18 = vld [vmem:[#allocation9 + $0x988] sm:$0xff] }
  0x7d   :  { %1184 = vmatpush.msrb.mxu0 %v9757_v2  ;;  %1323 = vmatpush.msrb.mxu2 %v9760_v58  ;;  %v15660_v27 = vand.u32 4294901760, %v9845_v12  ;;  %v9896_v53 = vsub.f32 %v266_v57, %v9866_v54  ;;  %v9909_v50 = vsub.f32 %v261_v31, %v9880_v24  ;;  %v9913_v57 = vand.u32 4294901760, %v251_v32 }
  0x7e   :  { %1063 = vmatpush.msra.mxu1 %v9594_v49  ;;  %1173 = vmatpush.msra.mxu3 %v9610_v10  ;;  %v15663_v49 = vand.u32 4294901760, %v9811_v14  ;;  %v15659_v60 = vand.u32 4294901760, %v9858_v44  ;;  %v1260_v28 = vand.u32 4294901760, %v1259_v7  ;;  %v9921_v31 = vsub.f32 %v256_v37, %v9892_v22 }
  0x7f   :  { %1175 = vmatmul.f32.vlgmr.msra.gmra.mxu3 %v9641_v23  ;;  %1186 = vmatpush.msrb.mxu0 %v9767_v42  ;;  %v1265_v30 = vsub.f32 %v9845_v12, %v15660_v27  ;;  %v9940_v27 = vsub.f32 %v251_v32, %v9913_v57  ;;  %v9963_v9 = vand.u32 4294901760, %v391_v18  ;;  %v9982_v23 = vand.u32 4294901760, %v381_v13 }
  0x80   :  { %1326 = vmatpush.msrb.mxu2 %v9770_v15  ;;  %1376 = vmatpush.msrb.mxu3 %v9743_v56  ;;  %v1253_v55 = vsub.f32 %v9811_v14, %v15663_v49  ;;  %v1271_v39 = vsub.f32 %v9858_v44, %v15659_v60  ;;  %v15669_v60 = vand.u32 4294901760, %v9909_v50 }
  0x81   :  { %1065 = vmatpush.msra.mxu1 %v9610_v10  ;;  %1188 = vmatpush.msrb.mxu0 %v9774_v61  ;;  %v1247_v10 = vsub.f32 %v9797_v36, %v15664_v1  ;;  %v386_v1 = vld [vmem:[#allocation9 + $0x960] sm:$0xff] }
  0x82   :  { %1069 = vmatmul.f32.vlgmr.msra.gmra.mxu1 %v9676_v41  ;;  %1329 = vmatpush.msrb.mxu2 %v9781_v3  ;;  %v1254_v29 = vand.u32 4294901760, %v1253_v55  ;;  %v1277_v55 = vsub.f32 %v9870_v38, %v15658_v34 }
  0x83   :  { %1225 = vmatpush.msrb.mxu1 %v1224_v46  ;;  %1378 = vmatpush.msrb.mxu3 %v9750_v48  ;;  %v1248_v47 = vand.u32 4294901760, %v1247_v10  ;;  %v9901_v46 = vsub.f32 %v489_v63, %v9874_v45  ;;  %v401_v10 = vld [vmem:[#allocation9 + $0x9d8] sm:$0xff]  ;;  %v246_v63 = vld [vmem:[#allocation9 + $0x500] sm:$0xff] }
  0x84   :  { %1190 = vmatpush.msrb.mxu0 %v9785_v25  ;;  %1332 = vmatpush.msrb.mxu2 %v9792_v19  ;;  %v9928_v7 = vand.u32 4294901760, %v401_v10  ;;  %v9934_v37 = vand.u32 4294901760, %v246_v63 }
  0x85   :  { %1231 = vmatpush.msrb.mxu1 %v1230_v40  ;;  %1380 = vmatpush.msrb.mxu3 %v9757_v2  ;;  %15947 = vst [vmem:[#allocation17_spill] sm:$0xff] %v9901_v46  ;;  %v15662_v40 = vand.u32 4294901760, %v9884_v6 }
  0x86   :  { %1192 = vmatpush.msrb.mxu0 %v9805_v17  ;;  %1335 = vmatpush.msrb.mxu2 %v9797_v36  ;;  %15949 = vst [vmem:[#allocation27_spill] sm:$0xff] %v9934_v37  ;;  %v9961_v21 = vsub.f32 %v246_v63, %v9934_v37 }
  0x87   :  { %1237 = vmatpush.msrb.mxu1 %v1236_v62  ;;  %1382 = vmatpush.msrb.mxu3 %v9767_v42  ;;  %v1266_v62 = vand.u32 4294901760, %v1265_v30  ;;  %v1272_v30 = vand.u32 4294901760, %v1271_v39  ;;  %v1283_v34 = vsub.f32 %v9884_v6, %v15662_v40  ;;  %v15673_v40 = vand.u32 4294901760, %v9921_v31 }
  0x88   :  { %1194 = vmatpush.msrb.mxu0 %v9818_v5  ;;  %1338 = vmatpush.msrb.mxu2 %v9811_v14 }
  0x89   :  { %1243 = vmatpush.msrb.mxu1 %v1242_v33  ;;  %1384 = vmatpush.msrb.mxu3 %v9774_v61  ;;  %v15665_v33 = vand.u32 4294901760, %v9896_v53  ;;  %v1301_v63 = vsub.f32 %v9921_v31, %v15673_v40 }
  0x8a   :  { %1196 = vmatpush.msrb.mxu0 %v9829_v11  ;;  %1341 = vmatpush.msrb.mxu2 %v9832_v35 }
  0x8b   :  { %1249 = vmatpush.msrb.mxu1 %v1248_v47  ;;  %1386 = vmatpush.msrb.mxu3 %v9785_v25  ;;  %v9926_v47 = vand.u32 4294901760, %v9901_v46  ;;  %v1289_v39 = vsub.f32 %v9896_v53, %v15665_v33  ;;  %v1295_v33 = vsub.f32 %v9909_v50, %v15669_v60 }
  0x8c   :  { %1198 = vmatpush.msrb.mxu0 %v9842_v51  ;;  %1344 = vmatpush.msrb.mxu2 %v9845_v12 }
  0x8d   :  { %1255 = vmatpush.msrb.mxu1 %v1254_v29  ;;  %1388 = vmatpush.msrb.mxu3 %v9805_v17  ;;  %15948 = vst [vmem:[#allocation26_spill] sm:$0xff] %v9926_v47  ;;  %v396_v29 = vld [vmem:[#allocation9 + $0x9b0] sm:$0xff]  ;;  %v1214_v32 = vsub.f32 %v9901_v46, %v9926_v47 }
  0x8e   :  { %1200 = vmatpush.msrb.mxu0 %v9854_v20  ;;  %1347 = vmatpush.msrb.mxu2 %v9858_v44  ;;  %v9947_v49 = vand.u32 4294901760, %v396_v29 }
  0x8f   :  { %1261 = vmatpush.msrb.mxu1 %v1260_v28  ;;  %1390 = vmatpush.msrb.mxu3 %v9818_v5  ;;  %v1278_v28 = vand.u32 4294901760, %v1277_v55  ;;  %v1284_v55 = vand.u32 4294901760, %v1283_v34  ;;  %v1290_v34 = vand.u32 4294901760, %v1289_v39  ;;  %v9979_v8 = vand.u32 4294901760, %v1214_v32 }
  0x90   :  { %1202 = vmatpush.msrb.mxu0 %v9866_v54  ;;  %1350 = vmatpush.msrb.mxu2 %v9870_v38  ;;  %v9975_v60 = vsub.f32 %v396_v29, %v9947_v49  ;;  %v1296_v39 = vand.u32 4294901760, %v1295_v33  ;;  %v9987_v29 = vsub.f32 %v391_v18, %v9963_v9  ;;  %v15951_v32 = vand.u32 4294901760, %v9940_v27 }
  0x91   :  { %1267 = vmatpush.msrb.mxu1 %v1266_v62  ;;  %1392 = vmatpush.msrb.mxu3 %v9829_v11  ;;  %v9954_v62 = vsub.f32 %v401_v10, %v9928_v7  ;;  %15950 = vst [vmem:[#allocation28_spill] sm:$0xff] %v9979_v8  ;;  %v1302_v33 = vand.u32 4294901760, %v1301_v63  ;;  %v15954_v63 = vand.u32 4294901760, %v9961_v21 }
  0x92   :  { %1204 = vmatpush.msrb.mxu0 %v9880_v24  ;;  %1353 = vmatpush.msrb.mxu2 %v9884_v6  ;;  %v1307_v10 = vsub.f32 %v9940_v27, %v15951_v32 }
  0x93   :  { %1273 = vmatpush.msrb.mxu1 %v1272_v30  ;;  %1394 = vmatpush.msrb.mxu3 %v9842_v51  ;;  %v9968_v30 = vand.u32 4294901760, %v386_v1  ;;  %v15952_v52 = vand.u32 4294901760, %v9954_v62  ;;  %v1313_v40 = vsub.f32 %v9961_v21, %v15954_v63 }
  0x94   :  { %1206 = vmatpush.msrb.mxu0 %v9892_v22  ;;  %1356 = vmatpush.msrb.mxu2 %v9896_v53 }
  0x95   :  { %1279 = vmatpush.msrb.mxu1 %v1278_v28  ;;  %1396 = vmatpush.msrb.mxu3 %v9854_v20  ;;  %v376_v28 = vld [vmem:[#allocation9 + $0x910] sm:$0xff]  ;;  %v9995_v41 = vsub.f32 %v386_v1, %v9968_v30  ;;  %v1564_v32 = vsub.f32 %v9954_v62, %v15952_v52  ;;  %v10007_v1 = vsub.f32 %v381_v13, %v9982_v23  ;;  %v1308_v52 = vand.u32 4294901760, %v1307_v10 }
  0x96   :  { %1208 = vmatpush.msrb.mxu0 %v9913_v57  ;;  %1359 = vmatpush.msrb.mxu2 %v9909_v50  ;;  %v9999_v18 = vand.u32 4294901760, %v376_v28 }
  0x97   :  { %1285 = vmatpush.msrb.mxu1 %v1284_v55  ;;  %1398 = vmatpush.msrb.mxu3 %v9866_v54  ;;  %v371_v55 = vld [vmem:[#allocation9 + $0x8e8] sm:$0xff]  ;;  %v1565_v10 = vand.u32 4294901760, %v1564_v32  ;;  %v15959_v32 = vand.u32 4294901760, %v9995_v41 }
  0x98   :  { %1210 = vmatpush.msrb.mxu0 %v9934_v37  ;;  %1362 = vmatpush.msrb.mxu2 %v9921_v31  ;;  %v10015_v59 = vand.u32 4294901760, %v371_v55  ;;  %v10026_v63 = vsub.f32 %v376_v28, %v9999_v18 }
  0x99   :  { %1291 = vmatpush.msrb.mxu1 %v1290_v34  ;;  %1400 = vmatpush.msrb.mxu3 %v9880_v24  ;;  %v15953_v34 = vand.u32 4294901760, %v9760_v58  ;;  %v15955_v58 = vand.u32 4294901760, %v9770_v15  ;;  %v15957_v15 = vand.u32 4294901760, %v9781_v3  ;;  %v1582_v3 = vsub.f32 %v9995_v41, %v15959_v32 }
  0x9a   :  { %1216 = vmatmul.f32.vlgmr.msrb.gmra.mxu0 %v9979_v8  ;;  %1365 = vmatpush.msrb.mxu2 %v9940_v27  ;;  %v10028_v8 = vand.u32 4294901760, %v366_v4 }
  0x9b   :  { %1417 = vmatpush.msra.mxu0 %v15953_v34  ;;  %1297 = vmatpush.msrb.mxu1 %v1296_v39  ;;  %v15956_v39 = vand.u32 4294901760, %v9975_v60 }
  0x9c   :  { %1402 = vmatpush.msrb.mxu3 %v9892_v22  ;;  %1368 = vmatpush.msrb.mxu2 %v9961_v21 }
  0x9d   :  { %1421 = vmatpush.msra.mxu0 %v15955_v58  ;;  %1303 = vmatpush.msrb.mxu1 %v1302_v33  ;;  %v1570_v34 = vsub.f32 %v9975_v60, %v15956_v39  ;;  %v1314_v33 = vand.u32 4294901760, %v1313_v40  ;;  %v15958_v58 = vand.u32 4294901760, %v9987_v29  ;;  %v10040_v39 = vsub.f32 %v371_v55, %v10015_v59 }
  0x9e   :  { %1404 = vmatpush.msrb.mxu3 %v9913_v57  ;;  %1371 = vmatmul.f32.vlgmr.msrb.gmra.mxu2 %v9901_v46  ;;  %v15960_v40 = vand.u32 4294901760, %v9792_v19  ;;  %v10053_v55 = vsub.f32 %v366_v4, %v10028_v8  ;;  %v10055_v46 = vand.u32 4294901760, %v356_v16  ;;  %v15962_v19 = vand.u32 4294901760, %v9797_v36 }
  0x9f   :  { %1425 = vmatpush.msra.mxu0 %v15957_v15  ;;  %1521 = vmatpush.msra.mxu2 %v9928_v7  ;;  %v1576_v28 = vsub.f32 %v9987_v29, %v15958_v58  ;;  %v351_v15 = vld [vmem:[#allocation9 + $0x848] sm:$0xff]  ;;  %v1571_v13 = vand.u32 4294901760, %v1570_v34  ;;  %v10065_v4 = vsub.f32 %v361_v0, %v10042_v26  ;;  %v15963_v36 = vand.u32 4294901760, %v10026_v63 }
  0xa0   :  { %1309 = vmatpush.msrb.mxu1 %v1308_v52  ;;  %1406 = vmatpush.msrb.mxu3 %v9934_v37  ;;  %v15961_v52 = vand.u32 4294901760, %v10007_v1  ;;  %v346_v37 = vld [vmem:[#allocation9 + $0x820] sm:$0xff]  ;;  %v10067_v58 = vand.u32 4294901760, %v351_v15  ;;  %v10077_v0 = vsub.f32 %v356_v16, %v10055_v46 }
  0xa1   :  { %1410 = vmatmul.f32.vlgmr.msrb.gmra.mxu3 %v9926_v47  ;;  %1429 = vmatpush.msra.mxu0 %v15960_v40  ;;  %v1577_v34 = vand.u32 4294901760, %v1576_v28  ;;  %v15695_v40 = vand.u32 4294901760, %v10040_v39  ;;  %v341_v47 = vld [vmem:[#allocation9 + $0x7f8] sm:$0xff]  ;;  %v336_v28 = vld [vmem:[#allocation9 + $0x7d0] sm:$0xff] }
  0xa2   :  { %1523 = vmatpush.msra.mxu2 %v9947_v49  ;;  %1566 = vmatpush.msra.mxu3 %v1565_v10  ;;  %v1588_v32 = vsub.f32 %v10007_v1, %v15961_v52  ;;  %v1583_v10 = vand.u32 4294901760, %v1582_v3  ;;  %v10079_v52 = vand.u32 4294901760, %v346_v37  ;;  %v10090_v16 = vsub.f32 %v351_v15, %v10067_v58 }
  0xa3   :  { %1315 = vmatpush.msrb.mxu1 %v1314_v33  ;;  %1433 = vmatpush.msra.mxu0 %v15962_v19  ;;  %v1594_v33 = vsub.f32 %v10026_v63, %v15963_v36  ;;  %v15964_v19 = vand.u32 4294901760, %v9811_v14  ;;  %v10092_v36 = vand.u32 4294901760, %v341_v47  ;;  %v15965_v14 = vand.u32 4294901760, %v9832_v35 }
  0xa4   :  { %1317 = vmatmul.f32.vlgmr.msrb.gmra.mxu1 %v9874_v45  ;;  %1525 = vmatpush.msra.mxu2 %v9963_v9  ;;  %v1589_v3 = vand.u32 4294901760, %v1588_v32  ;;  %v1617_v15 = vand.u32 4294901760, %v10077_v0  ;;  %v15967_v35 = vand.u32 4294901760, %v9845_v12  ;;  %v15969_v12 = vand.u32 4294901760, %v9858_v44 }
  0xa5   :  { %1484 = vmatpush.msra.mxu1 %v9743_v56  ;;  %1572 = vmatpush.msra.mxu3 %v1571_v13  ;;  %v1600_v56 = vsub.f32 %v10040_v39, %v15695_v40  ;;  %v1595_v32 = vand.u32 4294901760, %v1594_v33  ;;  %v10104_v40 = vsub.f32 %v346_v37, %v10079_v52  ;;  %v331_v13 = vld [vmem:[#allocation9 + $0x7a8] sm:$0xff]  ;;  %v10117_v37 = vsub.f32 %v341_v47, %v10092_v36 }
  0xa6   :  { %1437 = vmatpush.msra.mxu0 %v15964_v19  ;;  %1527 = vmatpush.msra.mxu2 %v9968_v30 }
  0xa7   :  { %1486 = vmatpush.msra.mxu1 %v9750_v48  ;;  %1578 = vmatpush.msra.mxu3 %v1577_v34  ;;  %v490_v48 = vperm.slane %v9520_v43, 3  ;;  %v15966_v34 = vand.u32 4294901760, %v10053_v55  ;;  %v10109_v43 = vand.u32 4294901760, %v336_v28  ;;  %v1629_v47 = vand.u32 4294901760, %v10104_v40 }
  0xa8   :  { %1441 = vmatpush.msra.mxu0 %v15965_v14  ;;  %1529 = vmatpush.msra.mxu2 %v9982_v23  ;;  %v1623_v14 = vand.u32 4294901760, %v10090_v16 }
  0xa9   :  { %1488 = vmatpush.msra.mxu1 %v9757_v2  ;;  %1584 = vmatpush.msra.mxu3 %v1583_v10  ;;  %v1606_v19 = vsub.f32 %v10053_v55, %v15966_v34  ;;  %v1601_v2 = vand.u32 4294901760, %v1600_v56  ;;  %v15968_v10 = vand.u32 4294901760, %v10065_v4  ;;  %v326_v34 = vld [vmem:[#allocation9 + $0x780] sm:$0xff]  ;;  %v1618_v56 = vsub.f32 %v10077_v0, %v1617_v15 }
  0xaa   :  { %1445 = vmatpush.msra.mxu0 %v15967_v35  ;;  %1531 = vmatpush.msra.mxu2 %v9999_v18  ;;  %v10122_v35 = vand.u32 4294901760, %v331_v13  ;;  %v10135_v44 = vsub.f32 %v336_v28, %v10109_v43 }
  0xab   :  { %1490 = vmatpush.msra.mxu1 %v9767_v42  ;;  %1590 = vmatpush.msra.mxu3 %v1589_v3  ;;  %v1612_v33 = vsub.f32 %v10065_v4, %v15968_v10  ;;  %v10124_v42 = vand.u32 4294901760, %v490_v48  ;;  %v1607_v3 = vand.u32 4294901760, %v1606_v19  ;;  %v15971_v10 = vand.u32 4294901760, %v9870_v38 }
  0xac   :  { %1449 = vmatpush.msra.mxu0 %v15969_v12  ;;  %1533 = vmatpush.msra.mxu2 %v10015_v59  ;;  %v10137_v12 = vand.u32 4294901760, %v326_v34  ;;  %v1635_v19 = vand.u32 4294901760, %v10117_v37  ;;  %v15972_v38 = vand.u32 4294901760, %v9884_v6  ;;  %v10148_v28 = vsub.f32 %v331_v13, %v10122_v35 }
  0xad   :  { %15970 = vst [vmem:[#allocation29_spill] sm:$0xff] %v10124_v42  ;;  %1492 = vmatpush.msra.mxu1 %v9774_v61  ;;  %1596 = vmatpush.msra.mxu3 %v1595_v32  ;;  %v1613_v61 = vand.u32 4294901760, %v1612_v33  ;;  %v1624_v32 = vsub.f32 %v10090_v16, %v1623_v14  ;;  %v15974_v33 = vand.u32 4294901760, %v9896_v53  ;;  %v1641_v6 = vand.u32 4294901760, %v10135_v44 }
  0xae   :  { %1453 = vmatpush.msra.mxu0 %v15971_v10  ;;  %1535 = vmatpush.msra.mxu2 %v10028_v8  ;;  %v10151_v10 = vsub.f32 %v490_v48, %v10124_v42  ;;  %v10162_v13 = vsub.f32 %v326_v34, %v10137_v12  ;;  %v1636_v48 = vsub.f32 %v10117_v37, %v1635_v19  ;;  %v1647_v53 = vand.u32 4294901760, %v10148_v28 }
  0xaf   :  { %1494 = vmatpush.msra.mxu1 %v9785_v25  ;;  %1602 = vmatpush.msra.mxu3 %v1601_v2  ;;  %v1619_v25 = vand.u32 4294901760, %v1618_v56  ;;  %v1630_v2 = vsub.f32 %v10104_v40, %v1629_v47  ;;  %v15977_v34 = vand.u32 4294901760, %v9921_v31 }
  0xb0   :  { %1457 = vmatpush.msra.mxu0 %v15972_v38  ;;  %1537 = vmatpush.msra.mxu2 %v10042_v26  ;;  %15973 = vst [vmem:[#allocation30_spill] sm:$0xff] %v10151_v10  ;;  %v10173_v56 = vand.u32 4294901760, %v10151_v10  ;;  %v15978_v38 = vand.u32 4294901760, %v9940_v27 }
  0xb1   :  { %1496 = vmatpush.msra.mxu1 %v9805_v17  ;;  %1608 = vmatpush.msra.mxu3 %v1607_v3  ;;  %v1625_v17 = vand.u32 4294901760, %v1624_v32  ;;  %v15975_v3 = vand.u32 4294901760, %v9909_v50  ;;  %v1642_v50 = vsub.f32 %v10135_v44, %v1641_v6  ;;  %v1637_v32 = vand.u32 4294901760, %v1636_v48 }
  0xb2   :  { %1461 = vmatpush.msra.mxu0 %v15974_v33  ;;  %1539 = vmatpush.msra.mxu2 %v10055_v46  ;;  %15976 = vst [vmem:[#allocation31_spill] sm:$0xff] %v10173_v56  ;;  %v1555_v31 = vsub.f32 %v10151_v10, %v10173_v56 }
  0xb3   :  { %1498 = vmatpush.msra.mxu1 %v9818_v5  ;;  %1614 = vmatpush.msra.mxu3 %v1613_v61  ;;  %v1631_v5 = vand.u32 4294901760, %v1630_v2  ;;  %v1653_v61 = vand.u32 4294901760, %v10162_v13 }
  0xb4   :  { %1465 = vmatpush.msra.mxu0 %v15975_v3  ;;  %1541 = vmatpush.msra.mxu2 %v10067_v58 }
  0xb5   :  { %1500 = vmatpush.msra.mxu1 %v9829_v11  ;;  %1620 = vmatpush.msra.mxu3 %v1619_v25  ;;  %v1648_v11 = vsub.f32 %v10148_v28, %v1647_v53  ;;  %v15979_v25 = vand.u32 4294901760, %v9961_v21  ;;  %v1654_v27 = vsub.f32 %v10162_v13, %v1653_v61 }
  0xb6   :  { %1469 = vmatpush.msra.mxu0 %v15977_v34  ;;  %1543 = vmatpush.msra.mxu2 %v10079_v52  ;;  %v431_v34 = vld [vmem:[#allocation9 + $0xac8] sm:$0xff] }
  0xb7   :  { %1502 = vmatpush.msra.mxu1 %v9842_v51  ;;  %1626 = vmatpush.msra.mxu3 %v1625_v17  ;;  %v1643_v51 = vand.u32 4294901760, %v1642_v50  ;;  %v1649_v2 = vand.u32 4294901760, %v1648_v11  ;;  %v1655_v21 = vand.u32 4294901760, %v1654_v27  ;;  %v436_v17 = vld [vmem:[#allocation9 + $0xaf0] sm:$0xff]  ;;  %v426_v11 = vld [vmem:[#allocation9 + $0xaa0] sm:$0xff]  ;;  %v10371_v27 = vand.u32 4294901760, %v431_v34 }
  0xb8   :  { %1473 = vmatpush.msra.mxu0 %v15978_v38  ;;  %1545 = vmatpush.msra.mxu2 %v10092_v36 }
  0xb9   :  { %1504 = vmatpush.msra.mxu1 %v9854_v20  ;;  %1632 = vmatpush.msra.mxu3 %v1631_v5  ;;  %v10202_v20 = vand.u32 4294901760, %v1555_v31  ;;  %v9084_v31 = vld [vmem:[#allocation3] sm:$0x1f] }
  0xba   :  { %1477 = vmatpush.msra.mxu0 %v15979_v25  ;;  %1547 = vmatpush.msra.mxu2 %v10109_v43  ;;  %v491_v25 = vperm.slane %v9084_v31, 4 }
  0xbb   :  { %1506 = vmatpush.msra.mxu1 %v9866_v54  ;;  %1638 = vmatpush.msra.mxu3 %v1637_v32  ;;  %15980 = vst [vmem:[#allocation32_spill] sm:$0xff] %v10202_v20  ;;  %v15981_v54 = vand.u32 4294901760, %v9954_v62  ;;  %v10360_v32 = vand.u32 4294901760, %v436_v17 }
  0xbc   :  { %1479 = vmatmul.f32.vlgmr.msra.gmra.mxu0 %v9874_v45  ;;  %1549 = vmatpush.msra.mxu2 %v10122_v35 }
  0xbd   :  { %1664 = vmatpush.msrb.mxu0 %v9954_v62  ;;  %1508 = vmatpush.msra.mxu1 %v9880_v24  ;;  %v15982_v24 = vand.u32 4294901760, %v9975_v60  ;;  %v15984_v62 = vand.u32 4294901760, %v9987_v29 }
  0xbe   :  { %1644 = vmatpush.msra.mxu3 %v1643_v51  ;;  %1551 = vmatpush.msra.mxu2 %v10137_v12 }
  0xbf   :  { %1667 = vmatpush.msrb.mxu0 %v9975_v60  ;;  %1510 = vmatpush.msra.mxu1 %v9892_v22  ;;  %v15983_v22 = vld [vmem:[#allocation27_spill] sm:$0xff]  ;;  %v15985_v60 = vand.u32 4294901760, %v9995_v41 }
  0xc0   :  { %1650 = vmatpush.msra.mxu3 %v1649_v2  ;;  %1557 = vmatmul.f32.vlgmr.msra.gmra.mxu2 %v10202_v20 }
  0xc1   :  { %1670 = vmatpush.msrb.mxu0 %v9987_v29  ;;  %1758 = vmatpush.msrb.mxu2 %v15981_v54 }
  0xc2   :  { %1512 = vmatpush.msra.mxu1 %v9913_v57  ;;  %1656 = vmatpush.msra.mxu3 %v1655_v21  ;;  %v15986_v57 = vand.u32 4294901760, %v10007_v1 }
  0xc3   :  { %1658 = vmatmul.f32.vlgmr.msra.gmra.mxu3 %v10124_v42  ;;  %1673 = vmatpush.msrb.mxu0 %v9995_v41  ;;  %v15988_v41 = vand.u32 4294901760, %v10040_v39 }
  0xc4   :  { %1762 = vmatpush.msrb.mxu2 %v15982_v24  ;;  %1825 = vmatpush.msrb.mxu3 %v9928_v7  ;;  %v421_v24 = vld [vmem:[#allocation9 + $0xa78] sm:$0xff] }
  0xc5   :  { %1514 = vmatpush.msra.mxu1 %v15983_v22  ;;  %1676 = vmatpush.msrb.mxu0 %v10007_v1 }
  0xc6   :  { %1516 = vmatmul.f32.vlgmr.msra.gmra.mxu1 %v9874_v45  ;;  %1766 = vmatpush.msrb.mxu2 %v15984_v62  ;;  %v10383_v62 = vand.u32 4294901760, %v426_v11  ;;  %v107_v45 = vld [vmem:[#allocation9 + $0xa8] sm:$0xff] }
  0xc7   :  { %1717 = vmatpush.msrb.mxu1 %v9928_v7  ;;  %1827 = vmatpush.msrb.mxu3 %v9947_v49  ;;  %v15987_v7 = vand.u32 4294901760, %v10026_v63 }
  0xc8   :  { %1679 = vmatpush.msrb.mxu0 %v10026_v63  ;;  %1770 = vmatpush.msrb.mxu2 %v15985_v60 }
  0xc9   :  { %1719 = vmatpush.msrb.mxu1 %v9947_v49  ;;  %1829 = vmatpush.msrb.mxu3 %v9963_v9  ;;  %v15990_v49 = vand.u32 4294901760, %v10065_v4 }
  0xca   :  { %1682 = vmatpush.msrb.mxu0 %v10040_v39  ;;  %1774 = vmatpush.msrb.mxu2 %v15986_v57  ;;  %v10387_v57 = vsub.f32 %v436_v17, %v10360_v32 }
  0xcb   :  { %1721 = vmatpush.msrb.mxu1 %v9963_v9  ;;  %1831 = vmatpush.msrb.mxu3 %v9968_v30  ;;  %v15989_v9 = vand.u32 4294901760, %v10053_v55 }
  0xcc   :  { %1685 = vmatpush.msrb.mxu0 %v10053_v55  ;;  %1778 = vmatpush.msrb.mxu2 %v15987_v7  ;;  %v456_v55 = vld [vmem:[#allocation9 + $0xb90] sm:$0xff] }
  0xcd   :  { %1723 = vmatpush.msrb.mxu1 %v9968_v30  ;;  %1833 = vmatpush.msrb.mxu3 %v9982_v23  ;;  %v481_v30 = vld [vmem:[#allocation9 + $0xc58] sm:$0xff] }
  0xce   :  { %1688 = vmatpush.msrb.mxu0 %v10065_v4  ;;  %1782 = vmatpush.msrb.mxu2 %v15988_v41  ;;  %v10261_v29 = vand.u32 4294901760, %v481_v30  ;;  %v416_v41 = vld [vmem:[#allocation9 + $0xa50] sm:$0xff] }
  0xcf   :  { %1725 = vmatpush.msrb.mxu1 %v9982_v23  ;;  %1835 = vmatpush.msrb.mxu3 %v9999_v18  ;;  %v476_v23 = vld [vmem:[#allocation9 + $0xc30] sm:$0xff] }
  0xd0   :  { %1691 = vmatpush.msrb.mxu0 %v10077_v0  ;;  %1786 = vmatpush.msrb.mxu2 %v15989_v9  ;;  %v10278_v63 = vsub.f32 %v481_v30, %v10261_v29  ;;  %v10304_v0 = vand.u32 4294901760, %v456_v55  ;;  %v10391_v9 = vand.u32 4294901760, %v491_v25  ;;  %v10397_v30 = vand.u32 4294901760, %v421_v24 }
  0xd1   :  { %1727 = vmatpush.msrb.mxu1 %v9999_v18  ;;  %1837 = vmatpush.msrb.mxu3 %v10015_v59  ;;  %v10268_v18 = vand.u32 4294901760, %v476_v23 }
  0xd2   :  { %1694 = vmatpush.msrb.mxu0 %v10090_v16  ;;  %1790 = vmatpush.msrb.mxu2 %v15990_v49  ;;  %v451_v16 = vld [vmem:[#allocation9 + $0xb68] sm:$0xff]  ;;  %15991 = vst [vmem:[#allocation27_spill] sm:$0xff] %v10391_v9 }
  0xd3   :  { %1729 = vmatpush.msrb.mxu1 %v10015_v59  ;;  %1839 = vmatpush.msrb.mxu3 %v10028_v8  ;;  %v471_v59 = vld [vmem:[#allocation9 + $0xc08] sm:$0xff] }
  0xd4   :  { %1697 = vmatpush.msrb.mxu0 %v10104_v40  ;;  %1794 = vmatpush.msrb.mxu2 %v1617_v15  ;;  %v10275_v1 = vand.u32 4294901760, %v471_v59 }
  0xd5   :  { %1731 = vmatpush.msrb.mxu1 %v10028_v8  ;;  %1841 = vmatpush.msrb.mxu3 %v10042_v26  ;;  %v466_v8 = vld [vmem:[#allocation9 + $0xbe0] sm:$0xff] }
  0xd6   :  { %1700 = vmatpush.msrb.mxu0 %v10117_v37  ;;  %1798 = vmatpush.msrb.mxu2 %v1623_v14  ;;  %v10285_v39 = vand.u32 4294901760, %v466_v8  ;;  %v10299_v4 = vsub.f32 %v471_v59, %v10275_v1  ;;  %v446_v37 = vld [vmem:[#allocation9 + $0xb40] sm:$0xff]  ;;  %v10401_v59 = vsub.f32 %v431_v34, %v10371_v27 }
  0xd7   :  { %1733 = vmatpush.msrb.mxu1 %v10042_v26  ;;  %1843 = vmatpush.msrb.mxu3 %v10055_v46  ;;  %v461_v26 = vld [vmem:[#allocation9 + $0xbb8] sm:$0xff]  ;;  %v10336_v33 = vand.u32 4294901760, %v446_v37  ;;  %v162_v34 = vld [vmem:[#allocation9 + $0x260] sm:$0xff] }
  0xd8   :  { %1703 = vmatpush.msrb.mxu0 %v10135_v44  ;;  %1802 = vmatpush.msrb.mxu2 %v1629_v47  ;;  %v10293_v40 = vand.u32 4294901760, %v461_v26  ;;  %v10310_v15 = vsub.f32 %v466_v8, %v10285_v39  ;;  %v10323_v47 = vand.u32 4294901760, %v451_v16  ;;  %v15706_v44 = vand.u32 4294901760, %v10299_v4 }
  0xd9   :  { %1735 = vmatpush.msrb.mxu1 %v10055_v46  ;;  %1845 = vmatpush.msrb.mxu3 %v10067_v58  ;;  %v10288_v46 = vsub.f32 %v476_v23, %v10268_v18  ;;  %v10363_v38 = vsub.f32 %v446_v37, %v10336_v33  ;;  %v10413_v37 = vsub.f32 %v426_v11, %v10383_v62 }
  0xda   :  { %1706 = vmatpush.msrb.mxu0 %v10148_v28  ;;  %1806 = vmatpush.msrb.mxu2 %v1635_v19  ;;  %v10316_v14 = vsub.f32 %v461_v26, %v10293_v40  ;;  %v10329_v19 = vsub.f32 %v456_v55, %v10304_v0  ;;  %v441_v28 = vld [vmem:[#allocation9 + $0xb18] sm:$0xff]  ;;  %v1917_v3 = vsub.f32 %v10299_v4, %v15706_v44  ;;  %v10409_v55 = vand.u32 4294901760, %v416_v41 }
  0xdb   :  { %1737 = vmatpush.msrb.mxu1 %v10067_v58  ;;  %1847 = vmatpush.msrb.mxu3 %v10079_v52  ;;  %v15710_v58 = vand.u32 4294901760, %v10278_v63  ;;  %v10350_v5 = vsub.f32 %v451_v16, %v10323_v47  ;;  %v15700_v60 = vand.u32 4294901760, %v10363_v38  ;;  %v15697_v16 = vand.u32 4294901760, %v10387_v57 }
  0xdc   :  { %1709 = vmatpush.msrb.mxu0 %v10162_v13  ;;  %1810 = vmatpush.msrb.mxu2 %v1641_v6  ;;  %v15705_v6 = vand.u32 4294901760, %v10310_v15  ;;  %v15704_v13 = vand.u32 4294901760, %v10316_v14  ;;  %v1918_v51 = vand.u32 4294901760, %v1917_v3  ;;  %v10426_v3 = vsub.f32 %v421_v24, %v10397_v30  ;;  %v157_v24 = vld [vmem:[#allocation9 + $0x238] sm:$0xff] }
  0xdd   :  { %1739 = vmatpush.msrb.mxu1 %v10079_v52  ;;  %1849 = vmatpush.msrb.mxu3 %v10092_v36  ;;  %v15708_v52 = vand.u32 4294901760, %v10288_v46  ;;  %v15701_v2 = vand.u32 4294901760, %v10350_v5  ;;  %v1947_v26 = vsub.f32 %v10363_v38, %v15700_v60  ;;  %v1959_v11 = vsub.f32 %v10387_v57, %v15697_v16 }
  0xde   :  { %1712 = vmatmul.f32.vlgmr.msrb.gmra.mxu0 %v10151_v10  ;;  %1814 = vmatpush.msrb.mxu2 %v1647_v53  ;;  %v10347_v53 = vand.u32 4294901760, %v441_v28  ;;  %v15699_v31 = vand.u32 4294901760, %v10413_v37  ;;  %v10464_v16 = vand.u32 4294901760, %v157_v24  ;;  %v117_v10 = vld [vmem:[#allocation9 + $0xf8] sm:$0xff] }
  0xdf   :  { %1862 = vmatpush.msra.mxu0 %v10261_v29  ;;  %1741 = vmatpush.msrb.mxu1 %v10092_v36  ;;  %v1905_v36 = vsub.f32 %v10278_v63, %v15710_v58  ;;  %v1941_v49 = vsub.f32 %v10350_v5, %v15701_v2  ;;  %v127_v58 = vld [vmem:[#allocation9 + $0x148] sm:$0xff] }
  0xe0   :  { %1851 = vmatpush.msrb.mxu3 %v10109_v43  ;;  %1818 = vmatpush.msrb.mxu2 %v1653_v61  ;;  %v1923_v61 = vsub.f32 %v10310_v15, %v15705_v6  ;;  %v10375_v21 = vsub.f32 %v441_v28, %v10347_v53  ;;  %v10418_v28 = vsub.f32 %v491_v25, %v10391_v9 }
  0xe1   :  { %1864 = vmatpush.msra.mxu0 %v10268_v18  ;;  %1743 = vmatpush.msrb.mxu1 %v10109_v43  ;;  %v1911_v43 = vsub.f32 %v10288_v46, %v15708_v52  ;;  %v1906_v48 = vand.u32 4294901760, %v1905_v36  ;;  %v411_v36 = vld [vmem:[#allocation9 + $0xa28] sm:$0xff]  ;;  %v10438_v25 = vsub.f32 %v416_v41, %v10409_v55 }
  0xe2   :  { %1853 = vmatpush.msrb.mxu3 %v10122_v35  ;;  %1820 = vmatmul.f32.vlgmr.msrb.gmra.mxu2 %v10124_v42  ;;  %v1924_v22 = vand.u32 4294901760, %v1923_v61  ;;  %v15698_v23 = vand.u32 4294901760, %v10375_v21  ;;  %15992 = vst [vmem:[#allocation33_spill] sm:$0xff] %v10418_v28  ;;  %v406_v61 = vld [vmem:[#allocation9 + $0xa00] sm:$0xff] }
  0xe3   :  { %1866 = vmatpush.msra.mxu0 %v10275_v1  ;;  %2005 = vmatpush.msra.mxu2 %v10278_v63  ;;  %v1912_v50 = vand.u32 4294901760, %v1911_v43  ;;  %v1942_v43 = vand.u32 4294901760, %v1941_v49  ;;  %v10451_v41 = vand.u32 4294901760, %v406_v61  ;;  %v15703_v49 = vand.u32 4294901760, %v10426_v3 }
  0xe4   :  { %1745 = vmatpush.msrb.mxu1 %v10122_v35  ;;  %1855 = vmatpush.msrb.mxu3 %v10137_v12  ;;  %v15702_v35 = vand.u32 4294901760, %v10329_v19  ;;  %v1953_v17 = vsub.f32 %v10375_v21, %v15698_v23  ;;  %v147_v23 = vld [vmem:[#allocation9 + $0x1e8] sm:$0xff] }
  0xe5   :  { %1857 = vmatmul.f32.vlgmr.msrb.gmra.mxu3 %v10124_v42  ;;  %1868 = vmatpush.msra.mxu0 %v10285_v39  ;;  %v10478_v60 = vsub.f32 %v406_v61, %v10451_v41 }
  0xe6   :  { %2008 = vmatpush.msra.mxu2 %v10288_v46  ;;  %2058 = vmatpush.msra.mxu3 %v10261_v29  ;;  %v1935_v54 = vsub.f32 %v10329_v19, %v15702_v35  ;;  %v142_v35 = vld [vmem:[#allocation9 + $0x1c0] sm:$0xff] }
  0xe7   :  { %1747 = vmatpush.msrb.mxu1 %v10137_v12  ;;  %1870 = vmatpush.msra.mxu0 %v10293_v40  ;;  %v1929_v12 = vsub.f32 %v10316_v14, %v15704_v13  ;;  %v10499_v44 = vand.u32 4294901760, %v142_v35 }
  0xe8   :  { %1751 = vmatmul.f32.vlgmr.msrb.gmra.mxu1 %v10173_v56  ;;  %2011 = vmatpush.msra.mxu2 %v10299_v4  ;;  %v1936_v8 = vand.u32 4294901760, %v1935_v54  ;;  %v10445_v54 = vand.u32 4294901760, %v162_v34  ;;  %v122_v56 = vld [vmem:[#allocation9 + $0x120] sm:$0xff] }
  0xe9   :  { %1907 = vmatpush.msra.mxu1 %v1906_v48  ;;  %2060 = vmatpush.msra.mxu3 %v10268_v18  ;;  %v1930_v7 = vand.u32 4294901760, %v1929_v12  ;;  %v15696_v48 = vand.u32 4294901760, %v10401_v59  ;;  %v1948_v12 = vand.u32 4294901760, %v1947_v26  ;;  %v152_v26 = vld [vmem:[#allocation9 + $0x210] sm:$0xff]  ;;  %v10559_v20 = vand.u32 4294901760, %v122_v56 }
  0xea   :  { %1872 = vmatpush.msra.mxu0 %v10304_v0  ;;  %2014 = vmatpush.msra.mxu2 %v10310_v15  ;;  %v10480_v2 = vand.u32 4294901760, %v152_v26 }
  0xeb   :  { %1913 = vmatpush.msra.mxu1 %v1912_v50  ;;  %2062 = vmatpush.msra.mxu3 %v10275_v1  ;;  %v10430_v50 = vand.u32 4294901760, %v411_v36 }
  0xec   :  { %1874 = vmatpush.msra.mxu0 %v10323_v47  ;;  %2017 = vmatpush.msra.mxu2 %v10316_v14 }
  0xed   :  { %1919 = vmatpush.msra.mxu1 %v1918_v51  ;;  %2064 = vmatpush.msra.mxu3 %v10285_v39  ;;  %v10443_v51 = vand.u32 4294901760, %v10418_v28 }
  0xee   :  { %1876 = vmatpush.msra.mxu0 %v10336_v33  ;;  %2020 = vmatpush.msra.mxu2 %v10329_v19 }
  0xef   :  { %1925 = vmatpush.msra.mxu1 %v1924_v22  ;;  %2066 = vmatpush.msra.mxu3 %v10293_v40  ;;  %15993 = vst [vmem:[#allocation34_spill] sm:$0xff] %v10443_v51  ;;  %v1954_v22 = vand.u32 4294901760, %v1953_v17  ;;  %v1971_v17 = vsub.f32 %v10413_v37, %v15699_v31  ;;  %v1977_v31 = vsub.f32 %v10426_v3, %v15703_v49 }
  0xf0   :  { %1878 = vmatpush.msra.mxu0 %v10347_v53  ;;  %2023 = vmatpush.msra.mxu2 %v10350_v5  ;;  %v10492_v49 = vsub.f32 %v157_v24, %v10464_v16  ;;  %v10504_v24 = vsub.f32 %v152_v26, %v10480_v2 }
  0xf1   :  { %1931 = vmatpush.msra.mxu1 %v1930_v7  ;;  %2068 = vmatpush.msra.mxu3 %v10304_v0  ;;  %v1965_v7 = vsub.f32 %v10401_v59, %v15696_v48  ;;  %v15707_v48 = vand.u32 4294901760, %v10438_v25 }
  0xf2   :  { %1880 = vmatpush.msra.mxu0 %v10360_v32  ;;  %2026 = vmatpush.msra.mxu2 %v10363_v38 }
  0xf3   :  { %1937 = vmatpush.msra.mxu1 %v1936_v8  ;;  %2070 = vmatpush.msra.mxu3 %v10323_v47  ;;  %v10457_v8 = vsub.f32 %v411_v36, %v10430_v50  ;;  %v1896_v36 = vsub.f32 %v10418_v28, %v10443_v51  ;;  %v1983_v61 = vsub.f32 %v10438_v25, %v15707_v48 }
  0xf4   :  { %1882 = vmatpush.msra.mxu0 %v10371_v27  ;;  %2029 = vmatpush.msra.mxu2 %v10375_v21 }
  0xf5   :  { %1943 = vmatpush.msra.mxu1 %v1942_v43  ;;  %2072 = vmatpush.msra.mxu3 %v10336_v33  ;;  %v1960_v43 = vand.u32 4294901760, %v1959_v11  ;;  %v1966_v11 = vand.u32 4294901760, %v1965_v7  ;;  %v1972_v7 = vand.u32 4294901760, %v1971_v17  ;;  %v10496_v13 = vand.u32 4294901760, %v1896_v36 }
  0xf6   :  { %1884 = vmatpush.msra.mxu0 %v10383_v62  ;;  %2032 = vmatpush.msra.mxu2 %v10387_v57  ;;  %v1978_v17 = vand.u32 4294901760, %v1977_v31  ;;  %v1984_v31 = vand.u32 4294901760, %v1983_v61  ;;  %v15996_v61 = vand.u32 4294901760, %v10478_v60 }
  0xf7   :  { %1949 = vmatpush.msra.mxu1 %v1948_v12  ;;  %2074 = vmatpush.msra.mxu3 %v10347_v53  ;;  %v10471_v12 = vsub.f32 %v162_v34, %v10445_v54  ;;  %v15709_v34 = vand.u32 4294901760, %v10457_v8  ;;  %15994 = vst [vmem:[#allocation35_spill] sm:$0xff] %v10496_v13 }
  0xf8   :  { %1886 = vmatpush.msra.mxu0 %v10397_v30  ;;  %2035 = vmatpush.msra.mxu2 %v10401_v59  ;;  %v1995_v48 = vsub.f32 %v10478_v60, %v15996_v61 }
  0xf9   :  { %1955 = vmatpush.msra.mxu1 %v1954_v22  ;;  %2076 = vmatpush.msra.mxu3 %v10360_v32  ;;  %v10485_v22 = vand.u32 4294901760, %v147_v23  ;;  %v15715_v6 = vand.u32 4294901760, %v10471_v12  ;;  %v1989_v36 = vsub.f32 %v10457_v8, %v15709_v34 }
  0xfa   :  { %1888 = vmatpush.msra.mxu0 %v10409_v55  ;;  %2038 = vmatpush.msra.mxu2 %v10413_v37 }
  0xfb   :  { %1961 = vmatpush.msra.mxu1 %v1960_v43  ;;  %2078 = vmatpush.msra.mxu3 %v10371_v27  ;;  %v137_v43 = vld [vmem:[#allocation9 + $0x198] sm:$0xff]  ;;  %v10512_v52 = vsub.f32 %v147_v23, %v10485_v22  ;;  %v2246_v34 = vsub.f32 %v10471_v12, %v15715_v6  ;;  %v10524_v23 = vsub.f32 %v142_v35, %v10499_v44  ;;  %v1990_v6 = vand.u32 4294901760, %v1989_v36 }
  0xfc   :  { %1890 = vmatpush.msra.mxu0 %v10430_v50  ;;  %2041 = vmatpush.msra.mxu2 %v10426_v3  ;;  %v10516_v26 = vand.u32 4294901760, %v137_v43 }
  0xfd   :  { %1967 = vmatpush.msra.mxu1 %v1966_v11  ;;  %2080 = vmatpush.msra.mxu3 %v10383_v62  ;;  %v132_v11 = vld [vmem:[#allocation9 + $0x170] sm:$0xff]  ;;  %v2247_v36 = vand.u32 4294901760, %v2246_v34  ;;  %v16001_v34 = vand.u32 4294901760, %v10512_v52 }
  0xfe   :  { %1892 = vmatpush.msra.mxu0 %v10451_v41  ;;  %2044 = vmatpush.msra.mxu2 %v10438_v25  ;;  %v10532_v42 = vand.u32 4294901760, %v132_v11  ;;  %v10543_v61 = vsub.f32 %v137_v43, %v10516_v26 }
  0xff   :  { %1973 = vmatpush.msra.mxu1 %v1972_v7  ;;  %2082 = vmatpush.msra.mxu3 %v10397_v30  ;;  %v15995_v7 = vand.u32 4294901760, %v10278_v63  ;;  %v15997_v63 = vand.u32 4294901760, %v10288_v46  ;;  %v15999_v46 = vand.u32 4294901760, %v10299_v4  ;;  %v2264_v4 = vsub.f32 %v10512_v52, %v16001_v34 }
 0x100   :  { %1898 = vmatmul.f32.vlgmr.msra.gmra.mxu0 %v10496_v13  ;;  %2047 = vmatpush.msra.mxu2 %v10457_v8  ;;  %v10545_v13 = vand.u32 4294901760, %v127_v58 }
 0x101   :  { %2099 = vmatpush.msrb.mxu0 %v15995_v7  ;;  %1979 = vmatpush.msra.mxu1 %v1978_v17  ;;  %v15998_v17 = vand.u32 4294901760, %v10492_v49 }
 0x102   :  { %2084 = vmatpush.msra.mxu3 %v10409_v55  ;;  %2050 = vmatpush.msra.mxu2 %v10478_v60 }
 0x103   :  { %2103 = vmatpush.msrb.mxu0 %v15997_v63  ;;  %1985 = vmatpush.msra.mxu1 %v1984_v31  ;;  %v2252_v7 = vsub.f32 %v10492_v49, %v15998_v17  ;;  %v1996_v31 = vand.u32 4294901760, %v1995_v48  ;;  %v16000_v63 = vand.u32 4294901760, %v10504_v24  ;;  %v10557_v17 = vsub.f32 %v132_v11, %v10532_v42 }
 0x104   :  { %2086 = vmatpush.msra.mxu3 %v10430_v50  ;;  %2053 = vmatmul.f32.vlgmr.msra.gmra.mxu2 %v10418_v28  ;;  %v16002_v48 = vand.u32 4294901760, %v10310_v15  ;;  %v10570_v11 = vsub.f32 %v127_v58, %v10545_v13  ;;  %v10572_v28 = vand.u32 4294901760, %v117_v10  ;;  %v16004_v15 = vand.u32 4294901760, %v10316_v14 }
 0x105   :  { %2107 = vmatpush.msrb.mxu0 %v15999_v46  ;;  %2203 = vmatpush.msrb.mxu2 %v10445_v54  ;;  %v2258_v43 = vsub.f32 %v10504_v24, %v16000_v63  ;;  %v112_v46 = vld [vmem:[#allocation9 + $0xd0] sm:$0xff]  ;;  %v2253_v35 = vand.u32 4294901760, %v2252_v7  ;;  %v10582_v58 = vsub.f32 %v122_v56, %v10559_v20  ;;  %v16005_v14 = vand.u32 4294901760, %v10543_v61 }
 0x106   :  { %1991 = vmatpush.msra.mxu1 %v1990_v6  ;;  %2088 = vmatpush.msra.mxu3 %v10451_v41  ;;  %v16003_v6 = vand.u32 4294901760, %v10524_v23  ;;  %v10584_v63 = vand.u32 4294901760, %v112_v46  ;;  %v10594_v56 = vsub.f32 %v117_v10, %v10572_v28 }
 0x107   :  { %2092 = vmatmul.f32.vlgmr.msra.gmra.mxu3 %v10443_v51  ;;  %2111 = vmatpush.msrb.mxu0 %v16002_v48  ;;  %v2259_v7 = vand.u32 4294901760, %v2258_v43  ;;  %v15728_v48 = vand.u32 4294901760, %v10557_v17  ;;  %v102_v51 = vld [vmem:[#allocation9 + $0x80] sm:$0xff]  ;;  %v97_v43 = vld [vmem:[#allocation9 + $0x58] sm:$0xff] }
 0x108   :  { %2205 = vmatpush.msrb.mxu2 %v10464_v16  ;;  %2248 = vmatpush.msrb.mxu3 %v2247_v36  ;;  %v2270_v34 = vsub.f32 %v10524_v23, %v16003_v6  ;;  %v2265_v36 = vand.u32 4294901760, %v2264_v4  ;;  %v10596_v6 = vand.u32 4294901760, %v107_v45  ;;  %v10607_v10 = vsub.f32 %v112_v46, %v10584_v63 }
 0x109   :  { %1997 = vmatpush.msra.mxu1 %v1996_v31  ;;  %2115 = vmatpush.msrb.mxu0 %v16004_v15  ;;  %v2276_v31 = vsub.f32 %v10543_v61, %v16005_v14  ;;  %v16006_v15 = vand.u32 4294901760, %v10329_v19  ;;  %v10609_v14 = vand.u32 4294901760, %v102_v51  ;;  %v16007_v19 = vand.u32 4294901760, %v10350_v5 }
 0x10a   :  { %1999 = vmatmul.f32.vlgmr.msra.gmra.mxu1 %v10391_v9  ;;  %2207 = vmatpush.msrb.mxu2 %v10480_v2  ;;  %v2271_v4 = vand.u32 4294901760, %v2270_v34  ;;  %v16008_v34 = vand.u32 4294901760, %v10570_v11  ;;  %v10620_v46 = vsub.f32 %v107_v45, %v10596_v6  ;;  %v10625_v5 = vand.u32 4294901760, %v97_v43 }
 0x10b   :  { %2166 = vmatpush.msrb.mxu1 %v10261_v29  ;;  %2254 = vmatpush.msrb.mxu3 %v2253_v35  ;;  %v2282_v29 = vsub.f32 %v10557_v17, %v15728_v48  ;;  %v92_v48 = vld [vmem:[#allocation9 + $0x30] sm:$0xff]  ;;  %v16009_v35 = vand.u32 4294901760, %v10363_v38  ;;  %v10633_v45 = vsub.f32 %v102_v51, %v10609_v14  ;;  %v16011_v38 = vand.u32 4294901760, %v10375_v21 }
 0x10c   :  { %2119 = vmatpush.msrb.mxu0 %v16006_v15  ;;  %2209 = vmatpush.msrb.mxu2 %v10485_v22  ;;  %v2299_v15 = vand.u32 4294901760, %v10594_v56  ;;  %v16012_v51 = vand.u32 4294901760, %v10387_v57  ;;  %v10649_v21 = vsub.f32 %v97_v43, %v10625_v5  ;;  %v16013_v57 = vand.u32 4294901760, %v10401_v59 }
 0x10d   :  { %2168 = vmatpush.msrb.mxu1 %v10268_v18  ;;  %2260 = vmatpush.msrb.mxu3 %v2259_v7  ;;  %v2277_v18 = vand.u32 4294901760, %v2276_v31  ;;  %v2288_v7 = vsub.f32 %v10570_v11, %v16008_v34  ;;  %v87_v34 = vld [vmem:[#allocation9 + $0x8] sm:$0xff] }
 0x10e   :  { %2123 = vmatpush.msrb.mxu0 %v16007_v19  ;;  %2211 = vmatpush.msrb.mxu2 %v10499_v44  ;;  %v2305_v19 = vand.u32 4294901760, %v10607_v10  ;;  %v2323_v59 = vand.u32 4294901760, %v10649_v21 }
 0x10f   :  { %2170 = vmatpush.msrb.mxu1 %v10275_v1  ;;  %2266 = vmatpush.msrb.mxu3 %v2265_v36  ;;  %v2283_v1 = vand.u32 4294901760, %v2282_v29  ;;  %v16010_v36 = vand.u32 4294901760, %v10582_v58  ;;  %v2311_v29 = vand.u32 4294901760, %v10620_v46 }
 0x110   :  { %2127 = vmatpush.msrb.mxu0 %v16009_v35  ;;  %2213 = vmatpush.msrb.mxu2 %v10516_v26  ;;  %v10638_v35 = vand.u32 4294901760, %v92_v48 }
 0x111   :  { %2172 = vmatpush.msrb.mxu1 %v10285_v39  ;;  %2272 = vmatpush.msrb.mxu3 %v2271_v4  ;;  %v2294_v31 = vsub.f32 %v10582_v58, %v16010_v36  ;;  %v2289_v39 = vand.u32 4294901760, %v2288_v7  ;;  %v2300_v4 = vsub.f32 %v10594_v56, %v2299_v15  ;;  %v10651_v36 = vand.u32 4294901760, %v87_v34 }
 0x112   :  { %2131 = vmatpush.msrb.mxu0 %v16011_v38  ;;  %2215 = vmatpush.msrb.mxu2 %v10532_v42  ;;  %v2317_v7 = vand.u32 4294901760, %v10633_v45  ;;  %v10662_v43 = vsub.f32 %v92_v48, %v10638_v35 }
 0x113   :  { %2174 = vmatpush.msrb.mxu1 %v10293_v40  ;;  %2278 = vmatpush.msrb.mxu3 %v2277_v18  ;;  %v2295_v40 = vand.u32 4294901760, %v2294_v31  ;;  %v2306_v18 = vsub.f32 %v10607_v10, %v2305_v19  ;;  %v16014_v31 = vand.u32 4294901760, %v10413_v37  ;;  %v10673_v38 = vsub.f32 %v87_v34, %v10651_v36 }
 0x114   :  { %2135 = vmatpush.msrb.mxu0 %v16012_v51  ;;  %2217 = vmatpush.msrb.mxu2 %v10545_v13  ;;  %v2318_v48 = vsub.f32 %v10633_v45, %v2317_v7  ;;  %v2329_v37 = vand.u32 4294901760, %v10662_v43 }
 0x115   :  { %2176 = vmatpush.msrb.mxu1 %v10304_v0  ;;  %2284 = vmatpush.msrb.mxu3 %v2283_v1  ;;  %v2301_v0 = vand.u32 4294901760, %v2300_v4  ;;  %v2312_v1 = vsub.f32 %v10620_v46, %v2311_v29  ;;  %v16016_v4 = vand.u32 4294901760, %v10438_v25  ;;  %v16018_v25 = vand.u32 4294901760, %v10478_v60 }
 0x116   :  { %2139 = vmatpush.msrb.mxu0 %v16013_v57  ;;  %2219 = vmatpush.msrb.mxu2 %v10559_v20  ;;  %v2319_v51 = vand.u32 4294901760, %v2318_v48  ;;  %v16020_v60 = vand.u32 4294901760, %v10492_v49  ;;  %v192_v48 = vld [vmem:[#allocation9 + $0x350] sm:$0xff] }
 0x117   :  { %2178 = vmatpush.msrb.mxu1 %v10323_v47  ;;  %2290 = vmatpush.msrb.mxu3 %v2289_v39  ;;  %v2307_v47 = vand.u32 4294901760, %v2306_v18  ;;  %v16015_v39 = vand.u32 4294901760, %v10426_v3  ;;  %v2313_v34 = vand.u32 4294901760, %v2312_v1  ;;  %v2335_v3 = vand.u32 4294901760, %v10673_v38  ;;  %v197_v1 = vld [vmem:[#allocation9 + $0x378] sm:$0xff] }
 0x118   :  { %2143 = vmatpush.msrb.mxu0 %v16014_v31  ;;  %2221 = vmatpush.msrb.mxu2 %v10572_v28 }
 0x119   :  { %2180 = vmatpush.msrb.mxu1 %v10336_v33  ;;  %2296 = vmatpush.msrb.mxu3 %v2295_v40  ;;  %v2324_v33 = vsub.f32 %v10649_v21, %v2323_v59  ;;  %v16017_v40 = vand.u32 4294901760, %v10457_v8  ;;  %v2336_v8 = vsub.f32 %v10673_v38, %v2335_v3 }
 0x11a   :  { %2147 = vmatpush.msrb.mxu0 %v16015_v39  ;;  %2223 = vmatpush.msrb.mxu2 %v10584_v63 }
 0x11b   :  { %2182 = vmatpush.msrb.mxu1 %v10347_v53  ;;  %2302 = vmatpush.msrb.mxu3 %v2301_v0  ;;  %v2330_v53 = vsub.f32 %v10662_v43, %v2329_v37 }
 0x11c   :  { %2151 = vmatpush.msrb.mxu0 %v16016_v4  ;;  %2225 = vmatpush.msrb.mxu2 %v10596_v6 }
 0x11d   :  { %2184 = vmatpush.msrb.mxu1 %v10360_v32  ;;  %2308 = vmatpush.msrb.mxu3 %v2307_v47  ;;  %v2325_v32 = vand.u32 4294901760, %v2324_v33  ;;  %v2331_v18 = vand.u32 4294901760, %v2330_v53 }
 0x11e   :  { %2155 = vmatpush.msrb.mxu0 %v16017_v40  ;;  %2227 = vmatpush.msrb.mxu2 %v10609_v14  ;;  %v10869_v40 = vand.u32 4294901760, %v192_v48 }
 0x11f   :  { %2186 = vmatpush.msrb.mxu1 %v10371_v27  ;;  %2314 = vmatpush.msrb.mxu3 %v2313_v34  ;;  %v2337_v27 = vand.u32 4294901760, %v2336_v8 }
 0x120   :  { %2159 = vmatpush.msrb.mxu0 %v16018_v25  ;;  %2229 = vmatpush.msrb.mxu2 %v10625_v5 }
 0x121   :  { %2188 = vmatpush.msrb.mxu1 %v10383_v62  ;;  %2320 = vmatpush.msrb.mxu3 %v2319_v51  ;;  %v16019_v62 = vand.u32 4294901760, %v10471_v12 }
 0x122   :  { %2161 = vmatmul.f32.vlgmr.msrb.gmra.mxu0 %v10391_v9  ;;  %2231 = vmatpush.msrb.mxu2 %v10638_v35 }
 0x123   :  { %2346 = vmatpush.msra.mxu0 %v10471_v12  ;;  %2190 = vmatpush.msrb.mxu1 %v10397_v30  ;;  %v16021_v30 = vand.u32 4294901760, %v10504_v24  ;;  %v232_v12 = vld [vmem:[#allocation9 + $0x490] sm:$0xff] }
 0x124   :  { %2326 = vmatpush.msrb.mxu3 %v2325_v32  ;;  %2233 = vmatpush.msrb.mxu2 %v10651_v36  ;;  %v182_v32 = vld [vmem:[#allocation9 + $0x300] sm:$0xff] }
 0x125   :  { %2349 = vmatpush.msra.mxu0 %v10492_v49  ;;  %2192 = vmatpush.msrb.mxu1 %v10409_v55  ;;  %v16022_v55 = vand.u32 4294901760, %v10512_v52  ;;  %v237_v49 = vld [vmem:[#allocation9 + $0x4b8] sm:$0xff] }
 0x126   :  { %2332 = vmatpush.msrb.mxu3 %v2331_v18  ;;  %2440 = vmatpush.msra.mxu2 %v16019_v62 }
 0x127   :  { %2352 = vmatpush.msra.mxu0 %v10504_v24  ;;  %2194 = vmatpush.msrb.mxu1 %v10430_v50  ;;  %v16023_v50 = vand.u32 4294901760, %v10524_v23  ;;  %v227_v24 = vld [vmem:[#allocation9 + $0x468] sm:$0xff] }
 0x128   :  { %2338 = vmatpush.msrb.mxu3 %v2337_v27  ;;  %2444 = vmatpush.msra.mxu2 %v16020_v60 }
 0x129   :  { %2355 = vmatpush.msra.mxu0 %v10512_v52  ;;  %2196 = vmatpush.msrb.mxu1 %v10451_v41  ;;  %v16025_v52 = vand.u32 4294901760, %v10557_v17  ;;  %v16027_v41 = vand.u32 4294901760, %v10582_v58 }
 0x12a   :  { %2507 = vmatpush.msra.mxu3 %v10445_v54  ;;  %2448 = vmatpush.msra.mxu2 %v16021_v30 }
 0x12b   :  { %2198 = vmatmul.f32.vlgmr.msrb.gmra.mxu1 %v10391_v9  ;;  %2358 = vmatpush.msra.mxu0 %v10524_v23  ;;  %v10780_v23 = vand.u32 4294901760, %v227_v24 }
 0x12c   :  { %2399 = vmatpush.msra.mxu1 %v10445_v54  ;;  %2509 = vmatpush.msra.mxu3 %v10464_v16  ;;  %v16024_v54 = vand.u32 4294901760, %v10543_v61 }
 0x12d   :  { %2361 = vmatpush.msra.mxu0 %v10543_v61  ;;  %2452 = vmatpush.msra.mxu2 %v16022_v55  ;;  %v10893_v55 = vand.u32 4294901760, %v182_v32 }
 0x12e   :  { %2401 = vmatpush.msra.mxu1 %v10464_v16  ;;  %2511 = vmatpush.msra.mxu3 %v10480_v2  ;;  %v242_v16 = vld [vmem:[#allocation9 + $0x4e0] sm:$0xff] }
 0x12f   :  { %2364 = vmatpush.msra.mxu0 %v10557_v17  ;;  %2456 = vmatpush.msra.mxu2 %v16023_v50  ;;  %v217_v17 = vld [vmem:[#allocation9 + $0x418] sm:$0xff] }
 0x130   :  { %2403 = vmatpush.msra.mxu1 %v10480_v2  ;;  %2513 = vmatpush.msra.mxu3 %v10485_v22  ;;  %v16026_v2 = vand.u32 4294901760, %v10570_v11 }
 0x131   :  { %2367 = vmatpush.msra.mxu0 %v10570_v11  ;;  %2460 = vmatpush.msra.mxu2 %v16024_v54  ;;  %v10897_v54 = vsub.f32 %v192_v48, %v10869_v40 }
 0x132   :  { %2405 = vmatpush.msra.mxu1 %v10485_v22  ;;  %2515 = vmatpush.msra.mxu3 %v10499_v44  ;;  %v10765_v22 = vand.u32 4294901760, %v237_v49 }
 0x133   :  { %2370 = vmatpush.msra.mxu0 %v10582_v58  ;;  %2464 = vmatpush.msra.mxu2 %v16025_v52  ;;  %v10802_v58 = vsub.f32 %v227_v24, %v10780_v23  ;;  %v177_v52 = vld [vmem:[#allocation9 + $0x2d8] sm:$0xff]  ;;  %v172_v24 = vld [vmem:[#allocation9 + $0x2b0] sm:$0xff] }
 0x134   :  { %2407 = vmatpush.msra.mxu1 %v10499_v44  ;;  %2517 = vmatpush.msra.mxu3 %v10516_v26  ;;  %v10758_v44 = vand.u32 4294901760, %v242_v16 }
 0x135   :  { %2373 = vmatpush.msra.mxu0 %v10594_v56  ;;  %2468 = vmatpush.msra.mxu2 %v16026_v2  ;;  %v212_v56 = vld [vmem:[#allocation9 + $0x3f0] sm:$0xff] }
 0x136   :  { %2409 = vmatpush.msra.mxu1 %v10516_v26  ;;  %2519 = vmatpush.msra.mxu3 %v10532_v42  ;;  %v10775_v26 = vsub.f32 %v242_v16, %v10758_v44 }
 0x137   :  { %2376 = vmatpush.msra.mxu0 %v10607_v10  ;;  %2472 = vmatpush.msra.mxu2 %v16027_v41 }
 0x138   :  { %2411 = vmatpush.msra.mxu1 %v10532_v42  ;;  %2521 = vmatpush.msra.mxu3 %v10545_v13  ;;  %v10772_v42 = vand.u32 4294901760, %v232_v12  ;;  %v2586_v11 = vand.u32 4294901760, %v10775_v26 }
 0x139   :  { %2379 = vmatpush.msra.mxu0 %v10620_v46  ;;  %2476 = vmatpush.msra.mxu2 %v2299_v15  ;;  %v207_v46 = vld [vmem:[#allocation9 + $0x3c8] sm:$0xff] }
 0x13a   :  { %2413 = vmatpush.msra.mxu1 %v10545_v13  ;;  %2523 = vmatpush.msra.mxu3 %v10559_v20  ;;  %v222_v13 = vld [vmem:[#allocation9 + $0x440] sm:$0xff] }
 0x13b   :  { %2382 = vmatpush.msra.mxu0 %v10633_v45  ;;  %2480 = vmatpush.msra.mxu2 %v2305_v19  ;;  %v10790_v61 = vand.u32 4294901760, %v222_v13  ;;  %v10820_v19 = vand.u32 4294901760, %v212_v56 }
 0x13c   :  { %2415 = vmatpush.msra.mxu1 %v10559_v20  ;;  %2525 = vmatpush.msra.mxu3 %v10572_v28  ;;  %v10785_v20 = vsub.f32 %v237_v49, %v10765_v22 }
 0x13d   :  { %2385 = vmatpush.msra.mxu0 %v10649_v21  ;;  %2484 = vmatpush.msra.mxu2 %v2311_v29  ;;  %v10813_v15 = vsub.f32 %v222_v13, %v10790_v61  ;;  %v2604_v29 = vand.u32 4294901760, %v10802_v58  ;;  %v202_v21 = vld [vmem:[#allocation9 + $0x3a0] sm:$0xff] }
 0x13e   :  { %2417 = vmatpush.msra.mxu1 %v10572_v28  ;;  %2527 = vmatpush.msra.mxu3 %v10584_v63  ;;  %v10796_v28 = vsub.f32 %v232_v12, %v10772_v42  ;;  %v2592_v10 = vand.u32 4294901760, %v10785_v20  ;;  %v10911_v12 = vand.u32 4294901760, %v177_v52 }
 0x13f   :  { %2388 = vmatpush.msra.mxu0 %v10662_v43  ;;  %2488 = vmatpush.msra.mxu2 %v2317_v7  ;;  %v10832_v7 = vand.u32 4294901760, %v207_v46  ;;  %v16028_v43 = vld [vmem:[#allocation22_spill] sm:$0xff]  ;;  %v15742_v0 = vand.u32 4294901760, %v10813_v15  ;;  %v2605_v47 = vsub.f32 %v10802_v58, %v2604_v29 }
 0x140   :  { %2419 = vmatpush.msra.mxu1 %v10584_v63  ;;  %2529 = vmatpush.msra.mxu3 %v10596_v6  ;;  %v10806_v63 = vand.u32 4294901760, %v217_v17  ;;  %v2598_v45 = vand.u32 4294901760, %v10796_v28 }
 0x141   :  { %2391 = vmatpush.msra.mxu0 %v10673_v38  ;;  %2492 = vmatpush.msra.mxu2 %v2323_v59  ;;  %v10845_v59 = vand.u32 4294901760, %v202_v21  ;;  %v10848_v38 = vsub.f32 %v212_v56, %v10820_v19  ;;  %v10861_v4 = vsub.f32 %v207_v46, %v10832_v7  ;;  %v2611_v33 = vsub.f32 %v10813_v15, %v15742_v0 }
 0x142   :  { %2421 = vmatpush.msra.mxu1 %v10596_v6  ;;  %2531 = vmatpush.msra.mxu3 %v10609_v14  ;;  %v2587_v6 = vsub.f32 %v10775_v26, %v2586_v11  ;;  %v10835_v57 = vsub.f32 %v217_v17, %v10806_v63  ;;  %v2599_v31 = vsub.f32 %v10796_v28, %v2598_v45  ;;  %v15731_v56 = vand.u32 4294901760, %v10897_v54 }
 0x143   :  { %2544 = vmatpush.msrb.mxu0 %v10758_v44  ;;  %2496 = vmatpush.msra.mxu2 %v2329_v37  ;;  %v10857_v37 = vand.u32 4294901760, %v197_v1  ;;  %v15737_v53 = vand.u32 4294901760, %v10848_v38  ;;  %v10873_v25 = vsub.f32 %v202_v21, %v10845_v59  ;;  %v15735_v27 = vand.u32 4294901760, %v10861_v4 }
 0x144   :  { %2423 = vmatpush.msra.mxu1 %v10609_v14  ;;  %2533 = vmatpush.msra.mxu3 %v10625_v5  ;;  %v2593_v14 = vsub.f32 %v10785_v20, %v2592_v10  ;;  %v15740_v34 = vand.u32 4294901760, %v10835_v57  ;;  %v2600_v51 = vand.u32 4294901760, %v2599_v31  ;;  %v2612_v60 = vand.u32 4294901760, %v2611_v33  ;;  %v322_v31 = vld [vmem:[#allocation9 + $0x760] sm:$0xff] }
 0x145   :  { %2546 = vmatpush.msrb.mxu0 %v10765_v22  ;;  %2500 = vmatpush.msra.mxu2 %v2335_v3  ;;  %v187_v3 = vld [vmem:[#allocation9 + $0x328] sm:$0xff]  ;;  %v10885_v62 = vsub.f32 %v197_v1, %v10857_v37  ;;  %v2623_v30 = vsub.f32 %v10848_v38, %v15737_v53  ;;  %v15734_v50 = vand.u32 4294901760, %v10873_v25  ;;  %v2629_v16 = vsub.f32 %v10861_v4, %v15735_v27  ;;  %v16030_v27 = vld [vmem:[#allocation19_spill] sm:$0xff] }
 0x146   :  { %2425 = vmatpush.msra.mxu1 %v10625_v5  ;;  %2535 = vmatpush.msra.mxu3 %v10638_v35  ;;  %v2588_v5 = vand.u32 4294901760, %v2587_v6  ;;  %v2594_v39 = vand.u32 4294901760, %v2593_v14  ;;  %v2617_v8 = vsub.f32 %v10835_v57, %v15740_v34  ;;  %v10881_v18 = vand.u32 4294901760, %v187_v3  ;;  %v167_v1 = vld [vmem:[#allocation9 + $0x288] sm:$0xff]  ;;  %v282_v34 = vld [vmem:[#allocation9 + $0x620] sm:$0xff] }
 0x147   :  { %2239 = vmatmul.f32.vlgmr.msrb.gmra.mxu2 %v16028_v43  ;;  %2548 = vmatpush.msrb.mxu0 %v10772_v42  ;;  %v15733_v41 = vand.u32 4294901760, %v10885_v62  ;;  %v2624_v13 = vand.u32 4294901760, %v2623_v30  ;;  %v2635_v17 = vsub.f32 %v10873_v25, %v15734_v50  ;;  %v10919_v46 = vsub.f32 %v182_v32, %v10893_v55  ;;  %v247_v43 = vld [vmem:[#allocation9 + $0x508] sm:$0xff] }
 0x148   :  { %2687 = vmatpush.msrb.mxu2 %v10775_v26  ;;  %2427 = vmatpush.msra.mxu1 %v10638_v35  ;;  %v16029_v35 = vld [vmem:[#allocation18_spill] sm:$0xff]  ;;  %v2618_v2 = vand.u32 4294901760, %v2617_v8  ;;  %v10907_v49 = vsub.f32 %v187_v3, %v10881_v18  ;;  %v2630_v6 = vand.u32 4294901760, %v2629_v16  ;;  %v10927_v14 = vand.u32 4294901760, %v172_v24 }
 0x149   :  { %2537 = vmatpush.msra.mxu3 %v10651_v36  ;;  %2550 = vmatpush.msrb.mxu0 %v10780_v23  ;;  %v2641_v21 = vsub.f32 %v10885_v62, %v15733_v41  ;;  %v2636_v48 = vand.u32 4294901760, %v2635_v17  ;;  %v15729_v33 = vand.u32 4294901760, %v10919_v46  ;;  %v317_v3 = vld [vmem:[#allocation9 + $0x738] sm:$0xff] }
 0x14a   :  { %2340 = vmatmul.f32.vlgmr.msrb.gmra.mxu3 %v16029_v35  ;;  %2690 = vmatpush.msrb.mxu2 %v10785_v20 }
 0x14b   :  { %2740 = vmatpush.msrb.mxu3 %v10758_v44  ;;  %2429 = vmatpush.msra.mxu1 %v10651_v36  ;;  %v2606_v36 = vand.u32 4294901760, %v2605_v47  ;;  %v10933_v47 = vsub.f32 %v177_v52, %v10911_v12  ;;  %v2642_v32 = vand.u32 4294901760, %v2641_v21  ;;  %v10956_v52 = vand.u32 4294901760, %v317_v3 }
 0x14c   :  { %2552 = vmatpush.msrb.mxu0 %v10790_v61  ;;  %2693 = vmatpush.msrb.mxu2 %v10796_v28  ;;  %v16031_v28 = vld [vmem:[#allocation20_spill] sm:$0xff] }
 0x14d   :  { %2589 = vmatpush.msrb.mxu1 %v2588_v5  ;;  %2742 = vmatpush.msrb.mxu3 %v10765_v22  ;;  %v15730_v5 = vand.u32 4294901760, %v10907_v49  ;;  %v15732_v30 = vand.u32 4294901760, %v10933_v47 }
 0x14e   :  { %2554 = vmatpush.msrb.mxu0 %v10806_v63  ;;  %2696 = vmatpush.msrb.mxu2 %v10802_v58 }
 0x14f   :  { %2595 = vmatpush.msrb.mxu1 %v2594_v39  ;;  %2744 = vmatpush.msrb.mxu3 %v10772_v42  ;;  %v2647_v39 = vsub.f32 %v10897_v54, %v15731_v56  ;;  %v2653_v8 = vsub.f32 %v10907_v49, %v15730_v5 }
 0x150   :  { %2556 = vmatpush.msrb.mxu0 %v10820_v19  ;;  %2699 = vmatpush.msrb.mxu2 %v10813_v15 }
 0x151   :  { %2601 = vmatpush.msrb.mxu1 %v2600_v51  ;;  %2746 = vmatpush.msrb.mxu3 %v10780_v23  ;;  %v10942_v51 = vand.u32 4294901760, %v167_v1  ;;  %v2648_v16 = vand.u32 4294901760, %v2647_v39  ;;  %v2654_v21 = vand.u32 4294901760, %v2653_v8 }
 0x152   :  { %2558 = vmatpush.msrb.mxu0 %v10832_v7  ;;  %2702 = vmatpush.msrb.mxu2 %v10835_v57 }
 0x153   :  { %2607 = vmatpush.msrb.mxu1 %v2606_v36  ;;  %2748 = vmatpush.msrb.mxu3 %v10790_v61  ;;  %v10944_v36 = vand.u32 4294901760, %v322_v31 }
 0x154   :  { %2560 = vmatpush.msrb.mxu0 %v10845_v59  ;;  %2705 = vmatpush.msrb.mxu2 %v10848_v38 }
 0x155   :  { %2613 = vmatpush.msrb.mxu1 %v2612_v60  ;;  %2750 = vmatpush.msrb.mxu3 %v10806_v63  ;;  %v10951_v60 = vsub.f32 %v172_v24, %v10927_v14  ;;  %v10965_v24 = vsub.f32 %v167_v1, %v10942_v51  ;;  %v10968_v17 = vsub.f32 %v322_v31, %v10944_v36 }
 0x156   :  { %2562 = vmatpush.msrb.mxu0 %v10857_v37  ;;  %2708 = vmatpush.msrb.mxu2 %v10861_v4  ;;  %v2665_v1 = vsub.f32 %v10933_v47, %v15732_v30  ;;  %v10980_v31 = vsub.f32 %v317_v3, %v10956_v52  ;;  %v297_v30 = vld [vmem:[#allocation9 + $0x698] sm:$0xff] }
 0x157   :  { %2619 = vmatpush.msrb.mxu1 %v2618_v2  ;;  %2752 = vmatpush.msrb.mxu3 %v10820_v19  ;;  %v312_v2 = vld [vmem:[#allocation9 + $0x710] sm:$0xff]  ;;  %v15738_v5 = vand.u32 4294901760, %v10968_v17  ;;  %v15739_v56 = vand.u32 4294901760, %v10965_v24  ;;  %v11014_v53 = vand.u32 4294901760, %v297_v30 }
 0x158   :  { %2564 = vmatpush.msrb.mxu0 %v10869_v40  ;;  %2711 = vmatpush.msrb.mxu2 %v10873_v25  ;;  %v10972_v39 = vand.u32 4294901760, %v312_v2  ;;  %v2666_v41 = vand.u32 4294901760, %v2665_v1  ;;  %v15741_v50 = vand.u32 4294901760, %v10980_v31 }
 0x159   :  { %2625 = vmatpush.msrb.mxu1 %v2624_v13  ;;  %2754 = vmatpush.msrb.mxu3 %v10832_v7  ;;  %v2659_v13 = vsub.f32 %v10919_v46, %v15729_v33  ;;  %v302_v33 = vld [vmem:[#allocation9 + $0x6c0] sm:$0xff]  ;;  %v2677_v1 = vsub.f32 %v10965_v24, %v15739_v56 }
 0x15a   :  { %2566 = vmatpush.msrb.mxu0 %v10881_v18  ;;  %2714 = vmatpush.msrb.mxu2 %v10885_v62 }
 0x15b   :  { %2631 = vmatpush.msrb.mxu1 %v2630_v6  ;;  %2756 = vmatpush.msrb.mxu3 %v10845_v59  ;;  %v307_v6 = vld [vmem:[#allocation9 + $0x6e8] sm:$0xff] }
 0x15c   :  { %2568 = vmatpush.msrb.mxu0 %v10893_v55  ;;  %2717 = vmatpush.msrb.mxu2 %v10897_v54  ;;  %v10983_v8 = vand.u32 4294901760, %v307_v6 }
 0x15d   :  { %2637 = vmatpush.msrb.mxu1 %v2636_v48  ;;  %2758 = vmatpush.msrb.mxu3 %v10857_v37  ;;  %v15736_v48 = vand.u32 4294901760, %v10951_v60 }
 0x15e   :  { %2570 = vmatpush.msrb.mxu0 %v10911_v12  ;;  %2720 = vmatpush.msrb.mxu2 %v10907_v49 }
 0x15f   :  { %2643 = vmatpush.msrb.mxu1 %v2642_v32  ;;  %2760 = vmatpush.msrb.mxu3 %v10869_v40  ;;  %v2660_v32 = vand.u32 4294901760, %v2659_v13  ;;  %v2671_v3 = vsub.f32 %v10951_v60, %v15736_v48  ;;  %v10996_v13 = vand.u32 4294901760, %v302_v33  ;;  %v292_v48 = vld [vmem:[#allocation9 + $0x670] sm:$0xff] }
 0x160   :  { %2572 = vmatpush.msrb.mxu0 %v10927_v14  ;;  %2723 = vmatpush.msrb.mxu2 %v10919_v46  ;;  %v11027_v56 = vand.u32 4294901760, %v292_v48 }
 0x161   :  { %2649 = vmatpush.msrb.mxu1 %v2648_v16  ;;  %2762 = vmatpush.msrb.mxu3 %v10881_v18  ;;  %v10994_v16 = vsub.f32 %v312_v2, %v10972_v39  ;;  %v2928_v2 = vsub.f32 %v10968_v17, %v15738_v5  ;;  %v2934_v5 = vsub.f32 %v10980_v31, %v15741_v50 }
 0x162   :  { %2574 = vmatpush.msrb.mxu0 %v10942_v51  ;;  %2726 = vmatpush.msrb.mxu2 %v10933_v47 }
 0x163   :  { %2655 = vmatpush.msrb.mxu1 %v2654_v21  ;;  %2764 = vmatpush.msrb.mxu3 %v10893_v55  ;;  %v11003_v21 = vsub.f32 %v307_v6, %v10983_v8  ;;  %v2672_v6 = vand.u32 4294901760, %v2671_v3  ;;  %v15743_v26 = vand.u32 4294901760, %v10994_v16  ;;  %v2929_v20 = vand.u32 4294901760, %v2928_v2  ;;  %v277_v3 = vld [vmem:[#allocation9 + $0x5f8] sm:$0xff] }
 0x164   :  { %2394 = vmatmul.f32.vlgmr.msra.gmra.mxu0 %v16030_v27  ;;  %2729 = vmatpush.msrb.mxu2 %v10951_v60  ;;  %v11050_v2 = vand.u32 4294901760, %v282_v34 }
 0x165   :  { %2661 = vmatpush.msrb.mxu1 %v2660_v32  ;;  %2781 = vmatpush.msra.mxu0 %v2586_v11  ;;  %v11020_v11 = vsub.f32 %v302_v33, %v10996_v13  ;;  %v287_v32 = vld [vmem:[#allocation9 + $0x648] sm:$0xff]  ;;  %v2940_v50 = vsub.f32 %v10994_v16, %v15743_v26  ;;  %v272_v26 = vld [vmem:[#allocation9 + $0x5d0] sm:$0xff] }
 0x166   :  { %2766 = vmatpush.msrb.mxu3 %v10911_v12  ;;  %2502 = vmatmul.f32.vlgmr.msra.gmra.mxu2 %v16029_v35  ;;  %v11038_v33 = vand.u32 4294901760, %v287_v32 }
 0x167   :  { %2785 = vmatpush.msra.mxu0 %v2592_v10  ;;  %2667 = vmatpush.msrb.mxu1 %v2666_v41  ;;  %v2678_v10 = vand.u32 4294901760, %v2677_v1  ;;  %v11036_v41 = vsub.f32 %v297_v30, %v11014_v53  ;;  %v11048_v30 = vsub.f32 %v292_v48, %v11027_v56  ;;  %v16032_v1 = vand.u32 4294901760, %v11003_v21 }
 0x168   :  { %2732 = vmatpush.msrb.mxu2 %v10965_v24  ;;  %2768 = vmatpush.msrb.mxu3 %v10927_v14  ;;  %v11062_v48 = vand.u32 4294901760, %v277_v3  ;;  %v2941_v58 = vand.u32 4294901760, %v2940_v50  ;;  %v262_v50 = vld [vmem:[#allocation9 + $0x580] sm:$0xff] }
 0x169   :  { %2539 = vmatmul.f32.vlgmr.msra.gmra.mxu3 %v16029_v35  ;;  %2789 = vmatpush.msra.mxu0 %v2598_v45  ;;  %v2935_v45 = vand.u32 4294901760, %v2934_v5  ;;  %v15745_v0 = vand.u32 4294901760, %v11036_v41  ;;  %v11060_v5 = vsub.f32 %v287_v32, %v11038_v33  ;;  %v16033_v35 = vand.u32 4294901760, %v10813_v15  ;;  %v16035_v15 = vld [vmem:[#allocation23_spill] sm:$0xff] }
 0x16a   :  { %2885 = vmatpush.msra.mxu2 %v10944_v36  ;;  %2673 = vmatpush.msrb.mxu1 %v2672_v6  ;;  %v2946_v6 = vsub.f32 %v11003_v21, %v16032_v1  ;;  %v11073_v32 = vsub.f32 %v282_v34, %v11050_v2  ;;  %v11102_v27 = vand.u32 4294901760, %v262_v50 }
 0x16b   :  { %2770 = vmatpush.msrb.mxu3 %v10942_v51  ;;  %2433 = vmatmul.f32.vlgmr.msra.gmra.mxu1 %v16031_v28  ;;  %v267_v28 = vld [vmem:[#allocation9 + $0x5a8] sm:$0xff] }
 0x16c   :  { %2793 = vmatpush.msra.mxu0 %v2604_v29  ;;  %2887 = vmatpush.msra.mxu2 %v10956_v52  ;;  %v16034_v29 = vand.u32 4294901760, %v11020_v11 }
 0x16d   :  { %2930 = vmatpush.msra.mxu3 %v2929_v20  ;;  %2679 = vmatpush.msrb.mxu1 %v2678_v10  ;;  %v11075_v10 = vand.u32 4294901760, %v272_v26  ;;  %v11089_v20 = vand.u32 4294901760, %v267_v28 }
 0x16e   :  { %2797 = vmatpush.msra.mxu0 %v16033_v35  ;;  %v2952_v1 = vsub.f32 %v11020_v11, %v16034_v29  ;;  %2889 = vmatpush.msra.mxu2 %v10972_v39  ;;  %v2947_v35 = vand.u32 4294901760, %v2946_v6  ;;  %v11087_v29 = vsub.f32 %v277_v3, %v11062_v48 }
 0x16f   :  { %2848 = vmatpush.msra.mxu1 %v10758_v44  ;;  %2936 = vmatpush.msra.mxu3 %v2935_v45  ;;  %v16036_v44 = vand.u32 4294901760, %v10835_v57  ;;  %v2958_v45 = vsub.f32 %v11036_v41, %v15745_v0  ;;  %v16037_v57 = vld [vmem:[#allocation25_spill] sm:$0xff]  ;;  %v11100_v3 = vsub.f32 %v272_v26, %v11075_v10  ;;  %v11112_v26 = vsub.f32 %v267_v28, %v11089_v20 }
 0x170   :  { %2735 = vmatmul.f32.vlgmr.msrb.gmra.mxu2 %v16035_v15  ;;  %2580 = vmatmul.f32.vlgmr.msrb.gmra.mxu0 %v16037_v57  ;;  %v2953_v6 = vand.u32 4294901760, %v2952_v1  ;;  %v16040_v15 = vand.u32 4294901760, %v11048_v30  ;;  %v16041_v1 = vld [vmem:[#allocation21_spill] sm:$0xff]  ;;  %v16043_v57 = vand.u32 4294901760, %v10861_v4  ;;  %v11125_v28 = vsub.f32 %v262_v50, %v11102_v27 }
 0x171   :  { %2801 = vmatpush.msra.mxu0 %v16036_v44  ;;  %2850 = vmatpush.msra.mxu1 %v10765_v22  ;;  %v16038_v44 = vld [vmem:[#allocation24_spill] sm:$0xff]  ;;  %v16039_v22 = vand.u32 4294901760, %v10848_v38  ;;  %v2959_v38 = vand.u32 4294901760, %v2958_v45  ;;  %v16044_v45 = vand.u32 4294901760, %v11073_v32  ;;  %v2987_v34 = vand.u32 4294901760, %v11100_v3 }
 0x172   :  { %2891 = vmatpush.msra.mxu2 %v10983_v8  ;;  %2942 = vmatpush.msra.mxu3 %v2941_v58  ;;  %v2964_v0 = vsub.f32 %v11048_v30, %v16040_v15  ;;  %v257_v58 = vld [vmem:[#allocation9 + $0x558] sm:$0xff]  ;;  %v16045_v4 = vand.u32 4294901760, %v10873_v25  ;;  %v16047_v50 = vand.u32 4294901760, %v10885_v62  ;;  %v16048_v62 = vand.u32 4294901760, %v10897_v54 }
 0x173   :  { %2774 = vmatmul.f32.vlgmr.msrb.gmra.mxu3 %v16038_v44  ;;  %2805 = vmatpush.msra.mxu0 %v16039_v22  ;;  %v16042_v22 = vand.u32 4294901760, %v11060_v5  ;;  %v252_v44 = vld [vmem:[#allocation9 + $0x530] sm:$0xff] }
 0x174   :  { %2852 = vmatpush.msra.mxu1 %v10772_v42  ;;  %2893 = vmatpush.msra.mxu2 %v10996_v13  ;;  %v11117_v42 = vand.u32 4294901760, %v257_v58 }
 0x175   :  { %2948 = vmatpush.msra.mxu3 %v2947_v35  ;;  %2681 = vmatmul.f32.vlgmr.msrb.gmra.mxu1 %v16041_v1  ;;  %v2970_v15 = vsub.f32 %v11060_v5, %v16042_v22  ;;  %v2965_v35 = vand.u32 4294901760, %v2964_v0  ;;  %v2976_v22 = vsub.f32 %v11073_v32, %v16044_v45  ;;  %v2993_v45 = vand.u32 4294901760, %v11112_v26 }
 0x176   :  { %2809 = vmatpush.msra.mxu0 %v16043_v57  ;;  %2854 = vmatpush.msra.mxu1 %v10780_v23  ;;  %v11130_v23 = vand.u32 4294901760, %v252_v44  ;;  %v16046_v57 = vand.u32 4294901760, %v11087_v29  ;;  %v11141_v25 = vsub.f32 %v257_v58, %v11117_v42 }
 0x177   :  { %2895 = vmatpush.msra.mxu2 %v11014_v53  ;;  %2954 = vmatpush.msra.mxu3 %v2953_v6  ;;  %v2971_v0 = vand.u32 4294901760, %v2970_v15  ;;  %v2988_v15 = vsub.f32 %v11100_v3, %v2987_v34 }
 0x178   :  { %2813 = vmatpush.msra.mxu0 %v16045_v4  ;;  %2856 = vmatpush.msra.mxu1 %v10790_v61  ;;  %v2982_v6 = vsub.f32 %v11087_v29, %v16046_v57  ;;  %v11143_v61 = vand.u32 4294901760, %v247_v43  ;;  %v2999_v4 = vand.u32 4294901760, %v11125_v28  ;;  %v3005_v54 = vand.u32 4294901760, %v11141_v25 }
 0x179   :  { %2897 = vmatpush.msra.mxu2 %v11027_v56  ;;  %2960 = vmatpush.msra.mxu3 %v2959_v38  ;;  %v2977_v38 = vand.u32 4294901760, %v2976_v22  ;;  %v16049_v22 = vand.u32 4294901760, %v10907_v49  ;;  %v16050_v57 = vand.u32 4294901760, %v10919_v46  ;;  %v16051_v49 = vand.u32 4294901760, %v10933_v47 }
 0x17a   :  { %2817 = vmatpush.msra.mxu0 %v16047_v50  ;;  %2858 = vmatpush.msra.mxu1 %v10806_v63  ;;  %v11154_v63 = vsub.f32 %v252_v44, %v11130_v23  ;;  %v2983_v58 = vand.u32 4294901760, %v2982_v6  ;;  %v2989_v44 = vand.u32 4294901760, %v2988_v15  ;;  %v3006_v6 = vsub.f32 %v11141_v25, %v3005_v54  ;;  %v16056_v15 = vld [vmem:[#allocation16_spill] sm:$0xff] }
 0x17b   :  { %2899 = vmatpush.msra.mxu2 %v11038_v33  ;;  %2966 = vmatpush.msra.mxu3 %v2965_v35  ;;  %v2994_v35 = vsub.f32 %v11112_v26, %v2993_v45  ;;  %v16052_v50 = vand.u32 4294901760, %v10951_v60 }
 0x17c   :  { %2821 = vmatpush.msra.mxu0 %v16048_v62  ;;  %2860 = vmatpush.msra.mxu1 %v10820_v19  ;;  %v11165_v19 = vsub.f32 %v247_v43, %v11143_v61 }
 0x17d   :  { %2901 = vmatpush.msra.mxu2 %v11050_v2  ;;  %2972 = vmatpush.msra.mxu3 %v2971_v0  ;;  %v3000_v0 = vsub.f32 %v11125_v28, %v2999_v4  ;;  %v2995_v43 = vand.u32 4294901760, %v2994_v35 }
 0x17e   :  { %2825 = vmatpush.msra.mxu0 %v16049_v22  ;;  %2862 = vmatpush.msra.mxu1 %v10832_v7  ;;  %v3011_v7 = vand.u32 4294901760, %v11154_v63  ;;  %v3017_v46 = vand.u32 4294901760, %v11165_v19 }
 0x17f   :  { %2903 = vmatpush.msra.mxu2 %v11062_v48  ;;  %2978 = vmatpush.msra.mxu3 %v2977_v38  ;;  %v3007_v38 = vand.u32 4294901760, %v3006_v6 }
 0x180   :  { %2829 = vmatpush.msra.mxu0 %v16050_v57  ;;  %2864 = vmatpush.msra.mxu1 %v10845_v59  ;;  %v3001_v59 = vand.u32 4294901760, %v3000_v0  ;;  %v3012_v47 = vsub.f32 %v11154_v63, %v3011_v7  ;;  %v3018_v60 = vsub.f32 %v11165_v19, %v3017_v46 }
 0x181   :  { %2905 = vmatpush.msra.mxu2 %v11075_v10  ;;  %2984 = vmatpush.msra.mxu3 %v2983_v58  ;;  %v362_v58 = vld [vmem:[#allocation9 + $0x8a0] sm:$0xff] }
 0x182   :  { %2833 = vmatpush.msra.mxu0 %v16051_v49  ;;  %2866 = vmatpush.msra.mxu1 %v10857_v37  ;;  %v16053_v37 = vand.u32 4294901760, %v10965_v24  ;;  %v16054_v24 = vld [vmem:[#allocation28_spill] sm:$0xff]  ;;  %v11343_v57 = vand.u32 4294901760, %v362_v58 }
 0x183   :  { %2907 = vmatpush.msra.mxu2 %v11089_v20  ;;  %2990 = vmatpush.msra.mxu3 %v2989_v44 }
 0x184   :  { %2837 = vmatpush.msra.mxu0 %v16052_v50  ;;  %2868 = vmatpush.msra.mxu1 %v10869_v40  ;;  %v3013_v40 = vand.u32 4294901760, %v3012_v47  ;;  %v16067_v50 = vld [vmem:[#allocation26_spill] sm:$0xff]  ;;  %v347_v47 = vld [vmem:[#allocation9 + $0x828] sm:$0xff] }
 0x185   :  { %2909 = vmatpush.msra.mxu2 %v11102_v27  ;;  %2996 = vmatpush.msra.mxu3 %v2995_v43  ;;  %v352_v43 = vld [vmem:[#allocation9 + $0x850] sm:$0xff] }
 0x186   :  { %2841 = vmatpush.msra.mxu0 %v16053_v37  ;;  %2870 = vmatpush.msra.mxu1 %v10881_v18  ;;  %v3019_v18 = vand.u32 4294901760, %v3018_v60 }
 0x187   :  { %2911 = vmatpush.msra.mxu2 %v11117_v42  ;;  %3002 = vmatpush.msra.mxu3 %v3001_v59 }
 0x188   :  { %2843 = vmatmul.f32.vlgmr.msra.gmra.mxu0 %v16041_v1  ;;  %2872 = vmatpush.msra.mxu1 %v10893_v55  ;;  %v16055_v55 = vand.u32 4294901760, %v10968_v17 }
 0x189   :  { %3028 = vmatpush.msrb.mxu0 %v10968_v17  ;;  %2913 = vmatpush.msra.mxu2 %v11130_v23  ;;  %v16058_v17 = vand.u32 4294901760, %v10994_v16 }
 0x18a   :  { %3008 = vmatpush.msra.mxu3 %v3007_v38  ;;  %2874 = vmatpush.msra.mxu1 %v10911_v12  ;;  %v16057_v12 = vand.u32 4294901760, %v10980_v31  ;;  %v11367_v38 = vand.u32 4294901760, %v352_v43 }
 0x18b   :  { %3031 = vmatpush.msrb.mxu0 %v10980_v31  ;;  %2915 = vmatpush.msra.mxu2 %v11143_v61  ;;  %v16064_v31 = vand.u32 4294901760, %v11073_v32 }
 0x18c   :  { %3014 = vmatpush.msra.mxu3 %v3013_v40  ;;  %2921 = vmatmul.f32.vlgmr.msra.gmra.mxu2 %v16054_v24  ;;  %v11371_v40 = vsub.f32 %v362_v58, %v11343_v57 }
 0x18d   :  { %3034 = vmatpush.msrb.mxu0 %v10994_v16  ;;  %3122 = vmatpush.msrb.mxu2 %v16055_v55  ;;  %v16065_v16 = vand.u32 4294901760, %v11087_v29  ;;  %v342_v55 = vld [vmem:[#allocation9 + $0x800] sm:$0xff] }
 0x18e   :  { %2876 = vmatpush.msra.mxu1 %v10927_v14  ;;  %3020 = vmatpush.msra.mxu3 %v3019_v18  ;;  %v16059_v14 = vand.u32 4294901760, %v11003_v21 }
 0x18f   :  { %3022 = vmatmul.f32.vlgmr.msra.gmra.mxu3 %v16056_v15  ;;  %3037 = vmatpush.msrb.mxu0 %v11003_v21 }
 0x190   :  { %3126 = vmatpush.msrb.mxu2 %v16057_v12  ;;  %3189 = vmatpush.msrb.mxu3 %v10944_v36 }
 0x191   :  { %2878 = vmatpush.msra.mxu1 %v10942_v51  ;;  %3040 = vmatpush.msrb.mxu0 %v11020_v11  ;;  %v16060_v51 = vand.u32 4294901760, %v11020_v11  ;;  %v387_v11 = vld [vmem:[#allocation9 + $0x968] sm:$0xff] }
 0x192   :  { %2880 = vmatmul.f32.vlgmr.msra.gmra.mxu1 %v16041_v1  ;;  %3130 = vmatpush.msrb.mxu2 %v16058_v17  ;;  %v11379_v17 = vand.u32 4294901760, %v347_v47  ;;  %v427_v1 = vld [vmem:[#allocation9 + $0xaa8] sm:$0xff] }
 0x193   :  { %3081 = vmatpush.msrb.mxu1 %v10944_v36  ;;  %3191 = vmatpush.msrb.mxu3 %v10956_v52  ;;  %v16061_v36 = vand.u32 4294901760, %v11036_v41 }
 0x194   :  { %3043 = vmatpush.msrb.mxu0 %v11036_v41  ;;  %3134 = vmatpush.msrb.mxu2 %v16059_v14 }
 0x195   :  { %3083 = vmatpush.msrb.mxu1 %v10956_v52  ;;  %3193 = vmatpush.msrb.mxu3 %v10972_v39  ;;  %v16062_v52 = vand.u32 4294901760, %v11048_v30 }
 0x196   :  { %3046 = vmatpush.msrb.mxu0 %v11048_v30  ;;  %3138 = vmatpush.msrb.mxu2 %v16060_v51  ;;  %v382_v30 = vld [vmem:[#allocation9 + $0x940] sm:$0xff] }
 0x197   :  { %3085 = vmatpush.msrb.mxu1 %v10972_v39  ;;  %3195 = vmatpush.msrb.mxu3 %v10983_v8  ;;  %v16063_v39 = vand.u32 4294901760, %v11060_v5 }
 0x198   :  { %3049 = vmatpush.msrb.mxu0 %v11060_v5  ;;  %3142 = vmatpush.msrb.mxu2 %v16061_v36 }
 0x199   :  { %3087 = vmatpush.msrb.mxu1 %v10983_v8  ;;  %3197 = vmatpush.msrb.mxu3 %v10996_v13  ;;  %v402_v8 = vld [vmem:[#allocation9 + $0x9e0] sm:$0xff] }
 0x19a   :  { %3052 = vmatpush.msrb.mxu0 %v11073_v32  ;;  %3146 = vmatpush.msrb.mxu2 %v16062_v52  ;;  %v11289_v32 = vand.u32 4294901760, %v382_v30  ;;  %v337_v52 = vld [vmem:[#allocation9 + $0x7d8] sm:$0xff] }
 0x19b   :  { %3089 = vmatpush.msrb.mxu1 %v10996_v13  ;;  %3199 = vmatpush.msrb.mxu3 %v11014_v53  ;;  %v397_v13 = vld [vmem:[#allocation9 + $0x9b8] sm:$0xff] }
 0x19c   :  { %3055 = vmatpush.msrb.mxu0 %v11087_v29  ;;  %3150 = vmatpush.msrb.mxu2 %v16063_v39  ;;  %v11264_v21 = vand.u32 4294901760, %v397_v13  ;;  %v16066_v29 = vld [vmem:[#allocation17_spill] sm:$0xff] }
 0x19d   :  { %3091 = vmatpush.msrb.mxu1 %v11014_v53  ;;  %3201 = vmatpush.msrb.mxu3 %v11027_v56  ;;  %v11257_v53 = vand.u32 4294901760, %v402_v8 }
 0x19e   :  { %3058 = vmatpush.msrb.mxu0 %v11100_v3  ;;  %3154 = vmatpush.msrb.mxu2 %v16064_v31  ;;  %v11284_v5 = vsub.f32 %v397_v13, %v11264_v21  ;;  %v11391_v31 = vand.u32 4294901760, %v342_v55 }
 0x19f   :  { %3093 = vmatpush.msrb.mxu1 %v11027_v56  ;;  %3203 = vmatpush.msrb.mxu3 %v11038_v33  ;;  %v392_v56 = vld [vmem:[#allocation9 + $0x990] sm:$0xff] }
 0x1a0   :  { %3061 = vmatpush.msrb.mxu0 %v11112_v26  ;;  %3158 = vmatpush.msrb.mxu2 %v16065_v16  ;;  %v11271_v41 = vand.u32 4294901760, %v392_v56  ;;  %v372_v26 = vld [vmem:[#allocation9 + $0x8f0] sm:$0xff]  ;;  %v11395_v16 = vsub.f32 %v352_v43, %v11367_v38 }
 0x1a1   :  { %3095 = vmatpush.msrb.mxu1 %v11038_v33  ;;  %3205 = vmatpush.msrb.mxu3 %v11050_v2  ;;  %v11274_v33 = vsub.f32 %v402_v8, %v11257_v53  ;;  %v15749_v8 = vand.u32 4294901760, %v11371_v40 }
 0x1a2   :  { %3064 = vmatpush.msrb.mxu0 %v11125_v28  ;;  %3162 = vmatpush.msrb.mxu2 %v2987_v34  ;;  %v11295_v34 = vsub.f32 %v392_v56, %v11271_v41  ;;  %v15746_v58 = vand.u32 4294901760, %v11395_v16 }
 0x1a3   :  { %3097 = vmatpush.msrb.mxu1 %v11050_v2  ;;  %3207 = vmatpush.msrb.mxu3 %v11062_v48  ;;  %v11281_v2 = vand.u32 4294901760, %v387_v11 }
 0x1a4   :  { %3067 = vmatpush.msrb.mxu0 %v11141_v25  ;;  %3166 = vmatpush.msrb.mxu2 %v2993_v45  ;;  %v11312_v45 = vsub.f32 %v382_v30, %v11289_v32  ;;  %v367_v25 = vld [vmem:[#allocation9 + $0x8c8] sm:$0xff]  ;;  %v15757_v62 = vand.u32 4294901760, %v11295_v34 }
 0x1a5   :  { %3099 = vmatpush.msrb.mxu1 %v11062_v48  ;;  %3209 = vmatpush.msrb.mxu3 %v11075_v10  ;;  %v377_v48 = vld [vmem:[#allocation9 + $0x918] sm:$0xff]  ;;  %v11306_v28 = vsub.f32 %v387_v11, %v11281_v2  ;;  %v11332_v35 = vand.u32 4294901760, %v367_v25  ;;  %v11403_v11 = vand.u32 4294901760, %v337_v52 }
 0x1a6   :  { %3070 = vmatpush.msrb.mxu0 %v11154_v63  ;;  %3170 = vmatpush.msrb.mxu2 %v2999_v4  ;;  %v11300_v3 = vand.u32 4294901760, %v377_v48  ;;  %v11319_v4 = vand.u32 4294901760, %v372_v26  ;;  %v3281_v0 = vsub.f32 %v11295_v34, %v15757_v62  ;;  %v16069_v62 = vld [vmem:[#allocation32_spill] sm:$0xff] }
 0x1a7   :  { %3101 = vmatpush.msrb.mxu1 %v11075_v10  ;;  %3211 = vmatpush.msrb.mxu3 %v11089_v20  ;;  %v3268_v10 = vand.u32 4294901760, %v11274_v33  ;;  %v15756_v22 = vand.u32 4294901760, %v11306_v28  ;;  %v11359_v59 = vsub.f32 %v367_v25, %v11332_v35 }
 0x1a8   :  { %3073 = vmatpush.msrb.mxu0 %v11165_v19  ;;  %3174 = vmatpush.msrb.mxu2 %v3005_v54  ;;  %v11325_v63 = vsub.f32 %v377_v48, %v11300_v3  ;;  %v15755_v54 = vand.u32 4294901760, %v11312_v45  ;;  %v357_v19 = vld [vmem:[#allocation9 + $0x878] sm:$0xff]  ;;  %v3282_v37 = vand.u32 4294901760, %v3281_v0  ;;  %v11407_v48 = vsub.f32 %v347_v47, %v11379_v17  ;;  %v327_v0 = vld [vmem:[#allocation9 + $0x788] sm:$0xff] }
 0x1a9   :  { %3103 = vmatpush.msrb.mxu1 %v11089_v20  ;;  %3213 = vmatpush.msrb.mxu3 %v11102_v27  ;;  %v15759_v20 = vand.u32 4294901760, %v11284_v5  ;;  %v3287_v6 = vsub.f32 %v11306_v28, %v15756_v22  ;;  %v15751_v14 = vand.u32 4294901760, %v11359_v59 }
 0x1aa   :  { %3076 = vmatmul.f32.vlgmr.msrb.gmra.mxu0 %v16066_v29  ;;  %3178 = vmatpush.msrb.mxu2 %v3011_v7  ;;  %v11346_v7 = vsub.f32 %v372_v26, %v11319_v4  ;;  %v332_v26 = vld [vmem:[#allocation9 + $0x7b0] sm:$0xff] }
 0x1ab   :  { %3226 = vmatpush.msra.mxu0 %v11257_v53  ;;  %3105 = vmatpush.msrb.mxu1 %v11102_v27  ;;  %v3269_v27 = vsub.f32 %v11274_v33, %v3268_v10  ;;  %v3288_v12 = vand.u32 4294901760, %v3287_v6  ;;  %v3311_v56 = vsub.f32 %v11359_v59, %v15751_v14  ;;  %v15747_v6 = vand.u32 4294901760, %v11407_v48 }
 0x1ac   :  { %3215 = vmatpush.msrb.mxu3 %v11117_v42  ;;  %3182 = vmatpush.msrb.mxu2 %v3017_v46  ;;  %v11356_v46 = vand.u32 4294901760, %v357_v19  ;;  %v15752_v60 = vand.u32 4294901760, %v11346_v7 }
 0x1ad   :  { %3228 = vmatpush.msra.mxu0 %v11264_v21  ;;  %3107 = vmatpush.msrb.mxu1 %v11117_v42  ;;  %v3275_v42 = vsub.f32 %v11284_v5, %v15759_v20  ;;  %v3270_v44 = vand.u32 4294901760, %v3269_v27  ;;  %v3317_v27 = vsub.f32 %v11371_v40, %v15749_v8  ;;  %v3312_v43 = vand.u32 4294901760, %v3311_v56  ;;  %v462_v8 = vld [vmem:[#allocation9 + $0xbc0] sm:$0xff]  ;;  %v447_v20 = vld [vmem:[#allocation9 + $0xb48] sm:$0xff] }
 0x1ae   :  { %3217 = vmatpush.msrb.mxu3 %v11130_v23  ;;  %3184 = vmatmul.f32.vlgmr.msrb.gmra.mxu2 %v16056_v15  ;;  %v11383_v51 = vsub.f32 %v357_v19, %v11356_v46  ;;  %v3305_v39 = vsub.f32 %v11346_v7, %v15752_v60  ;;  %v482_v19 = vld [vmem:[#allocation9 + $0xc60] sm:$0xff]  ;;  %v3335_v56 = vsub.f32 %v11407_v48, %v15747_v6  ;;  %v11483_v60 = vand.u32 4294901760, %v462_v8 }
 0x1af   :  { %3230 = vmatpush.msra.mxu0 %v11271_v41  ;;  %3369 = vmatpush.msra.mxu2 %v11274_v33  ;;  %v3276_v49 = vand.u32 4294901760, %v3275_v42  ;;  %v11417_v42 = vsub.f32 %v342_v55, %v11391_v31  ;;  %v11433_v47 = vand.u32 4294901760, %v482_v19  ;;  %v3329_v55 = vsub.f32 %v11395_v16, %v15746_v58  ;;  %v467_v58 = vld [vmem:[#allocation9 + $0xbe8] sm:$0xff] }
 0x1b0   :  { %3109 = vmatpush.msrb.mxu1 %v11130_v23  ;;  %3219 = vmatpush.msrb.mxu3 %v11143_v61  ;;  %v15753_v23 = vand.u32 4294901760, %v11325_v63  ;;  %v15748_v30 = vand.u32 4294901760, %v11383_v51  ;;  %v3306_v25 = vand.u32 4294901760, %v3305_v39  ;;  %v472_v39 = vld [vmem:[#allocation9 + $0xc10] sm:$0xff]  ;;  %v16070_v33 = vand.u32 4294901760, %v11284_v5 }
 0x1b1   :  { %3221 = vmatmul.f32.vlgmr.msrb.gmra.mxu3 %v16056_v15  ;;  %3232 = vmatpush.msra.mxu0 %v11281_v2  ;;  %v16072_v15 = vld [vmem:[#allocation30_spill] sm:$0xff] }
 0x1b2   :  { %3372 = vmatpush.msra.mxu2 %v11284_v5  ;;  %3422 = vmatpush.msra.mxu3 %v11257_v53  ;;  %v3299_v18 = vsub.f32 %v11325_v63, %v15753_v23  ;;  %v457_v23 = vld [vmem:[#allocation9 + $0xb98] sm:$0xff]  ;;  %v16073_v5 = vand.u32 4294901760, %v11295_v34 }
 0x1b3   :  { %3111 = vmatpush.msrb.mxu1 %v11143_v61  ;;  %3234 = vmatpush.msra.mxu0 %v11289_v32  ;;  %v3293_v61 = vsub.f32 %v11312_v45, %v15755_v54 }
 0x1b4   :  { %3115 = vmatmul.f32.vlgmr.msrb.gmra.mxu1 %v16067_v50  ;;  %3375 = vmatpush.msra.mxu2 %v11295_v34  ;;  %v3300_v13 = vand.u32 4294901760, %v3299_v18  ;;  %v3318_v18 = vand.u32 4294901760, %v3317_v27  ;;  %v437_v50 = vld [vmem:[#allocation9 + $0xaf8] sm:$0xff] }
 0x1b5   :  { %3271 = vmatpush.msra.mxu1 %v3270_v44  ;;  %3424 = vmatpush.msra.mxu3 %v11264_v21  ;;  %v3294_v36 = vand.u32 4294901760, %v3293_v61  ;;  %v11421_v44 = vand.u32 4294901760, %v332_v26  ;;  %v11429_v61 = vsub.f32 %v337_v52, %v11403_v11  ;;  %v11556_v24 = vand.u32 4294901760, %v437_v50 }
 0x1b6   :  { %3236 = vmatpush.msra.mxu0 %v11300_v3  ;;  %3378 = vmatpush.msra.mxu2 %v11306_v28 }
 0x1b7   :  { %3277 = vmatpush.msra.mxu1 %v3276_v49  ;;  %3426 = vmatpush.msra.mxu3 %v11271_v41  ;;  %v3323_v49 = vsub.f32 %v11383_v51, %v15748_v30  ;;  %v11445_v52 = vsub.f32 %v332_v26, %v11421_v44  ;;  %v11457_v26 = vsub.f32 %v482_v19, %v11433_v47  ;;  %v11466_v30 = vand.u32 4294901760, %v472_v39 }
 0x1b8   :  { %3238 = vmatpush.msra.mxu0 %v11319_v4  ;;  %3381 = vmatpush.msra.mxu2 %v11312_v45 }
 0x1b9   :  { %3283 = vmatpush.msra.mxu1 %v3282_v37  ;;  %3428 = vmatpush.msra.mxu3 %v11281_v2  ;;  %v477_v37 = vld [vmem:[#allocation9 + $0xc38] sm:$0xff]  ;;  %v15758_v19 = vand.u32 4294901760, %v11445_v52  ;;  %v15760_v14 = vand.u32 4294901760, %v11457_v26 }
 0x1ba   :  { %3240 = vmatpush.msra.mxu0 %v11332_v35  ;;  %3384 = vmatpush.msra.mxu2 %v11325_v63  ;;  %v11452_v27 = vand.u32 4294901760, %v477_v37 }
 0x1bb   :  { %3289 = vmatpush.msra.mxu1 %v3288_v12  ;;  %3430 = vmatpush.msra.mxu3 %v11289_v32  ;;  %v11439_v12 = vand.u32 4294901760, %v327_v0 }
 0x1bc   :  { %3242 = vmatpush.msra.mxu0 %v11343_v57  ;;  %3387 = vmatpush.msra.mxu2 %v11346_v7  ;;  %16068 = vst [vmem:[#allocation36_spill] sm:$0xff] %v11452_v27 }
 0x1bd   :  { %3295 = vmatpush.msra.mxu1 %v3294_v36  ;;  %3432 = vmatpush.msra.mxu3 %v11300_v3  ;;  %v15750_v36 = vand.u32 4294901760, %v11417_v42  ;;  %v11464_v6 = vsub.f32 %v327_v0, %v11439_v12 }
 0x1be   :  { %3244 = vmatpush.msra.mxu0 %v11356_v46  ;;  %3390 = vmatpush.msra.mxu2 %v11359_v59 }
 0x1bf   :  { %3301 = vmatpush.msra.mxu1 %v3300_v13  ;;  %3434 = vmatpush.msra.mxu3 %v11319_v4  ;;  %v3324_v13 = vand.u32 4294901760, %v3323_v49  ;;  %v3341_v49 = vsub.f32 %v11417_v42, %v15750_v36  ;;  %v11478_v36 = vsub.f32 %v477_v37, %v11452_v27  ;;  %v3353_v37 = vsub.f32 %v11445_v52, %v15758_v19 }
 0x1c0   :  { %3246 = vmatpush.msra.mxu0 %v11367_v38  ;;  %3393 = vmatpush.msra.mxu2 %v11371_v40  ;;  %v3610_v19 = vsub.f32 %v11457_v26, %v15760_v14 }
 0x1c1   :  { %3307 = vmatpush.msra.mxu1 %v3306_v25  ;;  %3436 = vmatpush.msra.mxu3 %v11332_v35  ;;  %v15754_v25 = vand.u32 4294901760, %v11429_v61  ;;  %v3354_v14 = vand.u32 4294901760, %v3353_v37 }
 0x1c2   :  { %3248 = vmatpush.msra.mxu0 %v11379_v17  ;;  %3396 = vmatpush.msra.mxu2 %v11383_v51  ;;  %v3611_v37 = vand.u32 4294901760, %v3610_v19 }
 0x1c3   :  { %3313 = vmatpush.msra.mxu1 %v3312_v43  ;;  %3438 = vmatpush.msra.mxu3 %v11343_v57  ;;  %v3330_v43 = vand.u32 4294901760, %v3329_v55  ;;  %v3336_v55 = vand.u32 4294901760, %v3335_v56  ;;  %v3347_v0 = vsub.f32 %v11429_v61, %v15754_v25  ;;  %v15761_v56 = vand.u32 4294901760, %v11464_v6 }
 0x1c4   :  { %3250 = vmatpush.msra.mxu0 %v11391_v31  ;;  %3399 = vmatpush.msra.mxu2 %v11395_v16  ;;  %v11488_v25 = vsub.f32 %v472_v39, %v11466_v30  ;;  %v11500_v39 = vand.u32 4294901760, %v457_v23 }
 0x1c5   :  { %3319 = vmatpush.msra.mxu1 %v3318_v18  ;;  %3440 = vmatpush.msra.mxu3 %v11356_v46  ;;  %v11471_v18 = vand.u32 4294901760, %v467_v58 }
 0x1c6   :  { %3252 = vmatpush.msra.mxu0 %v11403_v11  ;;  %3402 = vmatpush.msra.mxu2 %v11407_v48 }
 0x1c7   :  { %3325 = vmatpush.msra.mxu1 %v3324_v13  ;;  %3442 = vmatpush.msra.mxu3 %v11367_v38  ;;  %v3342_v13 = vand.u32 4294901760, %v3341_v49  ;;  %v11496_v54 = vsub.f32 %v467_v58, %v11471_v18  ;;  %v3348_v49 = vand.u32 4294901760, %v3347_v0  ;;  %v11508_v58 = vsub.f32 %v462_v8, %v11483_v60  ;;  %v16076_v8 = vld [vmem:[#allocation31_spill] sm:$0xff] }
 0x1c8   :  { %3254 = vmatpush.msra.mxu0 %v11421_v44  ;;  %3405 = vmatpush.msra.mxu2 %v11417_v42  ;;  %v11529_v0 = vand.u32 4294901760, %v447_v20 }
 0x1c9   :  { %3331 = vmatpush.msra.mxu1 %v3330_v43  ;;  %3444 = vmatpush.msra.mxu3 %v11379_v17  ;;  %v452_v43 = vld [vmem:[#allocation9 + $0xb70] sm:$0xff]  ;;  %v16075_v19 = vand.u32 4294901760, %v11496_v54 }
 0x1ca   :  { %3256 = vmatpush.msra.mxu0 %v11439_v12  ;;  %3408 = vmatpush.msra.mxu2 %v11429_v61  ;;  %v11516_v22 = vand.u32 4294901760, %v452_v43 }
 0x1cb   :  { %3337 = vmatpush.msra.mxu1 %v3336_v55  ;;  %3446 = vmatpush.msra.mxu3 %v11391_v31  ;;  %v3359_v55 = vsub.f32 %v11464_v6, %v15761_v56  ;;  %v11527_v56 = vsub.f32 %v457_v23, %v11500_v39  ;;  %v3628_v34 = vsub.f32 %v11496_v54, %v16075_v19 }
 0x1cc   :  { %3262 = vmatmul.f32.vlgmr.msra.gmra.mxu0 %v16069_v62  ;;  %3411 = vmatpush.msra.mxu2 %v11445_v52  ;;  %v442_v62 = vld [vmem:[#allocation9 + $0xb20] sm:$0xff] }
 0x1cd   :  { %3463 = vmatpush.msrb.mxu0 %v3268_v10  ;;  %3343 = vmatpush.msra.mxu1 %v3342_v13  ;;  %v16071_v10 = vand.u32 4294901760, %v11478_v36  ;;  %v11543_v29 = vand.u32 4294901760, %v442_v62 }
 0x1ce   :  { %3448 = vmatpush.msra.mxu3 %v11403_v11  ;;  %3414 = vmatpush.msra.mxu2 %v11464_v6 }
 0x1cf   :  { %3467 = vmatpush.msrb.mxu0 %v16070_v33  ;;  %3349 = vmatpush.msra.mxu1 %v3348_v49  ;;  %v3616_v13 = vsub.f32 %v11478_v36, %v16071_v10  ;;  %v3360_v49 = vand.u32 4294901760, %v3359_v55  ;;  %v16074_v33 = vand.u32 4294901760, %v11488_v25  ;;  %v11541_v10 = vsub.f32 %v452_v43, %v11516_v22 }
 0x1d0   :  { %3450 = vmatpush.msra.mxu3 %v11421_v44  ;;  %3417 = vmatmul.f32.vlgmr.msra.gmra.mxu2 %v16072_v15  ;;  %v16077_v55 = vand.u32 4294901760, %v11306_v28  ;;  %v11554_v43 = vsub.f32 %v447_v20, %v11529_v0  ;;  %v16079_v28 = vand.u32 4294901760, %v11312_v45  ;;  %v11566_v20 = vsub.f32 %v442_v62, %v11543_v29 }
 0x1d1   :  { %3471 = vmatpush.msrb.mxu0 %v16073_v5  ;;  %3567 = vmatpush.msrb.mxu2 %v11433_v47  ;;  %v3622_v23 = vsub.f32 %v11488_v25, %v16074_v33  ;;  %v432_v5 = vld [vmem:[#allocation9 + $0xad0] sm:$0xff]  ;;  %v3617_v15 = vand.u32 4294901760, %v3616_v13  ;;  %v16081_v45 = vand.u32 4294901760, %v11527_v56  ;;  %v11578_v62 = vsub.f32 %v437_v50, %v11556_v24 }
 0x1d2   :  { %3355 = vmatpush.msra.mxu1 %v3354_v14  ;;  %3452 = vmatpush.msra.mxu3 %v11439_v12  ;;  %v16078_v14 = vand.u32 4294901760, %v11508_v58  ;;  %v11568_v33 = vand.u32 4294901760, %v432_v5 }
 0x1d3   :  { %3456 = vmatmul.f32.vlgmr.msra.gmra.mxu3 %v16076_v8  ;;  %3475 = vmatpush.msrb.mxu0 %v16077_v55  ;;  %v3623_v13 = vand.u32 4294901760, %v3622_v23  ;;  %v15766_v55 = vand.u32 4294901760, %v11541_v10  ;;  %v16080_v8 = vld [vmem:[#allocation29_spill] sm:$0xff]  ;;  %v417_v23 = vld [vmem:[#allocation9 + $0xa58] sm:$0xff] }
 0x1d4   :  { %3569 = vmatpush.msrb.mxu2 %v11452_v27  ;;  %3612 = vmatpush.msrb.mxu3 %v3611_v37  ;;  %v3634_v19 = vsub.f32 %v11508_v58, %v16078_v14  ;;  %v3629_v37 = vand.u32 4294901760, %v3628_v34  ;;  %v422_v27 = vld [vmem:[#allocation9 + $0xa80] sm:$0xff]  ;;  %v11580_v14 = vand.u32 4294901760, %v427_v1  ;;  %v11591_v50 = vsub.f32 %v432_v5, %v11568_v33 }
 0x1d5   :  { %3361 = vmatpush.msra.mxu1 %v3360_v49  ;;  %3479 = vmatpush.msrb.mxu0 %v16079_v28  ;;  %v3640_v49 = vsub.f32 %v11527_v56, %v16081_v45  ;;  %v16082_v28 = vand.u32 4294901760, %v11325_v63  ;;  %v11593_v45 = vand.u32 4294901760, %v422_v27  ;;  %v16083_v63 = vand.u32 4294901760, %v11346_v7 }
 0x1d6   :  { %3363 = vmatmul.f32.vlgmr.msra.gmra.mxu1 %v16080_v8  ;;  %3571 = vmatpush.msrb.mxu2 %v11466_v30  ;;  %v3635_v34 = vand.u32 4294901760, %v3634_v19  ;;  %v16084_v19 = vand.u32 4294901760, %v11554_v43  ;;  %v11604_v5 = vsub.f32 %v427_v1, %v11580_v14  ;;  %v11609_v7 = vand.u32 4294901760, %v417_v23 }
 0x1d7   :  { %3530 = vmatpush.msrb.mxu1 %v11257_v53  ;;  %3618 = vmatpush.msrb.mxu3 %v3617_v15  ;;  %v3646_v15 = vsub.f32 %v11541_v10, %v15766_v55  ;;  %v412_v55 = vld [vmem:[#allocation9 + $0xa30] sm:$0xff]  ;;  %v16085_v53 = vand.u32 4294901760, %v11359_v59  ;;  %v11617_v1 = vsub.f32 %v422_v27, %v11593_v45  ;;  %v16087_v59 = vand.u32 4294901760, %v11371_v40 }
 0x1d8   :  { %3483 = vmatpush.msrb.mxu0 %v16082_v28  ;;  %3573 = vmatpush.msrb.mxu2 %v11471_v18  ;;  %v3663_v28 = vand.u32 4294901760, %v11578_v62  ;;  %v16088_v27 = vand.u32 4294901760, %v11383_v51  ;;  %v11633_v40 = vsub.f32 %v417_v23, %v11609_v7  ;;  %v16089_v51 = vand.u32 4294901760, %v11395_v16 }
 0x1d9   :  { %3532 = vmatpush.msrb.mxu1 %v11264_v21  ;;  %3624 = vmatpush.msrb.mxu3 %v3623_v13  ;;  %v3641_v21 = vand.u32 4294901760, %v3640_v49  ;;  %v3652_v13 = vsub.f32 %v11554_v43, %v16084_v19  ;;  %v407_v19 = vld [vmem:[#allocation9 + $0xa08] sm:$0xff] }
 0x1da   :  { %3487 = vmatpush.msrb.mxu0 %v16083_v63  ;;  %3575 = vmatpush.msrb.mxu2 %v11483_v60  ;;  %v3669_v63 = vand.u32 4294901760, %v11591_v50  ;;  %v3687_v16 = vand.u32 4294901760, %v11633_v40 }
 0x1db   :  { %3534 = vmatpush.msrb.mxu1 %v11271_v41  ;;  %3630 = vmatpush.msrb.mxu3 %v3629_v37  ;;  %v3647_v41 = vand.u32 4294901760, %v3646_v15  ;;  %v16086_v37 = vand.u32 4294901760, %v11566_v20  ;;  %v3675_v15 = vand.u32 4294901760, %v11604_v5 }
 0x1dc   :  { %3491 = vmatpush.msrb.mxu0 %v16085_v53  ;;  %3577 = vmatpush.msrb.mxu2 %v11500_v39  ;;  %v11622_v53 = vand.u32 4294901760, %v412_v55 }
 0x1dd   :  { %3536 = vmatpush.msrb.mxu1 %v11281_v2  ;;  %3636 = vmatpush.msrb.mxu3 %v3635_v34  ;;  %v3658_v49 = vsub.f32 %v11566_v20, %v16086_v37  ;;  %v3653_v2 = vand.u32 4294901760, %v3652_v13  ;;  %v3664_v34 = vsub.f32 %v11578_v62, %v3663_v28  ;;  %v11635_v37 = vand.u32 4294901760, %v407_v19 }
 0x1de   :  { %3495 = vmatpush.msrb.mxu0 %v16087_v59  ;;  %3579 = vmatpush.msrb.mxu2 %v11516_v22  ;;  %v3681_v13 = vand.u32 4294901760, %v11617_v1  ;;  %v11646_v23 = vsub.f32 %v412_v55, %v11622_v53 }
 0x1df   :  { %3538 = vmatpush.msrb.mxu1 %v11289_v32  ;;  %3642 = vmatpush.msrb.mxu3 %v3641_v21  ;;  %v3659_v32 = vand.u32 4294901760, %v3658_v49  ;;  %v3670_v21 = vsub.f32 %v11591_v50, %v3669_v63  ;;  %v16090_v49 = vand.u32 4294901760, %v11407_v48  ;;  %v11657_v59 = vsub.f32 %v407_v19, %v11635_v37 }
 0x1e0   :  { %3499 = vmatpush.msrb.mxu0 %v16088_v27  ;;  %3581 = vmatpush.msrb.mxu2 %v11529_v0  ;;  %v3682_v55 = vsub.f32 %v11617_v1, %v3681_v13  ;;  %v3693_v48 = vand.u32 4294901760, %v11646_v23 }
 0x1e1   :  { %3540 = vmatpush.msrb.mxu1 %v11300_v3  ;;  %3648 = vmatpush.msrb.mxu3 %v3647_v41  ;;  %v3665_v3 = vand.u32 4294901760, %v3664_v34  ;;  %v3676_v41 = vsub.f32 %v11604_v5, %v3675_v15  ;;  %v16092_v34 = vand.u32 4294901760, %v11429_v61  ;;  %v16094_v61 = vand.u32 4294901760, %v11464_v6 }
 0x1e2   :  { %3503 = vmatpush.msrb.mxu0 %v16089_v51  ;;  %3583 = vmatpush.msrb.mxu2 %v11543_v29  ;;  %v3683_v27 = vand.u32 4294901760, %v3682_v55  ;;  %v11697_v51 = vpop.f32.mrf.mxu1 }
 0x1e3   :  { %3542 = vmatpush.msrb.mxu1 %v11319_v4  ;;  %3654 = vmatpush.msrb.mxu3 %v3653_v2  ;;  %v3671_v4 = vand.u32 4294901760, %v3670_v21  ;;  %v16091_v2 = vand.u32 4294901760, %v11417_v42  ;;  %v3677_v19 = vand.u32 4294901760, %v3676_v41  ;;  %v3699_v42 = vand.u32 4294901760, %v11657_v59  ;;  %v11689_v21 = vpop.f32.mrf.mxu0  ;;  %16096 = vst [vmem:[#allocation38_spill] sm:$0xff] %v11697_v51  ;;  %v11704_v41 = vpop.f32.mrf.mxu2 }
 0x1e4   :  { %3507 = vmatpush.msrb.mxu0 %v16090_v49  ;;  %3585 = vmatpush.msrb.mxu2 %v11556_v24  ;;  %16095 = vst [vmem:[#allocation37_spill] sm:$0xff] %v11689_v21  ;;  %v16101_v49 = vand.u32 4294901760, %v11478_v36 }
 0x1e5   :  { %3544 = vmatpush.msrb.mxu1 %v11332_v35  ;;  %3660 = vmatpush.msrb.mxu3 %v3659_v32  ;;  %v3688_v35 = vsub.f32 %v11633_v40, %v3687_v16  ;;  %v16093_v32 = vand.u32 4294901760, %v11445_v52  ;;  %v3700_v52 = vsub.f32 %v11657_v59, %v3699_v42  ;;  %16099 = vst [vmem:[#allocation40_spill] sm:$0xff] %v11704_v41 }
 0x1e6   :  { %3511 = vmatpush.msrb.mxu0 %v16091_v2  ;;  %3587 = vmatpush.msrb.mxu2 %v11568_v33 }
 0x1e7   :  { %3546 = vmatpush.msrb.mxu1 %v11343_v57  ;;  %3666 = vmatpush.msrb.mxu3 %v3665_v3  ;;  %v3694_v57 = vsub.f32 %v11646_v23, %v3693_v48  ;;  %v3701_v6 = vand.u32 4294901760, %v3700_v52  ;;  %v11699_v3 = vpop.f32.mrf.mxu3 }
 0x1e8   :  { %3515 = vmatpush.msrb.mxu0 %v16092_v34  ;;  %3589 = vmatpush.msrb.mxu2 %v11580_v14  ;;  %16097 = vst [vmem:[#allocation39_spill] sm:$0xff] %v11699_v3  ;;  %v138_v34 = vld [vmem:[#allocation9 + $0x1a0] sm:$0xff] }
 0x1e9   :  { %3548 = vmatpush.msrb.mxu1 %v11356_v46  ;;  %3672 = vmatpush.msrb.mxu3 %v3671_v4  ;;  %v3689_v46 = vand.u32 4294901760, %v3688_v35 }
 0x1ea   :  { %3519 = vmatpush.msrb.mxu0 %v16093_v32  ;;  %3591 = vmatpush.msrb.mxu2 %v11593_v45  ;;  %v11727_v4 = vpop.f32.mrf.mxu1 }
 0x1eb   :  { %3550 = vmatpush.msrb.mxu1 %v11367_v38  ;;  %3678 = vmatpush.msrb.mxu3 %v3677_v19  ;;  %v3695_v38 = vand.u32 4294901760, %v3694_v57  ;;  %v128_v57 = vld [vmem:[#allocation9 + $0x150] sm:$0xff] }
 0x1ec   :  { %3523 = vmatpush.msrb.mxu0 %v16094_v61  ;;  %3593 = vmatpush.msrb.mxu2 %v11609_v7 }
 0x1ed   :  { %3552 = vmatpush.msrb.mxu1 %v11379_v17  ;;  %3684 = vmatpush.msrb.mxu3 %v3683_v27  ;;  %v16098_v17 = vld [vmem:[#allocation35_spill] sm:$0xff]  ;;  %v16123_v27 = vld [vmem:[#allocation33_spill] sm:$0xff] }
 0x1ee   :  { %3525 = vmatmul.f32.vlgmr.msrb.gmra.mxu0 %v16080_v8  ;;  %3595 = vmatpush.msrb.mxu2 %v11622_v53 }
 0x1ef   :  { %3710 = vmatpush.msra.mxu0 %v11457_v26  ;;  %3554 = vmatpush.msrb.mxu1 %v11391_v31  ;;  %v16100_v31 = vand.u32 4294901760, %v11457_v26  ;;  %v16104_v26 = vld [vmem:[#allocation36_spill] sm:$0xff]  ;;  %v11729_v55 = vpop.f32.mrf.mxu3 }
 0x1f0   :  { %3690 = vmatpush.msrb.mxu3 %v3689_v46  ;;  %3597 = vmatpush.msrb.mxu2 %v11635_v37  ;;  %16106 = vst [vmem:[#allocation36_spill] sm:$0xff] %v11727_v4 }
 0x1f1   :  { %3713 = vmatpush.msra.mxu0 %v11478_v36  ;;  %3556 = vmatpush.msrb.mxu1 %v11403_v11  ;;  %v11715_v11 = vpop.f32.mrf.mxu0  ;;  %v16105_v36 = vand.u32 4294901760, %v11496_v54  ;;  %16107 = vst [vmem:[#allocation42_spill] sm:$0xff] %v11729_v55 }
 0x1f2   :  { %3696 = vmatpush.msrb.mxu3 %v3695_v38  ;;  %3603 = vmatmul.f32.vlgmr.msrb.gmra.mxu2 %v16098_v17  ;;  %16102 = vst [vmem:[#allocation41_spill] sm:$0xff] %v11715_v11  ;;  %v11861_v38 = vand.u32 4294901760, %v128_v57 }
 0x1f3   :  { %3716 = vmatpush.msra.mxu0 %v11488_v25  ;;  %3804 = vmatpush.msra.mxu2 %v16100_v31 }
 0x1f4   :  { %3558 = vmatpush.msrb.mxu1 %v11421_v44  ;;  %3702 = vmatpush.msrb.mxu3 %v3701_v6  ;;  %v16103_v44 = vand.u32 4294901760, %v11488_v25 }
 0x1f5   :  { %3704 = vmatmul.f32.vlgmr.msrb.gmra.mxu3 %v10391_v9  ;;  %3719 = vmatpush.msra.mxu0 %v11496_v54  ;;  %v16110_v54 = vand.u32 4294901760, %v11527_v56 }
 0x1f6   :  { %3808 = vmatpush.msra.mxu2 %v16101_v49  ;;  %3871 = vmatpush.msra.mxu3 %v11433_v47  ;;  %v118_v49 = vld [vmem:[#allocation9 + $0x100] sm:$0xff] }
 0x1f7   :  { %3560 = vmatpush.msrb.mxu1 %v11439_v12  ;;  %3722 = vmatpush.msra.mxu0 %v11508_v58  ;;  %v16108_v12 = vand.u32 4294901760, %v11508_v58  ;;  %v16112_v58 = vand.u32 4294901760, %v11541_v10  ;;  %v11757_v2 = vpop.f32.mrf.mxu3 }
 0x1f8   :  { %3562 = vmatmul.f32.vlgmr.msrb.gmra.mxu1 %v16080_v8  ;;  %3812 = vmatpush.msra.mxu2 %v16103_v44  ;;  %16115 = vst [vmem:[#allocation46_spill] sm:$0xff] %v11757_v2  ;;  %v228_v2 = vld [vmem:[#allocation9 + $0x470] sm:$0xff] }
 0x1f9   :  { %3763 = vmatpush.msra.mxu1 %v11433_v47  ;;  %3873 = vmatpush.msra.mxu3 %v16104_v26  ;;  %v11736_v47 = vpop.f32.mrf.mxu2  ;;  %v11743_v25 = vpop.f32.mrf.mxu0 }
 0x1fa   :  { %3725 = vmatpush.msra.mxu0 %v11527_v56  ;;  %3816 = vmatpush.msra.mxu2 %v16105_v36  ;;  %16109 = vst [vmem:[#allocation43_spill] sm:$0xff] %v11736_v47  ;;  %v11755_v56 = vpop.f32.mrf.mxu1 }
 0x1fb   :  { %3765 = vmatpush.msra.mxu1 %v16104_v26  ;;  %3875 = vmatpush.msra.mxu3 %v11466_v30  ;;  %16111 = vst [vmem:[#allocation44_spill] sm:$0xff] %v11743_v25 }
 0x1fc   :  { %3728 = vmatpush.msra.mxu0 %v11541_v10  ;;  %3820 = vmatpush.msra.mxu2 %v16108_v12  ;;  %16114 = vst [vmem:[#allocation45_spill] sm:$0xff] %v11755_v56  ;;  %v223_v56 = vld [vmem:[#allocation9 + $0x448] sm:$0xff] }
 0x1fd   :  { %3767 = vmatpush.msra.mxu1 %v11466_v30  ;;  %3877 = vmatpush.msra.mxu3 %v11471_v18  ;;  %v16113_v30 = vand.u32 4294901760, %v11554_v43  ;;  %v12029_v47 = vand.u32 4294901760, %v223_v56 }
 0x1fe   :  { %3731 = vmatpush.msra.mxu0 %v11554_v43  ;;  %3824 = vmatpush.msra.mxu2 %v16110_v54 }
 0x1ff   :  { %3769 = vmatpush.msra.mxu1 %v11471_v18  ;;  %3879 = vmatpush.msra.mxu3 %v11483_v60  ;;  %v16116_v18 = vand.u32 4294901760, %v11566_v20  ;;  %v11789_v19 = vpop.f32.mrf.mxu3 }
 0x200   :  { %3734 = vmatpush.msra.mxu0 %v11566_v20  ;;  %3828 = vmatpush.msra.mxu2 %v16112_v58  ;;  %16120 = vst [vmem:[#allocation50_spill] sm:$0xff] %v11789_v19 }
 0x201   :  { %3771 = vmatpush.msra.mxu1 %v11483_v60  ;;  %3881 = vmatpush.msra.mxu3 %v11500_v39  ;;  %v163_v60 = vld [vmem:[#allocation9 + $0x268] sm:$0xff]  ;;  %v11764_v10 = vpop.f32.mrf.mxu2  ;;  %v11771_v43 = vpop.f32.mrf.mxu0 }
 0x202   :  { %3737 = vmatpush.msra.mxu0 %v11578_v62  ;;  %3832 = vmatpush.msra.mxu2 %v16113_v30  ;;  %16117 = vst [vmem:[#allocation47_spill] sm:$0xff] %v11764_v10  ;;  %v11775_v20 = vand.u32 4294901760, %v163_v60  ;;  %v113_v30 = vld [vmem:[#allocation9 + $0xd8] sm:$0xff] }
 0x203   :  { %3773 = vmatpush.msra.mxu1 %v11500_v39  ;;  %3883 = vmatpush.msra.mxu3 %v11516_v22  ;;  %v158_v39 = vld [vmem:[#allocation9 + $0x240] sm:$0xff]  ;;  %16118 = vst [vmem:[#allocation48_spill] sm:$0xff] %v11771_v43 }
 0x204   :  { %3740 = vmatpush.msra.mxu0 %v11591_v50  ;;  %3836 = vmatpush.msra.mxu2 %v16116_v18  ;;  %v11782_v62 = vand.u32 4294901760, %v158_v39 }
 0x205   :  { %3775 = vmatpush.msra.mxu1 %v11516_v22  ;;  %3885 = vmatpush.msra.mxu3 %v11529_v0  ;;  %v153_v22 = vld [vmem:[#allocation9 + $0x218] sm:$0xff] }
 0x206   :  { %3743 = vmatpush.msra.mxu0 %v11604_v5  ;;  %3840 = vmatpush.msra.mxu2 %v3663_v28  ;;  %v11787_v28 = vpop.f32.mrf.mxu1  ;;  %v11793_v50 = vand.u32 4294901760, %v153_v22  ;;  %v143_v5 = vld [vmem:[#allocation9 + $0x1c8] sm:$0xff] }
 0x207   :  { %3777 = vmatpush.msra.mxu1 %v11529_v0  ;;  %3887 = vmatpush.msra.mxu3 %v11543_v29  ;;  %v148_v0 = vld [vmem:[#allocation9 + $0x1f0] sm:$0xff]  ;;  %16119 = vst [vmem:[#allocation49_spill] sm:$0xff] %v11787_v28  ;;  %v233_v28 = vld [vmem:[#allocation9 + $0x498] sm:$0xff] }
 0x208   :  { %3746 = vmatpush.msra.mxu0 %v11617_v1  ;;  %3844 = vmatpush.msra.mxu2 %v3669_v63  ;;  %v11821_v35 = vsub.f32 %v153_v22, %v11793_v50  ;;  %v11893_v22 = vsub.f32 %v128_v57, %v11861_v38  ;;  %v12010_v10 = vand.u32 4294901760, %v233_v28 }
 0x209   :  { %3779 = vmatpush.msra.mxu1 %v11543_v29  ;;  %3889 = vmatpush.msra.mxu3 %v11556_v24  ;;  %v11796_v29 = vsub.f32 %v163_v60, %v11775_v20  ;;  %v11801_v63 = vpop.f32.mrf.mxu2  ;;  %v11813_v1 = vpop.f32.mrf.mxu0 }
 0x20a   :  { %3749 = vmatpush.msra.mxu0 %v11633_v40  ;;  %3848 = vmatpush.msra.mxu2 %v3675_v15  ;;  %16121 = vst [vmem:[#allocation51_spill] sm:$0xff] %v11801_v63  ;;  %v11808_v15 = vsub.f32 %v158_v39, %v11782_v62  ;;  %v133_v40 = vld [vmem:[#allocation9 + $0x178] sm:$0xff]  ;;  %v15768_v46 = vand.u32 4294901760, %v11821_v35  ;;  %v12037_v11 = vsub.f32 %v233_v28, %v12010_v10 }
 0x20b   :  { %3781 = vmatpush.msra.mxu1 %v11556_v24  ;;  %3891 = vmatpush.msra.mxu3 %v11568_v33  ;;  %v11805_v24 = vand.u32 4294901760, %v148_v0  ;;  %16122 = vst [vmem:[#allocation52_spill] sm:$0xff] %v11813_v1  ;;  %v11846_v61 = vand.u32 4294901760, %v133_v40 }
 0x20c   :  { %3752 = vmatpush.msra.mxu0 %v11646_v23  ;;  %3852 = vmatpush.msra.mxu2 %v3681_v13  ;;  %v15771_v13 = vand.u32 4294901760, %v11796_v29  ;;  %v3963_v12 = vsub.f32 %v11821_v35, %v15768_v46  ;;  %v103_v46 = vld [vmem:[#allocation9 + $0x88] sm:$0xff] }
 0x20d   :  { %3783 = vmatpush.msra.mxu1 %v11568_v33  ;;  %3893 = vmatpush.msra.mxu3 %v11580_v14  ;;  %v11817_v33 = vand.u32 4294901760, %v143_v5  ;;  %v11832_v32 = vsub.f32 %v148_v0, %v11805_v24  ;;  %v11880_v58 = vsub.f32 %v133_v40, %v11846_v61  ;;  %v16128_v0 = vld [vmem:[#allocation34_spill] sm:$0xff] }
 0x20e   :  { %3755 = vmatpush.msra.mxu0 %v11657_v59  ;;  %3856 = vmatpush.msra.mxu2 %v3687_v16  ;;  %v15770_v16 = vand.u32 4294901760, %v11808_v15  ;;  %v11837_v23 = vpop.f32.mrf.mxu1 }
 0x20f   :  { %3785 = vmatpush.msra.mxu1 %v11580_v14  ;;  %3895 = vmatpush.msra.mxu3 %v11593_v45  ;;  %v11828_v14 = vand.u32 4294901760, %v138_v34  ;;  %16124 = vst [vmem:[#allocation53_spill] sm:$0xff] %v11837_v23  ;;  %v11850_v59 = vsub.f32 %v143_v5, %v11817_v33  ;;  %v15767_v6 = vand.u32 4294901760, %v11832_v32 }
 0x210   :  { %3758 = vmatmul.f32.vlgmr.msra.gmra.mxu0 %v16123_v27  ;;  %3860 = vmatpush.msra.mxu2 %v3693_v48  ;;  %v11839_v48 = vpop.f32.mrf.mxu3  ;;  %v16152_v27 = vand.u32 4294901760, %v11796_v29 }
 0x211   :  { %3908 = vmatpush.msrb.mxu0 %v11775_v20  ;;  %3787 = vmatpush.msra.mxu1 %v11593_v45  ;;  %16125 = vst [vmem:[#allocation54_spill] sm:$0xff] %v11839_v48  ;;  %v3951_v45 = vsub.f32 %v11796_v29, %v15771_v13  ;;  %v11854_v52 = vpop.f32.mrf.mxu2  ;;  %v11865_v31 = vsub.f32 %v138_v34, %v11828_v14  ;;  %v11871_v26 = vpop.f32.mrf.mxu0  ;;  %v15769_v54 = vand.u32 4294901760, %v11850_v59  ;;  %v88_v48 = vld [vmem:[#allocation9 + $0x10] sm:$0xff] }
 0x212   :  { %3897 = vmatpush.msra.mxu3 %v11609_v7  ;;  %3864 = vmatpush.msra.mxu2 %v3699_v42  ;;  %v123_v42 = vld [vmem:[#allocation9 + $0x128] sm:$0xff]  ;;  %16126 = vst [vmem:[#allocation55_spill] sm:$0xff] %v11854_v52  ;;  %v3969_v60 = vsub.f32 %v11832_v32, %v15767_v6  ;;  %v98_v6 = vld [vmem:[#allocation9 + $0x60] sm:$0xff]  ;;  %v11977_v23 = vand.u32 4294901760, %v88_v48 }
 0x213   :  { %3910 = vmatpush.msrb.mxu0 %v11782_v62  ;;  %3789 = vmatpush.msra.mxu1 %v11609_v7  ;;  %v3957_v7 = vsub.f32 %v11808_v15, %v15770_v16  ;;  %v11869_v44 = vand.u32 4294901760, %v123_v42  ;;  %16127 = vst [vmem:[#allocation56_spill] sm:$0xff] %v11871_v26  ;;  %v3952_v36 = vand.u32 4294901760, %v3951_v45  ;;  %v15772_v39 = vand.u32 4294901760, %v11865_v31  ;;  %v243_v26 = vld [vmem:[#allocation9 + $0x4e8] sm:$0xff] }
 0x214   :  { %3899 = vmatpush.msra.mxu3 %v11622_v53  ;;  %3866 = vmatmul.f32.vlgmr.msra.gmra.mxu2 %v10391_v9  ;;  %v3964_v45 = vand.u32 4294901760, %v3963_v12  ;;  %v3975_v57 = vsub.f32 %v11850_v59, %v15769_v54  ;;  %v3970_v12 = vand.u32 4294901760, %v3969_v60  ;;  %v16133_v60 = vand.u32 4294901760, %v11880_v58  ;;  %16141 = vst [vmem:[#allocation65_spill] sm:$0xff] %v11977_v23 }
 0x215   :  { %3912 = vmatpush.msrb.mxu0 %v11793_v50  ;;  %4051 = vmatpush.msrb.mxu2 %v11796_v29  ;;  %v3958_v18 = vand.u32 4294901760, %v3957_v7  ;;  %v11898_v5 = vsub.f32 %v123_v42, %v11869_v44  ;;  %v11908_v7 = vand.u32 4294901760, %v113_v30  ;;  %v3981_v54 = vsub.f32 %v11865_v31, %v15772_v39 }
 0x216   :  { %3791 = vmatpush.msra.mxu1 %v11622_v53  ;;  %3901 = vmatpush.msra.mxu3 %v11635_v37  ;;  %v11884_v53 = vand.u32 4294901760, %v118_v49  ;;  %v11900_v34 = vpop.f32.mrf.mxu1  ;;  %v3987_v39 = vsub.f32 %v11880_v58, %v16133_v60 }
 0x217   :  { %3903 = vmatmul.f32.vlgmr.msra.gmra.mxu3 %v10391_v9  ;;  %3914 = vmatpush.msrb.mxu0 %v11805_v24  ;;  %16129 = vst [vmem:[#allocation57_spill] sm:$0xff] %v11900_v34  ;;  %v11937_v13 = vsub.f32 %v113_v30, %v11908_v7  ;;  %v11946_v34 = vand.u32 4294901760, %v98_v6 }
 0x218   :  { %4054 = vmatpush.msrb.mxu2 %v11808_v15  ;;  %4104 = vmatpush.msrb.mxu3 %v11775_v20  ;;  %v11902_v40 = vpop.f32.mrf.mxu3  ;;  %v11914_v42 = vsub.f32 %v118_v49, %v11884_v53  ;;  %v16135_v49 = vand.u32 4294901760, %v11898_v5 }
 0x219   :  { %3793 = vmatpush.msra.mxu1 %v11635_v37  ;;  %3916 = vmatpush.msrb.mxu0 %v11817_v33  ;;  %v108_v37 = vld [vmem:[#allocation9 + $0xb0] sm:$0xff]  ;;  %16130 = vst [vmem:[#allocation58_spill] sm:$0xff] %v11902_v40  ;;  %v11928_v40 = vpop.f32.mrf.mxu0  ;;  %v11981_v63 = vsub.f32 %v98_v6, %v11946_v34 }
 0x21a   :  { %3797 = vmatmul.f32.vlgmr.msra.gmra.mxu1 %v16128_v0  ;;  %4057 = vmatpush.msrb.mxu2 %v11821_v35  ;;  %v11922_v16 = vand.u32 4294901760, %v108_v37  ;;  %16132 = vst [vmem:[#allocation60_spill] sm:$0xff] %v11928_v40  ;;  %v93_v40 = vld [vmem:[#allocation9 + $0x38] sm:$0xff] }
 0x21b   :  { %3953 = vmatpush.msrb.mxu1 %v3952_v36  ;;  %4106 = vmatpush.msrb.mxu3 %v11782_v62  ;;  %v11916_v36 = vpop.f32.mrf.mxu2 }
 0x21c   :  { %3918 = vmatpush.msrb.mxu0 %v11828_v14  ;;  %4060 = vmatpush.msrb.mxu2 %v11832_v32  ;;  %16131 = vst [vmem:[#allocation59_spill] sm:$0xff] %v11916_v36  ;;  %v11934_v36 = vand.u32 4294901760, %v103_v46  ;;  %v11949_v30 = vsub.f32 %v108_v37, %v11922_v16  ;;  %v11961_v37 = vand.u32 4294901760, %v93_v40 }
 0x21d   :  { %3959 = vmatpush.msrb.mxu1 %v3958_v18  ;;  %4108 = vmatpush.msrb.mxu3 %v11793_v50  ;;  %v3976_v18 = vand.u32 4294901760, %v3975_v57  ;;  %v16134_v57 = vand.u32 4294901760, %v11893_v22 }
 0x21e   :  { %3920 = vmatpush.msrb.mxu0 %v11846_v61  ;;  %4063 = vmatpush.msrb.mxu2 %v11850_v59  ;;  %16138 = vst [vmem:[#allocation63_spill] sm:$0xff] %v11961_v37  ;;  %v11965_v1 = vsub.f32 %v103_v46, %v11934_v36  ;;  %v11993_v6 = vsub.f32 %v93_v40, %v11961_v37 }
 0x21f   :  { %3965 = vmatpush.msrb.mxu1 %v3964_v45  ;;  %4110 = vmatpush.msrb.mxu3 %v11805_v24  ;;  %v3982_v45 = vand.u32 4294901760, %v3981_v54  ;;  %v3993_v60 = vsub.f32 %v11893_v22, %v16134_v57  ;;  %v11956_v54 = vpop.f32.mrf.mxu1  ;;  %v3988_v57 = vand.u32 4294901760, %v3987_v39 }
 0x220   :  { %3922 = vmatpush.msrb.mxu0 %v11861_v38  ;;  %4066 = vmatpush.msrb.mxu2 %v11865_v31  ;;  %16136 = vst [vmem:[#allocation61_spill] sm:$0xff] %v11956_v54  ;;  %v11958_v52 = vpop.f32.mrf.mxu3  ;;  %v16147_v40 = vand.u32 4294901760, %v11965_v1 }
 0x221   :  { %3971 = vmatpush.msrb.mxu1 %v3970_v12  ;;  %4112 = vmatpush.msrb.mxu3 %v11817_v33  ;;  %v3999_v12 = vsub.f32 %v11898_v5, %v16135_v49  ;;  %16137 = vst [vmem:[#allocation62_spill] sm:$0xff] %v11958_v52  ;;  %v16139_v49 = vand.u32 4294901760, %v11914_v42  ;;  %v11972_v52 = vand.u32 4294901760, %v243_v26  ;;  %v3994_v39 = vand.u32 4294901760, %v3993_v60  ;;  %v11985_v43 = vpop.f32.mrf.mxu0 }
 0x222   :  { %3924 = vmatpush.msrb.mxu0 %v11869_v44  ;;  %4069 = vmatpush.msrb.mxu2 %v11880_v58  ;;  %16142 = vst [vmem:[#allocation66_spill] sm:$0xff] %v11985_v43  ;;  %v12008_v43 = vsub.f32 %v88_v48, %v11977_v23  ;;  %v4023_v48 = vsub.f32 %v11965_v1, %v16147_v40  ;;  %v16148_v40 = vand.u32 4294901760, %v11981_v63 }
 0x223   :  { %3977 = vmatpush.msrb.mxu1 %v3976_v18  ;;  %4114 = vmatpush.msrb.mxu3 %v11828_v14  ;;  %v4005_v54 = vsub.f32 %v11914_v42, %v16139_v49  ;;  %v238_v18 = vld [vmem:[#allocation9 + $0x4c0] sm:$0xff]  ;;  %v11974_v19 = vpop.f32.mrf.mxu2  ;;  %v4000_v49 = vand.u32 4294901760, %v3999_v12 }
 0x224   :  { %3926 = vmatpush.msrb.mxu0 %v11884_v53  ;;  %4072 = vmatpush.msrb.mxu2 %v11893_v22  ;;  %16140 = vst [vmem:[#allocation64_spill] sm:$0xff] %v11974_v19  ;;  %v11995_v19 = vand.u32 4294901760, %v238_v18  ;;  %v4029_v25 = vsub.f32 %v11981_v63, %v16148_v40  ;;  %v16149_v40 = vand.u32 4294901760, %v11993_v6  ;;  %v16151_v28 = vand.u32 4294901760, %v12008_v43 }
 0x225   :  { %3983 = vmatpush.msrb.mxu1 %v3982_v45  ;;  %4116 = vmatpush.msrb.mxu3 %v11846_v61  ;;  %v16143_v45 = vand.u32 4294901760, %v11937_v13  ;;  %v4006_v12 = vand.u32 4294901760, %v4005_v54 }
 0x226   :  { %3928 = vmatpush.msrb.mxu0 %v11908_v7  ;;  %4075 = vmatpush.msrb.mxu2 %v11898_v5  ;;  %16144 = vst [vmem:[#allocation67_spill] sm:$0xff] %v11995_v19  ;;  %v12024_v55 = vsub.f32 %v238_v18, %v11995_v19  ;;  %v4035_v18 = vsub.f32 %v11993_v6, %v16149_v40  ;;  %v4030_v40 = vand.u32 4294901760, %v4029_v25 }
 0x227   :  { %3989 = vmatpush.msrb.mxu1 %v3988_v57  ;;  %4118 = vmatpush.msrb.mxu3 %v11861_v38  ;;  %v4011_v60 = vsub.f32 %v11937_v13, %v16143_v45  ;;  %v12000_v57 = vsub.f32 %v243_v26, %v11972_v52  ;;  %v16145_v45 = vand.u32 4294901760, %v11949_v30  ;;  %v12014_v26 = vand.u32 4294901760, %v228_v2  ;;  %v12016_v54 = vpop.f32.mrf.mxu1 }
 0x228   :  { %3930 = vmatpush.msrb.mxu0 %v11922_v16  ;;  %4078 = vmatpush.msrb.mxu2 %v11914_v42  ;;  %16146 = vst [vmem:[#allocation68_spill] sm:$0xff] %v12016_v54  ;;  %v4041_v51 = vsub.f32 %v12008_v43, %v16151_v28  ;;  %v4036_v25 = vand.u32 4294901760, %v4035_v18  ;;  %v16153_v28 = vand.u32 4294901760, %v12024_v55 }
 0x229   :  { %3995 = vmatpush.msrb.mxu1 %v3994_v39  ;;  %4120 = vmatpush.msrb.mxu3 %v11869_v44  ;;  %v4017_v46 = vsub.f32 %v11949_v30, %v16145_v45  ;;  %v2341_v39 = vpop.f32.mrf.mxu3  ;;  %v4012_v45 = vand.u32 4294901760, %v4011_v60  ;;  %v12042_v54 = vsub.f32 %v228_v2, %v12014_v26  ;;  %v2395_v41 = vpop.f32.mrf.mxu0  ;;  %v16150_v2 = vand.u32 4294901760, %v12000_v57 }
 0x22a   :  { %3932 = vmatpush.msrb.mxu0 %v11934_v36  ;;  %4081 = vmatpush.msrb.mxu2 %v11937_v13  ;;  %v4298_v21 = vsub.f32 %v12024_v55, %v16153_v28  ;;  %v4042_v18 = vand.u32 4294901760, %v4041_v51  ;;  %v16155_v28 = vand.u32 4294901760, %v12037_v11  ;;  %v193_v51 = vld [vmem:[#allocation9 + $0x358] sm:$0xff] }
 0x22b   :  { %4001 = vmatpush.msrb.mxu1 %v4000_v49  ;;  %4122 = vmatpush.msrb.mxu3 %v11884_v53  ;;  %v218_v49 = vld [vmem:[#allocation9 + $0x420] sm:$0xff]  ;;  %v2240_v4 = vpop.f32.mrf.mxu2  ;;  %v4018_v60 = vand.u32 4294901760, %v4017_v46  ;;  %v4024_v46 = vand.u32 4294901760, %v4023_v48  ;;  %v208_v48 = vld [vmem:[#allocation9 + $0x3d0] sm:$0xff] }
 0x22c   :  { %3934 = vmatpush.msrb.mxu0 %v11946_v34  ;;  %4084 = vmatpush.msrb.mxu2 %v11949_v30  ;;  %v2342_v3 = vadd.f32 %v2341_v39, %v2240_v4  ;;  %v12049_v4 = vand.u32 4294901760, %v218_v49  ;;  %v4292_v39 = vsub.f32 %v12000_v57, %v16150_v2 }
 0x22d   :  { %4007 = vmatpush.msrb.mxu1 %v4006_v12  ;;  %4124 = vmatpush.msrb.mxu3 %v11908_v7  ;;  %v213_v12 = vld [vmem:[#allocation9 + $0x3f8] sm:$0xff] }
 0x22e   :  { %3936 = vmatpush.msrb.mxu0 %v11961_v37  ;;  %4087 = vmatpush.msrb.mxu2 %v11965_v1  ;;  %v12064_v9 = vand.u32 4294901760, %v213_v12  ;;  %v2396_v0 = vadd.f32 %v2395_v41, %v2342_v3  ;;  %v12075_v17 = vsub.f32 %v218_v49, %v12049_v4  ;;  %v12077_v3 = vand.u32 4294901760, %v208_v48 }
 0x22f   :  { %4013 = vmatpush.msrb.mxu1 %v4012_v45  ;;  %4126 = vmatpush.msrb.mxu3 %v11922_v16  ;;  %v12057_v45 = vsub.f32 %v223_v56, %v12029_v47  ;;  %v2434_v2 = vpop.f32.mrf.mxu1  ;;  %v16154_v41 = vand.u32 4294901760, %v11808_v15  ;;  %v4293_v29 = vand.u32 4294901760, %v4292_v39  ;;  %v4304_v49 = vsub.f32 %v12037_v11, %v16155_v28 }
 0x230   :  { %3938 = vmatpush.msrb.mxu0 %v11977_v23  ;;  %4090 = vmatpush.msrb.mxu2 %v11981_v63  ;;  %v12088_v56 = vsub.f32 %v213_v12, %v12064_v9  ;;  %v2435_v15 = vadd.f32 %v2434_v2, %v2396_v0  ;;  %v16157_v39 = vand.u32 4294901760, %v12042_v54  ;;  %v4299_v28 = vand.u32 4294901760, %v4298_v21 }
 0x231   :  { %4019 = vmatpush.msrb.mxu1 %v4018_v60  ;;  %4128 = vmatpush.msrb.mxu3 %v11934_v36  ;;  %v203_v60 = vld [vmem:[#allocation9 + $0x3a8] sm:$0xff]  ;;  %v16159_v2 = vand.u32 4294901760, %v12057_v45  ;;  %v4305_v21 = vand.u32 4294901760, %v4304_v49  ;;  %v12115_v12 = vand.u32 4294901760, %v193_v51 }
 0x232   :  { %4145 = vmatpush.msra.mxu0 %v16152_v27  ;;  %4093 = vmatpush.msrb.mxu2 %v11993_v6  ;;  %v12090_v8 = vand.u32 4294901760, %v203_v60 }
 0x233   :  { %4025 = vmatpush.msrb.mxu1 %v4024_v46  ;;  %4130 = vmatpush.msrb.mxu3 %v11946_v34  ;;  %v198_v46 = vld [vmem:[#allocation9 + $0x380] sm:$0xff]  ;;  %v2503_v27 = vpop.f32.mrf.mxu2 }
 0x234   :  { %4149 = vmatpush.msra.mxu0 %v16154_v41  ;;  %4096 = vmatpush.msrb.mxu2 %v12008_v43  ;;  %v16156_v41 = vand.u32 4294901760, %v11821_v35  ;;  %v12103_v0 = vand.u32 4294901760, %v198_v46  ;;  %v16158_v35 = vand.u32 4294901760, %v11832_v32  ;;  %v16160_v32 = vand.u32 4294901760, %v11850_v59 }
 0x235   :  { %4031 = vmatpush.msrb.mxu1 %v4030_v40  ;;  %4132 = vmatpush.msrb.mxu3 %v11961_v37  ;;  %v4310_v40 = vsub.f32 %v12042_v54, %v16157_v39  ;;  %v12101_v37 = vsub.f32 %v208_v48, %v12077_v3  ;;  %v4327_v39 = vand.u32 4294901760, %v12088_v56  ;;  %v12113_v48 = vsub.f32 %v203_v60, %v12090_v8 }
 0x236   :  { %4153 = vmatpush.msra.mxu0 %v16156_v41  ;;  %4249 = vmatpush.msra.mxu2 %v11972_v52  ;;  %v4316_v41 = vsub.f32 %v12057_v45, %v16159_v2  ;;  %v2540_v2 = vpop.f32.mrf.mxu3  ;;  %v12126_v49 = vsub.f32 %v198_v46, %v12103_v0  ;;  %v16162_v59 = vand.u32 4294901760, %v11865_v31  ;;  %v12139_v46 = vsub.f32 %v193_v51, %v12115_v12 }
 0x237   :  { %4037 = vmatpush.msrb.mxu1 %v4036_v25  ;;  %4134 = vmatpush.msrb.mxu3 %v11977_v23  ;;  %v188_v25 = vld [vmem:[#allocation9 + $0x330] sm:$0xff]  ;;  %v2504_v23 = vadd.f32 %v2503_v27, %v2435_v15  ;;  %v4333_v60 = vand.u32 4294901760, %v12101_v37  ;;  %v4328_v15 = vsub.f32 %v12088_v56, %v4327_v39 }
 0x238   :  { %4157 = vmatpush.msra.mxu0 %v16158_v35  ;;  %4251 = vmatpush.msra.mxu2 %v11995_v19  ;;  %v4311_v35 = vand.u32 4294901760, %v4310_v40  ;;  %v183_v19 = vld [vmem:[#allocation9 + $0x308] sm:$0xff]  ;;  %v12128_v27 = vand.u32 4294901760, %v188_v25  ;;  %v15780_v40 = vand.u32 4294901760, %v12113_v48  ;;  %v4345_v51 = vand.u32 4294901760, %v12126_v49 }
 0x239   :  { %4294 = vmatpush.msra.mxu3 %v4293_v29  ;;  %4043 = vmatpush.msrb.mxu1 %v4042_v18  ;;  %v16161_v29 = vand.u32 4294901760, %v12075_v17  ;;  %v2541_v31 = vadd.f32 %v2540_v2, %v2504_v23  ;;  %v173_v23 = vld [vmem:[#allocation9 + $0x2b8] sm:$0xff] }
 0x23a   :  { %4161 = vmatpush.msra.mxu0 %v16160_v32  ;;  %4253 = vmatpush.msra.mxu2 %v12010_v10  ;;  %v178_v32 = vld [vmem:[#allocation9 + $0x2e0] sm:$0xff]  ;;  %v4340_v2 = vsub.f32 %v12113_v48, %v15780_v40  ;;  %v4346_v40 = vsub.f32 %v12126_v49, %v4345_v51 }
 0x23b   :  { %4212 = vmatpush.msra.mxu1 %v11775_v20  ;;  %4300 = vmatpush.msra.mxu3 %v4299_v28  ;;  %v4322_v18 = vsub.f32 %v12075_v17, %v16161_v29  ;;  %v4317_v20 = vand.u32 4294901760, %v4316_v41  ;;  %v12141_v28 = vand.u32 4294901760, %v183_v19  ;;  %v16163_v29 = vand.u32 4294901760, %v11880_v58 }
 0x23c   :  { %4165 = vmatpush.msra.mxu0 %v16162_v59  ;;  %4255 = vmatpush.msra.mxu2 %v12014_v26  ;;  %v12152_v59 = vsub.f32 %v188_v25, %v12128_v27  ;;  %v16164_v58 = vand.u32 4294901760, %v11893_v22  ;;  %v16165_v22 = vand.u32 4294901760, %v11898_v5  ;;  %v4341_v5 = vand.u32 4294901760, %v4340_v2 }
 0x23d   :  { %4214 = vmatpush.msra.mxu1 %v11782_v62  ;;  %4306 = vmatpush.msra.mxu3 %v4305_v21  ;;  %v2581_v62 = vpop.f32.mrf.mxu0  ;;  %v4323_v41 = vand.u32 4294901760, %v4322_v18  ;;  %v4334_v21 = vsub.f32 %v12101_v37, %v4333_v60  ;;  %v4351_v18 = vand.u32 4294901760, %v12139_v46  ;;  %v12165_v25 = vsub.f32 %v183_v19, %v12141_v28 }
 0x23e   :  { %4169 = vmatpush.msra.mxu0 %v16163_v29  ;;  %4257 = vmatpush.msra.mxu2 %v12029_v47  ;;  %v2582_v29 = vadd.f32 %v2581_v62, %v2541_v31  ;;  %v4357_v19 = vand.u32 4294901760, %v12152_v59  ;;  %v16166_v31 = vand.u32 4294901760, %v11914_v42  ;;  %v16167_v42 = vand.u32 4294901760, %v11937_v13 }
 0x23f   :  { %4216 = vmatpush.msra.mxu1 %v11793_v50  ;;  %4312 = vmatpush.msra.mxu3 %v4311_v35  ;;  %v12157_v50 = vand.u32 4294901760, %v178_v32  ;;  %v4329_v35 = vand.u32 4294901760, %v4328_v15  ;;  %v4335_v15 = vand.u32 4294901760, %v4334_v21  ;;  %v4352_v62 = vsub.f32 %v12139_v46, %v4351_v18 }
 0x240   :  { %4173 = vmatpush.msra.mxu0 %v16164_v58  ;;  %4259 = vmatpush.msra.mxu2 %v12049_v4  ;;  %v168_v58 = vld [vmem:[#allocation9 + $0x290] sm:$0xff]  ;;  %v4358_v2 = vsub.f32 %v12152_v59, %v4357_v19 }
 0x241   :  { %4218 = vmatpush.msra.mxu1 %v11805_v24  ;;  %4318 = vmatpush.msra.mxu3 %v4317_v20  ;;  %v12170_v24 = vand.u32 4294901760, %v173_v23  ;;  %v2682_v20 = vpop.f32.mrf.mxu1  ;;  %v12188_v21 = vand.u32 4294901760, %v168_v58 }
 0x242   :  { %4177 = vmatpush.msra.mxu0 %v16165_v22  ;;  %4261 = vmatpush.msra.mxu2 %v12064_v9  ;;  %v2683_v22 = vadd.f32 %v2682_v20, %v2582_v29  ;;  %v16169_v20 = vand.u32 4294901760, %v11965_v1 }
 0x243   :  { %4220 = vmatpush.msra.mxu1 %v11817_v33  ;;  %4324 = vmatpush.msra.mxu3 %v4323_v41  ;;  %v12181_v33 = vsub.f32 %v178_v32, %v12157_v50  ;;  %v4363_v41 = vand.u32 4294901760, %v12165_v25  ;;  %v2736_v32 = vpop.f32.mrf.mxu2 }
 0x244   :  { %4181 = vmatpush.msra.mxu0 %v16166_v31  ;;  %4263 = vmatpush.msra.mxu2 %v12077_v3  ;;  %v16168_v31 = vand.u32 4294901760, %v11949_v30  ;;  %v2737_v29 = vadd.f32 %v2736_v32, %v2683_v22  ;;  %v2775_v30 = vpop.f32.mrf.mxu3 }
 0x245   :  { %4222 = vmatpush.msra.mxu1 %v11828_v14  ;;  %4330 = vmatpush.msra.mxu3 %v4329_v35  ;;  %v12194_v14 = vsub.f32 %v173_v23, %v12170_v24  ;;  %v4347_v35 = vand.u32 4294901760, %v4346_v40  ;;  %v4369_v13 = vand.u32 4294901760, %v12181_v33  ;;  %v4364_v23 = vsub.f32 %v12165_v25, %v4363_v41  ;;  %v2844_v1 = vpop.f32.mrf.mxu0 }
 0x246   :  { %4185 = vmatpush.msra.mxu0 %v16167_v42  ;;  %4265 = vmatpush.msra.mxu2 %v12090_v8  ;;  %v12209_v40 = vsub.f32 %v168_v58, %v12188_v21  ;;  %v2776_v22 = vadd.f32 %v2775_v30, %v2737_v29  ;;  %v16171_v42 = vand.u32 4294901760, %v11993_v6  ;;  %v16176_v30 = vand.u32 4294901760, %v12000_v57 }
 0x247   :  { %4224 = vmatpush.msra.mxu1 %v11846_v61  ;;  %4336 = vmatpush.msra.mxu3 %v4335_v15  ;;  %v4353_v61 = vand.u32 4294901760, %v4352_v62  ;;  %v4359_v15 = vand.u32 4294901760, %v4358_v2  ;;  %v4370_v58 = vsub.f32 %v12181_v33, %v4369_v13 }
 0x248   :  { %4189 = vmatpush.msra.mxu0 %v16168_v31  ;;  %4267 = vmatpush.msra.mxu2 %v12103_v0  ;;  %v4381_v62 = vand.u32 4294901760, %v12209_v40  ;;  %v2845_v32 = vadd.f32 %v2844_v1, %v2776_v22  ;;  %v16173_v31 = vld [vmem:[#allocation22_spill] sm:$0xff]  ;;  %v16179_v1 = vand.u32 4294901760, %v12024_v55  ;;  %v16180_v22 = vld [vmem:[#allocation65_spill] sm:$0xff] }
 0x249   :  { %4226 = vmatpush.msra.mxu1 %v11861_v38  ;;  %4342 = vmatpush.msra.mxu3 %v4341_v5  ;;  %v4375_v38 = vand.u32 4294901760, %v12194_v14  ;;  %v16170_v5 = vand.u32 4294901760, %v11981_v63  ;;  %v4371_v2 = vand.u32 4294901760, %v4370_v58  ;;  %v16178_v58 = vld [vmem:[#allocation18_spill] sm:$0xff] }
 0x24a   :  { %4193 = vmatpush.msra.mxu0 %v16169_v20  ;;  %4269 = vmatpush.msra.mxu2 %v12115_v12 }
 0x24b   :  { %4228 = vmatpush.msra.mxu1 %v11869_v44  ;;  %4348 = vmatpush.msra.mxu3 %v4347_v35  ;;  %v4365_v44 = vand.u32 4294901760, %v4364_v23  ;;  %v4376_v63 = vsub.f32 %v12194_v14, %v4375_v38  ;;  %v16172_v35 = vand.u32 4294901760, %v12008_v43  ;;  %v2922_v23 = vpop.f32.mrf.mxu2  ;;  %v16174_v43 = vld [vmem:[#allocation19_spill] sm:$0xff] }
 0x24c   :  { %4197 = vmatpush.msra.mxu0 %v16170_v5  ;;  %4271 = vmatpush.msra.mxu2 %v12128_v27  ;;  %v3023_v20 = vpop.f32.mrf.mxu3 }
 0x24d   :  { %4230 = vmatpush.msra.mxu1 %v11884_v53  ;;  %4354 = vmatpush.msra.mxu3 %v4353_v61  ;;  %v2881_v53 = vpop.f32.mrf.mxu1  ;;  %v4377_v61 = vand.u32 4294901760, %v4376_v63  ;;  %v3077_v5 = vpop.f32.mrf.mxu0  ;;  %v16182_v63 = vld [vmem:[#allocation67_spill] sm:$0xff] }
 0x24e   :  { %4201 = vmatpush.msra.mxu0 %v16171_v42  ;;  %4273 = vmatpush.msra.mxu2 %v12141_v28  ;;  %v2882_v6 = vadd.f32 %v2881_v53, %v2845_v32  ;;  %v16183_v32 = vld [vmem:[#allocation25_spill] sm:$0xff] }
 0x24f   :  { %4232 = vmatpush.msra.mxu1 %v11908_v7  ;;  %4360 = vmatpush.msra.mxu3 %v4359_v15  ;;  %v4382_v7 = vsub.f32 %v12209_v40, %v4381_v62  ;;  %v16177_v15 = vld [vmem:[#allocation63_spill] sm:$0xff] }
 0x250   :  { %4205 = vmatpush.msra.mxu0 %v16172_v35  ;;  %4275 = vmatpush.msra.mxu2 %v12157_v50  ;;  %v2923_v29 = vadd.f32 %v2922_v23, %v2882_v6  ;;  %v16184_v35 = vand.u32 4294901760, %v12042_v54  ;;  %v16187_v6 = vand.u32 4294901760, %v12075_v17 }
 0x251   :  { %4234 = vmatpush.msra.mxu1 %v11922_v16  ;;  %4366 = vmatpush.msra.mxu3 %v4365_v44  ;;  %v4383_v16 = vand.u32 4294901760, %v4382_v7 }
 0x252   :  { %3944 = vmatmul.f32.vlgmr.msrb.gmra.mxu0 %v16173_v31  ;;  %4277 = vmatpush.msra.mxu2 %v12170_v24  ;;  %v343_v31 = vld [vmem:[#allocation9 + $0x808] sm:$0xff] }
 0x253   :  { %4236 = vmatpush.msra.mxu1 %v11934_v36  ;;  %4392 = vmatpush.msrb.mxu0 %v12000_v57  ;;  %v16175_v36 = vld [vmem:[#allocation20_spill] sm:$0xff]  ;;  %v16181_v57 = vand.u32 4294901760, %v12037_v11 }
 0x254   :  { %4372 = vmatpush.msra.mxu3 %v4371_v2  ;;  %4099 = vmatmul.f32.vlgmr.msrb.gmra.mxu2 %v16174_v43  ;;  %v16186_v2 = vand.u32 4294901760, %v12057_v45  ;;  %v3222_v7 = vpop.f32.mrf.mxu3 }
 0x255   :  { %4395 = vmatpush.msrb.mxu0 %v12024_v55  ;;  %4238 = vmatpush.msra.mxu1 %v11946_v34  ;;  %v3024_v34 = vadd.f32 %v3023_v20, %v2923_v29  ;;  %v3116_v44 = vpop.f32.mrf.mxu1  ;;  %v3185_v55 = vpop.f32.mrf.mxu2  ;;  %v16189_v20 = vld [vmem:[#allocation23_spill] sm:$0xff] }
 0x256   :  { %4279 = vmatpush.msra.mxu2 %v12188_v21  ;;  %4378 = vmatpush.msra.mxu3 %v4377_v61 }
 0x257   :  { %4138 = vmatmul.f32.vlgmr.msrb.gmra.mxu3 %v16175_v36  ;;  %4398 = vmatpush.msrb.mxu0 %v12037_v11  ;;  %v3078_v42 = vadd.f32 %v3077_v5, %v3024_v34 }
 0x258   :  { %4486 = vmatpush.msrb.mxu2 %v16176_v30  ;;  %4240 = vmatpush.msra.mxu1 %v16177_v15  ;;  %v293_v15 = vld [vmem:[#allocation9 + $0x678] sm:$0xff] }
 0x259   :  { %4384 = vmatpush.msra.mxu3 %v4383_v16  ;;  %4045 = vmatmul.f32.vlgmr.msrb.gmra.mxu1 %v16178_v58  ;;  %v3117_v53 = vadd.f32 %v3116_v44, %v3078_v42  ;;  %v283_v42 = vld [vmem:[#allocation9 + $0x628] sm:$0xff] }
 0x25a   :  { %4401 = vmatpush.msrb.mxu0 %v12042_v54  ;;  %4490 = vmatpush.msrb.mxu2 %v16179_v1  ;;  %v3263_v54 = vpop.f32.mrf.mxu0  ;;  %v288_v1 = vld [vmem:[#allocation9 + $0x650] sm:$0xff] }
 0x25b   :  { %4553 = vmatpush.msrb.mxu3 %v11972_v52  ;;  %4242 = vmatpush.msra.mxu1 %v16180_v22  ;;  %v3186_v11 = vadd.f32 %v3185_v55, %v3117_v53  ;;  %v278_v53 = vld [vmem:[#allocation9 + $0x600] sm:$0xff] }
 0x25c   :  { %4404 = vmatpush.msrb.mxu0 %v12057_v45  ;;  %4494 = vmatpush.msrb.mxu2 %v16181_v57 }
 0x25d   :  { %4445 = vmatpush.msrb.mxu1 %v11972_v52  ;;  %4555 = vmatpush.msrb.mxu3 %v16182_v63  ;;  %v16185_v52 = vld [vmem:[#allocation21_spill] sm:$0xff]  ;;  %v3223_v61 = vadd.f32 %v3222_v7, %v3186_v11  ;;  %v12389_v11 = vand.u32 4294901760, %v283_v42  ;;  %v273_v7 = vld [vmem:[#allocation9 + $0x5d8] sm:$0xff] }
 0x25e   :  { %4285 = vmatmul.f32.vlgmr.msra.gmra.mxu2 %v16183_v32  ;;  %4407 = vmatpush.msrb.mxu0 %v12075_v17  ;;  %v16191_v32 = vld [vmem:[#allocation28_spill] sm:$0xff] }
 0x25f   :  { %4447 = vmatpush.msrb.mxu1 %v16182_v63  ;;  %4498 = vmatpush.msrb.mxu2 %v16184_v35  ;;  %v3264_v45 = vadd.f32 %v3263_v54, %v3223_v61  ;;  %v12402_v61 = vand.u32 4294901760, %v278_v53 }
 0x260   :  { %4557 = vmatpush.msrb.mxu3 %v12010_v10  ;;  %4207 = vmatmul.f32.vlgmr.msra.gmra.mxu0 %v16178_v58 }
 0x261   :  { %4386 = vmatmul.f32.vlgmr.msra.gmra.mxu3 %v16185_v52  ;;  %4410 = vmatpush.msrb.mxu0 %v12088_v56  ;;  %v16188_v56 = vand.u32 4294901760, %v12113_v48 }
 0x262   :  { %4449 = vmatpush.msrb.mxu1 %v12010_v10  ;;  %4502 = vmatpush.msrb.mxu2 %v16186_v2  ;;  %v3364_v10 = vpop.f32.mrf.mxu1 }
 0x263   :  { %4559 = vmatpush.msrb.mxu3 %v12014_v26  ;;  %4244 = vmatmul.f32.vlgmr.msra.gmra.mxu1 %v16178_v58  ;;  %v3365_v17 = vadd.f32 %v3364_v10, %v3264_v45  ;;  %v16190_v45 = vld [vmem:[#allocation24_spill] sm:$0xff] }
 0x264   :  { %4413 = vmatpush.msrb.mxu0 %v12101_v37  ;;  %4451 = vmatpush.msrb.mxu1 %v12014_v26  ;;  %v3418_v26 = vpop.f32.mrf.mxu2  ;;  %v318_v37 = vld [vmem:[#allocation9 + $0x740] sm:$0xff] }
 0x265   :  { %4506 = vmatpush.msrb.mxu2 %v16187_v6  ;;  %4561 = vmatpush.msrb.mxu3 %v12029_v47 }
 0x266   :  { %4416 = vmatpush.msrb.mxu0 %v12113_v48  ;;  %4453 = vmatpush.msrb.mxu1 %v12029_v47  ;;  %v323_v47 = vld [vmem:[#allocation9 + $0x768] sm:$0xff]  ;;  %v3457_v48 = vpop.f32.mrf.mxu3 }
 0x267   :  { %4510 = vmatpush.msrb.mxu2 %v4327_v39  ;;  %4563 = vmatpush.msrb.mxu3 %v12049_v4  ;;  %v313_v39 = vld [vmem:[#allocation9 + $0x718] sm:$0xff] }
 0x268   :  { %4419 = vmatpush.msrb.mxu0 %v12126_v49  ;;  %4455 = vmatpush.msrb.mxu1 %v12049_v4  ;;  %v12301_v4 = vand.u32 4294901760, %v323_v47  ;;  %v12315_v49 = vand.u32 4294901760, %v313_v39 }
 0x269   :  { %4514 = vmatpush.msrb.mxu2 %v4333_v60  ;;  %4565 = vmatpush.msrb.mxu3 %v12064_v9  ;;  %v308_v60 = vld [vmem:[#allocation9 + $0x6f0] sm:$0xff] }
 0x26a   :  { %4422 = vmatpush.msrb.mxu0 %v12139_v46  ;;  %4457 = vmatpush.msrb.mxu1 %v12064_v9  ;;  %v3419_v9 = vadd.f32 %v3418_v26, %v3365_v17  ;;  %v12318_v46 = vsub.f32 %v323_v47, %v12301_v4  ;;  %v268_v17 = vld [vmem:[#allocation9 + $0x5b0] sm:$0xff]  ;;  %v12413_v26 = vand.u32 4294901760, %v273_v7 }
 0x26b   :  { %4518 = vmatpush.msrb.mxu2 %v16188_v56  ;;  %4567 = vmatpush.msrb.mxu3 %v12077_v3 }
 0x26c   :  { %4425 = vmatpush.msrb.mxu0 %v12152_v59  ;;  %4459 = vmatpush.msrb.mxu1 %v12077_v3  ;;  %v12308_v3 = vand.u32 4294901760, %v318_v37 }
 0x26d   :  { %4522 = vmatpush.msrb.mxu2 %v4345_v51  ;;  %4569 = vmatpush.msrb.mxu3 %v12090_v8  ;;  %v303_v51 = vld [vmem:[#allocation9 + $0x6c8] sm:$0xff] }
 0x26e   :  { %4428 = vmatpush.msrb.mxu0 %v12165_v25  ;;  %4461 = vmatpush.msrb.mxu1 %v12090_v8  ;;  %v3526_v8 = vpop.f32.mrf.mxu0  ;;  %v12328_v59 = vsub.f32 %v318_v37, %v12308_v3  ;;  %v12332_v16 = vand.u32 4294901760, %v303_v51  ;;  %v12339_v25 = vsub.f32 %v313_v39, %v12315_v49  ;;  %v12417_v37 = vsub.f32 %v283_v42, %v12389_v11  ;;  %v263_v39 = vld [vmem:[#allocation9 + $0x588] sm:$0xff]  ;;  %v253_v42 = vld [vmem:[#allocation9 + $0x538] sm:$0xff] }
 0x26f   :  { %4526 = vmatpush.msrb.mxu2 %v4351_v18  ;;  %4571 = vmatpush.msrb.mxu3 %v12103_v0  ;;  %v3458_v18 = vadd.f32 %v3457_v48, %v3419_v9 }
 0x270   :  { %4431 = vmatpush.msrb.mxu0 %v12181_v33  ;;  %4463 = vmatpush.msrb.mxu1 %v12103_v0  ;;  %v12325_v0 = vand.u32 4294901760, %v308_v60  ;;  %v15792_v33 = vand.u32 4294901760, %v12328_v59  ;;  %v15791_v44 = vand.u32 4294901760, %v12339_v25 }
 0x271   :  { %4530 = vmatpush.msrb.mxu2 %v4357_v19  ;;  %4573 = vmatpush.msrb.mxu3 %v12115_v12  ;;  %v298_v19 = vld [vmem:[#allocation9 + $0x6a0] sm:$0xff]  ;;  %v3527_v23 = vadd.f32 %v3526_v8, %v3458_v18 }
 0x272   :  { %4434 = vmatpush.msrb.mxu0 %v12194_v14  ;;  %4465 = vmatpush.msrb.mxu1 %v12115_v12  ;;  %v15794_v12 = vand.u32 4294901760, %v12318_v46  ;;  %v12343_v30 = vand.u32 4294901760, %v298_v19  ;;  %v4645_v35 = vsub.f32 %v12339_v25, %v15791_v44 }
 0x273   :  { %4534 = vmatpush.msrb.mxu2 %v4363_v41  ;;  %4575 = vmatpush.msrb.mxu3 %v12128_v27 }
 0x274   :  { %4437 = vmatpush.msrb.mxu0 %v12209_v40  ;;  %4467 = vmatpush.msrb.mxu1 %v12128_v27  ;;  %v4633_v14 = vsub.f32 %v12318_v46, %v15794_v12  ;;  %v12371_v22 = vsub.f32 %v298_v19, %v12343_v30  ;;  %v4639_v40 = vsub.f32 %v12328_v59, %v15792_v33  ;;  %v4646_v47 = vand.u32 4294901760, %v4645_v35  ;;  %v258_v19 = vld [vmem:[#allocation9 + $0x560] sm:$0xff] }
 0x275   :  { %4538 = vmatpush.msrb.mxu2 %v4369_v13  ;;  %4577 = vmatpush.msrb.mxu3 %v12141_v28  ;;  %v3563_v41 = vpop.f32.mrf.mxu1  ;;  %v3604_v29 = vpop.f32.mrf.mxu2  ;;  %v12350_v13 = vsub.f32 %v308_v60, %v12325_v0  ;;  %v12425_v60 = vand.u32 4294901760, %v268_v17 }
 0x276   :  { %4440 = vmatmul.f32.vlgmr.msrb.gmra.mxu0 %v16189_v20  ;;  %4469 = vmatpush.msrb.mxu1 %v12141_v28  ;;  %v3564_v27 = vadd.f32 %v3563_v41, %v3527_v23  ;;  %v12355_v28 = vsub.f32 %v303_v51, %v12332_v16  ;;  %v4634_v55 = vand.u32 4294901760, %v4633_v14  ;;  %v4640_v54 = vand.u32 4294901760, %v4639_v40 }
 0x277   :  { %4590 = vmatpush.msra.mxu0 %v12301_v4  ;;  %4542 = vmatpush.msrb.mxu2 %v4375_v38  ;;  %v12363_v38 = vand.u32 4294901760, %v293_v15  ;;  %v15790_v57 = vand.u32 4294901760, %v12350_v13  ;;  %v12429_v51 = vsub.f32 %v278_v53, %v12402_v61  ;;  %v12437_v41 = vand.u32 4294901760, %v263_v39 }
 0x278   :  { %4579 = vmatpush.msrb.mxu3 %v12157_v50  ;;  %4471 = vmatpush.msrb.mxu1 %v12157_v50  ;;  %v3605_v5 = vadd.f32 %v3604_v29, %v3564_v27  ;;  %v3705_v34 = vpop.f32.mrf.mxu3  ;;  %v15788_v63 = vand.u32 4294901760, %v12355_v28  ;;  %v15783_v29 = vand.u32 4294901760, %v12417_v37  ;;  %v12441_v27 = vsub.f32 %v273_v7, %v12413_v26  ;;  %v403_v7 = vld [vmem:[#allocation9 + $0x9e8] sm:$0xff] }
 0x279   :  { %4592 = vmatpush.msra.mxu0 %v12308_v3  ;;  %4546 = vmatpush.msrb.mxu2 %v4381_v62  ;;  %v12378_v62 = vand.u32 4294901760, %v288_v1  ;;  %v12392_v2 = vsub.f32 %v293_v15, %v12363_v38  ;;  %v4651_v6 = vsub.f32 %v12350_v13, %v15790_v57  ;;  %v12453_v14 = vsub.f32 %v268_v17, %v12425_v60  ;;  %v373_v57 = vld [vmem:[#allocation9 + $0x8f8] sm:$0xff] }
 0x27a   :  { %4581 = vmatpush.msrb.mxu3 %v12170_v24  ;;  %4548 = vmatmul.f32.vlgmr.msrb.gmra.mxu2 %v16185_v52  ;;  %v12368_v50 = vadd.f32 %v3705_v34, %v3605_v5  ;;  %v12449_v34 = vand.u32 4294901760, %v258_v19  ;;  %v4681_v53 = vsub.f32 %v12417_v37, %v15783_v29  ;;  %v12463_v35 = vsub.f32 %v263_v39, %v12437_v41 }
 0x27b   :  { %4594 = vmatpush.msra.mxu0 %v12315_v49  ;;  %4733 = vmatpush.msra.mxu2 %v12318_v46  ;;  %v12405_v10 = vsub.f32 %v288_v1, %v12378_v62  ;;  %v15786_v56 = vand.u32 4294901760, %v12392_v2  ;;  %v4652_v48 = vand.u32 4294901760, %v4651_v6  ;;  %v15781_v1 = vand.u32 4294901760, %v12429_v51  ;;  %v248_v6 = vld [vmem:[#allocation9 + $0x510] sm:$0xff] }
 0x27c   :  { %4473 = vmatpush.msrb.mxu1 %v12170_v24  ;;  %4583 = vmatpush.msrb.mxu3 %v12188_v21  ;;  %v15787_v24 = vand.u32 4294901760, %v12371_v22  ;;  %v12479_v39 = vand.u32 4294901760, %v403_v7  ;;  %v12563_v36 = vand.u32 4294901760, %v373_v57 }
 0x27d   :  { %4585 = vmatmul.f32.vlgmr.msrb.gmra.mxu3 %v16185_v52  ;;  %4596 = vmatpush.msra.mxu0 %v12325_v0  ;;  %v15784_v8 = vand.u32 4294901760, %v12405_v10  ;;  %v4669_v23 = vsub.f32 %v12392_v2, %v15786_v56  ;;  %v4687_v17 = vsub.f32 %v12429_v51, %v15781_v1  ;;  %v393_v1 = vld [vmem:[#allocation9 + $0x998] sm:$0xff] }
 0x27e   :  { %4736 = vmatpush.msra.mxu2 %v12328_v59  ;;  %4786 = vmatpush.msra.mxu3 %v12301_v4  ;;  %v4663_v9 = vsub.f32 %v12371_v22, %v15787_v24  ;;  %v12512_v56 = vand.u32 4294901760, %v393_v1  ;;  %v383_v24 = vld [vmem:[#allocation9 + $0x948] sm:$0xff]  ;;  %v12590_v58 = vsub.f32 %v373_v57, %v12563_v36 }
 0x27f   :  { %4475 = vmatpush.msrb.mxu1 %v12188_v21  ;;  %4598 = vmatpush.msra.mxu0 %v12332_v16  ;;  %v4657_v21 = vsub.f32 %v12355_v28, %v15788_v63  ;;  %v4675_v5 = vsub.f32 %v12405_v10, %v15784_v8  ;;  %v4670_v40 = vand.u32 4294901760, %v4669_v23  ;;  %v388_v8 = vld [vmem:[#allocation9 + $0x970] sm:$0xff]  ;;  %v12529_v44 = vand.u32 4294901760, %v383_v24 }
 0x280   :  { %4479 = vmatmul.f32.vlgmr.msrb.gmra.mxu1 %v16190_v45  ;;  %4739 = vmatpush.msra.mxu2 %v12339_v25  ;;  %v4664_v15 = vand.u32 4294901760, %v4663_v9  ;;  %v12475_v9 = vsub.f32 %v258_v19, %v12449_v34  ;;  %v15789_v19 = vand.u32 4294901760, %v12463_v35 }
 0x281   :  { %4635 = vmatpush.msra.mxu1 %v4634_v55  ;;  %4788 = vmatpush.msra.mxu3 %v12308_v3  ;;  %v4658_v18 = vand.u32 4294901760, %v4657_v21  ;;  %v15782_v55 = vand.u32 4294901760, %v12441_v27  ;;  %v4676_v21 = vand.u32 4294901760, %v4675_v5 }
 0x282   :  { %4600 = vmatpush.msra.mxu0 %v12343_v30  ;;  %4742 = vmatpush.msra.mxu2 %v12350_v13 }
 0x283   :  { %4641 = vmatpush.msra.mxu1 %v4640_v54  ;;  %4790 = vmatpush.msra.mxu3 %v12315_v49  ;;  %v12467_v54 = vand.u32 4294901760, %v253_v42  ;;  %v4693_v23 = vsub.f32 %v12441_v27, %v15782_v55  ;;  %v15793_v55 = vand.u32 4294901760, %v12475_v9 }
 0x284   :  { %4602 = vmatpush.msra.mxu0 %v12363_v38  ;;  %4745 = vmatpush.msra.mxu2 %v12355_v28 }
 0x285   :  { %4647 = vmatpush.msra.mxu1 %v4646_v47  ;;  %4792 = vmatpush.msra.mxu3 %v12325_v0  ;;  %v15785_v47 = vand.u32 4294901760, %v12453_v14  ;;  %v12491_v5 = vsub.f32 %v253_v42, %v12467_v54  ;;  %v12503_v42 = vsub.f32 %v403_v7, %v12479_v39 }
 0x286   :  { %4604 = vmatpush.msra.mxu0 %v12378_v62  ;;  %4748 = vmatpush.msra.mxu2 %v12371_v22 }
 0x287   :  { %4653 = vmatpush.msra.mxu1 %v4652_v48  ;;  %4794 = vmatpush.msra.mxu3 %v12332_v16  ;;  %v398_v48 = vld [vmem:[#allocation9 + $0x9c0] sm:$0xff]  ;;  %v15796_v7 = vand.u32 4294901760, %v12491_v5 }
 0x288   :  { %4606 = vmatpush.msra.mxu0 %v12389_v11  ;;  %4751 = vmatpush.msra.mxu2 %v12392_v2  ;;  %v12498_v29 = vand.u32 4294901760, %v398_v48 }
 0x289   :  { %4659 = vmatpush.msra.mxu1 %v4658_v18  ;;  %4796 = vmatpush.msra.mxu3 %v12343_v30  ;;  %v4682_v18 = vand.u32 4294901760, %v4681_v53  ;;  %v4699_v53 = vsub.f32 %v12453_v14, %v15785_v47  ;;  %v4717_v12 = vsub.f32 %v12491_v5, %v15796_v7  ;;  %v368_v7 = vld [vmem:[#allocation9 + $0x8d0] sm:$0xff] }
 0x28a   :  { %4608 = vmatpush.msra.mxu0 %v12402_v61  ;;  %4754 = vmatpush.msra.mxu2 %v12405_v10  ;;  %v12576_v43 = vand.u32 4294901760, %v368_v7 }
 0x28b   :  { %4665 = vmatpush.msra.mxu1 %v4664_v15  ;;  %4798 = vmatpush.msra.mxu3 %v12363_v38  ;;  %v12485_v15 = vand.u32 4294901760, %v248_v6 }
 0x28c   :  { %4610 = vmatpush.msra.mxu0 %v12413_v26  ;;  %4757 = vmatpush.msra.mxu2 %v12417_v37  ;;  %v12603_v57 = vsub.f32 %v368_v7, %v12576_v43 }
 0x28d   :  { %4671 = vmatpush.msra.mxu1 %v4670_v40  ;;  %4800 = vmatpush.msra.mxu3 %v12378_v62  ;;  %v4688_v40 = vand.u32 4294901760, %v4687_v17  ;;  %v4705_v17 = vsub.f32 %v12463_v35, %v15789_v19  ;;  %v12510_v47 = vsub.f32 %v248_v6, %v12485_v15  ;;  %v3759_v63 = vpop.f32.mrf.mxu0  ;;  %v4711_v6 = vsub.f32 %v12475_v9, %v15793_v55 }
 0x28e   :  { %4612 = vmatpush.msra.mxu0 %v12425_v60  ;;  %4760 = vmatpush.msra.mxu2 %v12429_v51  ;;  %v12524_v19 = vsub.f32 %v398_v48, %v12498_v29  ;;  %v12534_v55 = vsub.f32 %v393_v1, %v12512_v56  ;;  %v3760_v48 = vadd.f32 %v3759_v63, %v12368_v50  ;;  %v16192_v50 = vand.u32 4294901760, %v12503_v42 }
 0x28f   :  { %4677 = vmatpush.msra.mxu1 %v4676_v21  ;;  %4802 = vmatpush.msra.mxu3 %v12389_v11  ;;  %v4694_v21 = vand.u32 4294901760, %v4693_v23  ;;  %v4700_v23 = vand.u32 4294901760, %v4699_v53  ;;  %v4706_v53 = vand.u32 4294901760, %v4705_v17  ;;  %v4712_v17 = vand.u32 4294901760, %v4711_v6 }
 0x290   :  { %4614 = vmatpush.msra.mxu0 %v12437_v41  ;;  %4763 = vmatpush.msra.mxu2 %v12441_v27  ;;  %v4974_v63 = vsub.f32 %v12503_v42, %v16192_v50  ;;  %v16193_v6 = vand.u32 4294901760, %v12318_v46  ;;  %v16194_v1 = vand.u32 4294901760, %v12510_v47  ;;  %v363_v46 = vld [vmem:[#allocation9 + $0x8a8] sm:$0xff] }
 0x291   :  { %4683 = vmatpush.msra.mxu1 %v4682_v18  ;;  %4804 = vmatpush.msra.mxu3 %v12402_v61  ;;  %v12517_v18 = vand.u32 4294901760, %v388_v8 }
 0x292   :  { %4616 = vmatpush.msra.mxu0 %v12449_v34  ;;  %4766 = vmatpush.msra.mxu2 %v12453_v14  ;;  %v4723_v20 = vsub.f32 %v12510_v47, %v16194_v1  ;;  %v16196_v1 = vand.u32 4294901760, %v12524_v19 }
 0x293   :  { %4689 = vmatpush.msra.mxu1 %v4688_v40  ;;  %4806 = vmatpush.msra.mxu3 %v12413_v26  ;;  %v378_v40 = vld [vmem:[#allocation9 + $0x920] sm:$0xff] }
 0x294   :  { %4618 = vmatpush.msra.mxu0 %v12467_v54  ;;  %4769 = vmatpush.msra.mxu2 %v12463_v35  ;;  %v12547_v45 = vand.u32 4294901760, %v378_v40 }
 0x295   :  { %4695 = vmatpush.msra.mxu1 %v4694_v21  ;;  %4808 = vmatpush.msra.mxu3 %v12425_v60  ;;  %v12543_v21 = vsub.f32 %v388_v8, %v12517_v18 }
 0x296   :  { %4620 = vmatpush.msra.mxu0 %v12485_v15  ;;  %4772 = vmatpush.msra.mxu2 %v12475_v9 }
 0x297   :  { %4701 = vmatpush.msra.mxu1 %v4700_v23  ;;  %4810 = vmatpush.msra.mxu3 %v12437_v41  ;;  %v3798_v33 = vpop.f32.mrf.mxu1  ;;  %v3867_v52 = vpop.f32.mrf.mxu2  ;;  %v12555_v23 = vsub.f32 %v383_v24, %v12529_v44 }
 0x298   :  { %4626 = vmatmul.f32.vlgmr.msra.gmra.mxu0 %v16191_v32  ;;  %4775 = vmatpush.msra.mxu2 %v12491_v5  ;;  %v3799_v8 = vadd.f32 %v3798_v33, %v3760_v48  ;;  %v4718_v33 = vand.u32 4294901760, %v4717_v12  ;;  %v12574_v32 = vsub.f32 %v378_v40, %v12547_v45  ;;  %v4975_v12 = vand.u32 4294901760, %v4974_v63 }
 0x299   :  { %4827 = vmatpush.msrb.mxu0 %v16193_v6  ;;  %4707 = vmatpush.msra.mxu1 %v4706_v53  ;;  %v16195_v53 = vand.u32 4294901760, %v12328_v59  ;;  %v4980_v6 = vsub.f32 %v12524_v19, %v16196_v1  ;;  %v4724_v1 = vand.u32 4294901760, %v4723_v20  ;;  %v16200_v40 = vand.u32 4294901760, %v12534_v55 }
 0x29a   :  { %4812 = vmatpush.msra.mxu3 %v12449_v34  ;;  %4778 = vmatpush.msra.mxu2 %v12510_v47  ;;  %v3868_v24 = vadd.f32 %v3867_v52, %v3799_v8  ;;  %v3904_v50 = vpop.f32.mrf.mxu3  ;;  %v16197_v52 = vld [vmem:[#allocation17_spill] sm:$0xff]  ;;  %v16201_v63 = vand.u32 4294901760, %v12543_v21  ;;  %v16203_v20 = vand.u32 4294901760, %v12350_v13  ;;  %v16205_v13 = vand.u32 4294901760, %v12355_v28 }
 0x29b   :  { %4831 = vmatpush.msrb.mxu0 %v16195_v53  ;;  %4713 = vmatpush.msra.mxu1 %v4712_v17  ;;  %v358_v53 = vld [vmem:[#allocation9 + $0x880] sm:$0xff]  ;;  %v16199_v17 = vand.u32 4294901760, %v12339_v25  ;;  %v4986_v48 = vsub.f32 %v12534_v55, %v16200_v40  ;;  %v16207_v28 = vand.u32 4294901760, %v12574_v32 }
 0x29c   :  { %4814 = vmatpush.msra.mxu3 %v12467_v54  ;;  %4781 = vmatmul.f32.vlgmr.msra.gmra.mxu2 %v16197_v52  ;;  %v12580_v8 = vadd.f32 %v3904_v50, %v3868_v24  ;;  %v12592_v52 = vand.u32 4294901760, %v363_v46  ;;  %v4992_v25 = vsub.f32 %v12543_v21, %v16201_v63  ;;  %v353_v24 = vld [vmem:[#allocation9 + $0x858] sm:$0xff]  ;;  %v12605_v59 = vand.u32 4294901760, %v358_v53 }
 0x29d   :  { %4835 = vmatpush.msrb.mxu0 %v16199_v17  ;;  %4931 = vmatpush.msrb.mxu2 %v12479_v39  ;;  %v16202_v50 = vld [vmem:[#allocation26_spill] sm:$0xff]  ;;  %v4981_v17 = vand.u32 4294901760, %v4980_v6  ;;  %v4987_v6 = vand.u32 4294901760, %v4986_v48  ;;  %v12617_v40 = vand.u32 4294901760, %v353_v24  ;;  %v5004_v48 = vsub.f32 %v12574_v32, %v16207_v28 }
 0x29e   :  { %16198 = vst [vmem:[#allocation63_spill] sm:$0xff] %v12580_v8  ;;  %4719 = vmatpush.msra.mxu1 %v4718_v33  ;;  %4816 = vmatpush.msra.mxu3 %v12485_v15  ;;  %v16204_v33 = vand.u32 4294901760, %v12555_v23  ;;  %v348_v8 = vld [vmem:[#allocation9 + $0x830] sm:$0xff]  ;;  %v12615_v7 = vsub.f32 %v363_v46, %v12592_v52  ;;  %v12627_v46 = vsub.f32 %v358_v53, %v12605_v59  ;;  %v12642_v28 = vand.u32 4294901760, %v343_v31 }
 0x29f   :  { %4820 = vmatmul.f32.vlgmr.msra.gmra.mxu3 %v16202_v50  ;;  %4839 = vmatpush.msrb.mxu0 %v16203_v20  ;;  %v15798_v20 = vand.u32 4294901760, %v12590_v58  ;;  %v16206_v50 = vld [vmem:[#allocation16_spill] sm:$0xff]  ;;  %v12640_v53 = vsub.f32 %v353_v24, %v12617_v40 }
 0x2a0   :  { %4933 = vmatpush.msrb.mxu2 %v12498_v29  ;;  %4976 = vmatpush.msrb.mxu3 %v4975_v12  ;;  %v4998_v63 = vsub.f32 %v12555_v23, %v16204_v33  ;;  %v4993_v12 = vand.u32 4294901760, %v4992_v25  ;;  %v12629_v33 = vand.u32 4294901760, %v348_v8 }
 0x2a1   :  { %4725 = vmatpush.msra.mxu1 %v4724_v1  ;;  %4843 = vmatpush.msrb.mxu0 %v16205_v13  ;;  %v16208_v13 = vand.u32 4294901760, %v12371_v22  ;;  %v338_v1 = vld [vmem:[#allocation9 + $0x7e0] sm:$0xff]  ;;  %v16209_v22 = vand.u32 4294901760, %v12392_v2 }
 0x2a2   :  { %4727 = vmatmul.f32.vlgmr.msra.gmra.mxu1 %v16206_v50  ;;  %4935 = vmatpush.msrb.mxu2 %v12512_v56  ;;  %v4999_v25 = vand.u32 4294901760, %v4998_v63  ;;  %v16210_v63 = vand.u32 4294901760, %v12603_v57  ;;  %v12653_v24 = vsub.f32 %v348_v8, %v12629_v33  ;;  %v12658_v2 = vand.u32 4294901760, %v338_v1 }
 0x2a3   :  { %4894 = vmatpush.msrb.mxu1 %v12301_v4  ;;  %4982 = vmatpush.msrb.mxu3 %v4981_v17  ;;  %v5010_v4 = vsub.f32 %v12590_v58, %v15798_v20  ;;  %v333_v20 = vld [vmem:[#allocation9 + $0x7b8] sm:$0xff]  ;;  %v16211_v17 = vand.u32 4294901760, %v12405_v10  ;;  %v12666_v8 = vsub.f32 %v343_v31, %v12642_v28  ;;  %v16213_v10 = vand.u32 4294901760, %v12417_v37 }
 0x2a4   :  { %4847 = vmatpush.msrb.mxu0 %v16208_v13  ;;  %4937 = vmatpush.msrb.mxu2 %v12517_v18  ;;  %v5027_v13 = vand.u32 4294901760, %v12627_v46  ;;  %v16214_v31 = vand.u32 4294901760, %v12429_v51  ;;  %v12682_v37 = vsub.f32 %v338_v1, %v12658_v2  ;;  %v16215_v51 = vand.u32 4294901760, %v12441_v27 }
 0x2a5   :  { %4896 = vmatpush.msrb.mxu1 %v12308_v3  ;;  %4988 = vmatpush.msrb.mxu3 %v4987_v6  ;;  %v5005_v3 = vand.u32 4294901760, %v5004_v48  ;;  %v5016_v6 = vsub.f32 %v12603_v57, %v16210_v63  ;;  %v328_v63 = vld [vmem:[#allocation9 + $0x790] sm:$0xff] }
 0x2a6   :  { %4851 = vmatpush.msrb.mxu0 %v16209_v22  ;;  %4939 = vmatpush.msrb.mxu2 %v12529_v44  ;;  %v5033_v22 = vand.u32 4294901760, %v12640_v53  ;;  %v5051_v27 = vand.u32 4294901760, %v12682_v37 }
 0x2a7   :  { %4898 = vmatpush.msrb.mxu1 %v12315_v49  ;;  %4994 = vmatpush.msrb.mxu3 %v4993_v12  ;;  %v5011_v49 = vand.u32 4294901760, %v5010_v4  ;;  %v16212_v12 = vand.u32 4294901760, %v12615_v7  ;;  %v5039_v4 = vand.u32 4294901760, %v12653_v24 }
 0x2a8   :  { %4855 = vmatpush.msrb.mxu0 %v16211_v17  ;;  %4941 = vmatpush.msrb.mxu2 %v12547_v45  ;;  %v12671_v17 = vand.u32 4294901760, %v333_v20 }
 0x2a9   :  { %4900 = vmatpush.msrb.mxu1 %v12325_v0  ;;  %5000 = vmatpush.msrb.mxu3 %v4999_v25  ;;  %v5022_v48 = vsub.f32 %v12615_v7, %v16212_v12  ;;  %v5017_v0 = vand.u32 4294901760, %v5016_v6  ;;  %v5028_v25 = vsub.f32 %v12627_v46, %v5027_v13  ;;  %v12684_v12 = vand.u32 4294901760, %v328_v63 }
 0x2aa   :  { %4859 = vmatpush.msrb.mxu0 %v16213_v10  ;;  %4943 = vmatpush.msrb.mxu2 %v12563_v36  ;;  %v5045_v6 = vand.u32 4294901760, %v12666_v8  ;;  %v12695_v1 = vsub.f32 %v333_v20, %v12671_v17 }
 0x2ab   :  { %4902 = vmatpush.msrb.mxu1 %v12332_v16  ;;  %5006 = vmatpush.msrb.mxu3 %v5005_v3  ;;  %v5023_v16 = vand.u32 4294901760, %v5022_v48  ;;  %v5034_v3 = vsub.f32 %v12640_v53, %v5033_v22  ;;  %v16216_v48 = vand.u32 4294901760, %v12453_v14  ;;  %v12706_v10 = vsub.f32 %v328_v63, %v12684_v12 }
 0x2ac   :  { %4863 = vmatpush.msrb.mxu0 %v16214_v31  ;;  %4945 = vmatpush.msrb.mxu2 %v12576_v43  ;;  %v5046_v20 = vsub.f32 %v12666_v8, %v5045_v6  ;;  %v5057_v14 = vand.u32 4294901760, %v12695_v1 }
 0x2ad   :  { %4904 = vmatpush.msrb.mxu1 %v12343_v30  ;;  %5012 = vmatpush.msrb.mxu3 %v5011_v49  ;;  %v5029_v30 = vand.u32 4294901760, %v5028_v25  ;;  %v5040_v49 = vsub.f32 %v12653_v24, %v5039_v4  ;;  %v16218_v25 = vand.u32 4294901760, %v12475_v9  ;;  %v16220_v9 = vand.u32 4294901760, %v12510_v47 }
 0x2ae   :  { %4867 = vmatpush.msrb.mxu0 %v16215_v51  ;;  %4947 = vmatpush.msrb.mxu2 %v12592_v52  ;;  %v5047_v31 = vand.u32 4294901760, %v5046_v20  ;;  %v16222_v47 = vand.u32 4294901760, %v12503_v42  ;;  %v16224_v51 = vand.u32 4294901760, %v12524_v19 }
 0x2af   :  { %4906 = vmatpush.msrb.mxu1 %v12363_v38  ;;  %5018 = vmatpush.msrb.mxu3 %v5017_v0  ;;  %v5035_v38 = vand.u32 4294901760, %v5034_v3  ;;  %v16217_v0 = vand.u32 4294901760, %v12463_v35  ;;  %v5041_v63 = vand.u32 4294901760, %v5040_v49  ;;  %v5063_v35 = vand.u32 4294901760, %v12706_v10 }
 0x2b0   :  { %4871 = vmatpush.msrb.mxu0 %v16216_v48  ;;  %4949 = vmatpush.msrb.mxu2 %v12605_v59 }
 0x2b1   :  { %4908 = vmatpush.msrb.mxu1 %v12378_v62  ;;  %5024 = vmatpush.msrb.mxu3 %v5023_v16  ;;  %v5052_v62 = vsub.f32 %v12682_v37, %v5051_v27  ;;  %v16219_v16 = vand.u32 4294901760, %v12491_v5  ;;  %v5064_v5 = vsub.f32 %v12706_v10, %v5063_v35 }
 0x2b2   :  { %4875 = vmatpush.msrb.mxu0 %v16217_v0  ;;  %4951 = vmatpush.msrb.mxu2 %v12617_v40 }
 0x2b3   :  { %4910 = vmatpush.msrb.mxu1 %v12389_v11  ;;  %5030 = vmatpush.msrb.mxu3 %v5029_v30  ;;  %v5058_v11 = vsub.f32 %v12695_v1, %v5057_v14  ;;  %v453_v30 = vld [vmem:[#allocation9 + $0xb78] sm:$0xff] }
 0x2b4   :  { %4879 = vmatpush.msrb.mxu0 %v16218_v25  ;;  %4953 = vmatpush.msrb.mxu2 %v12629_v33 }
 0x2b5   :  { %4912 = vmatpush.msrb.mxu1 %v12402_v61  ;;  %5036 = vmatpush.msrb.mxu3 %v5035_v38  ;;  %v5053_v61 = vand.u32 4294901760, %v5052_v62  ;;  %v5059_v3 = vand.u32 4294901760, %v5058_v11  ;;  %v448_v38 = vld [vmem:[#allocation9 + $0xb50] sm:$0xff]  ;;  %v438_v11 = vld [vmem:[#allocation9 + $0xb00] sm:$0xff] }
 0x2b6   :  { %4883 = vmatpush.msrb.mxu0 %v16219_v16  ;;  %4955 = vmatpush.msrb.mxu2 %v12642_v28 }
 0x2b7   :  { %4914 = vmatpush.msrb.mxu1 %v12413_v26  ;;  %5042 = vmatpush.msrb.mxu3 %v5041_v63  ;;  %v5065_v26 = vand.u32 4294901760, %v5064_v5  ;;  %v443_v63 = vld [vmem:[#allocation9 + $0xb28] sm:$0xff] }
 0x2b8   :  { %4887 = vmatpush.msrb.mxu0 %v16220_v9  ;;  %4957 = vmatpush.msrb.mxu2 %v12658_v2 }
 0x2b9   :  { %4916 = vmatpush.msrb.mxu1 %v12425_v60  ;;  %5048 = vmatpush.msrb.mxu3 %v5047_v31  ;;  %v16221_v60 = vld [vmem:[#allocation32_spill] sm:$0xff] }
 0x2ba   :  { %4889 = vmatmul.f32.vlgmr.msrb.gmra.mxu0 %v16206_v50  ;;  %4959 = vmatpush.msrb.mxu2 %v12671_v17 }
 0x2bb   :  { %5074 = vmatpush.msra.mxu0 %v12503_v42  ;;  %4918 = vmatpush.msrb.mxu1 %v12437_v41  ;;  %v16223_v41 = vld [vmem:[#allocation29_spill] sm:$0xff] }
 0x2bc   :  { %5054 = vmatpush.msrb.mxu3 %v5053_v61  ;;  %4961 = vmatpush.msrb.mxu2 %v12684_v12  ;;  %v468_v42 = vld [vmem:[#allocation9 + $0xbf0] sm:$0xff]  ;;  %v12884_v61 = vand.u32 4294901760, %v443_v63 }
 0x2bd   :  { %5077 = vmatpush.msra.mxu0 %v12524_v19  ;;  %4920 = vmatpush.msrb.mxu1 %v12449_v34  ;;  %v16225_v34 = vand.u32 4294901760, %v12534_v55  ;;  %v473_v19 = vld [vmem:[#allocation9 + $0xc18] sm:$0xff] }
 0x2be   :  { %5060 = vmatpush.msrb.mxu3 %v5059_v3  ;;  %4967 = vmatmul.f32.vlgmr.msrb.gmra.mxu2 %v16221_v60 }
 0x2bf   :  { %5080 = vmatpush.msra.mxu0 %v12534_v55  ;;  %5168 = vmatpush.msra.mxu2 %v16222_v47  ;;  %v16228_v55 = vand.u32 4294901760, %v12574_v32 }
 0x2c0   :  { %4922 = vmatpush.msrb.mxu1 %v12467_v54  ;;  %5066 = vmatpush.msrb.mxu3 %v5065_v26  ;;  %v16226_v54 = vand.u32 4294901760, %v12543_v21 }
 0x2c1   :  { %5068 = vmatmul.f32.vlgmr.msrb.gmra.mxu3 %v16223_v41  ;;  %5083 = vmatpush.msra.mxu0 %v12543_v21  ;;  %v12815_v21 = vand.u32 4294901760, %v473_v19 }
 0x2c2   :  { %5172 = vmatpush.msra.mxu2 %v16224_v51  ;;  %5235 = vmatpush.msra.mxu3 %v12479_v39  ;;  %v433_v51 = vld [vmem:[#allocation9 + $0xad8] sm:$0xff] }
 0x2c3   :  { %4924 = vmatpush.msrb.mxu1 %v12485_v15  ;;  %5086 = vmatpush.msra.mxu0 %v12555_v23  ;;  %v16227_v15 = vand.u32 4294901760, %v12555_v23 }
 0x2c4   :  { %4926 = vmatmul.f32.vlgmr.msrb.gmra.mxu1 %v16206_v50  ;;  %5176 = vmatpush.msra.mxu2 %v16225_v34  ;;  %v109_v50 = vld [vmem:[#allocation9 + $0xb8] sm:$0xff] }
 0x2c5   :  { %5127 = vmatpush.msra.mxu1 %v12479_v39  ;;  %5237 = vmatpush.msra.mxu3 %v12498_v29  ;;  %v16231_v39 = vand.u32 4294901760, %v12615_v7 }
 0x2c6   :  { %5089 = vmatpush.msra.mxu0 %v12574_v32  ;;  %5180 = vmatpush.msra.mxu2 %v16226_v54  ;;  %v483_v32 = vld [vmem:[#allocation9 + $0xc68] sm:$0xff]  ;;  %v12897_v54 = vand.u32 4294901760, %v438_v11 }
 0x2c7   :  { %5129 = vmatpush.msra.mxu1 %v12498_v29  ;;  %5239 = vmatpush.msra.mxu3 %v12512_v56  ;;  %v16229_v29 = vand.u32 4294901760, %v12590_v58 }
 0x2c8   :  { %5092 = vmatpush.msra.mxu0 %v12590_v58  ;;  %5184 = vmatpush.msra.mxu2 %v16227_v15  ;;  %v478_v58 = vld [vmem:[#allocation9 + $0xc40] sm:$0xff] }
 0x2c9   :  { %5131 = vmatpush.msra.mxu1 %v12512_v56  ;;  %5241 = vmatpush.msra.mxu3 %v12517_v18  ;;  %v16230_v56 = vand.u32 4294901760, %v12603_v57 }
 0x2ca   :  { %5095 = vmatpush.msra.mxu0 %v12603_v57  ;;  %5188 = vmatpush.msra.mxu2 %v16228_v55 }
 0x2cb   :  { %5133 = vmatpush.msra.mxu1 %v12517_v18  ;;  %5243 = vmatpush.msra.mxu3 %v12529_v44 }
 0x2cc   :  { %5098 = vmatpush.msra.mxu0 %v12615_v7  ;;  %5192 = vmatpush.msra.mxu2 %v16229_v29  ;;  %v16233_v29 = vld [vmem:[#allocation31_spill] sm:$0xff] }
 0x2cd   :  { %5135 = vmatpush.msra.mxu1 %v12529_v44  ;;  %5245 = vmatpush.msra.mxu3 %v12547_v45  ;;  %v12796_v44 = vand.u32 4294901760, %v483_v32 }
 0x2ce   :  { %5101 = vmatpush.msra.mxu0 %v12627_v46  ;;  %5196 = vmatpush.msra.mxu2 %v16230_v56  ;;  %v428_v56 = vld [vmem:[#allocation9 + $0xab0] sm:$0xff] }
 0x2cf   :  { %5137 = vmatpush.msra.mxu1 %v12547_v45  ;;  %5247 = vmatpush.msra.mxu3 %v12563_v36  ;;  %v3945_v45 = vpop.f32.mrf.mxu0 }
 0x2d0   :  { %5104 = vmatpush.msra.mxu0 %v12640_v53  ;;  %5200 = vmatpush.msra.mxu2 %v16231_v39  ;;  %v458_v53 = vld [vmem:[#allocation9 + $0xba0] sm:$0xff]  ;;  %v12910_v39 = vand.u32 4294901760, %v433_v51 }
 0x2d1   :  { %5139 = vmatpush.msra.mxu1 %v12563_v36  ;;  %5249 = vmatpush.msra.mxu3 %v12576_v43  ;;  %v12803_v36 = vand.u32 4294901760, %v478_v58 }
 0x2d2   :  { %5107 = vmatpush.msra.mxu0 %v12653_v24  ;;  %5204 = vmatpush.msra.mxu2 %v5027_v13 }
 0x2d3   :  { %5141 = vmatpush.msra.mxu1 %v12576_v43  ;;  %5251 = vmatpush.msra.mxu3 %v12592_v52  ;;  %v12811_v43 = vsub.f32 %v483_v32, %v12796_v44  ;;  %v12821_v7 = vsub.f32 %v478_v58, %v12803_v36 }
 0x2d4   :  { %5110 = vmatpush.msra.mxu0 %v12666_v8  ;;  %5208 = vmatpush.msra.mxu2 %v5033_v22 }
 0x2d5   :  { %5143 = vmatpush.msra.mxu1 %v12592_v52  ;;  %5253 = vmatpush.msra.mxu3 %v12605_v59  ;;  %v463_v52 = vld [vmem:[#allocation9 + $0xbc8] sm:$0xff]  ;;  %v15813_v24 = vand.u32 4294901760, %v12811_v43 }
 0x2d6   :  { %5113 = vmatpush.msra.mxu0 %v12682_v37  ;;  %5212 = vmatpush.msra.mxu2 %v5039_v4  ;;  %v4046_v18 = vpop.f32.mrf.mxu1  ;;  %v12830_v13 = vand.u32 4294901760, %v463_v52  ;;  %v16232_v4 = vld [vmem:[#allocation30_spill] sm:$0xff]  ;;  %v12841_v37 = vand.u32 4294901760, %v458_v53 }
 0x2d7   :  { %5145 = vmatpush.msra.mxu1 %v12605_v59  ;;  %5255 = vmatpush.msra.mxu3 %v12617_v40  ;;  %v4047_v23 = vadd.f32 %v4046_v18, %v3945_v45  ;;  %v4100_v57 = vpop.f32.mrf.mxu2  ;;  %v12825_v59 = vand.u32 4294901760, %v468_v42  ;;  %v12914_v45 = vsub.f32 %v443_v63, %v12884_v61  ;;  %v413_v63 = vld [vmem:[#allocation9 + $0xa38] sm:$0xff] }
 0x2d8   :  { %5116 = vmatpush.msra.mxu0 %v12695_v1  ;;  %5216 = vmatpush.msra.mxu2 %v5045_v6  ;;  %v15811_v6 = vand.u32 4294901760, %v12821_v7  ;;  %v5315_v1 = vsub.f32 %v12811_v43, %v15813_v24  ;;  %v12856_v48 = vsub.f32 %v463_v52, %v12830_v13  ;;  %v12869_v0 = vsub.f32 %v458_v53, %v12841_v37  ;;  %v418_v53 = vld [vmem:[#allocation9 + $0xa60] sm:$0xff]  ;;  %v129_v24 = vld [vmem:[#allocation9 + $0x158] sm:$0xff] }
 0x2d9   :  { %5147 = vmatpush.msra.mxu1 %v12617_v40  ;;  %5257 = vmatpush.msra.mxu3 %v12629_v33  ;;  %v4101_v46 = vadd.f32 %v4100_v57, %v4047_v23  ;;  %v12836_v40 = vsub.f32 %v473_v19, %v12815_v21  ;;  %v12922_v23 = vand.u32 4294901760, %v428_v56  ;;  %v12926_v57 = vsub.f32 %v438_v11, %v12897_v54 }
 0x2da   :  { %5119 = vmatpush.msra.mxu0 %v12706_v10  ;;  %5220 = vmatpush.msra.mxu2 %v5051_v27  ;;  %v4139_v22 = vpop.f32.mrf.mxu3  ;;  %v5321_v10 = vsub.f32 %v12821_v7, %v15811_v6  ;;  %v5316_v31 = vand.u32 4294901760, %v5315_v1  ;;  %v15808_v16 = vand.u32 4294901760, %v12856_v48  ;;  %v15806_v26 = vand.u32 4294901760, %v12869_v0 }
 0x2db   :  { %5149 = vmatpush.msra.mxu1 %v12629_v33  ;;  %5259 = vmatpush.msra.mxu3 %v12642_v28  ;;  %v4140_v8 = vadd.f32 %v4139_v22, %v4101_v46  ;;  %v12847_v33 = vsub.f32 %v468_v42, %v12825_v59  ;;  %v15810_v20 = vand.u32 4294901760, %v12836_v40  ;;  %v423_v42 = vld [vmem:[#allocation9 + $0xa88] sm:$0xff] }
 0x2dc   :  { %5122 = vmatmul.f32.vlgmr.msra.gmra.mxu0 %v16232_v4  ;;  %5224 = vmatpush.msra.mxu2 %v5057_v14  ;;  %v5322_v3 = vand.u32 4294901760, %v5321_v10  ;;  %v5345_v19 = vsub.f32 %v12869_v0, %v15806_v26  ;;  %v15800_v10 = vand.u32 4294901760, %v12926_v57  ;;  %v139_v26 = vld [vmem:[#allocation9 + $0x1a8] sm:$0xff]  ;;  %v13073_v4 = vand.u32 4294901760, %v129_v24 }
 0x2dd   :  { %5272 = vmatpush.msrb.mxu0 %v12796_v44  ;;  %5151 = vmatpush.msra.mxu1 %v12642_v28  ;;  %v4208_v49 = vpop.f32.mrf.mxu0  ;;  %v12860_v28 = vand.u32 4294901760, %v453_v30  ;;  %v15809_v25 = vand.u32 4294901760, %v12847_v33  ;;  %v5327_v9 = vsub.f32 %v12836_v40, %v15810_v20  ;;  %v13044_v6 = vand.u32 4294901760, %v139_v26 }
 0x2de   :  { %5261 = vmatpush.msra.mxu3 %v12658_v2  ;;  %5228 = vmatpush.msra.mxu2 %v5063_v35  ;;  %v4209_v27 = vadd.f32 %v4208_v49, %v4140_v8  ;;  %v12934_v8 = vand.u32 4294901760, %v423_v42  ;;  %v12938_v49 = vsub.f32 %v433_v51, %v12910_v39  ;;  %v5346_v1 = vand.u32 4294901760, %v5345_v19 }
 0x2df   :  { %5274 = vmatpush.msrb.mxu0 %v12803_v36  ;;  %5153 = vmatpush.msra.mxu1 %v12658_v2  ;;  %v12873_v2 = vand.u32 4294901760, %v448_v38  ;;  %v12887_v5 = vsub.f32 %v453_v30, %v12860_v28  ;;  %v5333_v34 = vsub.f32 %v12847_v33, %v15809_v25  ;;  %v5328_v32 = vand.u32 4294901760, %v5327_v9  ;;  %v164_v9 = vld [vmem:[#allocation9 + $0x270] sm:$0xff] }
 0x2e0   :  { %5263 = vmatpush.msra.mxu3 %v12671_v17  ;;  %5230 = vmatmul.f32.vlgmr.msra.gmra.mxu2 %v16223_v41  ;;  %v4245_v14 = vpop.f32.mrf.mxu1  ;;  %v15801_v30 = vand.u32 4294901760, %v12914_v45  ;;  %v12960_v11 = vsub.f32 %v423_v42, %v12934_v8  ;;  %v5369_v51 = vsub.f32 %v12926_v57, %v15800_v10 }
 0x2e1   :  { %5276 = vmatpush.msrb.mxu0 %v12815_v21  ;;  %5415 = vmatpush.msrb.mxu2 %v12811_v43  ;;  %v4246_v62 = vadd.f32 %v4245_v14, %v4209_v27  ;;  %v4286_v35 = vpop.f32.mrf.mxu2  ;;  %v12900_v15 = vsub.f32 %v448_v38, %v12873_v2  ;;  %v15805_v58 = vand.u32 4294901760, %v12887_v5  ;;  %v5334_v18 = vand.u32 4294901760, %v5333_v34 }
 0x2e2   :  { %5155 = vmatpush.msra.mxu1 %v12671_v17  ;;  %5265 = vmatpush.msra.mxu3 %v12684_v12  ;;  %v12946_v38 = vand.u32 4294901760, %v418_v53  ;;  %v12950_v14 = vsub.f32 %v428_v56, %v12922_v23  ;;  %v12976_v56 = vand.u32 4294901760, %v164_v9 }
 0x2e3   :  { %5267 = vmatmul.f32.vlgmr.msra.gmra.mxu3 %v16223_v41  ;;  %5278 = vmatpush.msrb.mxu0 %v12825_v59  ;;  %v4287_v17 = vadd.f32 %v4286_v35, %v4246_v62  ;;  %v15804_v52 = vand.u32 4294901760, %v12900_v15  ;;  %v5351_v22 = vsub.f32 %v12887_v5, %v15805_v58  ;;  %v5363_v35 = vsub.f32 %v12914_v45, %v15801_v30  ;;  %v149_v30 = vld [vmem:[#allocation9 + $0x1f8] sm:$0xff] }
 0x2e4   :  { %5418 = vmatpush.msrb.mxu2 %v12821_v7  ;;  %5468 = vmatpush.msrb.mxu3 %v12796_v44  ;;  %v4387_v47 = vpop.f32.mrf.mxu3  ;;  %v15802_v34 = vand.u32 4294901760, %v12950_v14 }
 0x2e5   :  { %5157 = vmatpush.msra.mxu1 %v12684_v12  ;;  %5280 = vmatpush.msrb.mxu0 %v12830_v13  ;;  %v12902_v55 = vadd.f32 %v4387_v47, %v4287_v17  ;;  %v5339_v12 = vsub.f32 %v12856_v48, %v15808_v16  ;;  %v5357_v27 = vsub.f32 %v12900_v15, %v15804_v52  ;;  %v5352_v62 = vand.u32 4294901760, %v5351_v22 }
 0x2e6   :  { %5161 = vmatmul.f32.vlgmr.msra.gmra.mxu1 %v16233_v29  ;;  %5421 = vmatpush.msrb.mxu2 %v12836_v40  ;;  %v12964_v17 = vand.u32 4294901760, %v413_v63  ;;  %v5364_v19 = vand.u32 4294901760, %v5363_v35  ;;  %v5381_v35 = vsub.f32 %v12950_v14, %v15802_v34  ;;  %v144_v34 = vld [vmem:[#allocation9 + $0x1d0] sm:$0xff] }
 0x2e7   :  { %5317 = vmatpush.msrb.mxu1 %v5316_v31  ;;  %5470 = vmatpush.msrb.mxu3 %v12803_v36  ;;  %v5340_v46 = vand.u32 4294901760, %v5339_v12  ;;  %v15799_v31 = vand.u32 4294901760, %v12938_v49  ;;  %v5358_v47 = vand.u32 4294901760, %v5357_v27  ;;  %v12972_v12 = vsub.f32 %v418_v53, %v12946_v38  ;;  %v154_v27 = vld [vmem:[#allocation9 + $0x220] sm:$0xff] }
 0x2e8   :  { %5282 = vmatpush.msrb.mxu0 %v12841_v37  ;;  %5424 = vmatpush.msrb.mxu2 %v12847_v33  ;;  %v15803_v53 = vand.u32 4294901760, %v12960_v11  ;;  %v13027_v58 = vand.u32 4294901760, %v144_v34 }
 0x2e9   :  { %5323 = vmatpush.msrb.mxu1 %v5322_v3  ;;  %5472 = vmatpush.msrb.mxu3 %v12815_v21  ;;  %v408_v3 = vld [vmem:[#allocation9 + $0xa10] sm:$0xff]  ;;  %v5375_v42 = vsub.f32 %v12938_v49, %v15799_v31  ;;  %v15807_v31 = vand.u32 4294901760, %v12972_v12 }
 0x2ea   :  { %5284 = vmatpush.msrb.mxu0 %v12860_v28  ;;  %5427 = vmatpush.msrb.mxu2 %v12856_v48 }
 0x2eb   :  { %5329 = vmatpush.msrb.mxu1 %v5328_v32  ;;  %5474 = vmatpush.msrb.mxu3 %v12825_v59  ;;  %v159_v32 = vld [vmem:[#allocation9 + $0x248] sm:$0xff] }
 0x2ec   :  { %5286 = vmatpush.msrb.mxu0 %v12873_v2  ;;  %5430 = vmatpush.msrb.mxu2 %v12869_v0  ;;  %v12996_v10 = vand.u32 4294901760, %v159_v32 }
 0x2ed   :  { %5335 = vmatpush.msrb.mxu1 %v5334_v18  ;;  %5476 = vmatpush.msrb.mxu3 %v12830_v13  ;;  %v12982_v18 = vand.u32 4294901760, %v408_v3 }
 0x2ee   :  { %5288 = vmatpush.msrb.mxu0 %v12884_v61  ;;  %5433 = vmatpush.msrb.mxu2 %v12887_v5  ;;  %16234 = vst [vmem:[#allocation65_spill] sm:$0xff] %v12996_v10 }
 0x2ef   :  { %5341 = vmatpush.msrb.mxu1 %v5340_v46  ;;  %5478 = vmatpush.msrb.mxu3 %v12841_v37 }
 0x2f0   :  { %5290 = vmatpush.msrb.mxu0 %v12897_v54  ;;  %5436 = vmatpush.msrb.mxu2 %v12900_v15 }
 0x2f1   :  { %5347 = vmatpush.msrb.mxu1 %v5346_v1  ;;  %5480 = vmatpush.msrb.mxu3 %v12860_v28  ;;  %v12989_v1 = vsub.f32 %v413_v63, %v12964_v17  ;;  %v5376_v63 = vand.u32 4294901760, %v5375_v42  ;;  %v5382_v42 = vand.u32 4294901760, %v5381_v35  ;;  %v16235_v35 = vld [vmem:[#allocation35_spill] sm:$0xff] }
 0x2f2   :  { %5292 = vmatpush.msrb.mxu0 %v12910_v39  ;;  %5439 = vmatpush.msrb.mxu2 %v12914_v45 }
 0x2f3   :  { %5353 = vmatpush.msrb.mxu1 %v5352_v62  ;;  %5482 = vmatpush.msrb.mxu3 %v12873_v2  ;;  %v4441_v46 = vpop.f32.mrf.mxu0  ;;  %v5370_v62 = vand.u32 4294901760, %v5369_v51  ;;  %v13008_v51 = vsub.f32 %v408_v3, %v12982_v18  ;;  %v5393_v3 = vsub.f32 %v12972_v12, %v15807_v31 }
 0x2f4   :  { %5294 = vmatpush.msrb.mxu0 %v12922_v23  ;;  %5442 = vmatpush.msrb.mxu2 %v12926_v57  ;;  %v4442_v22 = vadd.f32 %v4441_v46, %v12902_v55  ;;  %v13001_v55 = vsub.f32 %v164_v9, %v12976_v56  ;;  %v13010_v46 = vand.u32 4294901760, %v154_v27  ;;  %v15812_v9 = vand.u32 4294901760, %v12989_v1 }
 0x2f5   :  { %5359 = vmatpush.msrb.mxu1 %v5358_v47  ;;  %5484 = vmatpush.msrb.mxu3 %v12884_v61  ;;  %v5387_v47 = vsub.f32 %v12960_v11, %v15803_v53  ;;  %v13022_v53 = vsub.f32 %v159_v32, %v12996_v10  ;;  %v16237_v25 = vand.u32 4294901760, %v13008_v51 }
 0x2f6   :  { %5296 = vmatpush.msrb.mxu0 %v12934_v8  ;;  %5445 = vmatpush.msrb.mxu2 %v12938_v49  ;;  %v15815_v52 = vand.u32 4294901760, %v13001_v55  ;;  %v13032_v31 = vsub.f32 %v154_v27, %v13010_v46  ;;  %v5399_v32 = vsub.f32 %v12989_v1, %v15812_v9 }
 0x2f7   :  { %5365 = vmatpush.msrb.mxu1 %v5364_v19  ;;  %5486 = vmatpush.msrb.mxu3 %v12897_v54  ;;  %v13015_v19 = vand.u32 4294901760, %v149_v30  ;;  %v5405_v41 = vsub.f32 %v13008_v51, %v16237_v25  ;;  %v16239_v25 = vand.u32 4294901760, %v13022_v53 }
 0x2f8   :  { %5298 = vmatpush.msrb.mxu0 %v12946_v38  ;;  %5448 = vmatpush.msrb.mxu2 %v12950_v14 }
 0x2f9   :  { %5371 = vmatpush.msrb.mxu1 %v5370_v62  ;;  %5488 = vmatpush.msrb.mxu3 %v12910_v39  ;;  %v5388_v62 = vand.u32 4294901760, %v5387_v47  ;;  %v13040_v16 = vsub.f32 %v149_v30, %v13015_v19  ;;  %v5394_v47 = vand.u32 4294901760, %v5393_v3  ;;  %v5656_v30 = vsub.f32 %v13001_v55, %v15815_v52 }
 0x2fa   :  { %5300 = vmatpush.msrb.mxu0 %v12964_v17  ;;  %5451 = vmatpush.msrb.mxu2 %v12960_v11  ;;  %v16236_v3 = vand.u32 4294901760, %v12811_v43  ;;  %v124_v43 = vld [vmem:[#allocation9 + $0x130] sm:$0xff] }
 0x2fb   :  { %5377 = vmatpush.msrb.mxu1 %v5376_v63  ;;  %5490 = vmatpush.msrb.mxu3 %v12922_v23  ;;  %v134_v63 = vld [vmem:[#allocation9 + $0x180] sm:$0xff] }
 0x2fc   :  { %5302 = vmatpush.msrb.mxu0 %v12982_v18  ;;  %5454 = vmatpush.msrb.mxu2 %v12972_v12  ;;  %v13060_v29 = vand.u32 4294901760, %v134_v63 }
 0x2fd   :  { %5383 = vmatpush.msrb.mxu1 %v5382_v42  ;;  %5492 = vmatpush.msrb.mxu3 %v12934_v8  ;;  %v4480_v27 = vpop.f32.mrf.mxu1  ;;  %v4549_v20 = vpop.f32.mrf.mxu2  ;;  %v13052_v42 = vsub.f32 %v144_v34, %v13027_v58 }
 0x2fe   :  { %5308 = vmatmul.f32.vlgmr.msrb.gmra.mxu0 %v16235_v35  ;;  %5457 = vmatpush.msrb.mxu2 %v12989_v1  ;;  %v4481_v9 = vadd.f32 %v4480_v27, %v4442_v22  ;;  %v5400_v22 = vand.u32 4294901760, %v5399_v32  ;;  %v13071_v35 = vsub.f32 %v139_v26, %v13044_v6  ;;  %v16242_v26 = vand.u32 4294901760, %v13032_v31 }
 0x2ff   :  { %5509 = vmatpush.msra.mxu0 %v16236_v3  ;;  %5389 = vmatpush.msrb.mxu1 %v5388_v62  ;;  %v16238_v62 = vand.u32 4294901760, %v12821_v7  ;;  %v5662_v3 = vsub.f32 %v13022_v53, %v16239_v25  ;;  %v5406_v25 = vand.u32 4294901760, %v5405_v41  ;;  %v13087_v60 = vsub.f32 %v134_v63, %v13060_v29 }
 0x300   :  { %5494 = vmatpush.msrb.mxu3 %v12946_v38  ;;  %5460 = vmatpush.msrb.mxu2 %v13008_v51  ;;  %v4550_v34 = vadd.f32 %v4549_v20, %v4481_v9  ;;  %v4586_v52 = vpop.f32.mrf.mxu3  ;;  %v16240_v20 = vld [vmem:[#allocation33_spill] sm:$0xff]  ;;  %v5657_v9 = vand.u32 4294901760, %v5656_v30  ;;  %v5668_v27 = vsub.f32 %v13032_v31, %v16242_v26  ;;  %v114_v30 = vld [vmem:[#allocation9 + $0xe0] sm:$0xff]  ;;  %v16245_v41 = vand.u32 4294901760, %v12847_v33 }
 0x301   :  { %5513 = vmatpush.msra.mxu0 %v16238_v62  ;;  %5395 = vmatpush.msrb.mxu1 %v5394_v47  ;;  %v119_v62 = vld [vmem:[#allocation9 + $0x108] sm:$0xff]  ;;  %v16241_v47 = vand.u32 4294901760, %v12836_v40  ;;  %v13100_v63 = vsub.f32 %v129_v24, %v13073_v4  ;;  %v16247_v33 = vand.u32 4294901760, %v12856_v48  ;;  %v13114_v26 = vand.u32 4294901760, %v114_v30 }
 0x302   :  { %5496 = vmatpush.msrb.mxu3 %v12964_v17  ;;  %5463 = vmatmul.f32.vlgmr.msrb.gmra.mxu2 %v16240_v20  ;;  %v13077_v32 = vadd.f32 %v4586_v52, %v4550_v34  ;;  %v13089_v20 = vand.u32 4294901760, %v124_v43  ;;  %v16243_v52 = vand.u32 4294901760, %v13040_v16  ;;  %v16244_v34 = vld [vmem:[#allocation34_spill] sm:$0xff]  ;;  %v13102_v7 = vand.u32 4294901760, %v119_v62 }
 0x303   :  { %5517 = vmatpush.msra.mxu0 %v16241_v47  ;;  %5613 = vmatpush.msra.mxu2 %v12976_v56  ;;  %v5663_v47 = vand.u32 4294901760, %v5662_v3  ;;  %v5669_v3 = vand.u32 4294901760, %v5668_v27  ;;  %v16249_v48 = vand.u32 4294901760, %v13071_v35 }
 0x304   :  { %5401 = vmatpush.msrb.mxu1 %v5400_v22  ;;  %5498 = vmatpush.msrb.mxu3 %v12982_v18  ;;  %v5674_v40 = vsub.f32 %v13040_v16, %v16243_v52  ;;  %v16246_v22 = vand.u32 4294901760, %v13052_v42  ;;  %v13112_v24 = vsub.f32 %v124_v43, %v13089_v20  ;;  %v13124_v43 = vsub.f32 %v119_v62, %v13102_v7 }
 0x305   :  { %5502 = vmatmul.f32.vlgmr.msrb.gmra.mxu3 %v16244_v34  ;;  %5521 = vmatpush.msra.mxu0 %v16245_v41  ;;  %v15819_v41 = vand.u32 4294901760, %v13087_v60  ;;  %v16248_v34 = vld [vmem:[#allocation27_spill] sm:$0xff]  ;;  %v5686_v27 = vsub.f32 %v13071_v35, %v16249_v48  ;;  %v13137_v62 = vsub.f32 %v114_v30, %v13114_v26 }
 0x306   :  { %5615 = vmatpush.msra.mxu2 %v12996_v10  ;;  %5658 = vmatpush.msra.mxu3 %v5657_v9  ;;  %v5680_v52 = vsub.f32 %v13052_v42, %v16246_v22  ;;  %v5675_v9 = vand.u32 4294901760, %v5674_v40  ;;  %v104_v10 = vld [vmem:[#allocation9 + $0x90] sm:$0xff]  ;;  %v13126_v22 = vand.u32 4294901760, %v109_v50 }
 0x307   :  { %5407 = vmatpush.msrb.mxu1 %v5406_v25  ;;  %5525 = vmatpush.msra.mxu0 %v16247_v33  ;;  %v16250_v33 = vand.u32 4294901760, %v12869_v0  ;;  %v13139_v48 = vand.u32 4294901760, %v104_v10  ;;  %v99_v25 = vld [vmem:[#allocation9 + $0x68] sm:$0xff]  ;;  %v16251_v0 = vand.u32 4294901760, %v12887_v5 }
 0x308   :  { %5409 = vmatmul.f32.vlgmr.msrb.gmra.mxu1 %v16248_v34  ;;  %5617 = vmatpush.msra.mxu2 %v13010_v46  ;;  %v5681_v40 = vand.u32 4294901760, %v5680_v52  ;;  %v16252_v52 = vand.u32 4294901760, %v13100_v63  ;;  %v13150_v30 = vsub.f32 %v109_v50, %v13126_v22  ;;  %v13155_v5 = vand.u32 4294901760, %v99_v25 }
 0x309   :  { %5576 = vmatpush.msra.mxu1 %v12796_v44  ;;  %5664 = vmatpush.msra.mxu3 %v5663_v47  ;;  %v5692_v44 = vsub.f32 %v13087_v60, %v15819_v41  ;;  %v94_v41 = vld [vmem:[#allocation9 + $0x40] sm:$0xff]  ;;  %v16253_v47 = vand.u32 4294901760, %v12900_v15  ;;  %v13163_v50 = vsub.f32 %v104_v10, %v13139_v48  ;;  %v16255_v15 = vand.u32 4294901760, %v12914_v45 }
 0x30a   :  { %5529 = vmatpush.msra.mxu0 %v16250_v33  ;;  %5619 = vmatpush.msra.mxu2 %v13015_v19  ;;  %v5709_v33 = vand.u32 4294901760, %v13124_v43  ;;  %v16256_v10 = vand.u32 4294901760, %v12926_v57  ;;  %v13179_v45 = vsub.f32 %v99_v25, %v13155_v5  ;;  %v16257_v57 = vand.u32 4294901760, %v12938_v49 }
 0x30b   :  { %5578 = vmatpush.msra.mxu1 %v12803_v36  ;;  %5670 = vmatpush.msra.mxu3 %v5669_v3  ;;  %v5687_v36 = vand.u32 4294901760, %v5686_v27  ;;  %v5698_v3 = vsub.f32 %v13100_v63, %v16252_v52  ;;  %v89_v52 = vld [vmem:[#allocation9 + $0x18] sm:$0xff] }
 0x30c   :  { %5533 = vmatpush.msra.mxu0 %v16251_v0  ;;  %5621 = vmatpush.msra.mxu2 %v13027_v58  ;;  %v5715_v0 = vand.u32 4294901760, %v13137_v62 }
 0x30d   :  { %5580 = vmatpush.msra.mxu1 %v12815_v21  ;;  %5676 = vmatpush.msra.mxu3 %v5675_v9  ;;  %v5693_v21 = vand.u32 4294901760, %v5692_v44  ;;  %v16254_v9 = vand.u32 4294901760, %v13112_v24  ;;  %v5721_v44 = vand.u32 4294901760, %v13150_v30 }
 0x30e   :  { %5537 = vmatpush.msra.mxu0 %v16253_v47  ;;  %5623 = vmatpush.msra.mxu2 %v13044_v6  ;;  %v13168_v47 = vand.u32 4294901760, %v94_v41 }
 0x30f   :  { %5582 = vmatpush.msra.mxu1 %v12825_v59  ;;  %5682 = vmatpush.msra.mxu3 %v5681_v40  ;;  %v5704_v27 = vsub.f32 %v13112_v24, %v16254_v9  ;;  %v5699_v59 = vand.u32 4294901760, %v5698_v3  ;;  %v5710_v40 = vsub.f32 %v13124_v43, %v5709_v33  ;;  %v13181_v9 = vand.u32 4294901760, %v89_v52 }
 0x310   :  { %5541 = vmatpush.msra.mxu0 %v16255_v15  ;;  %5625 = vmatpush.msra.mxu2 %v13060_v29  ;;  %v5727_v3 = vand.u32 4294901760, %v13163_v50  ;;  %v13192_v25 = vsub.f32 %v94_v41, %v13168_v47  ;;  %v16258_v15 = vand.u32 4294901760, %v12950_v14  ;;  %v16259_v14 = vand.u32 4294901760, %v12960_v11 }
 0x311   :  { %5584 = vmatpush.msra.mxu1 %v12830_v13  ;;  %5688 = vmatpush.msra.mxu3 %v5687_v36  ;;  %v5705_v13 = vand.u32 4294901760, %v5704_v27  ;;  %v5716_v36 = vsub.f32 %v13137_v62, %v5715_v0  ;;  %v13204_v41 = vsub.f32 %v89_v52, %v13181_v9 }
 0x312   :  { %5545 = vmatpush.msra.mxu0 %v16256_v10  ;;  %5627 = vmatpush.msra.mxu2 %v13073_v4  ;;  %v5733_v10 = vand.u32 4294901760, %v13179_v45 }
 0x313   :  { %5586 = vmatpush.msra.mxu1 %v12841_v37  ;;  %5694 = vmatpush.msra.mxu3 %v5693_v21  ;;  %v5711_v37 = vand.u32 4294901760, %v5710_v40  ;;  %v5722_v21 = vsub.f32 %v13150_v30, %v5721_v44  ;;  %v16260_v40 = vand.u32 4294901760, %v12972_v12  ;;  %v5745_v11 = vand.u32 4294901760, %v13204_v41 }
 0x314   :  { %5549 = vmatpush.msra.mxu0 %v16257_v57  ;;  %5629 = vmatpush.msra.mxu2 %v13089_v20  ;;  %v16262_v12 = vand.u32 4294901760, %v13008_v51 }
 0x315   :  { %5588 = vmatpush.msra.mxu1 %v12860_v28  ;;  %5700 = vmatpush.msra.mxu3 %v5699_v59  ;;  %v4627_v27 = vpop.f32.mrf.mxu0  ;;  %v5717_v28 = vand.u32 4294901760, %v5716_v36  ;;  %v5728_v59 = vsub.f32 %v13163_v50, %v5727_v3  ;;  %v5723_v52 = vand.u32 4294901760, %v5722_v21  ;;  %v16261_v36 = vand.u32 4294901760, %v12989_v1 }
 0x316   :  { %5553 = vmatpush.msra.mxu0 %v16258_v15  ;;  %5631 = vmatpush.msra.mxu2 %v13102_v7  ;;  %v4628_v49 = vadd.f32 %v4627_v27, %v13077_v32  ;;  %v5739_v32 = vand.u32 4294901760, %v13192_v25  ;;  %v5746_v1 = vsub.f32 %v13204_v41, %v5745_v11 }
 0x317   :  { %5590 = vmatpush.msra.mxu1 %v12873_v2  ;;  %5706 = vmatpush.msra.mxu3 %v5705_v13  ;;  %v5734_v2 = vsub.f32 %v13179_v45, %v5733_v10  ;;  %v5729_v13 = vand.u32 4294901760, %v5728_v59 }
 0x318   :  { %5557 = vmatpush.msra.mxu0 %v16259_v14  ;;  %5633 = vmatpush.msra.mxu2 %v13114_v26  ;;  %v5747_v51 = vand.u32 4294901760, %v5746_v1 }
 0x319   :  { %5592 = vmatpush.msra.mxu1 %v12884_v61  ;;  %5712 = vmatpush.msra.mxu3 %v5711_v37  ;;  %v5740_v61 = vsub.f32 %v13192_v25, %v5739_v32 }
 0x31a   :  { %5561 = vmatpush.msra.mxu0 %v16260_v40  ;;  %5635 = vmatpush.msra.mxu2 %v13126_v22 }
 0x31b   :  { %5594 = vmatpush.msra.mxu1 %v12897_v54  ;;  %5718 = vmatpush.msra.mxu3 %v5717_v28  ;;  %v5735_v54 = vand.u32 4294901760, %v5734_v2 }
 0x31c   :  { %5565 = vmatpush.msra.mxu0 %v16261_v36  ;;  %5637 = vmatpush.msra.mxu2 %v13139_v48 }
 0x31d   :  { %5596 = vmatpush.msra.mxu1 %v12910_v39  ;;  %5724 = vmatpush.msra.mxu3 %v5723_v52  ;;  %v5741_v39 = vand.u32 4294901760, %v5740_v61  ;;  %v204_v52 = vld [vmem:[#allocation9 + $0x3b0] sm:$0xff]  ;;  %v199_v61 = vld [vmem:[#allocation9 + $0x388] sm:$0xff] }
 0x31e   :  { %5569 = vmatpush.msra.mxu0 %v16262_v12  ;;  %5639 = vmatpush.msra.mxu2 %v13155_v5  ;;  %v13378_v1 = vand.u32 4294901760, %v204_v52 }
 0x31f   :  { %5598 = vmatpush.msra.mxu1 %v12922_v23  ;;  %5730 = vmatpush.msra.mxu3 %v5729_v13  ;;  %v4728_v57 = vpop.f32.mrf.mxu1  ;;  %v4782_v37 = vpop.f32.mrf.mxu2  ;;  %v16263_v23 = vand.u32 4294901760, %v13001_v55 }
 0x320   :  { %5571 = vmatmul.f32.vlgmr.msra.gmra.mxu0 %v16248_v34  ;;  %5641 = vmatpush.msra.mxu2 %v13168_v47  ;;  %v4729_v21 = vadd.f32 %v4728_v57, %v4628_v49 }
 0x321   :  { %5756 = vmatpush.msrb.mxu0 %v13001_v55  ;;  %5600 = vmatpush.msra.mxu1 %v12934_v8  ;;  %v16264_v8 = vand.u32 4294901760, %v13022_v53  ;;  %v16271_v55 = vand.u32 4294901760, %v13100_v63 }
 0x322   :  { %5736 = vmatpush.msra.mxu3 %v5735_v54  ;;  %5643 = vmatpush.msra.mxu2 %v13181_v9  ;;  %v4783_v27 = vadd.f32 %v4782_v37, %v4729_v21  ;;  %v4821_v15 = vpop.f32.mrf.mxu3 }
 0x323   :  { %5759 = vmatpush.msrb.mxu0 %v13022_v53  ;;  %5602 = vmatpush.msra.mxu1 %v12946_v38  ;;  %v16265_v38 = vand.u32 4294901760, %v13032_v31  ;;  %v16267_v53 = vand.u32 4294901760, %v13040_v16 }
 0x324   :  { %5742 = vmatpush.msra.mxu3 %v5741_v39  ;;  %5850 = vmatpush.msrb.mxu2 %v16263_v23  ;;  %v4822_v28 = vadd.f32 %v4821_v15, %v4783_v27  ;;  %v16274_v39 = vld [vmem:[#allocation18_spill] sm:$0xff] }
 0x325   :  { %5762 = vmatpush.msrb.mxu0 %v13032_v31  ;;  %5604 = vmatpush.msra.mxu1 %v12964_v17  ;;  %v16266_v17 = vld [vmem:[#allocation65_spill] sm:$0xff]  ;;  %v16268_v31 = vand.u32 4294901760, %v13052_v42 }
 0x326   :  { %5748 = vmatpush.msra.mxu3 %v5747_v51  ;;  %5854 = vmatpush.msrb.mxu2 %v16264_v8  ;;  %v13390_v51 = vand.u32 4294901760, %v199_v61 }
 0x327   :  { %5765 = vmatpush.msrb.mxu0 %v13040_v16  ;;  %5606 = vmatpush.msra.mxu1 %v12982_v18  ;;  %v16270_v16 = vand.u32 4294901760, %v13087_v60  ;;  %v244_v18 = vld [vmem:[#allocation9 + $0x4f0] sm:$0xff] }
 0x328   :  { %5917 = vmatpush.msrb.mxu3 %v12976_v56  ;;  %5858 = vmatpush.msrb.mxu2 %v16265_v38 }
 0x329   :  { %5608 = vmatmul.f32.vlgmr.msra.gmra.mxu1 %v16248_v34  ;;  %5768 = vmatpush.msrb.mxu0 %v13052_v42 }
 0x32a   :  { %5809 = vmatpush.msrb.mxu1 %v12976_v56  ;;  %5919 = vmatpush.msrb.mxu3 %v16266_v17  ;;  %v16269_v56 = vand.u32 4294901760, %v13071_v35 }
 0x32b   :  { %5771 = vmatpush.msrb.mxu0 %v13071_v35  ;;  %5862 = vmatpush.msrb.mxu2 %v16267_v53  ;;  %v13406_v53 = vsub.f32 %v204_v52, %v13378_v1  ;;  %v174_v52 = vld [vmem:[#allocation9 + $0x2c0] sm:$0xff] }
 0x32c   :  { %5811 = vmatpush.msrb.mxu1 %v16266_v17  ;;  %5921 = vmatpush.msrb.mxu3 %v13010_v46 }
 0x32d   :  { %5774 = vmatpush.msrb.mxu0 %v13087_v60  ;;  %5866 = vmatpush.msrb.mxu2 %v16268_v31  ;;  %v13287_v60 = vand.u32 4294901760, %v244_v18  ;;  %v184_v31 = vld [vmem:[#allocation9 + $0x310] sm:$0xff] }
 0x32e   :  { %5813 = vmatpush.msrb.mxu1 %v13010_v46  ;;  %5923 = vmatpush.msrb.mxu3 %v13015_v19  ;;  %v16272_v46 = vand.u32 4294901760, %v13112_v24 }
 0x32f   :  { %5777 = vmatpush.msrb.mxu0 %v13100_v63  ;;  %5870 = vmatpush.msrb.mxu2 %v16269_v56  ;;  %v229_v63 = vld [vmem:[#allocation9 + $0x478] sm:$0xff] }
 0x330   :  { %5815 = vmatpush.msrb.mxu1 %v13015_v19  ;;  %5925 = vmatpush.msrb.mxu3 %v13027_v58  ;;  %v234_v19 = vld [vmem:[#allocation9 + $0x4a0] sm:$0xff] }
 0x331   :  { %5780 = vmatpush.msrb.mxu0 %v13112_v24  ;;  %5874 = vmatpush.msrb.mxu2 %v16270_v16  ;;  %v13306_v24 = vand.u32 4294901760, %v234_v19 }
 0x332   :  { %5817 = vmatpush.msrb.mxu1 %v13027_v58  ;;  %5927 = vmatpush.msrb.mxu3 %v13044_v6  ;;  %v239_v58 = vld [vmem:[#allocation9 + $0x4c8] sm:$0xff] }
 0x333   :  { %5783 = vmatpush.msrb.mxu0 %v13124_v43  ;;  %5878 = vmatpush.msrb.mxu2 %v16271_v55  ;;  %v13296_v42 = vand.u32 4294901760, %v239_v58  ;;  %v13311_v43 = vand.u32 4294901760, %v229_v63  ;;  %v13418_v55 = vsub.f32 %v199_v61, %v13390_v51  ;;  %v16277_v61 = vld [vmem:[#allocation40_spill] sm:$0xff] }
 0x334   :  { %5819 = vmatpush.msrb.mxu1 %v13044_v6  ;;  %5929 = vmatpush.msrb.mxu3 %v13060_v29 }
 0x335   :  { %5786 = vmatpush.msrb.mxu0 %v13137_v62  ;;  %5882 = vmatpush.msrb.mxu2 %v16272_v46  ;;  %v13316_v62 = vsub.f32 %v239_v58, %v13296_v42 }
 0x336   :  { %5821 = vmatpush.msrb.mxu1 %v13060_v29  ;;  %5931 = vmatpush.msrb.mxu3 %v13073_v4  ;;  %v13302_v29 = vsub.f32 %v244_v18, %v13287_v60 }
 0x337   :  { %5789 = vmatpush.msrb.mxu0 %v13150_v30  ;;  %5886 = vmatpush.msrb.mxu2 %v5709_v33  ;;  %v4890_v6 = vpop.f32.mrf.mxu0  ;;  %v219_v30 = vld [vmem:[#allocation9 + $0x428] sm:$0xff] }
 0x338   :  { %5823 = vmatpush.msrb.mxu1 %v13073_v4  ;;  %5933 = vmatpush.msrb.mxu3 %v13089_v20  ;;  %v4891_v35 = vadd.f32 %v4890_v6, %v4822_v28  ;;  %v224_v4 = vld [vmem:[#allocation9 + $0x450] sm:$0xff]  ;;  %v5996_v33 = vand.u32 4294901760, %v13302_v29  ;;  %v189_v28 = vld [vmem:[#allocation9 + $0x338] sm:$0xff]  ;;  %v13426_v6 = vand.u32 4294901760, %v184_v31 }
 0x339   :  { %5792 = vmatpush.msrb.mxu0 %v13163_v50  ;;  %5890 = vmatpush.msrb.mxu2 %v5715_v0  ;;  %v13333_v0 = vsub.f32 %v229_v63, %v13311_v43  ;;  %v214_v50 = vld [vmem:[#allocation9 + $0x400] sm:$0xff]  ;;  %v13414_v16 = vand.u32 4294901760, %v189_v28  ;;  %v179_v63 = vld [vmem:[#allocation9 + $0x2e8] sm:$0xff] }
 0x33a   :  { %5825 = vmatpush.msrb.mxu1 %v13089_v20  ;;  %5935 = vmatpush.msrb.mxu3 %v13102_v7  ;;  %v13321_v20 = vand.u32 4294901760, %v224_v4  ;;  %v13351_v14 = vand.u32 4294901760, %v214_v50 }
 0x33b   :  { %5795 = vmatpush.msrb.mxu0 %v13179_v45  ;;  %5894 = vmatpush.msrb.mxu2 %v5721_v44  ;;  %v13337_v44 = vand.u32 4294901760, %v219_v30  ;;  %v5997_v45 = vsub.f32 %v13302_v29, %v5996_v33 }
 0x33c   :  { %5827 = vmatpush.msrb.mxu1 %v13102_v7  ;;  %5937 = vmatpush.msrb.mxu3 %v13114_v26  ;;  %v13327_v7 = vsub.f32 %v234_v19, %v13306_v24  ;;  %v13381_v57 = vsub.f32 %v214_v50, %v13351_v14  ;;  %v15823_v19 = vand.u32 4294901760, %v13406_v53 }
 0x33d   :  { %5798 = vmatpush.msrb.mxu0 %v13192_v25  ;;  %5898 = vmatpush.msrb.mxu2 %v5727_v3  ;;  %v13366_v36 = vsub.f32 %v219_v30, %v13337_v44  ;;  %v16276_v30 = vld [vmem:[#allocation38_spill] sm:$0xff] }
 0x33e   :  { %5829 = vmatpush.msrb.mxu1 %v13114_v26  ;;  %5939 = vmatpush.msrb.mxu3 %v13126_v22  ;;  %v6002_v26 = vand.u32 4294901760, %v13316_v62  ;;  %v15832_v25 = vand.u32 4294901760, %v13327_v7  ;;  %v15827_v17 = vand.u32 4294901760, %v13381_v57 }
 0x33f   :  { %5801 = vmatpush.msrb.mxu0 %v13204_v41  ;;  %5902 = vmatpush.msrb.mxu2 %v5733_v10  ;;  %v13347_v10 = vsub.f32 %v224_v4, %v13321_v20  ;;  %v16273_v41 = vld [vmem:[#allocation22_spill] sm:$0xff]  ;;  %v15828_v27 = vand.u32 4294901760, %v13366_v36  ;;  %v16275_v4 = vld [vmem:[#allocation37_spill] sm:$0xff] }
 0x340   :  { %5831 = vmatpush.msrb.mxu1 %v13126_v22  ;;  %5941 = vmatpush.msrb.mxu3 %v13139_v48  ;;  %v209_v22 = vld [vmem:[#allocation9 + $0x3d8] sm:$0xff]  ;;  %v6009_v12 = vsub.f32 %v13327_v7, %v15832_v25  ;;  %v6033_v58 = vsub.f32 %v13381_v57, %v15827_v17  ;;  %v637_v50 = vadd.f32 %v16276_v30, %v16275_v4 }
 0x341   :  { %5954 = vmatpush.msra.mxu0 %v13287_v60  ;;  %5906 = vmatpush.msrb.mxu2 %v5739_v32  ;;  %v4927_v3 = vpop.f32.mrf.mxu1  ;;  %v4968_v49 = vpop.f32.mrf.mxu2  ;;  %v15831_v32 = vand.u32 4294901760, %v13333_v0  ;;  %v13363_v13 = vand.u32 4294901760, %v209_v22  ;;  %v6027_v56 = vsub.f32 %v13366_v36, %v15828_v27  ;;  %v16278_v4 = vld [vmem:[#allocation39_spill] sm:$0xff] }
 0x342   :  { %5833 = vmatpush.msrb.mxu1 %v13139_v48  ;;  %5943 = vmatpush.msrb.mxu3 %v13155_v5  ;;  %v4928_v59 = vadd.f32 %v4927_v3, %v4891_v35  ;;  %v6003_v48 = vsub.f32 %v13316_v62, %v6002_v26  ;;  %v6010_v8 = vand.u32 4294901760, %v6009_v12  ;;  %v691_v12 = vadd.f32 %v16277_v61, %v637_v50  ;;  %v16283_v27 = vld [vmem:[#allocation19_spill] sm:$0xff] }
 0x343   :  { %5956 = vmatpush.msra.mxu0 %v13296_v42  ;;  %5910 = vmatpush.msrb.mxu2 %v5745_v11  ;;  %v5998_v11 = vand.u32 4294901760, %v5997_v45  ;;  %v6015_v37 = vsub.f32 %v13333_v0, %v15831_v32  ;;  %v13394_v15 = vsub.f32 %v209_v22, %v13363_v13  ;;  %v6028_v45 = vand.u32 4294901760, %v6027_v56 }
 0x344   :  { %5835 = vmatpush.msrb.mxu1 %v13155_v5  ;;  %5945 = vmatpush.msrb.mxu3 %v13168_v47  ;;  %v4969_v40 = vadd.f32 %v4968_v49, %v4928_v59  ;;  %v5069_v2 = vpop.f32.mrf.mxu3  ;;  %v15830_v5 = vand.u32 4294901760, %v13347_v10  ;;  %v6004_v21 = vand.u32 4294901760, %v6003_v48  ;;  %v15822_v49 = vand.u32 4294901760, %v13418_v55 }
 0x345   :  { %5649 = vmatmul.f32.vlgmr.msra.gmra.mxu2 %v16273_v41  ;;  %5958 = vmatpush.msra.mxu0 %v13306_v24  ;;  %v15825_v18 = vand.u32 4294901760, %v13394_v15  ;;  %v13442_v22 = vsub.f32 %v189_v28, %v13414_v16  ;;  %v13446_v59 = vand.u32 4294901760, %v179_v63  ;;  %v6034_v48 = vand.u32 4294901760, %v6033_v58  ;;  %v319_v58 = vld [vmem:[#allocation9 + $0x748] sm:$0xff]  ;;  %v16287_v41 = vld [vmem:[#allocation42_spill] sm:$0xff] }
 0x346   :  { %6097 = vmatpush.msra.mxu2 %v13302_v29  ;;  %5837 = vmatpush.msrb.mxu1 %v13168_v47  ;;  %v13376_v54 = vadd.f32 %v5069_v2, %v4969_v40  ;;  %v194_v47 = vld [vmem:[#allocation9 + $0x360] sm:$0xff]  ;;  %v6021_v23 = vsub.f32 %v13347_v10, %v15830_v5  ;;  %v6045_v40 = vsub.f32 %v13406_v53, %v15823_v19 }
 0x347   :  { %5947 = vmatpush.msrb.mxu3 %v13181_v9  ;;  %5960 = vmatpush.msra.mxu0 %v13311_v43  ;;  %v13402_v38 = vand.u32 4294901760, %v194_v47  ;;  %v6039_v3 = vsub.f32 %v13394_v15, %v15825_v18  ;;  %v15820_v28 = vand.u32 4294901760, %v13442_v22  ;;  %v730_v30 = vadd.f32 %v16278_v4, %v691_v12  ;;  %v314_v4 = vld [vmem:[#allocation9 + $0x720] sm:$0xff] }
 0x348   :  { %5750 = vmatmul.f32.vlgmr.msra.gmra.mxu3 %v16274_v39  ;;  %6100 = vmatpush.msra.mxu2 %v13316_v62  ;;  %v6022_v46 = vand.u32 4294901760, %v6021_v23  ;;  %v169_v23 = vld [vmem:[#allocation9 + $0x298] sm:$0xff]  ;;  %v13493_v12 = vand.u32 4294901760, %v319_v58  ;;  %v16286_v62 = vand.u32 4294901760, %v13327_v7 }
 0x349   :  { %6150 = vmatpush.msra.mxu3 %v13287_v60  ;;  %5839 = vmatpush.msrb.mxu1 %v13181_v9  ;;  %v6016_v9 = vand.u32 4294901760, %v6015_v37  ;;  %v13430_v35 = vsub.f32 %v194_v47, %v13402_v38  ;;  %v6040_v37 = vand.u32 4294901760, %v6039_v3  ;;  %v6051_v47 = vsub.f32 %v13418_v55, %v15822_v49  ;;  %v16284_v5 = vld [vmem:[#allocation43_spill] sm:$0xff] }
 0x34a   :  { %5962 = vmatpush.msra.mxu0 %v13321_v20  ;;  %6103 = vmatpush.msra.mxu2 %v13327_v7  ;;  %v13479_v50 = vand.u32 4294901760, %v169_v23  ;;  %v6063_v3 = vsub.f32 %v13442_v22, %v15820_v28  ;;  %v16279_v28 = vld [vmem:[#allocation41_spill] sm:$0xff] }
 0x34b   :  { %5999 = vmatpush.msra.mxu1 %v5998_v11  ;;  %6152 = vmatpush.msra.mxu3 %v13296_v42  ;;  %v15821_v2 = vand.u32 4294901760, %v13430_v35  ;;  %v13454_v11 = vsub.f32 %v184_v31, %v13426_v6  ;;  %v6046_v31 = vand.u32 4294901760, %v6045_v40 }
 0x34c   :  { %5964 = vmatpush.msra.mxu0 %v13337_v44  ;;  %6106 = vmatpush.msra.mxu2 %v13333_v0  ;;  %v13504_v49 = vsub.f32 %v169_v23, %v13479_v50 }
 0x34d   :  { %6005 = vmatpush.msra.mxu1 %v6004_v21  ;;  %6154 = vmatpush.msra.mxu3 %v13306_v24  ;;  %v13463_v21 = vand.u32 4294901760, %v174_v52  ;;  %v6057_v56 = vsub.f32 %v13430_v35, %v15821_v2  ;;  %v799_v2 = vadd.f32 %v16279_v28, %v730_v30  ;;  %v13519_v28 = vsub.f32 %v319_v58, %v13493_v12 }
 0x34e   :  { %5966 = vmatpush.msra.mxu0 %v13351_v14  ;;  %6109 = vmatpush.msra.mxu2 %v13347_v10 }
 0x34f   :  { %6011 = vmatpush.msra.mxu1 %v6010_v8  ;;  %6156 = vmatpush.msra.mxu3 %v13311_v43  ;;  %v324_v8 = vld [vmem:[#allocation9 + $0x770] sm:$0xff]  ;;  %v15835_v17 = vand.u32 4294901760, %v13519_v28 }
 0x350   :  { %5968 = vmatpush.msra.mxu0 %v13363_v13  ;;  %6112 = vmatpush.msra.mxu2 %v13366_v36 }
 0x351   :  { %6017 = vmatpush.msra.mxu1 %v6016_v9  ;;  %6158 = vmatpush.msra.mxu3 %v13321_v20  ;;  %v13469_v9 = vsub.f32 %v179_v63, %v13446_v59  ;;  %v13481_v63 = vand.u32 4294901760, %v324_v8 }
 0x352   :  { %5970 = vmatpush.msra.mxu0 %v13378_v1  ;;  %6115 = vmatpush.msra.mxu2 %v13381_v57 }
 0x353   :  { %6023 = vmatpush.msra.mxu1 %v6022_v46  ;;  %6160 = vmatpush.msra.mxu3 %v13337_v44  ;;  %v15824_v46 = vand.u32 4294901760, %v13454_v11  ;;  %v15826_v61 = vand.u32 4294901760, %v13469_v9  ;;  %v13507_v19 = vsub.f32 %v324_v8, %v13481_v63  ;;  %v304_v8 = vld [vmem:[#allocation9 + $0x6d0] sm:$0xff] }
 0x354   :  { %5972 = vmatpush.msra.mxu0 %v13390_v51  ;;  %6118 = vmatpush.msra.mxu2 %v13394_v15 }
 0x355   :  { %6029 = vmatpush.msra.mxu1 %v6028_v45  ;;  %6162 = vmatpush.msra.mxu3 %v13351_v14  ;;  %v6052_v45 = vand.u32 4294901760, %v6051_v47  ;;  %v6075_v23 = vsub.f32 %v13469_v9, %v15826_v61  ;;  %v15833_v18 = vand.u32 4294901760, %v13507_v19  ;;  %v15834_v61 = vand.u32 4294901760, %v13504_v49 }
 0x356   :  { %5974 = vmatpush.msra.mxu0 %v13402_v38  ;;  %6121 = vmatpush.msra.mxu2 %v13406_v53 }
 0x357   :  { %6035 = vmatpush.msra.mxu1 %v6034_v48  ;;  %6164 = vmatpush.msra.mxu3 %v13363_v13  ;;  %v13488_v48 = vsub.f32 %v174_v52, %v13463_v21  ;;  %v6069_v52 = vsub.f32 %v13454_v11, %v15824_v46  ;;  %v6087_v32 = vsub.f32 %v13504_v49, %v15834_v61 }
 0x358   :  { %5976 = vmatpush.msra.mxu0 %v13414_v16  ;;  %6124 = vmatpush.msra.mxu2 %v13418_v55  ;;  %v6344_v61 = vsub.f32 %v13519_v28, %v15835_v17 }
 0x359   :  { %6041 = vmatpush.msra.mxu1 %v6040_v37  ;;  %6166 = vmatpush.msra.mxu3 %v13378_v1  ;;  %v5123_v40 = vpop.f32.mrf.mxu0  ;;  %v6058_v37 = vand.u32 4294901760, %v6057_v56  ;;  %v15829_v56 = vand.u32 4294901760, %v13488_v48  ;;  %v6070_v30 = vand.u32 4294901760, %v6069_v52  ;;  %v13536_v52 = vand.u32 4294901760, %v304_v8 }
 0x35a   :  { %5978 = vmatpush.msra.mxu0 %v13426_v6  ;;  %v5124_v47 = vadd.f32 %v5123_v40, %v13376_v54  ;;  %6127 = vmatpush.msra.mxu2 %v13430_v35  ;;  %v6064_v54 = vand.u32 4294901760, %v6063_v3  ;;  %v13511_v40 = vand.u32 4294901760, %v314_v4  ;;  %v16282_v3 = vld [vmem:[#allocation36_spill] sm:$0xff] }
 0x35b   :  { %6047 = vmatpush.msra.mxu1 %v6046_v31  ;;  %6168 = vmatpush.msra.mxu3 %v13390_v51  ;;  %v309_v31 = vld [vmem:[#allocation9 + $0x6f8] sm:$0xff]  ;;  %v836_v46 = vadd.f32 %v16282_v3, %v799_v2  ;;  %v6081_v58 = vsub.f32 %v13488_v48, %v15829_v56  ;;  %v299_v2 = vld [vmem:[#allocation9 + $0x6a8] sm:$0xff]  ;;  %v6076_v3 = vand.u32 4294901760, %v6075_v23  ;;  %v294_v56 = vld [vmem:[#allocation9 + $0x680] sm:$0xff]  ;;  %v6338_v23 = vsub.f32 %v13507_v19, %v15833_v18 }
 0x35c   :  { %5980 = vmatpush.msra.mxu0 %v13446_v59  ;;  %16280 = vst [vmem:[#allocation67_spill] sm:$0xff] %v13511_v40  ;;  %6130 = vmatpush.msra.mxu2 %v13442_v22  ;;  %v289_v18 = vld [vmem:[#allocation9 + $0x658] sm:$0xff] }
 0x35d   :  { %6053 = vmatpush.msra.mxu1 %v6052_v45  ;;  %6170 = vmatpush.msra.mxu3 %v13402_v38  ;;  %v13522_v45 = vand.u32 4294901760, %v309_v31  ;;  %v6082_v29 = vand.u32 4294901760, %v6081_v58 }
 0x35e   :  { %5982 = vmatpush.msra.mxu0 %v13463_v21  ;;  %6133 = vmatpush.msra.mxu2 %v13454_v11 }
 0x35f   :  { %6059 = vmatpush.msra.mxu1 %v6058_v37  ;;  %16281 = vst [vmem:[#allocation65_spill] sm:$0xff] %v13522_v45  ;;  %6172 = vmatpush.msra.mxu3 %v13414_v16  ;;  %v13534_v37 = vsub.f32 %v314_v4, %v13511_v40  ;;  %v877_v4 = vadd.f32 %v16284_v5, %v836_v46  ;;  %v13579_v5 = vand.u32 4294901760, %v289_v18 }
 0x360   :  { %5984 = vmatpush.msra.mxu0 %v13479_v50  ;;  %6136 = vmatpush.msra.mxu2 %v13469_v9  ;;  %v13561_v46 = vsub.f32 %v304_v8, %v13536_v52 }
 0x361   :  { %6065 = vmatpush.msra.mxu1 %v6064_v54  ;;  %6174 = vmatpush.msra.mxu3 %v13426_v6  ;;  %v13543_v54 = vsub.f32 %v309_v31, %v13522_v45  ;;  %v13555_v31 = vand.u32 4294901760, %v299_v2  ;;  %v978_v34 = vadd.f32 %v16287_v41, %v877_v4  ;;  %v16290_v4 = vld [vmem:[#allocation44_spill] sm:$0xff] }
 0x362   :  { %5804 = vmatmul.f32.vlgmr.msrb.gmra.mxu0 %v16283_v27  ;;  %6139 = vmatpush.msra.mxu2 %v13488_v48  ;;  %v13568_v27 = vand.u32 4294901760, %v294_v56 }
 0x363   :  { %6071 = vmatpush.msra.mxu1 %v6070_v30  ;;  %6191 = vmatpush.msrb.mxu0 %v5996_v33  ;;  %v5162_v30 = vpop.f32.mrf.mxu1  ;;  %v5231_v25 = vpop.f32.mrf.mxu2  ;;  %16285 = vst [vmem:[#allocation37_spill] sm:$0xff] %v13555_v31  ;;  %v13577_v17 = vsub.f32 %v299_v2, %v13555_v31  ;;  %v6345_v2 = vand.u32 4294901760, %v6344_v61 }
 0x364   :  { %6176 = vmatpush.msra.mxu3 %v13446_v59  ;;  %5912 = vmatmul.f32.vlgmr.msrb.gmra.mxu2 %v16274_v39  ;;  %v5163_v33 = vadd.f32 %v5162_v30, %v5124_v47  ;;  %v284_v30 = vld [vmem:[#allocation9 + $0x630] sm:$0xff] }
 0x365   :  { %6195 = vmatpush.msrb.mxu0 %v6002_v26  ;;  %6077 = vmatpush.msra.mxu1 %v6076_v3  ;;  %v6339_v26 = vand.u32 4294901760, %v6338_v23  ;;  %v6088_v3 = vand.u32 4294901760, %v6087_v32  ;;  %v279_v23 = vld [vmem:[#allocation9 + $0x608] sm:$0xff]  ;;  %v13594_v41 = vand.u32 4294901760, %v284_v30 }
 0x366   :  { %6142 = vmatpush.msra.mxu2 %v13504_v49  ;;  %6178 = vmatpush.msra.mxu3 %v13463_v21  ;;  %v5232_v47 = vadd.f32 %v5231_v25, %v5163_v33  ;;  %v5268_v8 = vpop.f32.mrf.mxu3  ;;  %v16288_v25 = vand.u32 4294901760, %v13534_v37  ;;  %v16289_v32 = vld [vmem:[#allocation20_spill] sm:$0xff]  ;;  %v13607_v7 = vand.u32 4294901760, %v279_v23 }
 0x367   :  { %5949 = vmatmul.f32.vlgmr.msrb.gmra.mxu3 %v16274_v39  ;;  %6199 = vmatpush.msrb.mxu0 %v16286_v62  ;;  %v13592_v62 = vsub.f32 %v294_v56, %v13568_v27  ;;  %v16291_v39 = vand.u32 4294901760, %v13333_v0  ;;  %v13605_v56 = vsub.f32 %v289_v18, %v13579_v5  ;;  %v16294_v0 = vand.u32 4294901760, %v13347_v10  ;;  %v16296_v10 = vld [vmem:[#allocation23_spill] sm:$0xff] }
 0x368   :  { %6295 = vmatpush.msrb.mxu2 %v13481_v63  ;;  %6083 = vmatpush.msra.mxu1 %v6082_v29  ;;  %v6350_v33 = vsub.f32 %v13534_v37, %v16288_v25  ;;  %v13586_v58 = vadd.f32 %v5268_v8, %v5232_v47  ;;  %v1032_v29 = vadd.f32 %v16290_v4, %v978_v34  ;;  %v16292_v47 = vand.u32 4294901760, %v13543_v54  ;;  %v274_v25 = vld [vmem:[#allocation9 + $0x5e0] sm:$0xff]  ;;  %v16293_v34 = vld [vmem:[#allocation45_spill] sm:$0xff] }
 0x369   :  { %6180 = vmatpush.msra.mxu3 %v13479_v50  ;;  %5843 = vmatmul.f32.vlgmr.msrb.gmra.mxu1 %v16289_v32  ;;  %v13619_v61 = vsub.f32 %v284_v30, %v13594_v41  ;;  %v16302_v32 = vand.u32 4294901760, %v13381_v57 }
 0x36a   :  { %6203 = vmatpush.msrb.mxu0 %v16291_v39  ;;  %6297 = vmatpush.msrb.mxu2 %v13493_v12  ;;  %v6356_v8 = vsub.f32 %v13543_v54, %v16292_v47  ;;  %v1071_v4 = vadd.f32 %v16293_v34, %v1032_v29  ;;  %v6351_v39 = vand.u32 4294901760, %v6350_v33  ;;  %v16295_v47 = vand.u32 4294901760, %v13561_v46  ;;  %v264_v34 = vld [vmem:[#allocation9 + $0x590] sm:$0xff] }
 0x36b   :  { %6340 = vmatpush.msrb.mxu3 %v6339_v26  ;;  %6089 = vmatpush.msra.mxu1 %v6088_v3  ;;  %v269_v3 = vld [vmem:[#allocation9 + $0x5b8] sm:$0xff]  ;;  %v13621_v29 = vand.u32 4294901760, %v274_v25 }
 0x36c   :  { %6207 = vmatpush.msrb.mxu0 %v16294_v0  ;;  %v6362_v26 = vsub.f32 %v13561_v46, %v16295_v47  ;;  %6299 = vmatpush.msrb.mxu2 %v13511_v40  ;;  %v6357_v33 = vand.u32 4294901760, %v6356_v8  ;;  %v13633_v47 = vsub.f32 %v279_v23, %v13607_v7  ;;  %v13635_v18 = vand.u32 4294901760, %v269_v3  ;;  %v16300_v8 = vld [vmem:[#allocation25_spill] sm:$0xff]  ;;  %v16306_v23 = vld [vmem:[#allocation46_spill] sm:$0xff] }
 0x36d   :  { %6258 = vmatpush.msrb.mxu1 %v13287_v60  ;;  %6346 = vmatpush.msrb.mxu3 %v6345_v2  ;;  %v16297_v60 = vand.u32 4294901760, %v13366_v36  ;;  %v16298_v2 = vand.u32 4294901760, %v13577_v17  ;;  %v13649_v40 = vand.u32 4294901760, %v264_v34 }
 0x36e   :  { %6145 = vmatmul.f32.vlgmr.msra.gmra.mxu2 %v16296_v10  ;;  %v16299_v10 = vld [vmem:[#allocation47_spill] sm:$0xff]  ;;  %5990 = vmatmul.f32.vlgmr.msra.gmra.mxu0 %v16300_v8 }
 0x36f   :  { %6211 = vmatpush.msrb.mxu0 %v16297_v60  ;;  %6260 = vmatpush.msrb.mxu1 %v13296_v42  ;;  %v6368_v0 = vsub.f32 %v13577_v17, %v16298_v2  ;;  %v1140_v36 = vadd.f32 %v16299_v10, %v1071_v4  ;;  %v6363_v60 = vand.u32 4294901760, %v6362_v26  ;;  %v16301_v42 = vld [vmem:[#allocation24_spill] sm:$0xff]  ;;  %v16303_v2 = vand.u32 4294901760, %v13592_v62 }
 0x370   :  { %6301 = vmatpush.msrb.mxu2 %v13522_v45  ;;  %6352 = vmatpush.msrb.mxu3 %v6351_v39  ;;  %v13647_v45 = vsub.f32 %v274_v25, %v13621_v29  ;;  %v259_v4 = vld [vmem:[#allocation9 + $0x568] sm:$0xff]  ;;  %v13659_v25 = vsub.f32 %v269_v3, %v13635_v18  ;;  %v13673_v8 = vsub.f32 %v264_v34, %v13649_v40 }
 0x371   :  { %6184 = vmatmul.f32.vlgmr.msra.gmra.mxu3 %v16301_v42  ;;  %6215 = vmatpush.msrb.mxu0 %v16302_v32  ;;  %v6374_v30 = vsub.f32 %v13592_v62, %v16303_v2  ;;  %v16304_v39 = vld [vmem:[#allocation21_spill] sm:$0xff]  ;;  %v6369_v57 = vand.u32 4294901760, %v6368_v0  ;;  %v16305_v32 = vand.u32 4294901760, %v13605_v56  ;;  %v254_v2 = vld [vmem:[#allocation9 + $0x540] sm:$0xff]  ;;  %v1177_v42 = vadd.f32 %v16306_v23, %v1140_v36  ;;  %v249_v36 = vld [vmem:[#allocation9 + $0x518] sm:$0xff] }
 0x372   :  { %6262 = vmatpush.msrb.mxu1 %v13306_v24  ;;  %6303 = vmatpush.msrb.mxu2 %v13536_v52  ;;  %v16307_v24 = vand.u32 4294901760, %v13394_v15  ;;  %v16309_v15 = vld [vmem:[#allocation48_spill] sm:$0xff]  ;;  %v6403_v34 = vand.u32 4294901760, %v13659_v25  ;;  %v16312_v3 = vld [vmem:[#allocation49_spill] sm:$0xff] }
 0x373   :  { %6358 = vmatpush.msrb.mxu3 %v6357_v33  ;;  %6091 = vmatmul.f32.vlgmr.msra.gmra.mxu1 %v16304_v39  ;;  %v6380_v26 = vsub.f32 %v13605_v56, %v16305_v32  ;;  %v13665_v33 = vand.u32 4294901760, %v259_v4  ;;  %v6375_v0 = vand.u32 4294901760, %v6374_v30  ;;  %v16308_v32 = vand.u32 4294901760, %v13619_v61 }
 0x374   :  { %6219 = vmatpush.msrb.mxu0 %v16307_v24  ;;  %6264 = vmatpush.msrb.mxu1 %v13311_v43  ;;  %v1218_v23 = vadd.f32 %v16309_v15, %v1177_v42  ;;  %v16310_v43 = vand.u32 4294901760, %v13406_v53  ;;  %v13679_v24 = vand.u32 4294901760, %v254_v2  ;;  %v16313_v42 = vand.u32 4294901760, %v13418_v55 }
 0x375   :  { %6305 = vmatpush.msrb.mxu2 %v13555_v31  ;;  %6364 = vmatpush.msrb.mxu3 %v6363_v60  ;;  %v6386_v10 = vsub.f32 %v13619_v61, %v16308_v32  ;;  %v6381_v30 = vand.u32 4294901760, %v6380_v26  ;;  %v16311_v60 = vand.u32 4294901760, %v13633_v47  ;;  %v13693_v53 = vand.u32 4294901760, %v249_v36 }
 0x376   :  { %6223 = vmatpush.msrb.mxu0 %v16310_v43  ;;  %6266 = vmatpush.msrb.mxu1 %v13321_v20  ;;  %v1319_v31 = vadd.f32 %v16312_v3, %v1218_v23  ;;  %v13691_v20 = vsub.f32 %v259_v4, %v13665_v33  ;;  %v16314_v26 = vand.u32 4294901760, %v13647_v45  ;;  %v6409_v3 = vand.u32 4294901760, %v13673_v8  ;;  %v16316_v23 = vld [vmem:[#allocation51_spill] sm:$0xff] }
 0x377   :  { %6307 = vmatpush.msrb.mxu2 %v13568_v27  ;;  %6370 = vmatpush.msrb.mxu3 %v6369_v57  ;;  %v6392_v32 = vsub.f32 %v13633_v47, %v16311_v60  ;;  %v6387_v57 = vand.u32 4294901760, %v6386_v10  ;;  %v16315_v55 = vand.u32 4294901760, %v13430_v35  ;;  %v6404_v10 = vsub.f32 %v13659_v25, %v6403_v34 }
 0x378   :  { %6227 = vmatpush.msrb.mxu0 %v16313_v42  ;;  %6268 = vmatpush.msrb.mxu1 %v13337_v44  ;;  %v6398_v15 = vsub.f32 %v13647_v45, %v16314_v26  ;;  %v13704_v44 = vsub.f32 %v254_v2, %v13679_v24  ;;  %v1373_v43 = vadd.f32 %v16316_v23, %v1319_v31  ;;  %v16317_v60 = vand.u32 4294901760, %v13442_v22  ;;  %v16321_v26 = vld [vmem:[#allocation52_spill] sm:$0xff] }
 0x379   :  { %6309 = vmatpush.msrb.mxu2 %v13579_v5  ;;  %6376 = vmatpush.msrb.mxu3 %v6375_v0  ;;  %v6393_v4 = vand.u32 4294901760, %v6392_v32  ;;  %v6415_v35 = vand.u32 4294901760, %v13691_v20  ;;  %v13717_v2 = vsub.f32 %v249_v36, %v13693_v53  ;;  %v6410_v31 = vsub.f32 %v13673_v8, %v6409_v3  ;;  %v16319_v36 = vld [vmem:[#allocation50_spill] sm:$0xff] }
 0x37a   :  { %6231 = vmatpush.msrb.mxu0 %v16315_v55  ;;  %6270 = vmatpush.msrb.mxu1 %v13351_v14  ;;  %v16318_v22 = vand.u32 4294901760, %v13454_v11  ;;  %v1412_v32 = vadd.f32 %v16319_v36, %v1373_v43  ;;  %v16320_v42 = vand.u32 4294901760, %v13469_v9  ;;  %v16322_v55 = vand.u32 4294901760, %v13488_v48  ;;  %v16323_v9 = vld [vmem:[#allocation53_spill] sm:$0xff] }
 0x37b   :  { %6311 = vmatpush.msrb.mxu2 %v13594_v41  ;;  %6382 = vmatpush.msrb.mxu3 %v6381_v30  ;;  %v5309_v0 = vpop.f32.mrf.mxu0  ;;  %v6399_v30 = vand.u32 4294901760, %v6398_v15  ;;  %v6416_v11 = vsub.f32 %v13691_v20, %v6415_v35  ;;  %v16331_v36 = vand.u32 4294901760, %v13519_v28 }
 0x37c   :  { %6235 = vmatpush.msrb.mxu0 %v16317_v60  ;;  %6272 = vmatpush.msrb.mxu1 %v13363_v13  ;;  %v5310_v14 = vadd.f32 %v5309_v0, %v13586_v58  ;;  %v6421_v13 = vand.u32 4294901760, %v13704_v44  ;;  %v6405_v58 = vand.u32 4294901760, %v6404_v10  ;;  %v1481_v15 = vadd.f32 %v16321_v26, %v1412_v32  ;;  %v16342_v26 = vld [vmem:[#allocation37_spill] sm:$0xff] }
 0x37d   :  { %6313 = vmatpush.msrb.mxu2 %v13607_v7  ;;  %6388 = vmatpush.msrb.mxu3 %v6387_v57  ;;  %v6427_v57 = vand.u32 4294901760, %v13717_v2  ;;  %v16324_v10 = vand.u32 4294901760, %v13504_v49  ;;  %v6417_v0 = vand.u32 4294901760, %v6416_v11 }
 0x37e   :  { %6239 = vmatpush.msrb.mxu0 %v16318_v22  ;;  %6274 = vmatpush.msrb.mxu1 %v13378_v1  ;;  %v6411_v1 = vand.u32 4294901760, %v6410_v31  ;;  %v16329_v22 = vld [vmem:[#allocation16_spill] sm:$0xff] }
 0x37f   :  { %6315 = vmatpush.msrb.mxu2 %v13621_v29  ;;  %6394 = vmatpush.msrb.mxu3 %v6393_v4  ;;  %v1518_v4 = vadd.f32 %v16323_v9, %v1481_v15  ;;  %v6428_v48 = vsub.f32 %v13717_v2, %v6427_v57  ;;  %v16343_v15 = vld [vmem:[#allocation60_spill] sm:$0xff] }
 0x380   :  { %6243 = vmatpush.msrb.mxu0 %v16320_v42  ;;  %6276 = vmatpush.msrb.mxu1 %v13390_v51  ;;  %v6422_v51 = vsub.f32 %v13704_v44, %v6421_v13  ;;  %v16336_v42 = vld [vmem:[#allocation59_spill] sm:$0xff] }
 0x381   :  { %6317 = vmatpush.msrb.mxu2 %v13635_v18  ;;  %6400 = vmatpush.msrb.mxu3 %v6399_v30  ;;  %v6429_v60 = vand.u32 4294901760, %v6428_v48  ;;  %v16326_v30 = vld [vmem:[#allocation28_spill] sm:$0xff] }
 0x382   :  { %6247 = vmatpush.msrb.mxu0 %v16322_v55  ;;  %6278 = vmatpush.msrb.mxu1 %v13402_v38  ;;  %v6423_v23 = vand.u32 4294901760, %v6422_v51  ;;  %v16345_v51 = vld [vmem:[#allocation61_spill] sm:$0xff] }
 0x383   :  { %6319 = vmatpush.msrb.mxu2 %v13649_v40  ;;  %6406 = vmatpush.msrb.mxu3 %v6405_v58 }
 0x384   :  { %6251 = vmatpush.msrb.mxu0 %v16324_v10  ;;  %6280 = vmatpush.msrb.mxu1 %v13414_v16  ;;  %v16325_v16 = vld [vmem:[#allocation55_spill] sm:$0xff]  ;;  %v399_v10 = vld [vmem:[#allocation9 + $0x9c8] sm:$0xff] }
 0x385   :  { %6321 = vmatpush.msrb.mxu2 %v13665_v33  ;;  %6412 = vmatpush.msrb.mxu3 %v6411_v1  ;;  %v5410_v38 = vpop.f32.mrf.mxu1  ;;  %v1559_v49 = vadd.f32 %v16325_v16, %v1518_v4  ;;  %v5464_v4 = vpop.f32.mrf.mxu2  ;;  %v394_v16 = vld [vmem:[#allocation9 + $0x9a0] sm:$0xff] }
 0x386   :  { %6253 = vmatmul.f32.vlgmr.msrb.gmra.mxu0 %v16304_v39  ;;  %6282 = vmatpush.msrb.mxu1 %v13426_v6  ;;  %v5411_v43 = vadd.f32 %v5410_v38, %v5310_v14  ;;  %v16327_v6 = vand.u32 4294901760, %v13507_v19  ;;  %v16328_v14 = vld [vmem:[#allocation54_spill] sm:$0xff] }
 0x387   :  { %6438 = vmatpush.msra.mxu0 %v13507_v19  ;;  %6323 = vmatpush.msrb.mxu2 %v13679_v24  ;;  %v1660_v31 = vadd.f32 %v16328_v14, %v1559_v49  ;;  %v16332_v19 = vld [vmem:[#allocation57_spill] sm:$0xff] }
 0x388   :  { %6418 = vmatpush.msrb.mxu3 %v6417_v0  ;;  %6284 = vmatpush.msrb.mxu1 %v13446_v59  ;;  %v16330_v59 = vld [vmem:[#allocation56_spill] sm:$0xff]  ;;  %v5465_v0 = vadd.f32 %v5464_v4, %v5411_v43  ;;  %v389_v43 = vld [vmem:[#allocation9 + $0x978] sm:$0xff] }
 0x389   :  { %6441 = vmatpush.msra.mxu0 %v13519_v28  ;;  %6325 = vmatpush.msrb.mxu2 %v13693_v53  ;;  %v1714_v58 = vadd.f32 %v16330_v59, %v1660_v31  ;;  %v16334_v28 = vand.u32 4294901760, %v13543_v54  ;;  %v379_v31 = vld [vmem:[#allocation9 + $0x928] sm:$0xff]  ;;  %v16351_v59 = vld [vmem:[#allocation66_spill] sm:$0xff] }
 0x38a   :  { %6424 = vmatpush.msrb.mxu3 %v6423_v23  ;;  %6331 = vmatmul.f32.vlgmr.msrb.gmra.mxu2 %v16326_v30  ;;  %v5503_v23 = vpop.f32.mrf.mxu3  ;;  %v429_v30 = vld [vmem:[#allocation9 + $0xab8] sm:$0xff] }
 0x38b   :  { %6444 = vmatpush.msra.mxu0 %v13534_v37  ;;  %6532 = vmatpush.msra.mxu2 %v16327_v6  ;;  %v1753_v32 = vadd.f32 %v16332_v19, %v1714_v58  ;;  %v5504_v49 = vadd.f32 %v5503_v23, %v5465_v0  ;;  %v16350_v6 = vld [vmem:[#allocation62_spill] sm:$0xff] }
 0x38c   :  { %6286 = vmatpush.msrb.mxu1 %v13463_v21  ;;  %6430 = vmatpush.msrb.mxu3 %v6429_v60  ;;  %v16333_v21 = vand.u32 4294901760, %v13534_v37  ;;  %v16337_v37 = vand.u32 4294901760, %v13561_v46  ;;  %v384_v60 = vld [vmem:[#allocation9 + $0x950] sm:$0xff] }
 0x38d   :  { %6432 = vmatmul.f32.vlgmr.msrb.gmra.mxu3 %v16329_v22  ;;  %6447 = vmatpush.msra.mxu0 %v13543_v54  ;;  %v1822_v11 = vadd.f32 %v16336_v42, %v1753_v32  ;;  %v16339_v54 = vand.u32 4294901760, %v13577_v17  ;;  %v16354_v42 = vld [vmem:[#allocation17_spill] sm:$0xff] }
 0x38e   :  { %6536 = vmatpush.msra.mxu2 %v16331_v36  ;;  %6599 = vmatpush.msra.mxu3 %v13481_v63  ;;  %v16352_v36 = vld [vmem:[#allocation63_spill] sm:$0xff] }
 0x38f   :  { %6288 = vmatpush.msrb.mxu1 %v13479_v50  ;;  %6450 = vmatpush.msra.mxu0 %v13561_v46  ;;  %v16335_v50 = vld [vmem:[#allocation67_spill] sm:$0xff]  ;;  %v16341_v46 = vand.u32 4294901760, %v13592_v62  ;;  %v9027_v19 = vrot.slane %v16352_v36, 7 }
 0x390   :  { %6290 = vmatmul.f32.vlgmr.msrb.gmra.mxu1 %v16304_v39  ;;  %6540 = vmatpush.msra.mxu2 %v16333_v21  ;;  %v424_v39 = vld [vmem:[#allocation9 + $0xa90] sm:$0xff] }
 0x391   :  { %6491 = vmatpush.msra.mxu1 %v13481_v63  ;;  %6601 = vmatpush.msra.mxu3 %v13493_v12  ;;  %v16338_v63 = vld [vmem:[#allocation65_spill] sm:$0xff] }
 0x392   :  { %6453 = vmatpush.msra.mxu0 %v13577_v17  ;;  %6544 = vmatpush.msra.mxu2 %v16334_v28  ;;  %v16344_v17 = vand.u32 4294901760, %v13605_v56  ;;  %v16353_v28 = vld [vmem:[#allocation68_spill] sm:$0xff] }
 0x393   :  { %6493 = vmatpush.msra.mxu1 %v13493_v12  ;;  %6603 = vmatpush.msra.mxu3 %v16335_v50  ;;  %v16340_v12 = vld [vmem:[#allocation58_spill] sm:$0xff] }
 0x394   :  { %6456 = vmatpush.msra.mxu0 %v13592_v62  ;;  %6548 = vmatpush.msra.mxu2 %v16337_v37  ;;  %v1859_v1 = vadd.f32 %v16340_v12, %v1822_v11  ;;  %v404_v62 = vld [vmem:[#allocation9 + $0x9f0] sm:$0xff] }
 0x395   :  { %6495 = vmatpush.msra.mxu1 %v16335_v50  ;;  %6605 = vmatpush.msra.mxu3 %v16338_v63  ;;  %v13820_v48 = vand.u32 4294901760, %v404_v62 }
 0x396   :  { %6459 = vmatpush.msra.mxu0 %v13605_v56  ;;  %6552 = vmatpush.msra.mxu2 %v16339_v54  ;;  %v1900_v55 = vadd.f32 %v16343_v15, %v1859_v1  ;;  %v16347_v56 = vand.u32 4294901760, %v13633_v47  ;;  %v364_v1 = vld [vmem:[#allocation9 + $0x8b0] sm:$0xff] }
 0x397   :  { %6497 = vmatpush.msra.mxu1 %v16338_v63  ;;  %6607 = vmatpush.msra.mxu3 %v13536_v52 }
 0x398   :  { %6462 = vmatpush.msra.mxu0 %v13619_v61  ;;  %6556 = vmatpush.msra.mxu2 %v16341_v46  ;;  %v2001_v9 = vadd.f32 %v16345_v51, %v1900_v55  ;;  %v359_v55 = vld [vmem:[#allocation9 + $0x888] sm:$0xff] }
 0x399   :  { %6499 = vmatpush.msra.mxu1 %v13536_v52  ;;  %6609 = vmatpush.msra.mxu3 %v16342_v26  ;;  %v16346_v52 = vand.u32 4294901760, %v13619_v61  ;;  %v16348_v61 = vld [vmem:[#allocation64_spill] sm:$0xff] }
 0x39a   :  { %6465 = vmatpush.msra.mxu0 %v13633_v47  ;;  %6560 = vmatpush.msra.mxu2 %v16344_v17  ;;  %v2055_v38 = vadd.f32 %v16348_v61, %v2001_v9  ;;  %v13828_v47 = vand.u32 4294901760, %v399_v10  ;;  %v13915_v9 = vand.u32 4294901760, %v364_v1  ;;  %v16356_v61 = vld [vmem:[#allocation26_spill] sm:$0xff] }
 0x39b   :  { %6501 = vmatpush.msra.mxu1 %v16342_v26  ;;  %6611 = vmatpush.msra.mxu3 %v13568_v27 }
 0x39c   :  { %6468 = vmatpush.msra.mxu0 %v13647_v45  ;;  %6564 = vmatpush.msra.mxu2 %v16346_v52  ;;  %v2094_v14 = vadd.f32 %v16350_v6, %v2055_v38  ;;  %v354_v52 = vld [vmem:[#allocation9 + $0x860] sm:$0xff]  ;;  %v349_v38 = vld [vmem:[#allocation9 + $0x838] sm:$0xff] }
 0x39d   :  { %6503 = vmatpush.msra.mxu1 %v13568_v27  ;;  %6613 = vmatpush.msra.mxu3 %v13579_v5  ;;  %v16349_v27 = vand.u32 4294901760, %v13647_v45  ;;  %v13835_v45 = vand.u32 4294901760, %v394_v16  ;;  %v13951_v6 = vand.u32 4294901760, %v349_v38 }
 0x39e   :  { %6471 = vmatpush.msra.mxu0 %v13659_v25  ;;  %6568 = vmatpush.msra.mxu2 %v16347_v56  ;;  %v13846_v25 = vand.u32 4294901760, %v389_v43  ;;  %v2163_v58 = vadd.f32 %v16351_v59, %v2094_v14  ;;  %v339_v59 = vld [vmem:[#allocation9 + $0x7e8] sm:$0xff] }
 0x39f   :  { %6505 = vmatpush.msra.mxu1 %v13579_v5  ;;  %6615 = vmatpush.msra.mxu3 %v13594_v41  ;;  %v5572_v5 = vpop.f32.mrf.mxu0  ;;  %v13862_v32 = vsub.f32 %v394_v16, %v13835_v45 }
 0x3a0   :  { %6474 = vmatpush.msra.mxu0 %v13673_v8  ;;  %6572 = vmatpush.msra.mxu2 %v16349_v27  ;;  %v13856_v8 = vand.u32 4294901760, %v384_v60  ;;  %v2200_v50 = vadd.f32 %v16353_v28, %v2163_v58  ;;  %v13874_v37 = vsub.f32 %v389_v43, %v13846_v25  ;;  %v13939_v27 = vand.u32 4294901760, %v354_v52 }
 0x3a1   :  { %6507 = vmatpush.msra.mxu1 %v13594_v41  ;;  %6617 = vmatpush.msra.mxu3 %v13607_v7  ;;  %v13838_v41 = vsub.f32 %v404_v62, %v13820_v48 }
 0x3a2   :  { %6477 = vmatpush.msra.mxu0 %v13691_v20  ;;  %6576 = vmatpush.msra.mxu2 %v6403_v34  ;;  %v13849_v34 = vsub.f32 %v399_v10, %v13828_v47  ;;  %v13868_v20 = vand.u32 4294901760, %v379_v31  ;;  %v9032_v63 = vsel %vm9031_vm0, %v2200_v50, %v9027_v19  ;;  %v15854_v26 = vand.u32 4294901760, %v13874_v37 }
 0x3a3   :  { %6509 = vmatpush.msra.mxu1 %v13607_v7  ;;  %6619 = vmatpush.msra.mxu3 %v13621_v29  ;;  %v5573_v7 = vadd.f32 %v5572_v5, %v5504_v49  ;;  %v13928_v10 = vand.u32 4294901760, %v359_v55  ;;  %v13943_v5 = vsub.f32 %v364_v1, %v13915_v9  ;;  %v344_v49 = vld [vmem:[#allocation9 + $0x810] sm:$0xff]  ;;  %v13975_v50 = vand.u32 4294901760, %v339_v59 }
 0x3a4   :  { %6480 = vmatpush.msra.mxu0 %v13704_v44  ;;  %6580 = vmatpush.msra.mxu2 %v6409_v3  ;;  %v6678_v3 = vand.u32 4294901760, %v13838_v41  ;;  %v15857_v11 = vand.u32 4294901760, %v13849_v34  ;;  %v13881_v44 = vsub.f32 %v384_v60, %v13856_v8  ;;  %v6697_v56 = vsub.f32 %v13874_v37, %v15854_v26 }
 0x3a5   :  { %6511 = vmatpush.msra.mxu1 %v13621_v29  ;;  %6621 = vmatpush.msra.mxu3 %v13635_v18  ;;  %v13963_v36 = vand.u32 4294901760, %v344_v49  ;;  %v15847_v19 = vand.u32 4294901760, %v13943_v5 }
 0x3a6   :  { %6483 = vmatpush.msra.mxu0 %v13717_v2  ;;  %6584 = vmatpush.msra.mxu2 %v6415_v35  ;;  %v5609_v29 = vpop.f32.mrf.mxu1  ;;  %v374_v35 = vld [vmem:[#allocation9 + $0x900] sm:$0xff]  ;;  %v15855_v2 = vand.u32 4294901760, %v13862_v32  ;;  %v15853_v15 = vand.u32 4294901760, %v13881_v44  ;;  %v6698_v60 = vand.u32 4294901760, %v6697_v56 }
 0x3a7   :  { %6513 = vmatpush.msra.mxu1 %v13635_v18  ;;  %6623 = vmatpush.msra.mxu3 %v13649_v40  ;;  %v5610_v21 = vadd.f32 %v5609_v29, %v5573_v7  ;;  %v13891_v12 = vand.u32 4294901760, %v374_v35  ;;  %v13955_v7 = vsub.f32 %v359_v55, %v13928_v10  ;;  %v13967_v29 = vsub.f32 %v354_v52, %v13939_v27  ;;  %v484_v55 = vld [vmem:[#allocation9 + $0xc70] sm:$0xff] }
 0x3a8   :  { %6486 = vmatmul.f32.vlgmr.msra.gmra.mxu0 %v16354_v42  ;;  %6588 = vmatpush.msra.mxu2 %v6421_v13  ;;  %v369_v13 = vld [vmem:[#allocation9 + $0x8d8] sm:$0xff]  ;;  %v6691_v51 = vsub.f32 %v13862_v32, %v15855_v2  ;;  %v16357_v2 = vld [vmem:[#allocation32_spill] sm:$0xff] }
 0x3a9   :  { %6636 = vmatpush.msrb.mxu0 %v13820_v48  ;;  %6515 = vmatpush.msra.mxu1 %v13649_v40  ;;  %v9028_v18 = vrot.slane %v5610_v21, 6  ;;  %v6679_v40 = vsub.f32 %v13838_v41, %v6678_v3  ;;  %v13904_v46 = vand.u32 4294901760, %v369_v13  ;;  %v13918_v4 = vsub.f32 %v374_v35, %v13891_v12 }
 0x3aa   :  { %6625 = vmatpush.msra.mxu3 %v13665_v33  ;;  %6592 = vmatpush.msra.mxu2 %v6427_v57  ;;  %v13897_v57 = vsub.f32 %v379_v31, %v13868_v20  ;;  %v6692_v23 = vand.u32 4294901760, %v6691_v51  ;;  %v15846_v35 = vand.u32 4294901760, %v13955_v7  ;;  %v15844_v1 = vand.u32 4294901760, %v13967_v29  ;;  %v329_v51 = vld [vmem:[#allocation9 + $0x798] sm:$0xff] }
 0x3ab   :  { %6638 = vmatpush.msrb.mxu0 %v13828_v47  ;;  %6517 = vmatpush.msra.mxu1 %v13665_v33  ;;  %v13889_v54 = vsel %vm9033_vm1, %v9032_v63, %v9028_v18  ;;  %v6685_v33 = vsub.f32 %v13849_v34, %v15857_v11  ;;  %v6680_v17 = vand.u32 4294901760, %v6679_v40  ;;  %v13931_v0 = vsub.f32 %v369_v13, %v13904_v46  ;;  %v334_v63 = vld [vmem:[#allocation9 + $0x7c0] sm:$0xff]  ;;  %v449_v11 = vld [vmem:[#allocation9 + $0xb58] sm:$0xff] }
 0x3ac   :  { %16355 = vst [vmem:[#allocation38_spill] sm:$0xff] %v13889_v54  ;;  %6627 = vmatpush.msra.mxu3 %v13679_v24  ;;  %6594 = vmatmul.f32.vlgmr.msra.gmra.mxu2 %v16329_v22  ;;  %v15850_v16 = vand.u32 4294901760, %v13918_v4  ;;  %v13979_v18 = vsub.f32 %v349_v38, %v13951_v6  ;;  %v6727_v40 = vsub.f32 %v13943_v5, %v15847_v19  ;;  %v14005_v38 = vand.u32 4294901760, %v484_v55  ;;  %v464_v19 = vld [vmem:[#allocation9 + $0xbd0] sm:$0xff] }
 0x3ad   :  { %6640 = vmatpush.msrb.mxu0 %v13835_v45  ;;  %6779 = vmatpush.msrb.mxu2 %v13838_v41  ;;  %v6686_v62 = vand.u32 4294901760, %v6685_v33  ;;  %v15849_v14 = vand.u32 4294901760, %v13931_v0  ;;  %v13989_v33 = vsub.f32 %v344_v49, %v13963_v36  ;;  %v6739_v49 = vsub.f32 %v13967_v29, %v15844_v1  ;;  %v469_v1 = vld [vmem:[#allocation9 + $0xbf8] sm:$0xff]  ;;  %v444_v54 = vld [vmem:[#allocation9 + $0xb30] sm:$0xff] }
 0x3ae   :  { %6519 = vmatpush.msra.mxu1 %v13679_v24  ;;  %6629 = vmatpush.msra.mxu3 %v13693_v53  ;;  %v15851_v24 = vand.u32 4294901760, %v13897_v57  ;;  %v6715_v58 = vsub.f32 %v13918_v4, %v15850_v16  ;;  %v15845_v56 = vand.u32 4294901760, %v13979_v18  ;;  %v14055_v16 = vand.u32 4294901760, %v464_v19 }
 0x3af   :  { %6631 = vmatmul.f32.vlgmr.msra.gmra.mxu3 %v16329_v22  ;;  %6642 = vmatpush.msrb.mxu0 %v13846_v25  ;;  %v6721_v28 = vsub.f32 %v13931_v0, %v15849_v14  ;;  %v16358_v41 = vand.u32 4294901760, %v13849_v34  ;;  %v439_v22 = vld [vmem:[#allocation9 + $0xb08] sm:$0xff] }
 0x3b0   :  { %6782 = vmatpush.msrb.mxu2 %v13849_v34  ;;  %6832 = vmatpush.msrb.mxu3 %v13820_v48  ;;  %v6709_v43 = vsub.f32 %v13897_v57, %v15851_v24  ;;  %v6716_v13 = vand.u32 4294901760, %v6715_v58  ;;  %v474_v58 = vld [vmem:[#allocation9 + $0xc20] sm:$0xff]  ;;  %v459_v24 = vld [vmem:[#allocation9 + $0xba8] sm:$0xff]  ;;  %v16361_v34 = vand.u32 4294901760, %v13862_v32  ;;  %v14128_v42 = vand.u32 4294901760, %v439_v22 }
 0x3b1   :  { %6521 = vmatpush.msra.mxu1 %v13693_v53  ;;  %6644 = vmatpush.msrb.mxu0 %v13856_v8  ;;  %v6703_v53 = vsub.f32 %v13881_v44, %v15853_v15  ;;  %v6722_v52 = vand.u32 4294901760, %v6721_v28  ;;  %v6745_v28 = vsub.f32 %v13979_v18, %v15845_v56 }
 0x3b2   :  { %6525 = vmatmul.f32.vlgmr.msra.gmra.mxu1 %v16356_v61  ;;  %6785 = vmatpush.msrb.mxu2 %v13862_v32  ;;  %v6710_v21 = vand.u32 4294901760, %v6709_v43  ;;  %v6728_v43 = vand.u32 4294901760, %v6727_v40  ;;  %v14115_v61 = vand.u32 4294901760, %v444_v54 }
 0x3b3   :  { %6681 = vmatpush.msrb.mxu1 %v6680_v17  ;;  %6834 = vmatpush.msrb.mxu3 %v13828_v47  ;;  %v6704_v31 = vand.u32 4294901760, %v6703_v53  ;;  %v13993_v17 = vand.u32 4294901760, %v334_v63  ;;  %v14001_v53 = vsub.f32 %v339_v59, %v13975_v50 }
 0x3b4   :  { %6646 = vmatpush.msrb.mxu0 %v13868_v20  ;;  %6788 = vmatpush.msrb.mxu2 %v13874_v37 }
 0x3b5   :  { %6687 = vmatpush.msrb.mxu1 %v6686_v62  ;;  %6836 = vmatpush.msrb.mxu3 %v13835_v45  ;;  %v6733_v62 = vsub.f32 %v13955_v7, %v15846_v35  ;;  %v14017_v59 = vsub.f32 %v334_v63, %v13993_v17  ;;  %v14029_v63 = vsub.f32 %v484_v55, %v14005_v38  ;;  %v14038_v35 = vand.u32 4294901760, %v474_v58 }
 0x3b6   :  { %6648 = vmatpush.msrb.mxu0 %v13891_v12  ;;  %6791 = vmatpush.msrb.mxu2 %v13881_v44 }
 0x3b7   :  { %6693 = vmatpush.msrb.mxu1 %v6692_v23  ;;  %6838 = vmatpush.msrb.mxu3 %v13846_v25  ;;  %v479_v23 = vld [vmem:[#allocation9 + $0xc48] sm:$0xff]  ;;  %v15856_v55 = vand.u32 4294901760, %v14017_v59  ;;  %v15858_v14 = vand.u32 4294901760, %v14029_v63 }
 0x3b8   :  { %6650 = vmatpush.msrb.mxu0 %v13904_v46  ;;  %6794 = vmatpush.msrb.mxu2 %v13897_v57  ;;  %v14024_v40 = vand.u32 4294901760, %v479_v23 }
 0x3b9   :  { %6699 = vmatpush.msrb.mxu1 %v6698_v60  ;;  %6840 = vmatpush.msrb.mxu3 %v13856_v8  ;;  %v14011_v60 = vand.u32 4294901760, %v329_v51 }
 0x3ba   :  { %6652 = vmatpush.msrb.mxu0 %v13915_v9  ;;  %6797 = vmatpush.msrb.mxu2 %v13918_v4 }
 0x3bb   :  { %6705 = vmatpush.msrb.mxu1 %v6704_v31  ;;  %6842 = vmatpush.msrb.mxu3 %v13868_v20  ;;  %v15848_v31 = vand.u32 4294901760, %v13989_v33  ;;  %v14036_v56 = vsub.f32 %v329_v51, %v14011_v60 }
 0x3bc   :  { %6654 = vmatpush.msrb.mxu0 %v13928_v10  ;;  %6800 = vmatpush.msrb.mxu2 %v13931_v0 }
 0x3bd   :  { %6711 = vmatpush.msrb.mxu1 %v6710_v21  ;;  %6844 = vmatpush.msrb.mxu3 %v13891_v12  ;;  %v6734_v21 = vand.u32 4294901760, %v6733_v62  ;;  %v6751_v62 = vsub.f32 %v13989_v33, %v15848_v31  ;;  %v14050_v31 = vsub.f32 %v479_v23, %v14024_v40  ;;  %v6763_v23 = vsub.f32 %v14017_v59, %v15856_v55 }
 0x3be   :  { %6656 = vmatpush.msrb.mxu0 %v13939_v27  ;;  %6803 = vmatpush.msrb.mxu2 %v13943_v5  ;;  %v7020_v55 = vsub.f32 %v14029_v63, %v15858_v14 }
 0x3bf   :  { %6717 = vmatpush.msrb.mxu1 %v6716_v13  ;;  %6846 = vmatpush.msrb.mxu3 %v13904_v46  ;;  %v15852_v13 = vand.u32 4294901760, %v14001_v53  ;;  %v6764_v14 = vand.u32 4294901760, %v6763_v23 }
 0x3c0   :  { %6658 = vmatpush.msrb.mxu0 %v13951_v6  ;;  %6806 = vmatpush.msrb.mxu2 %v13955_v7  ;;  %v7021_v23 = vand.u32 4294901760, %v7020_v55 }
 0x3c1   :  { %6723 = vmatpush.msrb.mxu1 %v6722_v52  ;;  %6848 = vmatpush.msrb.mxu3 %v13915_v9  ;;  %v6740_v52 = vand.u32 4294901760, %v6739_v49  ;;  %v6746_v49 = vand.u32 4294901760, %v6745_v28  ;;  %v6757_v51 = vsub.f32 %v14001_v53, %v15852_v13  ;;  %v15859_v28 = vand.u32 4294901760, %v14036_v56 }
 0x3c2   :  { %6660 = vmatpush.msrb.mxu0 %v13963_v36  ;;  %6809 = vmatpush.msrb.mxu2 %v13967_v29  ;;  %v14060_v13 = vsub.f32 %v474_v58, %v14038_v35  ;;  %v14072_v58 = vand.u32 4294901760, %v459_v24 }
 0x3c3   :  { %6729 = vmatpush.msrb.mxu1 %v6728_v43  ;;  %6850 = vmatpush.msrb.mxu3 %v13928_v10  ;;  %v14043_v43 = vand.u32 4294901760, %v469_v1 }
 0x3c4   :  { %6662 = vmatpush.msrb.mxu0 %v13975_v50  ;;  %6812 = vmatpush.msrb.mxu2 %v13979_v18 }
 0x3c5   :  { %6735 = vmatpush.msrb.mxu1 %v6734_v21  ;;  %6852 = vmatpush.msrb.mxu3 %v13939_v27  ;;  %v6752_v21 = vand.u32 4294901760, %v6751_v62  ;;  %v14068_v15 = vsub.f32 %v469_v1, %v14043_v43  ;;  %v6758_v62 = vand.u32 4294901760, %v6757_v51  ;;  %v14080_v1 = vsub.f32 %v464_v19, %v14055_v16  ;;  %v16364_v19 = vld [vmem:[#allocation31_spill] sm:$0xff] }
 0x3c6   :  { %6664 = vmatpush.msrb.mxu0 %v13993_v17  ;;  %6815 = vmatpush.msrb.mxu2 %v13989_v33  ;;  %v14101_v51 = vand.u32 4294901760, %v449_v11 }
 0x3c7   :  { %6741 = vmatpush.msrb.mxu1 %v6740_v52  ;;  %6854 = vmatpush.msrb.mxu3 %v13951_v6  ;;  %v454_v52 = vld [vmem:[#allocation9 + $0xb80] sm:$0xff]  ;;  %v16363_v55 = vand.u32 4294901760, %v14068_v15 }
 0x3c8   :  { %6666 = vmatpush.msrb.mxu0 %v14011_v60  ;;  %6818 = vmatpush.msrb.mxu2 %v14001_v53  ;;  %v14088_v26 = vand.u32 4294901760, %v454_v52 }
 0x3c9   :  { %6747 = vmatpush.msrb.mxu1 %v6746_v49  ;;  %6856 = vmatpush.msrb.mxu3 %v13963_v36  ;;  %v6769_v49 = vsub.f32 %v14036_v56, %v15859_v28  ;;  %v14099_v28 = vsub.f32 %v459_v24, %v14072_v58  ;;  %v7038_v32 = vsub.f32 %v14068_v15, %v16363_v55 }
 0x3ca   :  { %6672 = vmatmul.f32.vlgmr.msrb.gmra.mxu0 %v16357_v2  ;;  %6821 = vmatpush.msrb.mxu2 %v14017_v59  ;;  %v16360_v2 = vld [vmem:[#allocation30_spill] sm:$0xff] }
 0x3cb   :  { %6873 = vmatpush.msra.mxu0 %v6678_v3  ;;  %6753 = vmatpush.msrb.mxu1 %v6752_v21  ;;  %v16359_v3 = vand.u32 4294901760, %v14050_v31 }
 0x3cc   :  { %6858 = vmatpush.msrb.mxu3 %v13975_v50  ;;  %6824 = vmatpush.msrb.mxu2 %v14036_v56 }
 0x3cd   :  { %6877 = vmatpush.msra.mxu0 %v16358_v41  ;;  %6759 = vmatpush.msrb.mxu1 %v6758_v62  ;;  %v7026_v21 = vsub.f32 %v14050_v31, %v16359_v3  ;;  %v6770_v62 = vand.u32 4294901760, %v6769_v49  ;;  %v16362_v41 = vand.u32 4294901760, %v14060_v13  ;;  %v14113_v3 = vsub.f32 %v454_v52, %v14088_v26 }
 0x3ce   :  { %6860 = vmatpush.msrb.mxu3 %v13993_v17  ;;  %6827 = vmatmul.f32.vlgmr.msrb.gmra.mxu2 %v16360_v2  ;;  %v16365_v49 = vand.u32 4294901760, %v13874_v37  ;;  %v14126_v52 = vsub.f32 %v449_v11, %v14101_v51  ;;  %v16367_v37 = vand.u32 4294901760, %v13881_v44  ;;  %v14138_v11 = vsub.f32 %v444_v54, %v14115_v61 }
 0x3cf   :  { %6881 = vmatpush.msra.mxu0 %v16361_v34  ;;  %6977 = vmatpush.msra.mxu2 %v14005_v38  ;;  %v7032_v24 = vsub.f32 %v14060_v13, %v16362_v41  ;;  %v434_v34 = vld [vmem:[#allocation9 + $0xae0] sm:$0xff]  ;;  %v7027_v2 = vand.u32 4294901760, %v7026_v21  ;;  %v16369_v44 = vand.u32 4294901760, %v14099_v28  ;;  %v14150_v54 = vsub.f32 %v439_v22, %v14128_v42 }
 0x3d0   :  { %6765 = vmatpush.msrb.mxu1 %v6764_v14  ;;  %6862 = vmatpush.msrb.mxu3 %v14011_v60  ;;  %v16366_v14 = vand.u32 4294901760, %v14080_v1  ;;  %v14140_v41 = vand.u32 4294901760, %v434_v34 }
 0x3d1   :  { %6866 = vmatmul.f32.vlgmr.msrb.gmra.mxu3 %v16364_v19  ;;  %6885 = vmatpush.msra.mxu0 %v16365_v49  ;;  %v7033_v21 = vand.u32 4294901760, %v7032_v24  ;;  %v15862_v49 = vand.u32 4294901760, %v14113_v3  ;;  %v16368_v19 = vld [vmem:[#allocation29_spill] sm:$0xff] }
 0x3d2   :  { %6979 = vmatpush.msra.mxu2 %v14024_v40  ;;  %7022 = vmatpush.msra.mxu3 %v7021_v23  ;;  %v7044_v55 = vsub.f32 %v14080_v1, %v16366_v14  ;;  %v7039_v23 = vand.u32 4294901760, %v7038_v32  ;;  %v14152_v14 = vand.u32 4294901760, %v429_v30  ;;  %v14163_v22 = vsub.f32 %v434_v34, %v14140_v41  ;;  %v419_v24 = vld [vmem:[#allocation9 + $0xa68] sm:$0xff] }
 0x3d3   :  { %6771 = vmatpush.msrb.mxu1 %v6770_v62  ;;  %6889 = vmatpush.msra.mxu0 %v16367_v37  ;;  %v7050_v62 = vsub.f32 %v14099_v28, %v16369_v44  ;;  %v16370_v37 = vand.u32 4294901760, %v13897_v57  ;;  %v14165_v44 = vand.u32 4294901760, %v424_v39  ;;  %v16371_v57 = vand.u32 4294901760, %v13918_v4 }
 0x3d4   :  { %6773 = vmatmul.f32.vlgmr.msrb.gmra.mxu1 %v16368_v19  ;;  %6981 = vmatpush.msra.mxu2 %v14038_v35  ;;  %v7045_v32 = vand.u32 4294901760, %v7044_v55  ;;  %v16372_v55 = vand.u32 4294901760, %v14126_v52  ;;  %v14176_v34 = vsub.f32 %v429_v30, %v14152_v14  ;;  %v14181_v4 = vand.u32 4294901760, %v419_v24 }
 0x3d5   :  { %6940 = vmatpush.msra.mxu1 %v13820_v48  ;;  %7028 = vmatpush.msra.mxu3 %v7027_v2  ;;  %v7056_v48 = vsub.f32 %v14113_v3, %v15862_v49  ;;  %v414_v49 = vld [vmem:[#allocation9 + $0xa40] sm:$0xff]  ;;  %v16373_v2 = vand.u32 4294901760, %v13931_v0  ;;  %v14189_v30 = vsub.f32 %v424_v39, %v14165_v44  ;;  %v16375_v0 = vand.u32 4294901760, %v13943_v5 }
 0x3d6   :  { %6893 = vmatpush.msra.mxu0 %v16370_v37  ;;  %6983 = vmatpush.msra.mxu2 %v14043_v43  ;;  %v7073_v37 = vand.u32 4294901760, %v14150_v54  ;;  %v16376_v39 = vand.u32 4294901760, %v13955_v7  ;;  %v14205_v5 = vsub.f32 %v419_v24, %v14181_v4  ;;  %v16377_v7 = vand.u32 4294901760, %v13967_v29 }
 0x3d7   :  { %6942 = vmatpush.msra.mxu1 %v13828_v47  ;;  %7034 = vmatpush.msra.mxu3 %v7033_v21  ;;  %v7051_v47 = vand.u32 4294901760, %v7050_v62  ;;  %v7062_v21 = vsub.f32 %v14126_v52, %v16372_v55  ;;  %v409_v55 = vld [vmem:[#allocation9 + $0xa18] sm:$0xff] }
 0x3d8   :  { %6897 = vmatpush.msra.mxu0 %v16371_v57  ;;  %6985 = vmatpush.msra.mxu2 %v14055_v16  ;;  %v7079_v57 = vand.u32 4294901760, %v14163_v22  ;;  %v7097_v29 = vand.u32 4294901760, %v14205_v5 }
 0x3d9   :  { %6944 = vmatpush.msra.mxu1 %v13835_v45  ;;  %7040 = vmatpush.msra.mxu3 %v7039_v23  ;;  %v7057_v45 = vand.u32 4294901760, %v7056_v48  ;;  %v16374_v23 = vand.u32 4294901760, %v14138_v11  ;;  %v7085_v48 = vand.u32 4294901760, %v14176_v34 }
 0x3da   :  { %6901 = vmatpush.msra.mxu0 %v16373_v2  ;;  %6987 = vmatpush.msra.mxu2 %v14072_v58  ;;  %v14194_v2 = vand.u32 4294901760, %v414_v49 }
 0x3db   :  { %6946 = vmatpush.msra.mxu1 %v13846_v25  ;;  %7046 = vmatpush.msra.mxu3 %v7045_v32  ;;  %v7068_v62 = vsub.f32 %v14138_v11, %v16374_v23  ;;  %v7063_v25 = vand.u32 4294901760, %v7062_v21  ;;  %v7074_v32 = vsub.f32 %v14150_v54, %v7073_v37  ;;  %v14207_v23 = vand.u32 4294901760, %v409_v55 }
 0x3dc   :  { %6905 = vmatpush.msra.mxu0 %v16375_v0  ;;  %6989 = vmatpush.msra.mxu2 %v14088_v26  ;;  %v7091_v21 = vand.u32 4294901760, %v14189_v30  ;;  %v14218_v24 = vsub.f32 %v414_v49, %v14194_v2 }
 0x3dd   :  { %6948 = vmatpush.msra.mxu1 %v13856_v8  ;;  %7052 = vmatpush.msra.mxu3 %v7051_v47  ;;  %v7069_v8 = vand.u32 4294901760, %v7068_v62  ;;  %v7080_v47 = vsub.f32 %v14163_v22, %v7079_v57  ;;  %v16378_v62 = vand.u32 4294901760, %v13979_v18  ;;  %v14229_v0 = vsub.f32 %v409_v55, %v14207_v23 }
 0x3de   :  { %6909 = vmatpush.msra.mxu0 %v16376_v39  ;;  %6991 = vmatpush.msra.mxu2 %v14101_v51  ;;  %v7092_v49 = vsub.f32 %v14189_v30, %v7091_v21  ;;  %v7103_v18 = vand.u32 4294901760, %v14218_v24 }
 0x3df   :  { %6950 = vmatpush.msra.mxu1 %v13868_v20  ;;  %7058 = vmatpush.msra.mxu3 %v7057_v45  ;;  %v7075_v20 = vand.u32 4294901760, %v7074_v32  ;;  %v7086_v45 = vsub.f32 %v14176_v34, %v7085_v48  ;;  %v16380_v32 = vand.u32 4294901760, %v14001_v53  ;;  %v16382_v53 = vand.u32 4294901760, %v14036_v56 }
 0x3e0   :  { %6913 = vmatpush.msra.mxu0 %v16377_v7  ;;  %6993 = vmatpush.msra.mxu2 %v14115_v61  ;;  %v7093_v39 = vand.u32 4294901760, %v7092_v49  ;;  %v16384_v56 = vand.u32 4294901760, %v14029_v63  ;;  %v16386_v7 = vand.u32 4294901760, %v14050_v31 }
 0x3e1   :  { %6952 = vmatpush.msra.mxu1 %v13891_v12  ;;  %7064 = vmatpush.msra.mxu3 %v7063_v25  ;;  %v7081_v12 = vand.u32 4294901760, %v7080_v47  ;;  %v16379_v25 = vand.u32 4294901760, %v13989_v33  ;;  %v7087_v55 = vand.u32 4294901760, %v7086_v45  ;;  %v7109_v33 = vand.u32 4294901760, %v14229_v0  ;;  %v120_v45 = vld [vmem:[#allocation9 + $0x110] sm:$0xff] }
 0x3e2   :  { %6917 = vmatpush.msra.mxu0 %v16378_v62  ;;  %6995 = vmatpush.msra.mxu2 %v14128_v42 }
 0x3e3   :  { %6954 = vmatpush.msra.mxu1 %v13904_v46  ;;  %7070 = vmatpush.msra.mxu3 %v7069_v8  ;;  %v7098_v46 = vsub.f32 %v14205_v5, %v7097_v29  ;;  %v16381_v8 = vand.u32 4294901760, %v14017_v59  ;;  %v7110_v59 = vsub.f32 %v14229_v0, %v7109_v33 }
 0x3e4   :  { %6921 = vmatpush.msra.mxu0 %v16379_v25  ;;  %6997 = vmatpush.msra.mxu2 %v14140_v41  ;;  %v115_v25 = vld [vmem:[#allocation9 + $0xe8] sm:$0xff] }
 0x3e5   :  { %6956 = vmatpush.msra.mxu1 %v13915_v9  ;;  %7076 = vmatpush.msra.mxu3 %v7075_v20  ;;  %v7104_v9 = vsub.f32 %v14218_v24, %v7103_v18 }
 0x3e6   :  { %6925 = vmatpush.msra.mxu0 %v16380_v32  ;;  %6999 = vmatpush.msra.mxu2 %v14152_v14 }
 0x3e7   :  { %6958 = vmatpush.msra.mxu1 %v13928_v10  ;;  %7082 = vmatpush.msra.mxu3 %v7081_v12  ;;  %v7099_v10 = vand.u32 4294901760, %v7098_v46  ;;  %v7105_v47 = vand.u32 4294901760, %v7104_v9 }
 0x3e8   :  { %6929 = vmatpush.msra.mxu0 %v16381_v8  ;;  %7001 = vmatpush.msra.mxu2 %v14165_v44 }
 0x3e9   :  { %6960 = vmatpush.msra.mxu1 %v13939_v27  ;;  %7088 = vmatpush.msra.mxu3 %v7087_v55  ;;  %v7111_v27 = vand.u32 4294901760, %v7110_v59 }
 0x3ea   :  { %6933 = vmatpush.msra.mxu0 %v16382_v53  ;;  %7003 = vmatpush.msra.mxu2 %v14181_v4  ;;  %v14434_v53 = vand.u32 4294901760, %v115_v25 }
 0x3eb   :  { %6962 = vmatpush.msra.mxu1 %v13951_v6  ;;  %7094 = vmatpush.msra.mxu3 %v7093_v39  ;;  %v16383_v6 = vld [vmem:[#allocation35_spill] sm:$0xff] }
 0x3ec   :  { %6935 = vmatmul.f32.vlgmr.msra.gmra.mxu0 %v16368_v19  ;;  %7005 = vmatpush.msra.mxu2 %v14194_v2 }
 0x3ed   :  { %7120 = vmatpush.msrb.mxu0 %v14029_v63  ;;  %6964 = vmatpush.msra.mxu1 %v13963_v36  ;;  %v16385_v36 = vld [vmem:[#allocation27_spill] sm:$0xff] }
 0x3ee   :  { %7100 = vmatpush.msra.mxu3 %v7099_v10  ;;  %7007 = vmatpush.msra.mxu2 %v14207_v23 }
 0x3ef   :  { %7123 = vmatpush.msrb.mxu0 %v14050_v31  ;;  %6966 = vmatpush.msra.mxu1 %v13975_v50  ;;  %v16387_v50 = vand.u32 4294901760, %v14060_v13  ;;  %v16393_v31 = vand.u32 4294901760, %v14138_v11 }
 0x3f0   :  { %7106 = vmatpush.msra.mxu3 %v7105_v47  ;;  %7013 = vmatmul.f32.vlgmr.msra.gmra.mxu2 %v16383_v6  ;;  %v105_v47 = vld [vmem:[#allocation9 + $0x98] sm:$0xff] }
 0x3f1   :  { %7126 = vmatpush.msrb.mxu0 %v14060_v13  ;;  %7214 = vmatpush.msrb.mxu2 %v16384_v56  ;;  %v165_v13 = vld [vmem:[#allocation9 + $0x278] sm:$0xff] }
 0x3f2   :  { %6968 = vmatpush.msra.mxu1 %v13993_v17  ;;  %7112 = vmatpush.msra.mxu3 %v7111_v27  ;;  %v16388_v17 = vand.u32 4294901760, %v14068_v15 }
 0x3f3   :  { %7114 = vmatmul.f32.vlgmr.msra.gmra.mxu3 %v16385_v36  ;;  %7129 = vmatpush.msrb.mxu0 %v14068_v15  ;;  %v16391_v15 = vand.u32 4294901760, %v14113_v3 }
 0x3f4   :  { %7218 = vmatpush.msrb.mxu2 %v16386_v7  ;;  %7281 = vmatpush.msrb.mxu3 %v14005_v38 }
 0x3f5   :  { %6970 = vmatpush.msra.mxu1 %v14011_v60  ;;  %7132 = vmatpush.msrb.mxu0 %v14080_v1  ;;  %v16389_v60 = vand.u32 4294901760, %v14080_v1 }
 0x3f6   :  { %6972 = vmatmul.f32.vlgmr.msra.gmra.mxu1 %v16368_v19  ;;  %7222 = vmatpush.msrb.mxu2 %v16387_v50  ;;  %v185_v19 = vld [vmem:[#allocation9 + $0x318] sm:$0xff] }
 0x3f7   :  { %7173 = vmatpush.msrb.mxu1 %v14005_v38  ;;  %7283 = vmatpush.msrb.mxu3 %v14024_v40  ;;  %v16390_v38 = vand.u32 4294901760, %v14099_v28 }
 0x3f8   :  { %7135 = vmatpush.msrb.mxu0 %v14099_v28  ;;  %7226 = vmatpush.msrb.mxu2 %v16388_v17 }
 0x3f9   :  { %7175 = vmatpush.msrb.mxu1 %v14024_v40  ;;  %7285 = vmatpush.msrb.mxu3 %v14038_v35  ;;  %v14321_v40 = vand.u32 4294901760, %v165_v13 }
 0x3fa   :  { %7138 = vmatpush.msrb.mxu0 %v14113_v3  ;;  %7230 = vmatpush.msrb.mxu2 %v16389_v60  ;;  %v100_v60 = vld [vmem:[#allocation9 + $0x70] sm:$0xff] }
 0x3fb   :  { %7177 = vmatpush.msrb.mxu1 %v14038_v35  ;;  %7287 = vmatpush.msrb.mxu3 %v14043_v43  ;;  %v16392_v35 = vand.u32 4294901760, %v14126_v52 }
 0x3fc   :  { %7141 = vmatpush.msrb.mxu0 %v14126_v52  ;;  %7234 = vmatpush.msrb.mxu2 %v16390_v38 }
 0x3fd   :  { %7179 = vmatpush.msrb.mxu1 %v14043_v43  ;;  %7289 = vmatpush.msrb.mxu3 %v14055_v16  ;;  %v150_v43 = vld [vmem:[#allocation9 + $0x200] sm:$0xff] }
 0x3fe   :  { %7144 = vmatpush.msrb.mxu0 %v14138_v11  ;;  %7238 = vmatpush.msrb.mxu2 %v16391_v15  ;;  %v14345_v1 = vand.u32 4294901760, %v150_v43  ;;  %v16394_v11 = vld [vmem:[#allocation33_spill] sm:$0xff] }
 0x3ff   :  { %7181 = vmatpush.msrb.mxu1 %v14055_v16  ;;  %7291 = vmatpush.msrb.mxu3 %v14072_v58  ;;  %v160_v16 = vld [vmem:[#allocation9 + $0x250] sm:$0xff] }
 0x400   :  { %7147 = vmatpush.msrb.mxu0 %v14150_v54  ;;  %7242 = vmatpush.msrb.mxu2 %v16392_v35  ;;  %v14328_v63 = vand.u32 4294901760, %v160_v16  ;;  %v135_v54 = vld [vmem:[#allocation9 + $0x188] sm:$0xff]  ;;  %v14456_v35 = vand.u32 4294901760, %v105_v47 }
 0x401   :  { %7183 = vmatpush.msrb.mxu1 %v14072_v58  ;;  %7293 = vmatpush.msrb.mxu3 %v14088_v26  ;;  %v14338_v58 = vsub.f32 %v165_v13, %v14321_v40 }
 0x402   :  { %7150 = vmatpush.msrb.mxu0 %v14163_v22  ;;  %7246 = vmatpush.msrb.mxu2 %v16393_v31  ;;  %v14459_v31 = vsub.f32 %v115_v25, %v14434_v53 }
 0x403   :  { %7185 = vmatpush.msrb.mxu1 %v14088_v26  ;;  %7295 = vmatpush.msrb.mxu3 %v14101_v51  ;;  %v155_v26 = vld [vmem:[#allocation9 + $0x228] sm:$0xff] }
 0x404   :  { %7153 = vmatpush.msrb.mxu0 %v14176_v34  ;;  %7250 = vmatpush.msrb.mxu2 %v7073_v37  ;;  %v14335_v28 = vand.u32 4294901760, %v155_v26  ;;  %v14370_v37 = vsub.f32 %v150_v43, %v14345_v1  ;;  %v130_v34 = vld [vmem:[#allocation9 + $0x160] sm:$0xff] }
 0x405   :  { %7187 = vmatpush.msrb.mxu1 %v14101_v51  ;;  %7297 = vmatpush.msrb.mxu3 %v14115_v61  ;;  %v140_v51 = vld [vmem:[#allocation9 + $0x1b0] sm:$0xff] }
 0x406   :  { %7156 = vmatpush.msrb.mxu0 %v14189_v30  ;;  %7254 = vmatpush.msrb.mxu2 %v7079_v57  ;;  %v14359_v52 = vsub.f32 %v155_v26, %v14335_v28  ;;  %v14380_v57 = vand.u32 4294901760, %v135_v54 }
 0x407   :  { %7189 = vmatpush.msrb.mxu1 %v14115_v61  ;;  %7299 = vmatpush.msrb.mxu3 %v14128_v42  ;;  %v145_v61 = vld [vmem:[#allocation9 + $0x1d8] sm:$0xff] }
 0x408   :  { %7159 = vmatpush.msrb.mxu0 %v14205_v5  ;;  %7258 = vmatpush.msrb.mxu2 %v7085_v48  ;;  %v14355_v3 = vand.u32 4294901760, %v145_v61  ;;  %v15875_v30 = vand.u32 4294901760, %v14359_v52  ;;  %v125_v5 = vld [vmem:[#allocation9 + $0x138] sm:$0xff]  ;;  %v14410_v49 = vsub.f32 %v135_v54, %v14380_v57 }
 0x409   :  { %7191 = vmatpush.msrb.mxu1 %v14128_v42  ;;  %7301 = vmatpush.msrb.mxu3 %v14140_v41  ;;  %v14348_v42 = vsub.f32 %v160_v16, %v14328_v63  ;;  %v14401_v62 = vand.u32 4294901760, %v125_v5  ;;  %v95_v16 = vld [vmem:[#allocation9 + $0x48] sm:$0xff]  ;;  %v245_v54 = vld [vmem:[#allocation9 + $0x4f8] sm:$0xff] }
 0x40a   :  { %7162 = vmatpush.msrb.mxu0 %v14218_v24  ;;  %7262 = vmatpush.msrb.mxu2 %v7091_v21  ;;  %v14384_v48 = vsub.f32 %v145_v61, %v14355_v3  ;;  %v14393_v21 = vand.u32 4294901760, %v130_v34  ;;  %v15873_v24 = vand.u32 4294901760, %v14370_v37  ;;  %v15868_v10 = vand.u32 4294901760, %v14410_v49 }
 0x40b   :  { %7193 = vmatpush.msrb.mxu1 %v14140_v41  ;;  %7303 = vmatpush.msrb.mxu3 %v14152_v14  ;;  %v7360_v41 = vand.u32 4294901760, %v14338_v58  ;;  %v15876_v22 = vand.u32 4294901760, %v14348_v42  ;;  %v14428_v39 = vsub.f32 %v125_v5, %v14401_v62  ;;  %v14468_v61 = vand.u32 4294901760, %v100_v60 }
 0x40c   :  { %7165 = vmatpush.msrb.mxu0 %v14229_v0  ;;  %7266 = vmatpush.msrb.mxu2 %v7097_v29  ;;  %v7373_v0 = vsub.f32 %v14359_v52, %v15875_v30  ;;  %v15871_v12 = vand.u32 4294901760, %v14384_v48  ;;  %v7379_v55 = vsub.f32 %v14370_v37, %v15873_v24  ;;  %v14423_v46 = vsub.f32 %v130_v34, %v14393_v21 }
 0x40d   :  { %7195 = vmatpush.msrb.mxu1 %v14152_v14  ;;  %7305 = vmatpush.msrb.mxu3 %v14165_v44  ;;  %v14366_v14 = vand.u32 4294901760, %v140_v51  ;;  %v15865_v17 = vand.u32 4294901760, %v14428_v39  ;;  %v7397_v15 = vsub.f32 %v14410_v49, %v15868_v10  ;;  %v14490_v25 = vand.u32 4294901760, %v245_v54 }
 0x40e   :  { %7168 = vmatmul.f32.vlgmr.msrb.gmra.mxu0 %v16394_v11  ;;  %7270 = vmatpush.msrb.mxu2 %v7103_v18  ;;  %v7374_v8 = vand.u32 4294901760, %v7373_v0  ;;  %v7385_v9 = vsub.f32 %v14384_v48, %v15871_v12  ;;  %v7380_v27 = vand.u32 4294901760, %v7379_v55  ;;  %v15867_v50 = vand.u32 4294901760, %v14423_v46 }
 0x40f   :  { %7318 = vmatpush.msra.mxu0 %v14321_v40  ;;  %7197 = vmatpush.msrb.mxu1 %v14165_v44  ;;  %v7361_v44 = vsub.f32 %v14338_v58, %v7360_v41  ;;  %v14397_v20 = vsub.f32 %v140_v51, %v14366_v14  ;;  %v7409_v34 = vsub.f32 %v14428_v39, %v15865_v17  ;;  %v7398_v5 = vand.u32 4294901760, %v7397_v15  ;;  %v225_v17 = vld [vmem:[#allocation9 + $0x458] sm:$0xff] }
 0x410   :  { %7307 = vmatpush.msrb.mxu3 %v14181_v4  ;;  %7274 = vmatpush.msrb.mxu2 %v7109_v33  ;;  %v16395_v33 = vld [vmem:[#allocation34_spill] sm:$0xff]  ;;  %v7386_v38 = vand.u32 4294901760, %v7385_v9  ;;  %v7403_v43 = vsub.f32 %v14423_v46, %v15867_v50  ;;  %v14497_v9 = vsub.f32 %v100_v60, %v14468_v61  ;;  %v14541_v10 = vand.u32 4294901760, %v225_v17 }
 0x411   :  { %7320 = vmatpush.msra.mxu0 %v14328_v63  ;;  %7199 = vmatpush.msrb.mxu1 %v14181_v4  ;;  %v7367_v4 = vsub.f32 %v14348_v42, %v15876_v22  ;;  %v7362_v29 = vand.u32 4294901760, %v7361_v44  ;;  %v15870_v32 = vand.u32 4294901760, %v14397_v20  ;;  %v90_v44 = vld [vmem:[#allocation9 + $0x20] sm:$0xff] }
 0x412   :  { %7309 = vmatpush.msrb.mxu3 %v14194_v2  ;;  %7276 = vmatmul.f32.vlgmr.msrb.gmra.mxu2 %v16385_v36  ;;  %v7404_v55 = vand.u32 4294901760, %v7403_v43 }
 0x413   :  { %7322 = vmatpush.msra.mxu0 %v14335_v28  ;;  %7461 = vmatpush.msra.mxu2 %v14338_v58  ;;  %v7368_v18 = vand.u32 4294901760, %v7367_v4  ;;  %v7391_v56 = vsub.f32 %v14397_v20, %v15870_v32  ;;  %v14479_v4 = vand.u32 4294901760, %v95_v16  ;;  %v16397_v58 = vand.u32 4294901760, %v14348_v42 }
 0x414   :  { %7201 = vmatpush.msrb.mxu1 %v14194_v2  ;;  %7311 = vmatpush.msrb.mxu3 %v14207_v23  ;;  %v14414_v2 = vand.u32 4294901760, %v120_v45 }
 0x415   :  { %7313 = vmatmul.f32.vlgmr.msrb.gmra.mxu3 %v16385_v36  ;;  %7324 = vmatpush.msra.mxu0 %v14345_v1  ;;  %v7392_v26 = vand.u32 4294901760, %v7391_v56  ;;  %v14507_v15 = vsub.f32 %v95_v16, %v14479_v4  ;;  %v15872_v16 = vand.u32 4294901760, %v14497_v9 }
 0x416   :  { %7464 = vmatpush.msra.mxu2 %v14348_v42  ;;  %7514 = vmatpush.msra.mxu3 %v14321_v40  ;;  %v14440_v59 = vsub.f32 %v120_v45, %v14414_v2  ;;  %v15863_v45 = vand.u32 4294901760, %v14459_v31  ;;  %v16399_v42 = vand.u32 4294901760, %v14359_v52 }
 0x417   :  { %7203 = vmatpush.msrb.mxu1 %v14207_v23  ;;  %7326 = vmatpush.msra.mxu0 %v14355_v3  ;;  %v110_v23 = vld [vmem:[#allocation9 + $0xc0] sm:$0xff] }
 0x418   :  { %7207 = vmatmul.f32.vlgmr.msrb.gmra.mxu1 %v16395_v33  ;;  %7467 = vmatpush.msra.mxu2 %v14359_v52  ;;  %v14446_v7 = vand.u32 4294901760, %v110_v23  ;;  %v15864_v13 = vand.u32 4294901760, %v14440_v59  ;;  %v7421_v56 = vsub.f32 %v14459_v31, %v15863_v45  ;;  %v16401_v52 = vand.u32 4294901760, %v14370_v37 }
 0x419   :  { %7363 = vmatpush.msra.mxu1 %v7362_v29  ;;  %7516 = vmatpush.msra.mxu3 %v14328_v63  ;;  %v14483_v29 = vsub.f32 %v105_v47, %v14456_v35  ;;  %v7410_v47 = vand.u32 4294901760, %v7409_v34  ;;  %v14514_v34 = vsub.f32 %v245_v54, %v14490_v25 }
 0x41a   :  { %7328 = vmatpush.msra.mxu0 %v14366_v14  ;;  %7470 = vmatpush.msra.mxu2 %v14370_v37  ;;  %v14471_v51 = vsub.f32 %v110_v23, %v14446_v7  ;;  %v7415_v0 = vsub.f32 %v14440_v59, %v15864_v13  ;;  %v14493_v23 = vand.u32 4294901760, %v90_v44  ;;  %v16403_v37 = vand.u32 4294901760, %v14384_v48 }
 0x41b   :  { %7369 = vmatpush.msra.mxu1 %v7368_v18  ;;  %7518 = vmatpush.msra.mxu3 %v14335_v28  ;;  %v240_v18 = vld [vmem:[#allocation9 + $0x4d0] sm:$0xff]  ;;  %v15877_v50 = vand.u32 4294901760, %v14514_v34 }
 0x41c   :  { %7330 = vmatpush.msra.mxu0 %v14380_v57  ;;  %7473 = vmatpush.msra.mxu2 %v14384_v48  ;;  %v14509_v60 = vand.u32 4294901760, %v240_v18  ;;  %v7416_v43 = vand.u32 4294901760, %v7415_v0  ;;  %v14522_v45 = vsub.f32 %v90_v44, %v14493_v23  ;;  %v7422_v0 = vand.u32 4294901760, %v7421_v56 }
 0x41d   :  { %7375 = vmatpush.msra.mxu1 %v7374_v8  ;;  %7520 = vmatpush.msra.mxu3 %v14345_v1  ;;  %v15866_v8 = vand.u32 4294901760, %v14471_v51  ;;  %v15874_v44 = vand.u32 4294901760, %v14507_v15  ;;  %v16405_v48 = vand.u32 4294901760, %v14397_v20 }
 0x41e   :  { %7332 = vmatpush.msra.mxu0 %v14393_v21  ;;  %7476 = vmatpush.msra.mxu2 %v14397_v20  ;;  %v16406_v20 = vand.u32 4294901760, %v14410_v49 }
 0x41f   :  { %7381 = vmatpush.msra.mxu1 %v7380_v27  ;;  %7522 = vmatpush.msra.mxu3 %v14355_v3  ;;  %v235_v27 = vld [vmem:[#allocation9 + $0x4a8] sm:$0xff] }
 0x420   :  { %7334 = vmatpush.msra.mxu0 %v14401_v62  ;;  %7479 = vmatpush.msra.mxu2 %v14410_v49  ;;  %v14524_v13 = vand.u32 4294901760, %v235_v27 }
 0x421   :  { %7387 = vmatpush.msra.mxu1 %v7386_v38  ;;  %7524 = vmatpush.msra.mxu3 %v14366_v14  ;;  %v15869_v38 = vand.u32 4294901760, %v14483_v29 }
 0x422   :  { %7336 = vmatpush.msra.mxu0 %v14414_v2  ;;  %7482 = vmatpush.msra.mxu2 %v14423_v46  ;;  %v14549_v32 = vsub.f32 %v235_v27, %v14524_v13 }
 0x423   :  { %7393 = vmatpush.msra.mxu1 %v7392_v26  ;;  %7526 = vmatpush.msra.mxu3 %v14380_v57  ;;  %v230_v26 = vld [vmem:[#allocation9 + $0x480] sm:$0xff] }
 0x424   :  { %7338 = vmatpush.msra.mxu0 %v14434_v53  ;;  %7485 = vmatpush.msra.mxu2 %v14428_v39  ;;  %v14528_v54 = vand.u32 4294901760, %v230_v26 }
 0x425   :  { %7399 = vmatpush.msra.mxu1 %v7398_v5  ;;  %7528 = vmatpush.msra.mxu3 %v14393_v21  ;;  %v7427_v5 = vsub.f32 %v14471_v51, %v15866_v8  ;;  %v14536_v8 = vsub.f32 %v240_v18, %v14509_v60  ;;  %v15878_v18 = vand.u32 4294901760, %v14522_v45 }
 0x426   :  { %7340 = vmatpush.msra.mxu0 %v14446_v7  ;;  %7488 = vmatpush.msra.mxu2 %v14440_v59  ;;  %v14554_v12 = vsub.f32 %v230_v26, %v14528_v54  ;;  %v7702_v26 = vsub.f32 %v14514_v34, %v15877_v50  ;;  %v205_v50 = vld [vmem:[#allocation9 + $0x3b8] sm:$0xff] }
 0x427   :  { %7405 = vmatpush.msra.mxu1 %v7404_v55  ;;  %7530 = vmatpush.msra.mxu3 %v14401_v62  ;;  %v7433_v55 = vsub.f32 %v14483_v29, %v15869_v38  ;;  %v7428_v56 = vand.u32 4294901760, %v7427_v5  ;;  %v7439_v38 = vsub.f32 %v14497_v9, %v15872_v16  ;;  %v7445_v16 = vsub.f32 %v14507_v15, %v15874_v44 }
 0x428   :  { %7342 = vmatpush.msra.mxu0 %v14456_v35  ;;  %7491 = vmatpush.msra.mxu2 %v14459_v31  ;;  %v7451_v30 = vsub.f32 %v14522_v45, %v15878_v18  ;;  %v14602_v11 = vand.u32 4294901760, %v205_v50 }
 0x429   :  { %7411 = vmatpush.msra.mxu1 %v7410_v47  ;;  %7532 = vmatpush.msra.mxu3 %v14414_v2  ;;  %v220_v47 = vld [vmem:[#allocation9 + $0x430] sm:$0xff]  ;;  %v7434_v5 = vand.u32 4294901760, %v7433_v55  ;;  %v210_v55 = vld [vmem:[#allocation9 + $0x3e0] sm:$0xff]  ;;  %v7440_v44 = vand.u32 4294901760, %v7439_v38  ;;  %v7446_v38 = vand.u32 4294901760, %v7445_v16 }
 0x42a   :  { %7344 = vmatpush.msra.mxu0 %v14468_v61  ;;  %7494 = vmatpush.msra.mxu2 %v14471_v51  ;;  %v14561_v27 = vand.u32 4294901760, %v220_v47  ;;  %v14589_v36 = vand.u32 4294901760, %v210_v55  ;;  %v7452_v16 = vand.u32 4294901760, %v7451_v30 }
 0x42b   :  { %7417 = vmatpush.msra.mxu1 %v7416_v43  ;;  %7534 = vmatpush.msra.mxu3 %v14434_v53  ;;  %v215_v43 = vld [vmem:[#allocation9 + $0x408] sm:$0xff] }
 0x42c   :  { %7346 = vmatpush.msra.mxu0 %v14479_v4  ;;  %7497 = vmatpush.msra.mxu2 %v14483_v29  ;;  %v14576_v24 = vand.u32 4294901760, %v215_v43  ;;  %v14587_v22 = vsub.f32 %v220_v47, %v14561_v27 }
 0x42d   :  { %7423 = vmatpush.msra.mxu1 %v7422_v0  ;;  %7536 = vmatpush.msra.mxu3 %v14446_v7  ;;  %v14569_v0 = vsub.f32 %v225_v17, %v14541_v10  ;;  %v200_v17 = vld [vmem:[#allocation9 + $0x390] sm:$0xff] }
 0x42e   :  { %7348 = vmatpush.msra.mxu0 %v14493_v23  ;;  %7500 = vmatpush.msra.mxu2 %v14497_v9  ;;  %v14600_v33 = vsub.f32 %v215_v43, %v14576_v24  ;;  %v14613_v43 = vsub.f32 %v210_v55, %v14589_v36  ;;  %v14625_v55 = vsub.f32 %v205_v50, %v14602_v11 }
 0x42f   :  { %7429 = vmatpush.msra.mxu1 %v7428_v56  ;;  %7538 = vmatpush.msra.mxu3 %v14456_v35  ;;  %v16396_v56 = vand.u32 4294901760, %v14536_v8 }
 0x430   :  { %7555 = vmatpush.msrb.mxu0 %v7360_v41  ;;  %7503 = vmatpush.msra.mxu2 %v14507_v15  ;;  %v7703_v41 = vand.u32 4294901760, %v7702_v26  ;;  %v16400_v26 = vand.u32 4294901760, %v14554_v12 }
 0x431   :  { %7435 = vmatpush.msra.mxu1 %v7434_v5  ;;  %7540 = vmatpush.msra.mxu3 %v14468_v61  ;;  %v7708_v18 = vsub.f32 %v14536_v8, %v16396_v56  ;;  %v16398_v56 = vand.u32 4294901760, %v14549_v32  ;;  %v14615_v5 = vand.u32 4294901760, %v200_v17 }
 0x432   :  { %7559 = vmatpush.msrb.mxu0 %v16397_v58  ;;  %7506 = vmatpush.msra.mxu2 %v14522_v45  ;;  %v195_v58 = vld [vmem:[#allocation9 + $0x368] sm:$0xff] }
 0x433   :  { %7441 = vmatpush.msra.mxu1 %v7440_v44  ;;  %7542 = vmatpush.msra.mxu3 %v14479_v4  ;;  %v7714_v47 = vsub.f32 %v14549_v32, %v16398_v56  ;;  %v7720_v44 = vsub.f32 %v14554_v12, %v16400_v26  ;;  %v7709_v30 = vand.u32 4294901760, %v7708_v18  ;;  %v15881_v56 = vand.u32 4294901760, %v14600_v33 }
 0x434   :  { %7563 = vmatpush.msrb.mxu0 %v16399_v42  ;;  %7659 = vmatpush.msrb.mxu2 %v14490_v25  ;;  %v16402_v42 = vand.u32 4294901760, %v14569_v0  ;;  %v14627_v6 = vand.u32 4294901760, %v195_v58  ;;  %v14638_v50 = vsub.f32 %v200_v17, %v14615_v5 }
 0x435   :  { %7447 = vmatpush.msra.mxu1 %v7446_v38  ;;  %7544 = vmatpush.msra.mxu3 %v14493_v23  ;;  %v190_v38 = vld [vmem:[#allocation9 + $0x340] sm:$0xff]  ;;  %v7715_v18 = vand.u32 4294901760, %v7714_v47  ;;  %v7743_v47 = vand.u32 4294901760, %v14613_v43 }
 0x436   :  { %7567 = vmatpush.msrb.mxu0 %v16401_v52  ;;  %7661 = vmatpush.msrb.mxu2 %v14509_v60  ;;  %v7726_v26 = vsub.f32 %v14569_v0, %v16402_v42  ;;  %v7721_v52 = vand.u32 4294901760, %v7720_v44  ;;  %v14640_v42 = vand.u32 4294901760, %v190_v38  ;;  %v7738_v44 = vsub.f32 %v14600_v33, %v15881_v56 }
 0x437   :  { %7704 = vmatpush.msrb.mxu3 %v7703_v41  ;;  %7453 = vmatpush.msra.mxu1 %v7452_v16  ;;  %v16404_v41 = vand.u32 4294901760, %v14587_v22  ;;  %v14651_v17 = vsub.f32 %v195_v58, %v14627_v6  ;;  %v16407_v56 = vand.u32 4294901760, %v14423_v46  ;;  %v16408_v46 = vand.u32 4294901760, %v14428_v39 }
 0x438   :  { %7571 = vmatpush.msrb.mxu0 %v16403_v37  ;;  %7663 = vmatpush.msrb.mxu2 %v14524_v13  ;;  %v14653_v37 = vand.u32 4294901760, %v185_v19  ;;  %v14664_v58 = vsub.f32 %v190_v38, %v14640_v42  ;;  %v7739_v49 = vand.u32 4294901760, %v7738_v44 }
 0x439   :  { %7622 = vmatpush.msrb.mxu1 %v14321_v40  ;;  %7710 = vmatpush.msrb.mxu3 %v7709_v30  ;;  %v7732_v16 = vsub.f32 %v14587_v22, %v16404_v41  ;;  %v7727_v40 = vand.u32 4294901760, %v7726_v26  ;;  %v7749_v30 = vand.u32 4294901760, %v14625_v55  ;;  %v180_v41 = vld [vmem:[#allocation9 + $0x2f0] sm:$0xff]  ;;  %v7744_v26 = vsub.f32 %v14613_v43, %v7743_v47 }
 0x43a   :  { %7575 = vmatpush.msrb.mxu0 %v16405_v48  ;;  %7665 = vmatpush.msrb.mxu2 %v14528_v54  ;;  %v175_v48 = vld [vmem:[#allocation9 + $0x2c8] sm:$0xff]  ;;  %v14677_v38 = vsub.f32 %v185_v19, %v14653_v37  ;;  %v16409_v19 = vand.u32 4294901760, %v14440_v59  ;;  %v16410_v59 = vand.u32 4294901760, %v14459_v31 }
 0x43b   :  { %7624 = vmatpush.msrb.mxu1 %v14328_v63  ;;  %7716 = vmatpush.msrb.mxu3 %v7715_v18  ;;  %v7733_v63 = vand.u32 4294901760, %v7732_v16  ;;  %v7755_v18 = vand.u32 4294901760, %v14638_v50  ;;  %v7761_v16 = vand.u32 4294901760, %v14651_v17 }
 0x43c   :  { %7579 = vmatpush.msrb.mxu0 %v16406_v20  ;;  %7667 = vmatpush.msrb.mxu2 %v14541_v10  ;;  %v7767_v20 = vand.u32 4294901760, %v14664_v58 }
 0x43d   :  { %7626 = vmatpush.msrb.mxu1 %v14335_v28  ;;  %7722 = vmatpush.msrb.mxu3 %v7721_v52  ;;  %v14669_v28 = vand.u32 4294901760, %v180_v41  ;;  %v7750_v52 = vsub.f32 %v14625_v55, %v7749_v30  ;;  %v7756_v44 = vsub.f32 %v14638_v50, %v7755_v18 }
 0x43e   :  { %7583 = vmatpush.msrb.mxu0 %v16407_v56  ;;  %7669 = vmatpush.msrb.mxu2 %v14561_v27  ;;  %v170_v56 = vld [vmem:[#allocation9 + $0x2a0] sm:$0xff] }
 0x43f   :  { %7628 = vmatpush.msrb.mxu1 %v14345_v1  ;;  %7728 = vmatpush.msrb.mxu3 %v7727_v40  ;;  %v14682_v1 = vand.u32 4294901760, %v175_v48  ;;  %v7745_v40 = vand.u32 4294901760, %v7744_v26  ;;  %v7751_v39 = vand.u32 4294901760, %v7750_v52  ;;  %v7773_v26 = vand.u32 4294901760, %v14677_v38 }
 0x440   :  { %7587 = vmatpush.msrb.mxu0 %v16408_v46  ;;  %7671 = vmatpush.msrb.mxu2 %v14576_v24  ;;  %v14700_v46 = vand.u32 4294901760, %v170_v56  ;;  %v16411_v52 = vand.u32 4294901760, %v14471_v51 }
 0x441   :  { %7630 = vmatpush.msrb.mxu1 %v14355_v3  ;;  %7734 = vmatpush.msrb.mxu3 %v7733_v63  ;;  %v14693_v3 = vsub.f32 %v180_v41, %v14669_v28  ;;  %v7762_v63 = vsub.f32 %v14651_v17, %v7761_v16  ;;  %v7757_v41 = vand.u32 4294901760, %v7756_v44  ;;  %v16412_v44 = vand.u32 4294901760, %v14483_v29 }
 0x442   :  { %7591 = vmatpush.msrb.mxu0 %v16409_v19  ;;  %7673 = vmatpush.msrb.mxu2 %v14589_v36  ;;  %v16413_v19 = vand.u32 4294901760, %v14497_v9 }
 0x443   :  { %7632 = vmatpush.msrb.mxu1 %v14366_v14  ;;  %7740 = vmatpush.msrb.mxu3 %v7739_v49  ;;  %v14706_v14 = vsub.f32 %v175_v48, %v14682_v1  ;;  %v7768_v49 = vsub.f32 %v14664_v58, %v7767_v20  ;;  %v7779_v31 = vand.u32 4294901760, %v14693_v3  ;;  %v7774_v48 = vsub.f32 %v14677_v38, %v7773_v26 }
 0x444   :  { %7595 = vmatpush.msrb.mxu0 %v16410_v59  ;;  %7675 = vmatpush.msrb.mxu2 %v14602_v11 }
 0x445   :  { %7634 = vmatpush.msrb.mxu1 %v14380_v57  ;;  %7746 = vmatpush.msrb.mxu3 %v7745_v40  ;;  %v7763_v57 = vand.u32 4294901760, %v7762_v63  ;;  %v14721_v40 = vsub.f32 %v170_v56, %v14700_v46  ;;  %v7769_v51 = vand.u32 4294901760, %v7768_v49  ;;  %v7780_v56 = vsub.f32 %v14693_v3, %v7779_v31  ;;  %v16420_v49 = vld [vmem:[#allocation18_spill] sm:$0xff] }
 0x446   :  { %7599 = vmatpush.msrb.mxu0 %v16411_v52  ;;  %7677 = vmatpush.msrb.mxu2 %v14615_v5  ;;  %v7775_v29 = vand.u32 4294901760, %v7774_v48 }
 0x447   :  { %7636 = vmatpush.msrb.mxu1 %v14393_v21  ;;  %7752 = vmatpush.msrb.mxu3 %v7751_v39  ;;  %v7785_v21 = vand.u32 4294901760, %v14706_v14  ;;  %v16414_v39 = vand.u32 4294901760, %v14507_v15  ;;  %v7781_v63 = vand.u32 4294901760, %v7780_v56  ;;  %v16416_v15 = vld [vmem:[#allocation22_spill] sm:$0xff] }
 0x448   :  { %7603 = vmatpush.msrb.mxu0 %v16412_v44  ;;  %7679 = vmatpush.msrb.mxu2 %v14627_v6 }
 0x449   :  { %7638 = vmatpush.msrb.mxu1 %v14401_v62  ;;  %7758 = vmatpush.msrb.mxu3 %v7757_v41  ;;  %v7791_v62 = vand.u32 4294901760, %v14721_v40  ;;  %v7786_v9 = vsub.f32 %v14706_v14, %v7785_v21  ;;  %v16418_v41 = vld [vmem:[#allocation20_spill] sm:$0xff] }
 0x44a   :  { %7607 = vmatpush.msrb.mxu0 %v16413_v19  ;;  %7681 = vmatpush.msrb.mxu2 %v14640_v42 }
 0x44b   :  { %7640 = vmatpush.msrb.mxu1 %v14414_v2  ;;  %7764 = vmatpush.msrb.mxu3 %v7763_v57  ;;  %v16415_v2 = vand.u32 4294901760, %v14522_v45  ;;  %v7787_v59 = vand.u32 4294901760, %v7786_v9  ;;  %v16417_v45 = vld [vmem:[#allocation19_spill] sm:$0xff] }
 0x44c   :  { %7611 = vmatpush.msrb.mxu0 %v16414_v39  ;;  %7683 = vmatpush.msrb.mxu2 %v14653_v37  ;;  %v270_v39 = vld [vmem:[#allocation9 + $0x5c0] sm:$0xff] }
 0x44d   :  { %7642 = vmatpush.msrb.mxu1 %v14434_v53  ;;  %7770 = vmatpush.msrb.mxu3 %v7769_v51  ;;  %v7792_v53 = vsub.f32 %v14721_v40, %v7791_v62 }
 0x44e   :  { %7615 = vmatpush.msrb.mxu0 %v16415_v2  ;;  %7685 = vmatpush.msrb.mxu2 %v14669_v28 }
 0x44f   :  { %7644 = vmatpush.msrb.mxu1 %v14446_v7  ;;  %7776 = vmatpush.msrb.mxu3 %v7775_v29  ;;  %v7793_v7 = vand.u32 4294901760, %v7792_v53 }
 0x450   :  { %7354 = vmatmul.f32.vlgmr.msra.gmra.mxu0 %v16416_v15  ;;  %7687 = vmatpush.msrb.mxu2 %v14682_v1 }
 0x451   :  { %7646 = vmatpush.msrb.mxu1 %v14456_v35  ;;  %7802 = vmatpush.msra.mxu0 %v14514_v34  ;;  %v16419_v35 = vand.u32 4294901760, %v14514_v34  ;;  %v16422_v34 = vand.u32 4294901760, %v14549_v32 }
 0x452   :  { %7782 = vmatpush.msrb.mxu3 %v7781_v63  ;;  %7509 = vmatmul.f32.vlgmr.msra.gmra.mxu2 %v16417_v45 }
 0x453   :  { %7805 = vmatpush.msra.mxu0 %v14536_v8  ;;  %7648 = vmatpush.msrb.mxu1 %v14468_v61  ;;  %v16421_v61 = vand.u32 4294901760, %v14536_v8  ;;  %v16424_v8 = vand.u32 4294901760, %v14554_v12 }
 0x454   :  { %7689 = vmatpush.msrb.mxu2 %v14700_v46  ;;  %7788 = vmatpush.msrb.mxu3 %v7787_v59  ;;  %v265_v59 = vld [vmem:[#allocation9 + $0x598] sm:$0xff] }
 0x455   :  { %7548 = vmatmul.f32.vlgmr.msra.gmra.mxu3 %v16418_v41  ;;  %7808 = vmatpush.msra.mxu0 %v14549_v32  ;;  %v16426_v32 = vand.u32 4294901760, %v14569_v0 }
 0x456   :  { %7896 = vmatpush.msra.mxu2 %v16419_v35  ;;  %7650 = vmatpush.msrb.mxu1 %v14479_v4  ;;  %v16423_v4 = vld [vmem:[#allocation25_spill] sm:$0xff] }
 0x457   :  { %7794 = vmatpush.msrb.mxu3 %v7793_v7  ;;  %7455 = vmatmul.f32.vlgmr.msra.gmra.mxu1 %v16420_v49  ;;  %v14935_v7 = vand.u32 4294901760, %v270_v39 }
 0x458   :  { %7811 = vmatpush.msra.mxu0 %v14554_v12  ;;  %7900 = vmatpush.msra.mxu2 %v16421_v61  ;;  %v16427_v12 = vand.u32 4294901760, %v14587_v22  ;;  %v260_v61 = vld [vmem:[#allocation9 + $0x570] sm:$0xff] }
 0x459   :  { %7963 = vmatpush.msra.mxu3 %v14490_v25  ;;  %7652 = vmatpush.msrb.mxu1 %v14493_v23  ;;  %v16425_v23 = vld [vmem:[#allocation21_spill] sm:$0xff] }
 0x45a   :  { %7814 = vmatpush.msra.mxu0 %v14569_v0  ;;  %7904 = vmatpush.msra.mxu2 %v16422_v34 }
 0x45b   :  { %7855 = vmatpush.msra.mxu1 %v14490_v25  ;;  %7965 = vmatpush.msra.mxu3 %v14509_v60 }
 0x45c   :  { %7695 = vmatmul.f32.vlgmr.msrb.gmra.mxu2 %v16423_v4  ;;  %7817 = vmatpush.msra.mxu0 %v14587_v22  ;;  %v325_v22 = vld [vmem:[#allocation9 + $0x778] sm:$0xff]  ;;  %v14947_v4 = vand.u32 4294901760, %v265_v59 }
 0x45d   :  { %7857 = vmatpush.msra.mxu1 %v14509_v60  ;;  %7908 = vmatpush.msra.mxu2 %v16424_v8 }
 0x45e   :  { %7967 = vmatpush.msra.mxu3 %v14524_v13  ;;  %7617 = vmatmul.f32.vlgmr.msrb.gmra.mxu0 %v16420_v49 }
 0x45f   :  { %7796 = vmatmul.f32.vlgmr.msrb.gmra.mxu3 %v16425_v23  ;;  %7820 = vmatpush.msra.mxu0 %v14600_v33 }
 0x460   :  { %7859 = vmatpush.msra.mxu1 %v14524_v13  ;;  %7912 = vmatpush.msra.mxu2 %v16426_v32  ;;  %v16428_v13 = vand.u32 4294901760, %v14600_v33  ;;  %v320_v33 = vld [vmem:[#allocation9 + $0x750] sm:$0xff] }
 0x461   :  { %7969 = vmatpush.msra.mxu3 %v14528_v54  ;;  %7654 = vmatmul.f32.vlgmr.msrb.gmra.mxu1 %v16420_v49  ;;  %v14820_v25 = vand.u32 4294901760, %v320_v33 }
 0x462   :  { %7823 = vmatpush.msra.mxu0 %v14613_v43  ;;  %7861 = vmatpush.msra.mxu1 %v14528_v54  ;;  %v305_v54 = vld [vmem:[#allocation9 + $0x6d8] sm:$0xff] }
 0x463   :  { %7916 = vmatpush.msra.mxu2 %v16427_v12  ;;  %7971 = vmatpush.msra.mxu3 %v14541_v10  ;;  %v14840_v0 = vsub.f32 %v320_v33, %v14820_v25  ;;  %v14844_v43 = vand.u32 4294901760, %v305_v54  ;;  %v14963_v33 = vsub.f32 %v270_v39, %v14935_v7 }
 0x464   :  { %7826 = vmatpush.msra.mxu0 %v14625_v55  ;;  %7863 = vmatpush.msra.mxu1 %v14541_v10  ;;  %v14813_v10 = vand.u32 4294901760, %v325_v22 }
 0x465   :  { %7920 = vmatpush.msra.mxu2 %v16428_v13  ;;  %7973 = vmatpush.msra.mxu3 %v14561_v27  ;;  %v14959_v13 = vand.u32 4294901760, %v260_v61 }
 0x466   :  { %7829 = vmatpush.msra.mxu0 %v14638_v50  ;;  %7865 = vmatpush.msra.mxu1 %v14561_v27 }
 0x467   :  { %7924 = vmatpush.msra.mxu2 %v7743_v47  ;;  %7975 = vmatpush.msra.mxu3 %v14576_v24  ;;  %v16429_v47 = vld [vmem:[#allocation23_spill] sm:$0xff] }
 0x468   :  { %7832 = vmatpush.msra.mxu0 %v14651_v17  ;;  %7867 = vmatpush.msra.mxu1 %v14576_v24  ;;  %v315_v24 = vld [vmem:[#allocation9 + $0x728] sm:$0xff] }
 0x469   :  { %7928 = vmatpush.msra.mxu2 %v7749_v30  ;;  %7977 = vmatpush.msra.mxu3 %v14589_v36  ;;  %v14827_v60 = vand.u32 4294901760, %v315_v24  ;;  %v295_v30 = vld [vmem:[#allocation9 + $0x688] sm:$0xff] }
 0x46a   :  { %7835 = vmatpush.msra.mxu0 %v14664_v58  ;;  %7869 = vmatpush.msra.mxu1 %v14589_v36  ;;  %v310_v36 = vld [vmem:[#allocation9 + $0x700] sm:$0xff] }
 0x46b   :  { %7932 = vmatpush.msra.mxu2 %v7755_v18  ;;  %7979 = vmatpush.msra.mxu3 %v14602_v11  ;;  %v14837_v27 = vand.u32 4294901760, %v310_v36  ;;  %v14851_v55 = vsub.f32 %v315_v24, %v14827_v60  ;;  %v14867_v18 = vsub.f32 %v305_v54, %v14844_v43  ;;  %v255_v24 = vld [vmem:[#allocation9 + $0x548] sm:$0xff] }
 0x46c   :  { %7838 = vmatpush.msra.mxu0 %v14677_v38  ;;  %7871 = vmatpush.msra.mxu1 %v14602_v11  ;;  %v14830_v11 = vsub.f32 %v325_v22, %v14813_v10 }
 0x46d   :  { %7936 = vmatpush.msra.mxu2 %v7761_v16  ;;  %7981 = vmatpush.msra.mxu3 %v14615_v5  ;;  %v14862_v17 = vsub.f32 %v310_v36, %v14837_v27  ;;  %v14875_v16 = vand.u32 4294901760, %v295_v30  ;;  %v8054_v38 = vand.u32 4294901760, %v14851_v55  ;;  %v15894_v52 = vand.u32 4294901760, %v14867_v18 }
 0x46e   :  { %7841 = vmatpush.msra.mxu0 %v14693_v3  ;;  %7873 = vmatpush.msra.mxu1 %v14615_v5  ;;  %v300_v5 = vld [vmem:[#allocation9 + $0x6b0] sm:$0xff] }
 0x46f   :  { %7940 = vmatpush.msra.mxu2 %v7767_v20  ;;  %7983 = vmatpush.msra.mxu3 %v14627_v6  ;;  %v14855_v50 = vand.u32 4294901760, %v300_v5  ;;  %v285_v20 = vld [vmem:[#allocation9 + $0x638] sm:$0xff]  ;;  %v8055_v48 = vsub.f32 %v14851_v55, %v8054_v38  ;;  %v14902_v44 = vsub.f32 %v295_v30, %v14875_v16 }
 0x470   :  { %7844 = vmatpush.msra.mxu0 %v14706_v14  ;;  %7875 = vmatpush.msra.mxu1 %v14627_v6  ;;  %v8042_v6 = vand.u32 4294901760, %v14830_v11  ;;  %v8060_v14 = vand.u32 4294901760, %v14862_v17  ;;  %v405_v30 = vld [vmem:[#allocation9 + $0x9f8] sm:$0xff] }
 0x471   :  { %7944 = vmatpush.msra.mxu2 %v7773_v26  ;;  %7985 = vmatpush.msra.mxu3 %v14640_v42  ;;  %v8056_v9 = vand.u32 4294901760, %v8055_v48  ;;  %v15891_v63 = vand.u32 4294901760, %v14902_v44  ;;  %v14989_v48 = vand.u32 4294901760, %v405_v30 }
 0x472   :  { %7847 = vmatpush.msra.mxu0 %v14721_v40  ;;  %7877 = vmatpush.msra.mxu1 %v14640_v42  ;;  %v8048_v42 = vand.u32 4294901760, %v14840_v0  ;;  %v8043_v58 = vsub.f32 %v14830_v11, %v8042_v6  ;;  %v14899_v40 = vand.u32 4294901760, %v285_v20  ;;  %v8061_v19 = vsub.f32 %v14862_v17, %v8060_v14 }
 0x473   :  { %7948 = vmatpush.msra.mxu2 %v7779_v31  ;;  %7987 = vmatpush.msra.mxu3 %v14653_v37  ;;  %v280_v31 = vld [vmem:[#allocation9 + $0x610] sm:$0xff]  ;;  %v8079_v34 = vsub.f32 %v14902_v44, %v15891_v63  ;;  %v365_v63 = vld [vmem:[#allocation9 + $0x8b8] sm:$0xff] }
 0x474   :  { %7850 = vmatmul.f32.vlgmr.msra.gmra.mxu0 %v16429_v47  ;;  %7879 = vmatpush.msra.mxu1 %v14653_v37  ;;  %v290_v37 = vld [vmem:[#allocation9 + $0x660] sm:$0xff]  ;;  %v8049_v3 = vsub.f32 %v14840_v0, %v8048_v42  ;;  %v8044_v57 = vand.u32 4294901760, %v8043_v58  ;;  %v14912_v56 = vand.u32 4294901760, %v280_v31  ;;  %v14927_v53 = vsub.f32 %v285_v20, %v14899_v40 }
 0x475   :  { %8000 = vmatpush.msrb.mxu0 %v14813_v10  ;;  %7952 = vmatpush.msra.mxu2 %v7785_v21  ;;  %v14888_v26 = vand.u32 4294901760, %v290_v37  ;;  %v275_v21 = vld [vmem:[#allocation9 + $0x5e8] sm:$0xff]  ;;  %v8062_v45 = vand.u32 4294901760, %v8061_v19  ;;  %v8080_v36 = vand.u32 4294901760, %v8079_v34  ;;  %v14973_v47 = vsub.f32 %v265_v59, %v14947_v4  ;;  %v250_v58 = vld [vmem:[#allocation9 + $0x520] sm:$0xff] }
 0x476   :  { %7989 = vmatpush.msra.mxu3 %v14669_v28  ;;  %7881 = vmatpush.msra.mxu1 %v14669_v28  ;;  %v14881_v28 = vsub.f32 %v300_v5, %v14855_v50  ;;  %v8050_v51 = vand.u32 4294901760, %v8049_v3  ;;  %v14923_v2 = vand.u32 4294901760, %v275_v21  ;;  %v14939_v35 = vsub.f32 %v280_v31, %v14912_v56 }
 0x477   :  { %8002 = vmatpush.msrb.mxu0 %v14820_v25  ;;  %7956 = vmatpush.msra.mxu2 %v7791_v62  ;;  %v14915_v29 = vsub.f32 %v290_v37, %v14888_v26  ;;  %v16430_v62 = vld [vmem:[#allocation24_spill] sm:$0xff]  ;;  %v15887_v8 = vand.u32 4294901760, %v14927_v53  ;;  %v14977_v37 = vand.u32 4294901760, %v255_v24  ;;  %v15883_v31 = vand.u32 4294901760, %v14963_v33 }
 0x478   :  { %7991 = vmatpush.msra.mxu3 %v14682_v1  ;;  %7958 = vmatmul.f32.vlgmr.msra.gmra.mxu2 %v16425_v23  ;;  %v15886_v22 = vand.u32 4294901760, %v14939_v35  ;;  %v15013_v34 = vsub.f32 %v405_v30, %v14989_v48 }
 0x479   :  { %8004 = vmatpush.msrb.mxu0 %v14827_v60  ;;  %8143 = vmatpush.msrb.mxu2 %v14830_v11  ;;  %v15889_v41 = vand.u32 4294901760, %v14915_v29  ;;  %v8091_v54 = vsub.f32 %v14927_v53, %v15887_v8  ;;  %v15001_v39 = vsub.f32 %v255_v24, %v14977_v37  ;;  %v8109_v59 = vsub.f32 %v14963_v33, %v15883_v31  ;;  %v380_v31 = vld [vmem:[#allocation9 + $0x930] sm:$0xff]  ;;  %v16431_v8 = vld [vmem:[#allocation28_spill] sm:$0xff] }
 0x47a   :  { %7883 = vmatpush.msra.mxu1 %v14682_v1  ;;  %7993 = vmatpush.msra.mxu3 %v14700_v46  ;;  %v15893_v1 = vand.u32 4294901760, %v14881_v28  ;;  %v8097_v3 = vsub.f32 %v14939_v35, %v15886_v22 }
 0x47b   :  { %7995 = vmatmul.f32.vlgmr.msra.gmra.mxu3 %v16425_v23  ;;  %8006 = vmatpush.msrb.mxu0 %v14837_v27  ;;  %v14951_v23 = vsub.f32 %v275_v21, %v14923_v2  ;;  %v8085_v12 = vsub.f32 %v14915_v29, %v15889_v41  ;;  %v400_v21 = vld [vmem:[#allocation9 + $0x9d0] sm:$0xff]  ;;  %v15888_v30 = vand.u32 4294901760, %v15001_v39  ;;  %v370_v41 = vld [vmem:[#allocation9 + $0x8e0] sm:$0xff] }
 0x47c   :  { %8146 = vmatpush.msrb.mxu2 %v14840_v0  ;;  %8196 = vmatpush.msrb.mxu3 %v14813_v10  ;;  %v8073_v15 = vsub.f32 %v14881_v28, %v15893_v1 }
 0x47d   :  { %7885 = vmatpush.msra.mxu1 %v14700_v46  ;;  %8008 = vmatpush.msrb.mxu0 %v14844_v43  ;;  %v8067_v46 = vsub.f32 %v14867_v18, %v15894_v52  ;;  %v15885_v5 = vand.u32 4294901760, %v14951_v23  ;;  %v8086_v20 = vand.u32 4294901760, %v8085_v12  ;;  %v360_v52 = vld [vmem:[#allocation9 + $0x890] sm:$0xff] }
 0x47e   :  { %7889 = vmatmul.f32.vlgmr.msra.gmra.mxu1 %v16430_v62  ;;  %8149 = vmatpush.msrb.mxu2 %v14851_v55  ;;  %v8074_v32 = vand.u32 4294901760, %v8073_v15  ;;  %v14995_v62 = vand.u32 4294901760, %v250_v58  ;;  %v8098_v15 = vand.u32 4294901760, %v8097_v3  ;;  %v8110_v3 = vand.u32 4294901760, %v8109_v59 }
 0x47f   :  { %8045 = vmatpush.msrb.mxu1 %v8044_v57  ;;  %8198 = vmatpush.msrb.mxu3 %v14820_v25  ;;  %v8068_v49 = vand.u32 4294901760, %v8067_v46  ;;  %v14985_v57 = vsub.f32 %v260_v61, %v14959_v13  ;;  %v8103_v19 = vsub.f32 %v14951_v23, %v15885_v5  ;;  %v15882_v46 = vand.u32 4294901760, %v14973_v47  ;;  %v390_v61 = vld [vmem:[#allocation9 + $0x980] sm:$0xff] }
 0x480   :  { %8010 = vmatpush.msrb.mxu0 %v14855_v50  ;;  %8152 = vmatpush.msrb.mxu2 %v14862_v17  ;;  %v15020_v24 = vsub.f32 %v250_v58, %v14995_v62  ;;  %v16434_v17 = vand.u32 4294901760, %v14867_v18 }
 0x481   :  { %8051 = vmatpush.msrb.mxu1 %v8050_v51  ;;  %8200 = vmatpush.msrb.mxu3 %v14827_v60  ;;  %v8092_v51 = vand.u32 4294901760, %v8091_v54  ;;  %v8115_v12 = vsub.f32 %v14973_v47, %v15882_v46  ;;  %v385_v54 = vld [vmem:[#allocation9 + $0x958] sm:$0xff] }
 0x482   :  { %8012 = vmatpush.msrb.mxu0 %v14875_v16  ;;  %8155 = vmatpush.msrb.mxu2 %v14867_v18  ;;  %v15039_v46 = vand.u32 4294901760, %v385_v54  ;;  %v15892_v59 = vand.u32 4294901760, %v15020_v24 }
 0x483   :  { %8057 = vmatpush.msrb.mxu1 %v8056_v9  ;;  %8202 = vmatpush.msrb.mxu3 %v14837_v27  ;;  %v395_v9 = vld [vmem:[#allocation9 + $0x9a8] sm:$0xff] }
 0x484   :  { %8014 = vmatpush.msrb.mxu0 %v14888_v26  ;;  %8158 = vmatpush.msrb.mxu2 %v14881_v28 }
 0x485   :  { %8063 = vmatpush.msrb.mxu1 %v8062_v45  ;;  %8204 = vmatpush.msrb.mxu3 %v14844_v43  ;;  %v15884_v45 = vand.u32 4294901760, %v14985_v57 }
 0x486   :  { %8016 = vmatpush.msrb.mxu0 %v14899_v40  ;;  %8161 = vmatpush.msrb.mxu2 %v14902_v44 }
 0x487   :  { %8069 = vmatpush.msrb.mxu1 %v8068_v49  ;;  %8206 = vmatpush.msrb.mxu3 %v14855_v50  ;;  %v15008_v49 = vand.u32 4294901760, %v400_v21  ;;  %v8121_v58 = vsub.f32 %v14985_v57, %v15884_v45 }
 0x488   :  { %8018 = vmatpush.msrb.mxu0 %v14912_v56  ;;  %8164 = vmatpush.msrb.mxu2 %v14915_v29 }
 0x489   :  { %8075 = vmatpush.msrb.mxu1 %v8074_v32  ;;  %8208 = vmatpush.msrb.mxu3 %v14875_v16  ;;  %v8104_v32 = vand.u32 4294901760, %v8103_v19  ;;  %v15890_v19 = vand.u32 4294901760, %v15013_v34 }
 0x48a   :  { %8020 = vmatpush.msrb.mxu0 %v14923_v2  ;;  %8167 = vmatpush.msrb.mxu2 %v14927_v53 }
 0x48b   :  { %8081 = vmatpush.msrb.mxu1 %v8080_v36  ;;  %8210 = vmatpush.msrb.mxu3 %v14888_v26  ;;  %v15022_v36 = vand.u32 4294901760, %v395_v9 }
 0x48c   :  { %8022 = vmatpush.msrb.mxu0 %v14935_v7  ;;  %8170 = vmatpush.msrb.mxu2 %v14939_v35 }
 0x48d   :  { %8087 = vmatpush.msrb.mxu1 %v8086_v20  ;;  %8212 = vmatpush.msrb.mxu3 %v14899_v40  ;;  %v15027_v20 = vand.u32 4294901760, %v390_v61  ;;  %v15044_v45 = vsub.f32 %v395_v9, %v15022_v36  ;;  %v15056_v9 = vand.u32 4294901760, %v380_v31 }
 0x48e   :  { %8024 = vmatpush.msrb.mxu0 %v14947_v4  ;;  %8173 = vmatpush.msrb.mxu2 %v14951_v23 }
 0x48f   :  { %8093 = vmatpush.msrb.mxu1 %v8092_v51  ;;  %8214 = vmatpush.msrb.mxu3 %v14912_v56  ;;  %v15034_v51 = vsub.f32 %v400_v21, %v15008_v49  ;;  %v8127_v21 = vsub.f32 %v15001_v39, %v15888_v30  ;;  %v15052_v5 = vsub.f32 %v390_v61, %v15027_v20 }
 0x490   :  { %8026 = vmatpush.msrb.mxu0 %v14959_v13  ;;  %8176 = vmatpush.msrb.mxu2 %v14963_v33  ;;  %v8384_v30 = vsub.f32 %v15013_v34, %v15890_v19  ;;  %v15064_v61 = vsub.f32 %v385_v54, %v15039_v46 }
 0x491   :  { %8099 = vmatpush.msrb.mxu1 %v8098_v15  ;;  %8216 = vmatpush.msrb.mxu3 %v14923_v2  ;;  %v8116_v15 = vand.u32 4294901760, %v8115_v12  ;;  %v8122_v12 = vand.u32 4294901760, %v8121_v58  ;;  %v15897_v22 = vand.u32 4294901760, %v15034_v51  ;;  %v8128_v19 = vand.u32 4294901760, %v8127_v21 }
 0x492   :  { %8028 = vmatpush.msrb.mxu0 %v14977_v37  ;;  %8179 = vmatpush.msrb.mxu2 %v14973_v47  ;;  %v15896_v54 = vand.u32 4294901760, %v15052_v5  ;;  %v8385_v21 = vand.u32 4294901760, %v8384_v30  ;;  %v15898_v1 = vand.u32 4294901760, %v15064_v61  ;;  %v16433_v30 = vld [vmem:[#allocation26_spill] sm:$0xff] }
 0x493   :  { %8105 = vmatpush.msrb.mxu1 %v8104_v32  ;;  %8218 = vmatpush.msrb.mxu3 %v14935_v7  ;;  %v375_v32 = vld [vmem:[#allocation9 + $0x908] sm:$0xff]  ;;  %v8390_v11 = vsub.f32 %v15034_v51, %v15897_v22 }
 0x494   :  { %8030 = vmatpush.msrb.mxu0 %v14995_v62  ;;  %8182 = vmatpush.msrb.mxu2 %v14985_v57  ;;  %v15072_v58 = vand.u32 4294901760, %v375_v32  ;;  %v8402_v55 = vsub.f32 %v15052_v5, %v15896_v54  ;;  %v350_v54 = vld [vmem:[#allocation9 + $0x840] sm:$0xff] }
 0x495   :  { %8111 = vmatpush.msrb.mxu1 %v8110_v3  ;;  %8220 = vmatpush.msrb.mxu3 %v14947_v4  ;;  %v8133_v3 = vsub.f32 %v15020_v24, %v15892_v59  ;;  %v16432_v59 = vld [vmem:[#allocation17_spill] sm:$0xff]  ;;  %v16435_v22 = vld [vmem:[#allocation16_spill] sm:$0xff] }
 0x496   :  { %8036 = vmatmul.f32.vlgmr.msrb.gmra.mxu0 %v16431_v8  ;;  %8185 = vmatpush.msrb.mxu2 %v15001_v39  ;;  %v15895_v8 = vand.u32 4294901760, %v15044_v45 }
 0x497   :  { %8237 = vmatpush.msra.mxu0 %v8042_v6  ;;  %8117 = vmatpush.msrb.mxu1 %v8116_v15  ;;  %v15083_v6 = vsub.f32 %v380_v31, %v15056_v9  ;;  %v15085_v15 = vand.u32 4294901760, %v370_v41  ;;  %v8134_v0 = vand.u32 4294901760, %v8133_v3  ;;  %v15097_v31 = vsub.f32 %v375_v32, %v15072_v58  ;;  %v345_v3 = vld [vmem:[#allocation9 + $0x818] sm:$0xff] }
 0x498   :  { %8222 = vmatpush.msrb.mxu3 %v14959_v13  ;;  %8188 = vmatpush.msrb.mxu2 %v15020_v24 }
 0x499   :  { %8241 = vmatpush.msra.mxu0 %v8048_v42  ;;  %8123 = vmatpush.msrb.mxu1 %v8122_v12  ;;  %v8396_v42 = vsub.f32 %v15044_v45, %v15895_v8  ;;  %v15099_v12 = vand.u32 4294901760, %v365_v63  ;;  %v15110_v32 = vsub.f32 %v370_v41, %v15085_v15  ;;  %v15112_v8 = vand.u32 4294901760, %v360_v52 }
 0x49a   :  { %8224 = vmatpush.msrb.mxu3 %v14977_v37  ;;  %8191 = vmatmul.f32.vlgmr.msrb.gmra.mxu2 %v16432_v59  ;;  %v8391_v59 = vand.u32 4294901760, %v8390_v11  ;;  %v15899_v11 = vand.u32 4294901760, %v15097_v31  ;;  %v16436_v18 = vand.u32 4294901760, %v15083_v6 }
 0x49b   :  { %8245 = vmatpush.msra.mxu0 %v8054_v38  ;;  %8341 = vmatpush.msra.mxu2 %v14989_v48  ;;  %v355_v38 = vld [vmem:[#allocation9 + $0x868] sm:$0xff]  ;;  %v15122_v41 = vsub.f32 %v365_v63, %v15099_v12  ;;  %v15134_v63 = vsub.f32 %v360_v52, %v15112_v8 }
 0x49c   :  { %8129 = vmatpush.msrb.mxu1 %v8128_v19  ;;  %8226 = vmatpush.msrb.mxu3 %v14995_v62  ;;  %v8408_v19 = vsub.f32 %v15064_v61, %v15898_v1  ;;  %v16437_v1 = vand.u32 4294901760, %v14881_v28  ;;  %v16438_v28 = vand.u32 4294901760, %v14902_v44 }
 0x49d   :  { %8230 = vmatmul.f32.vlgmr.msrb.gmra.mxu3 %v16433_v30  ;;  %8249 = vmatpush.msra.mxu0 %v8060_v14  ;;  %v8397_v14 = vand.u32 4294901760, %v8396_v42  ;;  %v15124_v30 = vand.u32 4294901760, %v355_v38  ;;  %v340_v42 = vld [vmem:[#allocation9 + $0x7f0] sm:$0xff] }
 0x49e   :  { %8343 = vmatpush.msra.mxu2 %v15008_v49  ;;  %8386 = vmatpush.msra.mxu3 %v8385_v21  ;;  %v8403_v21 = vand.u32 4294901760, %v8402_v55  ;;  %v8409_v55 = vand.u32 4294901760, %v8408_v19  ;;  %v15165_v44 = vand.u32 4294901760, %v340_v42 }
 0x49f   :  { %8135 = vmatpush.msrb.mxu1 %v8134_v0  ;;  %8253 = vmatpush.msra.mxu0 %v16434_v17  ;;  %v8414_v0 = vsub.f32 %v15083_v6, %v16436_v18  ;;  %v15136_v17 = vand.u32 4294901760, %v350_v54  ;;  %v15147_v52 = vsub.f32 %v355_v38, %v15124_v30  ;;  %v15149_v18 = vand.u32 4294901760, %v345_v3 }
 0x4a0   :  { %8137 = vmatmul.f32.vlgmr.msrb.gmra.mxu1 %v16435_v22  ;;  %8345 = vmatpush.msra.mxu2 %v15022_v36 }
 0x4a1   :  { %8304 = vmatpush.msra.mxu1 %v14813_v10  ;;  %8392 = vmatpush.msra.mxu3 %v8391_v59  ;;  %v8420_v10 = vsub.f32 %v15097_v31, %v15899_v11  ;;  %v15160_v38 = vsub.f32 %v350_v54, %v15136_v17  ;;  %v335_v11 = vld [vmem:[#allocation9 + $0x7c8] sm:$0xff]  ;;  %v16440_v59 = vand.u32 4294901760, %v14915_v29  ;;  %v15173_v54 = vsub.f32 %v345_v3, %v15149_v18 }
 0x4a2   :  { %8257 = vmatpush.msra.mxu0 %v16437_v1  ;;  %8347 = vmatpush.msra.mxu2 %v15027_v20  ;;  %v16439_v1 = vand.u32 4294901760, %v15110_v32  ;;  %v16442_v29 = vand.u32 4294901760, %v14927_v53  ;;  %v16443_v3 = vand.u32 4294901760, %v14939_v35  ;;  %v15189_v53 = vsub.f32 %v340_v42, %v15165_v44 }
 0x4a3   :  { %8306 = vmatpush.msra.mxu1 %v14820_v25  ;;  %8398 = vmatpush.msra.mxu3 %v8397_v14  ;;  %v8415_v25 = vand.u32 4294901760, %v8414_v0  ;;  %v8437_v14 = vand.u32 4294901760, %v15134_v63  ;;  %v16444_v35 = vand.u32 4294901760, %v14951_v23 }
 0x4a4   :  { %8261 = vmatpush.msra.mxu0 %v16438_v28  ;;  %8349 = vmatpush.msra.mxu2 %v15039_v46  ;;  %v8426_v19 = vsub.f32 %v15110_v32, %v16439_v1  ;;  %v8443_v28 = vand.u32 4294901760, %v15147_v52  ;;  %v330_v1 = vld [vmem:[#allocation9 + $0x7a0] sm:$0xff]  ;;  %v8461_v23 = vand.u32 4294901760, %v15189_v53 }
 0x4a5   :  { %8308 = vmatpush.msra.mxu1 %v14827_v60  ;;  %8404 = vmatpush.msra.mxu3 %v8403_v21  ;;  %v8421_v60 = vand.u32 4294901760, %v8420_v10  ;;  %v16441_v21 = vand.u32 4294901760, %v15122_v41  ;;  %v8449_v10 = vand.u32 4294901760, %v15160_v38 }
 0x4a6   :  { %8265 = vmatpush.msra.mxu0 %v16440_v59  ;;  %8351 = vmatpush.msra.mxu2 %v15056_v9  ;;  %v15178_v59 = vand.u32 4294901760, %v335_v11 }
 0x4a7   :  { %8310 = vmatpush.msra.mxu1 %v14837_v27  ;;  %8410 = vmatpush.msra.mxu3 %v8409_v55  ;;  %v8432_v0 = vsub.f32 %v15122_v41, %v16441_v21  ;;  %v8427_v27 = vand.u32 4294901760, %v8426_v19  ;;  %v8438_v55 = vsub.f32 %v15134_v63, %v8437_v14  ;;  %v15191_v21 = vand.u32 4294901760, %v330_v1 }
 0x4a8   :  { %8269 = vmatpush.msra.mxu0 %v16442_v29  ;;  %8353 = vmatpush.msra.mxu2 %v15072_v58  ;;  %v8455_v19 = vand.u32 4294901760, %v15173_v54  ;;  %v15202_v42 = vsub.f32 %v335_v11, %v15178_v59 }
 0x4a9   :  { %8312 = vmatpush.msra.mxu1 %v14844_v43  ;;  %8416 = vmatpush.msra.mxu3 %v8415_v25  ;;  %v8433_v43 = vand.u32 4294901760, %v8432_v0  ;;  %v8444_v25 = vsub.f32 %v15147_v52, %v8443_v28  ;;  %v16445_v0 = vand.u32 4294901760, %v14963_v33  ;;  %v15213_v29 = vsub.f32 %v330_v1, %v15191_v21 }
 0x4aa   :  { %8273 = vmatpush.msra.mxu0 %v16443_v3  ;;  %8355 = vmatpush.msra.mxu2 %v15085_v15  ;;  %v8456_v11 = vsub.f32 %v15173_v54, %v8455_v19  ;;  %v8467_v33 = vand.u32 4294901760, %v15202_v42 }
 0x4ab   :  { %8314 = vmatpush.msra.mxu1 %v14855_v50  ;;  %8422 = vmatpush.msra.mxu3 %v8421_v60  ;;  %v8439_v50 = vand.u32 4294901760, %v8438_v55  ;;  %v8450_v60 = vsub.f32 %v15160_v38, %v8449_v10  ;;  %v16447_v55 = vand.u32 4294901760, %v14985_v57  ;;  %v16449_v57 = vand.u32 4294901760, %v15020_v24 }
 0x4ac   :  { %8277 = vmatpush.msra.mxu0 %v16444_v35  ;;  %8357 = vmatpush.msra.mxu2 %v15099_v12  ;;  %v8457_v3 = vand.u32 4294901760, %v8456_v11  ;;  %v16451_v24 = vand.u32 4294901760, %v15013_v34  ;;  %v16453_v35 = vand.u32 4294901760, %v15034_v51  ;;  %v435_v11 = vld [vmem:[#allocation9 + $0xae8] sm:$0xff] }
 0x4ad   :  { %8316 = vmatpush.msra.mxu1 %v14875_v16  ;;  %8428 = vmatpush.msra.mxu3 %v8427_v27  ;;  %v8445_v16 = vand.u32 4294901760, %v8444_v25  ;;  %v16446_v27 = vand.u32 4294901760, %v14973_v47  ;;  %v8451_v1 = vand.u32 4294901760, %v8450_v60  ;;  %v8473_v47 = vand.u32 4294901760, %v15213_v29  ;;  %v440_v60 = vld [vmem:[#allocation9 + $0xb10] sm:$0xff] }
 0x4ae   :  { %8281 = vmatpush.msra.mxu0 %v16445_v0  ;;  %8359 = vmatpush.msra.mxu2 %v15112_v8 }
 0x4af   :  { %8318 = vmatpush.msra.mxu1 %v14888_v26  ;;  %8434 = vmatpush.msra.mxu3 %v8433_v43  ;;  %v8462_v26 = vsub.f32 %v15189_v53, %v8461_v23  ;;  %v16448_v43 = vand.u32 4294901760, %v15001_v39  ;;  %v8474_v39 = vsub.f32 %v15213_v29, %v8473_v47 }
 0x4b0   :  { %8285 = vmatpush.msra.mxu0 %v16446_v27  ;;  %8361 = vmatpush.msra.mxu2 %v15124_v30 }
 0x4b1   :  { %8320 = vmatpush.msra.mxu1 %v14899_v40  ;;  %8440 = vmatpush.msra.mxu3 %v8439_v50  ;;  %v8468_v40 = vsub.f32 %v15202_v42, %v8467_v33 }
 0x4b2   :  { %8289 = vmatpush.msra.mxu0 %v16447_v55  ;;  %8363 = vmatpush.msra.mxu2 %v15136_v17 }
 0x4b3   :  { %8322 = vmatpush.msra.mxu1 %v14912_v56  ;;  %8446 = vmatpush.msra.mxu3 %v8445_v16  ;;  %v8463_v56 = vand.u32 4294901760, %v8462_v26  ;;  %v8469_v25 = vand.u32 4294901760, %v8468_v40  ;;  %v16462_v26 = vld [vmem:[#allocation31_spill] sm:$0xff]  ;;  %v15416_v40 = vand.u32 4294901760, %v435_v11 }
 0x4b4   :  { %8293 = vmatpush.msra.mxu0 %v16448_v43  ;;  %8365 = vmatpush.msra.mxu2 %v15149_v18 }
 0x4b5   :  { %8324 = vmatpush.msra.mxu1 %v14923_v2  ;;  %8452 = vmatpush.msra.mxu3 %v8451_v1  ;;  %v8475_v2 = vand.u32 4294901760, %v8474_v39  ;;  %v15404_v1 = vand.u32 4294901760, %v440_v60  ;;  %v425_v39 = vld [vmem:[#allocation9 + $0xa98] sm:$0xff] }
 0x4b6   :  { %8297 = vmatpush.msra.mxu0 %v16449_v57  ;;  %8367 = vmatpush.msra.mxu2 %v15165_v44 }
 0x4b7   :  { %8326 = vmatpush.msra.mxu1 %v14935_v7  ;;  %8458 = vmatpush.msra.mxu3 %v8457_v3  ;;  %v16450_v7 = vld [vmem:[#allocation32_spill] sm:$0xff] }
 0x4b8   :  { %8299 = vmatmul.f32.vlgmr.msra.gmra.mxu0 %v16435_v22  ;;  %8369 = vmatpush.msra.mxu2 %v15178_v59  ;;  %v430_v3 = vld [vmem:[#allocation9 + $0xac0] sm:$0xff] }
 0x4b9   :  { %8484 = vmatpush.msrb.mxu0 %v15013_v34  ;;  %8328 = vmatpush.msra.mxu1 %v14947_v4  ;;  %v16452_v4 = vld [vmem:[#allocation29_spill] sm:$0xff] }
 0x4ba   :  { %8464 = vmatpush.msra.mxu3 %v8463_v56  ;;  %8371 = vmatpush.msra.mxu2 %v15191_v21 }
 0x4bb   :  { %8487 = vmatpush.msrb.mxu0 %v15034_v51  ;;  %8330 = vmatpush.msra.mxu1 %v14959_v13  ;;  %v16454_v13 = vand.u32 4294901760, %v15044_v45  ;;  %v470_v51 = vld [vmem:[#allocation9 + $0xc00] sm:$0xff] }
 0x4bc   :  { %8470 = vmatpush.msra.mxu3 %v8469_v25  ;;  %8377 = vmatmul.f32.vlgmr.msra.gmra.mxu2 %v16450_v7 }
 0x4bd   :  { %8490 = vmatpush.msrb.mxu0 %v15044_v45  ;;  %8578 = vmatpush.msrb.mxu2 %v16451_v24  ;;  %v16460_v45 = vand.u32 4294901760, %v15122_v41  ;;  %v15431_v24 = vsub.f32 %v440_v60, %v15404_v1 }
 0x4be   :  { %8332 = vmatpush.msra.mxu1 %v14977_v37  ;;  %8476 = vmatpush.msra.mxu3 %v8475_v2  ;;  %v16455_v37 = vand.u32 4294901760, %v15052_v5  ;;  %v15427_v2 = vand.u32 4294901760, %v430_v3 }
 0x4bf   :  { %8478 = vmatmul.f32.vlgmr.msra.gmra.mxu3 %v16452_v4  ;;  %8493 = vmatpush.msrb.mxu0 %v15052_v5  ;;  %v16458_v5 = vand.u32 4294901760, %v15097_v31 }
 0x4c0   :  { %8582 = vmatpush.msrb.mxu2 %v16453_v35  ;;  %8645 = vmatpush.msrb.mxu3 %v14989_v48  ;;  %v420_v35 = vld [vmem:[#allocation9 + $0xa70] sm:$0xff] }
 0x4c1   :  { %8334 = vmatpush.msra.mxu1 %v14995_v62  ;;  %8496 = vmatpush.msrb.mxu0 %v15064_v61  ;;  %v16459_v62 = vand.u32 4294901760, %v15110_v32 }
 0x4c2   :  { %8336 = vmatmul.f32.vlgmr.msra.gmra.mxu1 %v16435_v22  ;;  %8586 = vmatpush.msrb.mxu2 %v16454_v13  ;;  %v16456_v22 = vand.u32 4294901760, %v15064_v61 }
 0x4c3   :  { %8537 = vmatpush.msrb.mxu1 %v14989_v48  ;;  %8647 = vmatpush.msrb.mxu3 %v15008_v49  ;;  %v16457_v48 = vand.u32 4294901760, %v15083_v6 }
 0x4c4   :  { %8499 = vmatpush.msrb.mxu0 %v15083_v6  ;;  %8590 = vmatpush.msrb.mxu2 %v16455_v37  ;;  %v15329_v6 = vand.u32 4294901760, %v470_v51  ;;  %v15439_v37 = vand.u32 4294901760, %v425_v39 }
 0x4c5   :  { %8539 = vmatpush.msrb.mxu1 %v15008_v49  ;;  %8649 = vmatpush.msrb.mxu3 %v15022_v36  ;;  %v485_v49 = vld [vmem:[#allocation9 + $0xc78] sm:$0xff] }
 0x4c6   :  { %8502 = vmatpush.msrb.mxu0 %v15097_v31  ;;  %8594 = vmatpush.msrb.mxu2 %v16456_v22  ;;  %v15305_v34 = vand.u32 4294901760, %v485_v49 }
 0x4c7   :  { %8541 = vmatpush.msrb.mxu1 %v15022_v36  ;;  %8651 = vmatpush.msrb.mxu3 %v15027_v20  ;;  %v475_v36 = vld [vmem:[#allocation9 + $0xc28] sm:$0xff] }
 0x4c8   :  { %8505 = vmatpush.msrb.mxu0 %v15110_v32  ;;  %8598 = vmatpush.msrb.mxu2 %v16457_v48  ;;  %v15322_v61 = vsub.f32 %v485_v49, %v15305_v34  ;;  %v15443_v48 = vsub.f32 %v435_v11, %v15416_v40  ;;  %v15451_v49 = vand.u32 4294901760, %v420_v35 }
 0x4c9   :  { %8543 = vmatpush.msrb.mxu1 %v15027_v20  ;;  %8653 = vmatpush.msrb.mxu3 %v15039_v46 }
 0x4ca   :  { %8508 = vmatpush.msrb.mxu0 %v15122_v41  ;;  %8602 = vmatpush.msrb.mxu2 %v16458_v5  ;;  %v455_v41 = vld [vmem:[#allocation9 + $0xb88] sm:$0xff]  ;;  %v15477_v60 = vsub.f32 %v420_v35, %v15451_v49 }
 0x4cb   :  { %8545 = vmatpush.msrb.mxu1 %v15039_v46  ;;  %8655 = vmatpush.msrb.mxu3 %v15056_v9  ;;  %v480_v46 = vld [vmem:[#allocation9 + $0xc50] sm:$0xff] }
 0x4cc   :  { %8511 = vmatpush.msrb.mxu0 %v15134_v63  ;;  %8606 = vmatpush.msrb.mxu2 %v16459_v62  ;;  %v15312_v20 = vand.u32 4294901760, %v480_v46  ;;  %v415_v62 = vld [vmem:[#allocation9 + $0xa48] sm:$0xff] }
 0x4cd   :  { %8547 = vmatpush.msrb.mxu1 %v15056_v9  ;;  %8657 = vmatpush.msrb.mxu3 %v15072_v58  ;;  %v15319_v9 = vand.u32 4294901760, %v475_v36 }
 0x4ce   :  { %8514 = vmatpush.msrb.mxu0 %v15147_v52  ;;  %8610 = vmatpush.msrb.mxu2 %v16460_v45  ;;  %v15354_v52 = vsub.f32 %v470_v51, %v15329_v6 }
 0x4cf   :  { %8549 = vmatpush.msrb.mxu1 %v15072_v58  ;;  %8659 = vmatpush.msrb.mxu3 %v15085_v15  ;;  %v465_v58 = vld [vmem:[#allocation9 + $0xbd8] sm:$0xff]  ;;  %v15343_v32 = vsub.f32 %v475_v36, %v15319_v9  ;;  %v15455_v36 = vsub.f32 %v430_v3, %v15427_v2 }
 0x4d0   :  { %8517 = vmatpush.msrb.mxu0 %v15160_v38  ;;  %8614 = vmatpush.msrb.mxu2 %v8437_v14  ;;  %v15339_v31 = vand.u32 4294901760, %v465_v58  ;;  %v15359_v14 = vand.u32 4294901760, %v455_v41  ;;  %v450_v38 = vld [vmem:[#allocation9 + $0xb60] sm:$0xff] }
 0x4d1   :  { %8551 = vmatpush.msrb.mxu1 %v15085_v15  ;;  %8661 = vmatpush.msrb.mxu3 %v15099_v12  ;;  %v460_v15 = vld [vmem:[#allocation9 + $0xbb0] sm:$0xff] }
 0x4d2   :  { %8520 = vmatpush.msrb.mxu0 %v15173_v54  ;;  %8618 = vmatpush.msrb.mxu2 %v8443_v28  ;;  %v15348_v63 = vand.u32 4294901760, %v460_v15  ;;  %v8736_v28 = vand.u32 4294901760, %v15343_v32  ;;  %v15368_v54 = vsub.f32 %v465_v58, %v15339_v31  ;;  %v15386_v50 = vsub.f32 %v455_v41, %v15359_v14 }
 0x4d3   :  { %8553 = vmatpush.msrb.mxu1 %v15099_v12  ;;  %8663 = vmatpush.msrb.mxu3 %v15112_v8  ;;  %v8724_v12 = vand.u32 4294901760, %v15322_v61  ;;  %v8784_v41 = vand.u32 4294901760, %v15443_v48 }
 0x4d4   :  { %8523 = vmatpush.msrb.mxu0 %v15189_v53  ;;  %8622 = vmatpush.msrb.mxu2 %v8449_v10  ;;  %v15373_v10 = vsub.f32 %v460_v15, %v15348_v63  ;;  %v445_v53 = vld [vmem:[#allocation9 + $0xb38] sm:$0xff]  ;;  %v8748_v16 = vand.u32 4294901760, %v15368_v54  ;;  %v15463_v15 = vand.u32 4294901760, %v415_v62 }
 0x4d5   :  { %8555 = vmatpush.msrb.mxu1 %v15112_v8  ;;  %8665 = vmatpush.msrb.mxu3 %v15124_v30  ;;  %v15332_v8 = vsub.f32 %v480_v46, %v15312_v20  ;;  %v8778_v46 = vand.u32 4294901760, %v15431_v24  ;;  %v8785_v11 = vsub.f32 %v15443_v48, %v8784_v41 }
 0x4d6   :  { %8526 = vmatpush.msrb.mxu0 %v15202_v42  ;;  %8626 = vmatpush.msrb.mxu2 %v8455_v19  ;;  %v15380_v19 = vand.u32 4294901760, %v450_v38  ;;  %v8742_v42 = vand.u32 4294901760, %v15354_v52  ;;  %v8749_v43 = vsub.f32 %v15368_v54, %v8748_v16 }
 0x4d7   :  { %8557 = vmatpush.msrb.mxu1 %v15124_v30  ;;  %8667 = vmatpush.msrb.mxu3 %v15136_v17  ;;  %v16461_v30 = vld [vmem:[#allocation30_spill] sm:$0xff] }
 0x4d8   :  { %8529 = vmatpush.msrb.mxu0 %v15213_v29  ;;  %8630 = vmatpush.msrb.mxu2 %v8461_v23  ;;  %v8737_v23 = vsub.f32 %v15343_v32, %v8736_v28  ;;  %v15393_v29 = vand.u32 4294901760, %v445_v53  ;;  %v15407_v55 = vsub.f32 %v450_v38, %v15380_v19  ;;  %v8750_v13 = vand.u32 4294901760, %v8749_v43  ;;  %v410_v38 = vld [vmem:[#allocation9 + $0xa20] sm:$0xff] }
 0x4d9   :  { %8559 = vmatpush.msrb.mxu1 %v15136_v17  ;;  %8669 = vmatpush.msrb.mxu3 %v15149_v18  ;;  %v8730_v17 = vand.u32 4294901760, %v15332_v8 }
 0x4da   :  { %8532 = vmatmul.f32.vlgmr.msrb.gmra.mxu0 %v16461_v30  ;;  %8634 = vmatpush.msrb.mxu2 %v8467_v33  ;;  %v8743_v33 = vsub.f32 %v15354_v52, %v8742_v42  ;;  %v15419_v57 = vsub.f32 %v445_v53, %v15393_v29  ;;  %v8766_v7 = vand.u32 4294901760, %v15407_v55  ;;  %v15467_v30 = vsub.f32 %v425_v39, %v15439_v37 }
 0x4db   :  { %8682 = vmatpush.msra.mxu0 %v15305_v34  ;;  %8561 = vmatpush.msrb.mxu1 %v15149_v18  ;;  %v8725_v18 = vsub.f32 %v15322_v61, %v8724_v12  ;;  %v8779_v53 = vsub.f32 %v15431_v24, %v8778_v46 }
 0x4dc   :  { %8671 = vmatpush.msrb.mxu3 %v15165_v44  ;;  %8638 = vmatpush.msrb.mxu2 %v8473_v47  ;;  %v8760_v47 = vand.u32 4294901760, %v15386_v50  ;;  %v8744_v25 = vand.u32 4294901760, %v8743_v33  ;;  %v8772_v22 = vand.u32 4294901760, %v15419_v57  ;;  %v8767_v45 = vsub.f32 %v15407_v55, %v8766_v7 }
 0x4dd   :  { %8684 = vmatpush.msra.mxu0 %v15312_v20  ;;  %8563 = vmatpush.msrb.mxu1 %v15165_v44  ;;  %v8731_v44 = vsub.f32 %v15332_v8, %v8730_v17  ;;  %v8726_v0 = vand.u32 4294901760, %v8725_v18  ;;  %v15489_v33 = vsub.f32 %v415_v62, %v15463_v15 }
 0x4de   :  { %8673 = vmatpush.msrb.mxu3 %v15178_v59  ;;  %8640 = vmatmul.f32.vlgmr.msrb.gmra.mxu2 %v16452_v4  ;;  %v8773_v58 = vsub.f32 %v15419_v57, %v8772_v22  ;;  %v8768_v18 = vand.u32 4294901760, %v8767_v45 }
 0x4df   :  { %8686 = vmatpush.msra.mxu0 %v15319_v9  ;;  %8825 = vmatpush.msra.mxu2 %v15322_v61  ;;  %v8732_v27 = vand.u32 4294901760, %v8731_v44  ;;  %v8790_v44 = vand.u32 4294901760, %v15455_v36  ;;  %v16465_v61 = vld [vmem:[#allocation34_spill] sm:$0xff] }
 0x4e0   :  { %8565 = vmatpush.msrb.mxu1 %v15178_v59  ;;  %8675 = vmatpush.msrb.mxu3 %v15191_v21  ;;  %v8754_v59 = vand.u32 4294901760, %v15373_v10 }
 0x4e1   :  { %8677 = vmatmul.f32.vlgmr.msrb.gmra.mxu3 %v16452_v4  ;;  %8688 = vmatpush.msra.mxu0 %v15329_v6  ;;  %v8761_v4 = vsub.f32 %v15386_v50, %v8760_v47  ;;  %v8791_v3 = vsub.f32 %v15455_v36, %v8790_v44 }
 0x4e2   :  { %8828 = vmatpush.msra.mxu2 %v15332_v8  ;;  %8878 = vmatpush.msra.mxu3 %v15305_v34  ;;  %v8755_v56 = vsub.f32 %v15373_v10, %v8754_v59  ;;  %v16466_v8 = vld [vmem:[#allocation27_spill] sm:$0xff] }
 0x4e3   :  { %8567 = vmatpush.msrb.mxu1 %v15191_v21  ;;  %8690 = vmatpush.msra.mxu0 %v15339_v31  ;;  %v8738_v21 = vand.u32 4294901760, %v8737_v23  ;;  %v8762_v51 = vand.u32 4294901760, %v8761_v4  ;;  %v8774_v23 = vand.u32 4294901760, %v8773_v58  ;;  %v8792_v4 = vand.u32 4294901760, %v8791_v3 }
 0x4e4   :  { %8571 = vmatmul.f32.vlgmr.msrb.gmra.mxu1 %v16462_v26  ;;  %8831 = vmatpush.msra.mxu2 %v15343_v32  ;;  %v8756_v5 = vand.u32 4294901760, %v8755_v56  ;;  %v8780_v26 = vand.u32 4294901760, %v8779_v53  ;;  %v8786_v56 = vand.u32 4294901760, %v8785_v11  ;;  %v5751_v32 = vpop.f32.mrf.mxu3 }
 0x4e5   :  { %8727 = vmatpush.msra.mxu1 %v8726_v0  ;;  %8880 = vmatpush.msra.mxu3 %v15312_v20  ;;  %v15481_v0 = vand.u32 4294901760, %v410_v38 }
 0x4e6   :  { %8692 = vmatpush.msra.mxu0 %v15348_v63  ;;  %8834 = vmatpush.msra.mxu2 %v15354_v52 }
 0x4e7   :  { %8733 = vmatpush.msra.mxu1 %v8732_v27  ;;  %8882 = vmatpush.msra.mxu3 %v15319_v9  ;;  %v8796_v27 = vand.u32 4294901760, %v15467_v30  ;;  %v15501_v43 = vsub.f32 %v410_v38, %v15481_v0 }
 0x4e8   :  { %8694 = vmatpush.msra.mxu0 %v15359_v14  ;;  %8837 = vmatpush.msra.mxu2 %v15368_v54 }
 0x4e9   :  { %8739 = vmatpush.msra.mxu1 %v8738_v21  ;;  %8884 = vmatpush.msra.mxu3 %v15329_v6  ;;  %v8802_v21 = vand.u32 4294901760, %v15477_v60  ;;  %v8797_v39 = vsub.f32 %v15467_v30, %v8796_v27 }
 0x4ea   :  { %8696 = vmatpush.msra.mxu0 %v15380_v19  ;;  %8840 = vmatpush.msra.mxu2 %v15373_v10 }
 0x4eb   :  { %8745 = vmatpush.msra.mxu1 %v8744_v25  ;;  %8886 = vmatpush.msra.mxu3 %v15339_v31  ;;  %v8808_v25 = vand.u32 4294901760, %v15489_v33  ;;  %v8803_v35 = vsub.f32 %v15477_v60, %v8802_v21 }
 0x4ec   :  { %8698 = vmatpush.msra.mxu0 %v15393_v29  ;;  %8843 = vmatpush.msra.mxu2 %v15386_v50 }
 0x4ed   :  { %8751 = vmatpush.msra.mxu1 %v8750_v13  ;;  %8888 = vmatpush.msra.mxu3 %v15348_v63  ;;  %v8814_v13 = vand.u32 4294901760, %v15501_v43  ;;  %v8809_v62 = vsub.f32 %v15489_v33, %v8808_v25  ;;  %v8804_v45 = vand.u32 4294901760, %v8803_v35 }
 0x4ee   :  { %8700 = vmatpush.msra.mxu0 %v15404_v1  ;;  %8846 = vmatpush.msra.mxu2 %v15407_v55 }
 0x4ef   :  { %8757 = vmatpush.msra.mxu1 %v8756_v5  ;;  %8890 = vmatpush.msra.mxu3 %v15359_v14  ;;  %v8798_v5 = vand.u32 4294901760, %v8797_v39  ;;  %v8815_v58 = vsub.f32 %v15501_v43, %v8814_v13  ;;  %v8810_v38 = vand.u32 4294901760, %v8809_v62 }
 0x4f0   :  { %8702 = vmatpush.msra.mxu0 %v15416_v40  ;;  %8849 = vmatpush.msra.mxu2 %v15419_v57 }
 0x4f1   :  { %8763 = vmatpush.msra.mxu1 %v8762_v51  ;;  %8892 = vmatpush.msra.mxu3 %v15380_v19  ;;  %v16463_v51 = vld [vmem:[#allocation35_spill] sm:$0xff]  ;;  %v8816_v53 = vand.u32 4294901760, %v8815_v58 }
 0x4f2   :  { %8704 = vmatpush.msra.mxu0 %v15427_v2  ;;  %8852 = vmatpush.msra.mxu2 %v15431_v24 }
 0x4f3   :  { %8769 = vmatpush.msra.mxu1 %v8768_v18  ;;  %8894 = vmatpush.msra.mxu3 %v15393_v29  ;;  %v16464_v18 = vld [vmem:[#allocation33_spill] sm:$0xff] }
 0x4f4   :  { %8706 = vmatpush.msra.mxu0 %v15439_v37  ;;  %8855 = vmatpush.msra.mxu2 %v15443_v48 }
 0x4f5   :  { %8775 = vmatpush.msra.mxu1 %v8774_v23  ;;  %8896 = vmatpush.msra.mxu3 %v15404_v1 }
 0x4f6   :  { %8708 = vmatpush.msra.mxu0 %v15451_v49  ;;  %8858 = vmatpush.msra.mxu2 %v15455_v36 }
 0x4f7   :  { %8781 = vmatpush.msra.mxu1 %v8780_v26  ;;  %8898 = vmatpush.msra.mxu3 %v15416_v40 }
 0x4f8   :  { %8710 = vmatpush.msra.mxu0 %v15463_v15  ;;  %8861 = vmatpush.msra.mxu2 %v15467_v30 }
 0x4f9   :  { %8787 = vmatpush.msra.mxu1 %v8786_v56  ;;  %8900 = vmatpush.msra.mxu3 %v15427_v2 }
 0x4fa   :  { %8712 = vmatpush.msra.mxu0 %v15481_v0  ;;  %8864 = vmatpush.msra.mxu2 %v15477_v60 }
 0x4fb   :  { %8793 = vmatpush.msra.mxu1 %v8792_v4  ;;  %8902 = vmatpush.msra.mxu3 %v15439_v37 }
 0x4fc   :  { %8718 = vmatmul.f32.vlgmr.msra.gmra.mxu0 %v16463_v51  ;;  %8867 = vmatpush.msra.mxu2 %v15489_v33 }
 0x4fd   :  { %8919 = vmatpush.msrb.mxu0 %v8724_v12  ;;  %8799 = vmatpush.msra.mxu1 %v8798_v5  ;;  %v5650_v12 = vpop.f32.mrf.mxu2 }
 0x4fe   :  { %8904 = vmatpush.msra.mxu3 %v15451_v49  ;;  %8870 = vmatpush.msra.mxu2 %v15501_v43 }
 0x4ff   :  { %8923 = vmatpush.msrb.mxu0 %v8730_v17  ;;  %8805 = vmatpush.msra.mxu1 %v8804_v45 }
 0x500   :  { %8906 = vmatpush.msra.mxu3 %v15463_v15  ;;  %8873 = vmatmul.f32.vlgmr.msra.gmra.mxu2 %v16464_v18 }
 0x501   :  { %8927 = vmatpush.msrb.mxu0 %v8736_v28  ;;  %8811 = vmatpush.msra.mxu1 %v8810_v38 }
 0x502   :  { %8908 = vmatpush.msra.mxu3 %v15481_v0 }
 0x503   :  { %8912 = vmatmul.f32.vlgmr.msra.gmra.mxu3 %v16465_v61  ;;  %8931 = vmatpush.msrb.mxu0 %v8742_v42 }
 0x504   :  { %8817 = vmatpush.msra.mxu1 %v8816_v53 }
 0x505   :  { %8819 = vmatmul.f32.vlgmr.msra.gmra.mxu1 %v16466_v8  ;;  %8935 = vmatpush.msrb.mxu0 %v8748_v16 }
 0x506   :  { %8986 = vmatpush.msrb.mxu1 %v15305_v34  ;;  %v5844_v34 = vpop.f32.mrf.mxu1 }
 0x507   :  { %8939 = vmatpush.msrb.mxu0 %v8754_v59 }
 0x508   :  { %8988 = vmatpush.msrb.mxu1 %v15312_v20  ;;  %v5805_v20 = vpop.f32.mrf.mxu0 }
 0x509   :  { %8943 = vmatpush.msrb.mxu0 %v8760_v47 }
 0x50a   :  { %8990 = vmatpush.msrb.mxu1 %v15319_v9  ;;  %v5913_v9 = vpop.f32.mrf.mxu2 }
 0x50b   :  { %8947 = vmatpush.msrb.mxu0 %v8766_v7 }
 0x50c   :  { %8992 = vmatpush.msrb.mxu1 %v15329_v6  ;;  %v5950_v6 = vpop.f32.mrf.mxu3 }
 0x50d   :  { %8951 = vmatpush.msrb.mxu0 %v8772_v22  ;;  %v5752_v22 = vadd.f32 %v5751_v32, %v5650_v12 }
 0x50e   :  { %8994 = vmatpush.msrb.mxu1 %v15339_v31  ;;  %v6092_v31 = vpop.f32.mrf.mxu1 }
 0x50f   :  { %8955 = vmatpush.msrb.mxu0 %v8778_v46  ;;  %v5806_v46 = vadd.f32 %v5805_v20, %v5752_v22 }
 0x510   :  { %8996 = vmatpush.msrb.mxu1 %v15348_v63  ;;  %v5991_v63 = vpop.f32.mrf.mxu0 }
 0x511   :  { %8959 = vmatpush.msrb.mxu0 %v8784_v41  ;;  %v5845_v30 = vadd.f32 %v5844_v34, %v5806_v46 }
 0x512   :  { %8998 = vmatpush.msrb.mxu1 %v15359_v14  ;;  %v6146_v17 = vpop.f32.mrf.mxu2 }
 0x513   :  { %8963 = vmatpush.msrb.mxu0 %v8790_v44 }
 0x514   :  { %9000 = vmatpush.msrb.mxu1 %v15380_v19  ;;  %v6185_v52 = vpop.f32.mrf.mxu3 }
 0x515   :  { %8967 = vmatpush.msrb.mxu0 %v8796_v27 }
 0x516   :  { %9002 = vmatpush.msrb.mxu1 %v15393_v29  ;;  %v6291_v14 = vpop.f32.mrf.mxu1 }
 0x517   :  { %8971 = vmatpush.msrb.mxu0 %v8802_v21 }
 0x518   :  { %9004 = vmatpush.msrb.mxu1 %v15404_v1  ;;  %v6254_v28 = vpop.f32.mrf.mxu0 }
 0x519   :  { %8975 = vmatpush.msrb.mxu0 %v8808_v25 }
 0x51a   :  { %9006 = vmatpush.msrb.mxu1 %v15416_v40  ;;  %v6332_v54 = vpop.f32.mrf.mxu2 }
 0x51b   :  { %8979 = vmatpush.msrb.mxu0 %v8814_v13 }
 0x51c   :  { %9008 = vmatpush.msrb.mxu1 %v15427_v2  ;;  %8981 = vmatmul.f32.vlgmr.msrb.gmra.mxu0 %v16466_v8  ;;  %v6433_v10 = vpop.f32.mrf.mxu3 }
 0x51e   :  { %9010 = vmatpush.msrb.mxu1 %v15439_v37  ;;  %v6526_v19 = vpop.f32.mrf.mxu1 }
 0x520   :  { %9012 = vmatpush.msrb.mxu1 %v15451_v49  ;;  %v6487_v42 = vpop.f32.mrf.mxu0 }
 0x522   :  { %9014 = vmatpush.msrb.mxu1 %v15463_v15  ;;  %v6595_v50 = vpop.f32.mrf.mxu2 }
 0x524   :  { %9016 = vmatpush.msrb.mxu1 %v15481_v0  ;;  %v6632_v29 = vpop.f32.mrf.mxu3  ;;  %v5914_v0 = vadd.f32 %v5913_v9, %v5845_v30 }
 0x525   :  { %9018 = vmatmul.f32.vlgmr.msrb.gmra.mxu1 %v16466_v8 }
 0x526   :  { %v15582_v16 = vpop.f32.mrf.mxu1  ;;  %v5951_v27 = vadd.f32 %v5950_v6, %v5914_v0 }
 0x528   :  { %v15584_v59 = vpop.f32.mrf.mxu0  ;;  %v5992_v3 = vadd.f32 %v5991_v63, %v5951_v27 }
 0x52a   :  { %v15586_v1 = vpop.f32.mrf.mxu2  ;;  %v6093_v56 = vadd.f32 %v6092_v31, %v5992_v3 }
 0x52c   :  { %v15588_v55 = vpop.f32.mrf.mxu3  ;;  %v6147_v4 = vadd.f32 %v6146_v17, %v6093_v56 }
 0x52e   :  { %v15590_v47 = vpop.f32.mrf.mxu1  ;;  %v6186_v62 = vadd.f32 %v6185_v52, %v6147_v4 }
 0x530   :  { %v15592_v40 = vpop.f32.mrf.mxu0  ;;  %v6255_v51 = vadd.f32 %v6254_v28, %v6186_v62 }
 0x532   :  { %v15594_v57 = vpop.f32.mrf.mxu2  ;;  %v6292_v18 = vadd.f32 %v6291_v14, %v6255_v51 }
 0x534   :  { %v15596_v2 = vpop.f32.mrf.mxu3  ;;  %v6333_v8 = vadd.f32 %v6332_v54, %v6292_v18 }
 0x536   :  { %v15598_v7 = vpop.f32.mrf.mxu1  ;;  %v6434_v20 = vadd.f32 %v6433_v10, %v6333_v8 }
 0x538   :  { %v15600_v24 = vpop.f32.mrf.mxu0  ;;  %v6488_v6 = vadd.f32 %v6487_v42, %v6434_v20 }
 0x53a   :  { %v15602_v37 = vpop.f32.mrf.mxu2  ;;  %v6527_v17 = vadd.f32 %v6526_v19, %v6488_v6  ;;  %v9219_v19 = vmov 0.0  }
 0x53c   :  { %v15604_v48 = vpop.f32.mrf.mxu3  ;;  %v6596_v52 = vadd.f32 %v6595_v50, %v6527_v17 }
 0x53e   :  { %v7456_v49 = vpop.f32.mrf.mxu1 }
 0x540   :  { %v7355_v36 = vpop.f32.mrf.mxu0 }
 0x541   :  { %v7457_v15 = vadd.f32 %v7456_v49, %v7355_v36 }
 0x542   :  { %v7510_v41 = vpop.f32.mrf.mxu2 }
 0x543   :  { %v7511_v44 = vadd.f32 %v7510_v41, %v7457_v15  ;;  %v6633_v15 = vadd.f32 %v6632_v29, %v6596_v52  ;;  %v79_v41 = vlaneseq }
 0x544   :  { %v7549_v60 = vpop.f32.mrf.mxu3 }
 0x545   :  { %v7550_v23 = vadd.f32 %v7549_v60, %v7511_v44  ;;  %v6674_v54 = vadd.f32 %v15584_v59, %v6633_v15  ;;  %vm15607_vm2 = vcmp.lt.s32.totalorder %v79_v41, 640 }
 0x546   :  { %v7655_v26 = vpop.f32.mrf.mxu1  ;;  %83 = vst.msk [vmem:[#allocation2] sm:$0x1f] %vm15607_vm2, %v9219_v19 }
 0x547   :  { %v6775_v42 = vadd.f32 %v15582_v16, %v6674_v54 }
 0x548   :  { %v7618_v11 = vpop.f32.mrf.mxu0 }
 0x549   :  { %v7619_v33 = vadd.f32 %v7618_v11, %v7550_v23  ;;  %v6829_v29 = vadd.f32 %v15586_v1, %v6775_v42 }
 0x54a   :  { %v7696_v43 = vpop.f32.mrf.mxu2 }
 0x54b   :  { %v7656_v21 = vadd.f32 %v7655_v26, %v7619_v33  ;;  %v6868_v59 = vadd.f32 %v15588_v55, %v6829_v29 }
 0x54c   :  { %v7797_v25 = vpop.f32.mrf.mxu3 }
 0x54d   :  { %v7697_v39 = vadd.f32 %v7696_v43, %v7656_v21  ;;  %v6937_v33 = vadd.f32 %v15592_v40, %v6868_v59 }
 0x54e   :  { %v7890_v5 = vpop.f32.mrf.mxu1 }
 0x54f   :  { %v7798_v13 = vadd.f32 %v7797_v25, %v7697_v39  ;;  %v6974_v16 = vadd.f32 %v15590_v47, %v6937_v33 }
 0x550   :  { %v7851_v35 = vpop.f32.mrf.mxu0 }
 0x551   :  { %v7852_v45 = vadd.f32 %v7851_v35, %v7798_v13  ;;  %v7015_v56 = vadd.f32 %v15594_v57, %v6974_v16 }
 0x552   :  { %v7959_v38 = vpop.f32.mrf.mxu2 }
 0x553   :  { %v7891_v58 = vadd.f32 %v7890_v5, %v7852_v45  ;;  %v7116_v1 = vadd.f32 %v15596_v2, %v7015_v56 }
 0x554   :  { %v7996_v61 = vpop.f32.mrf.mxu3 }
 0x555   :  { %v7960_v53 = vadd.f32 %v7959_v38, %v7891_v58  ;;  %v7170_v13 = vadd.f32 %v15600_v24, %v7116_v1  ;;  %v84_v24 = vld [vmem:[#allocation2] sm:$0x1f] }
 0x556   :  { %v8138_v34 = vpop.f32.mrf.mxu1 }
 0x557   :  { %v7997_v32 = vadd.f32 %v7996_v61, %v7960_v53  ;;  %v7209_v40 = vadd.f32 %v15598_v7, %v7170_v13 }
 0x558   :  { %v8037_v12 = vpop.f32.mrf.mxu0 }
 0x559   :  { %v8038_v9 = vadd.f32 %v8037_v12, %v7997_v32  ;;  %v7278_v47 = vadd.f32 %v15602_v37, %v7209_v40  ;;  %v16469_v12 = vld [vmem:[#allocation38_spill] sm:$0xff] }
 0x55a   :  { %v8192_v63 = vpop.f32.mrf.mxu2  ;;  %v9049_v37 = vld [vmem:[#allocation6] sm:$0x1f] }
 0x55b   :  { %v8139_v31 = vadd.f32 %v8138_v34, %v8038_v9  ;;  %v7315_v57 = vadd.f32 %v15604_v48, %v7278_v47  ;;  %v9053_v34 = vld [vmem:[#allocation8] sm:$0x1f] }
 0x55c   :  { %v8231_v49 = vpop.f32.mrf.mxu3  ;;  %v9054_v48 = vmul.f32 %v9053_v34, %v9049_v37 }
 0x55d   :  { %v8193_v22 = vadd.f32 %v8192_v63, %v8139_v31  ;;  %v9029_v2 = vrot.slane %v7315_v57, 5 }
 0x55e   :  { %v8337_v36 = vpop.f32.mrf.mxu1 }
 0x55f   :  { %v8232_v28 = vadd.f32 %v8231_v49, %v8193_v22 }
 0x560   :  { %v8300_v46 = vpop.f32.mrf.mxu0 }
 0x561   :  { %v8301_v14 = vadd.f32 %v8300_v46, %v8232_v28 }
 0x562   :  { %v8378_v44 = vpop.f32.mrf.mxu2 }
 0x563   :  { %v8338_v30 = vadd.f32 %v8337_v36, %v8301_v14 }
 0x564   :  { %v8479_v60 = vpop.f32.mrf.mxu3 }
 0x565   :  { %v8379_v50 = vadd.f32 %v8378_v44, %v8338_v30 }
 0x566   :  { %v8572_v11 = vpop.f32.mrf.mxu1 }
 0x567   :  { %v8480_v23 = vadd.f32 %v8479_v60, %v8379_v50 }
 0x568   :  { %v8533_v0 = vpop.f32.mrf.mxu0 }
 0x569   :  { %v8534_v27 = vadd.f32 %v8533_v0, %v8480_v23 }
 0x56a   :  { %v8641_v3 = vpop.f32.mrf.mxu2 }
 0x56b   :  { %v8573_v26 = vadd.f32 %v8572_v11, %v8534_v27 }
 0x56c   :  { %v8678_v43 = vpop.f32.mrf.mxu3 }
 0x56d   :  { %v8642_v21 = vadd.f32 %v8641_v3, %v8573_v26 }
 0x56f   :  { %v8679_v25 = vadd.f32 %v8678_v43, %v8642_v21 }
 0x579   :  { %v8719_v39 = vpop.f32.mrf.mxu0 }
 0x57a   :  { %v8720_v35 = vadd.f32 %v8719_v39, %v8679_v25 }
 0x582   :  { %v8820_v4 = vpop.f32.mrf.mxu1 }
 0x583   :  { %v8821_v55 = vadd.f32 %v8820_v4, %v8720_v35  ;;  %v8874_v5 = vpop.f32.mrf.mxu2 }
 0x585   :  { %v8875_v62 = vadd.f32 %v8874_v5, %v8821_v55 }
 0x586   :  { %v8913_v45 = vpop.f32.mrf.mxu3 }
 0x587   :  { %v8914_v58 = vadd.f32 %v8913_v45, %v8875_v62 }
 0x599   :  { %v8982_v51 = vpop.f32.mrf.mxu0 }
 0x59a   :  { %v8983_v38 = vadd.f32 %v8982_v51, %v8914_v58 }
 0x5a2   :  { %v9019_v18 = vpop.f32.mrf.mxu1 }
 0x5a3   :  { %v9020_v53 = vadd.f32 %v9019_v18, %v8983_v38 }
 0x5a5   :  { %v9030_v61 = vrot.slane %v9020_v53, 4 }
 0x5a7   :  { %v9036_v8 = vsel %vm9035_vm3, %v9029_v2, %v9030_v61 }
 0x5a8   :  { %v9038_v32 = vsel %vm9037_vm4, %v16469_v12, %v9036_v8 }
 0x5a9   :  { %v9040_v7 = vadd.f32 %v9038_v32, %v84_v24 }
 0x5ab   :  { %9045 = vst.msk [vmem:[#allocation2] sm:$0x1f] %vm15607_vm2, %v9040_v7 }
 0x5b2   :  { %v9050_v20 = vld [vmem:[#allocation2] sm:$0x1f] }
 0x5b3   :  { %v9051_v9 = vmul.f32 %v9050_v20, %v9049_v37 }
 0x5b5   :  { %v9052_v6 = vadd.f32 %v9051_v9, %v9049_v37 }
 0x5b7   :  { %v9055_v31 = vadd.f32 %v9054_v48, %v9052_v6 }
 0x5b9   :  { %9056 = vst.msk [vmem:[#allocation11] sm:$0x1f] %vm15607_vm2, %v9055_v31 }
 0x5ba   :  { %9067 = dma.vmem_to_hbm [thread:$0]  %s9063_s3, 80, %s9065_s11, [#allocation5]  }
 0x5bb   :  { %9211 = dma.done.wait [#allocation5], 80  }
 0x5bc   :  { %9212 = vsyncadd [#allocation5], 4294967216 }
 0x5bd   :  { %9072 = vsyncpa [#allocation4], 1 }
 0x5be   :  { %9073 = vsyncpa [#allocation7], 1 }
 0x5bf   :  { %9074 = vsyncpa [#allocation10], 1 }
 0x5c0   :  { %9075 = vsyncpa [#allocation5], 1 }

</bundles_post_ra>
